<compile_context>
chip_gen: v6e
topology: v6e:2x2x1
jax: 0.10.0
libtpu: 0.0.40
codegen_flags: <defaults>
</compile_context>

<pallas_src>
import functools

import jax
import jax.numpy as jnp
import numpy as np
from jax import lax
from jax.experimental import pallas as pl
from jax.experimental.pallas import tpu as pltpu


_MAX_TRACE_UNROLL = 64   # fully unroll the step loop up to this many steps


# ----------------------------------------------------------------------------
# Pallas kernel
# ----------------------------------------------------------------------------
def _fcpcn_kernel(*refs, sizes, precisions, steps, gamma0, x_decay,
                  has_obs, has_y, pin_obs, pin_target):
    L = len(sizes)

    idx = 0
    obs_ref = None
    y_ref = None
    if has_obs:
        obs_ref = refs[idx]; idx += 1
    if has_y:
        y_ref = refs[idx]; idx += 1
    w_ref, wt_ref, b_ref = refs[idx], refs[idx + 1], refs[idx + 2]
    xout_ref, eout_ref = refs[idx + 3], refs[idx + 4]

    B, D = xout_ref.shape[1], xout_ref.shape[2]

    def actv(v):
        return jnp.tanh(v)

    def d_actv(v):                       # derivative of tanh
        t = jnp.tanh(v)
        return 1.0 - t * t

    def predict(l, x_l):
        # layer l predicts layer l-1:  actv(x_l) @ W[l].T + b[l]
        # WT[l] == W[l].T is pre-transposed in the wrapper -> plain contraction.
        p = lax.dot_general(actv(x_l), wt_ref[l],
                            (((1,), (0,)), ((), ())),
                            preferred_element_type=jnp.float32)
        return p + b_ref[l]                                 # b_ref[l] is (1, D)

    def propagate(l, e_below):
        # symmetric bottom-up error propagation:  e_below @ W[l]
        return lax.dot_general(e_below, w_ref[l],
                               (((1,), (0,)), ((), ())),
                               preferred_element_type=jnp.float32)

    def e_update(X):
        """Recompute errors for layers 0..L-2 with fused per-sample VFE."""
        E = []
        vfe = jnp.zeros((B, 1), jnp.float32)
        for i in range(L - 1):
            e = X[i] - predict(i + 1, X[i + 1])
            if precisions[i] != 1.0:
                e = e * jnp.float32(precisions[i])
            E.append(e)
            vfe = vfe + 0.5 * jnp.sum(e * e, axis=1, keepdims=True)
        return tuple(E), vfe

    def x_update(X, E, gamma):
        X = list(X)
        for i in range(L):                      # bottom to top
            if i == 0 and pin_obs:
                continue
            if i == L - 1 and pin_target:
                continue
            x_i = X[i]
            dx = None
            if i < L - 1:                       # top-layer error is identically 0
                dx = -E[i]
            if x_decay != 0.0:
                t = -x_decay * x_i
                dx = t if dx is None else dx + t
            if i > 0:
                t = propagate(i, E[i - 1]) * d_actv(x_i)
                dx = t if dx is None else dx + t
            if dx is None:
                continue
            X[i] = x_i + gamma * dx
        return tuple(X)

    # ---------------- init_state ----------------
    X = [jnp.zeros((B, D), jnp.float32) for _ in range(L)]
    if has_obs:
        X[0] = obs_ref[...]
    if has_y:
        X[L - 1] = y_ref[...]
    X = tuple(X)
    E, _ = e_update(X)

    gamma = jnp.full((B, D), gamma0, jnp.float32)   # lane-replicated step size

    # ---------------- inference steps ----------------
    if steps >= 1:
        # Peeled step 0: prev_vfe is None -> no gamma decay.
        X = x_update(X, E, gamma)
        E, pvfe = e_update(X)

    if steps >= 2:
        def one_step(X, E, gamma, pvfe):
            X = x_update(X, E, gamma)
            E, vfe = e_update(X)
            mult = jnp.where(vfe < pvfe, 1.0, 0.9).astype(jnp.float32)   # (B,1)
            return X, E, gamma * mult, vfe

        if steps - 1 <= _MAX_TRACE_UNROLL:
            for _ in range(steps - 1):          # fully unrolled at trace time
                X, E, gamma, pvfe = one_step(X, E, gamma, pvfe)
        else:
            def body(_, carry):
                return one_step(*carry)
            X, E, gamma, pvfe = lax.fori_loop(
                0, steps - 1, body, (X, E, gamma, pvfe), unroll=4)

    # ---------------- write outputs once ----------------
    for l in range(L):
        xout_ref[l] = X[l]
    for i in range(L - 1):
        eout_ref[i] = E[i]
    eout_ref[L - 1] = jnp.zeros((B, D), jnp.float32)   # has_top=False


# ----------------------------------------------------------------------------
# Wrapper
# ----------------------------------------------------------------------------
def fcpcn_forward(obs, y, W_pad, b_pad, *, sizes, precisions, steps,
                  gamma0, x_decay=0.0, pin_obs=False, pin_target=False):
    L = len(sizes)
    B = obs.shape[0]
    D = W_pad.shape[-1]

    obs_pad = jnp.zeros((B, D), jnp.float32).at[:, :sizes[0]].set(obs)
    has_y = y is not None

    # One-time transpose outside the kernel: makes top-down predict a plain
    # (non-transposed) MXU contraction inside the serial step loop.
    WT_pad = jnp.transpose(W_pad, (0, 2, 1))

    args = [obs_pad]
    in_specs = [pl.BlockSpec((B, D), lambda i: (0, 0))]
    if has_y:
        y_pad = jnp.zeros((B, D), jnp.float32).at[:, :sizes[-1]].set(y)
        args.append(y_pad)
        in_specs.append(pl.BlockSpec((B, D), lambda i: (0, 0)))
    args += [W_pad, WT_pad, b_pad]
    in_specs += [
        pl.BlockSpec((L, D, D), lambda i: (0, 0, 0)),
        pl.BlockSpec((L, D, D), lambda i: (0, 0, 0)),
        pl.BlockSpec((L, 1, D), lambda i: (0, 0, 0)),
    ]

    kernel = functools.partial(
        _fcpcn_kernel,
        sizes=tuple(sizes),
        precisions=tuple(float(p) for p in precisions),
        steps=int(steps), gamma0=float(gamma0), x_decay=float(x_decay),
        has_obs=True, has_y=has_y,
        pin_obs=bool(pin_obs), pin_target=bool(pin_target))

    x_out, e_out = pl.pallas_call(
        kernel,
        out_shape=(jax.ShapeDtypeStruct((L, B, D), jnp.float32),
                   jax.ShapeDtypeStruct((L, B, D), jnp.float32)),
        grid=(1,),
        in_specs=in_specs,
        out_specs=(
            pl.BlockSpec((L, B, D), lambda i: (0, 0, 0)),
            pl.BlockSpec((L, B, D), lambda i: (0, 0, 0)),
        ),
        compiler_params=pltpu.CompilerParams(
            dimension_semantics=("arbitrary",)),
    )(*args)

    out = x_out[L - 1, :, :sizes[-1]]
    state = [{'x': x_out[l, :, :sizes[l]], 'e': e_out[l, :, :sizes[l]]}
             for l in range(L)]
    return out, state


# ----------------------------------------------------------------------------
# Pure-JAX reference (same semantics, for verification)
# ----------------------------------------------------------------------------
def fcpcn_forward_ref(obs, y, Ws, bs, *, sizes, precisions, steps,
                      gamma0, x_decay=0.0, pin_obs=False, pin_target=False):
    L = len(sizes)
    B = obs.shape[0]
    d_actv = lambda v: 1.0 - jnp.tanh(v) ** 2
    xs = [jnp.zeros((B, s), jnp.float32) for s in sizes]
    es = [jnp.zeros((B, s), jnp.float32) for s in sizes]
    xs[0] = obs
    if y is not None:
        xs[-1] = y

    def predict(l, x_l):
        return jnp.tanh(x_l) @ Ws[l].T + bs[l]

    def propagate(l, e_below):
        return e_below @ Ws[l]

    for i in range(L - 1):
        es[i] = (xs[i] - predict(i + 1, xs[i + 1])) * precisions[i]
    gamma = jnp.full((B, 1), gamma0, jnp.float32)
    prev_vfe = None
    for _ in range(steps):
        for i in range(L):
            if i == 0 and pin_obs:
                continue
            if i == L - 1 and pin_target:
                continue
            dx = -es[i] - x_decay * xs[i]
            if i > 0:
                dx = dx + propagate(i, es[i - 1]) * d_actv(xs[i])
            xs[i] = xs[i] + gamma * dx
        for i in range(L - 1):
            es[i] = (xs[i] - predict(i + 1, xs[i + 1])) * precisions[i]
        vfe = sum(0.5 * jnp.sum(e * e, axis=1, keepdims=True) for e in es)
        if prev_vfe is not None:
            gamma = gamma * jnp.where(vfe < prev_vfe, 1.0, 0.9)
        prev_vfe = vfe
    return xs[-1], list(zip(xs, es))


# ----------------------------------------------------------------------------
if __name__ == "__main__":
    # Model config (FCPCN defaults: tanh, symmetric, bias, gamma=0.1, x_decay=0,
    # dropout=0, momentum=0, inverted=False, has_top=False)
    sizes = [64, 128, 32]
    precisions = [1.0, 1.0, 1.0]
    steps = 20
    gamma0 = 0.1
    B = 8
    DMAX = 128
    L = len(sizes)

    key = jax.random.PRNGKey(0)
    k_obs, *k_params = jax.random.split(key, 1 + 2 * L)

    # Deterministic synthetic parameters. Layer l (l>=1): W[l] (sizes[l-1], sizes[l]),
    # bias[l] (sizes[l-1],).  Layer 0 has no parameters.
    Ws = {0: None}
    bs = {0: None}
    for l in range(1, L):
        kw, kb = k_params[2 * l], k_params[2 * l + 1]
        Ws[l] = (jax.random.normal(kw, (sizes[l - 1], sizes[l]), jnp.float32)
                 / jnp.sqrt(jnp.float32(sizes[l])))
        bs[l] = 0.01 * jax.random.normal(kb, (sizes[l - 1],), jnp.float32)

    W_pad = jnp.zeros((L, DMAX, DMAX), jnp.float32)
    b_pad = jnp.zeros((L, 1, DMAX), jnp.float32)
    for l in range(1, L):
        W_pad = W_pad.at[l, :sizes[l - 1], :sizes[l]].set(Ws[l])
        b_pad = b_pad.at[l, 0, :sizes[l - 1]].set(bs[l])

    obs = jax.random.normal(k_obs, (B, sizes[0]), jnp.float32)

    # forward(obs, pin_obs=True): observation pinned, target layer free to evolve
    out, state = fcpcn_forward(obs, None, W_pad, b_pad,
                               sizes=sizes, precisions=precisions, steps=steps,
                               gamma0=gamma0, pin_obs=True, pin_target=False)
    out = jax.block_until_ready(out)

    # Verify against pure-JAX reference
    out_ref, state_ref = fcpcn_forward_ref(obs, None, Ws, bs,
                                           sizes=sizes, precisions=precisions,
                                           steps=steps, gamma0=gamma0,
                                           pin_obs=True, pin_target=False)
    assert np.all(np.isfinite(np.asarray(out)))
    assert out.shape == (B, sizes[-1])
    np.testing.assert_allclose(np.asarray(out), np.asarray(out_ref),
                               atol=5e-2, rtol=0)
    for l in range(L):
        np.testing.assert_allclose(np.asarray(state[l]['x']),
                                   np.asarray(state_ref[l][0]), atol=5e-2, rtol=0)
        np.testing.assert_allclose(np.asarray(state[l]['e']),
                                   np.asarray(state_ref[l][1]), atol=5e-2, rtol=0)

    print("KERNEL_OK")
</pallas_src>

<mosaic_0001>
module attributes {stable_mosaic.version = 11 : i64} {
  func.func @_fcpcn_kernel(%arg0: i32, %arg1: memref<8x128xf32, #tpu.memory_space<vmem>>, %arg2: memref<3x128x128xf32, #tpu.memory_space<vmem>>, %arg3: memref<3x128x128xf32, #tpu.memory_space<vmem>>, %arg4: memref<3x1x128xf32, #tpu.memory_space<vmem>>, %arg5: memref<3x8x128xf32, #tpu.memory_space<vmem>>, %arg6: memref<3x8x128xf32, #tpu.memory_space<vmem>>) attributes {dimension_semantics = [#tpu.dimension_semantics<arbitrary>], iteration_bounds = array<i64: 1>, scalar_prefetch = 0 : i64, scratch_operands = 0 : i64, tpu.core_type = #tpu.core_type<tc>, window_params = [{pipeline_mode = #tpu.pipeline_mode<synchronous>, transform_indices = @transform_0, window_bounds = array<i64: 8, 128>}, {pipeline_mode = #tpu.pipeline_mode<synchronous>, transform_indices = @transform_1, window_bounds = array<i64: 3, 128, 128>}, {pipeline_mode = #tpu.pipeline_mode<synchronous>, transform_indices = @transform_2, window_bounds = array<i64: 3, 128, 128>}, {pipeline_mode = #tpu.pipeline_mode<synchronous>, transform_indices = @transform_3, window_bounds = array<i64: 3, 1, 128>}, {pipeline_mode = #tpu.pipeline_mode<synchronous>, transform_indices = @transform_4, window_bounds = array<i64: 3, 8, 128>}, {pipeline_mode = #tpu.pipeline_mode<synchronous>, transform_indices = @transform_5, window_bounds = array<i64: 3, 8, 128>}]} {
    %cst = arith.constant 0.000000e+00 : f32
    %0 = vector.broadcast %cst : f32 to vector<8x128xf32>
    %cst_0 = arith.constant 0.000000e+00 : f32
    %1 = vector.broadcast %cst_0 : f32 to vector<8x128xf32>
    %c0 = arith.constant 0 : index
    %c0_1 = arith.constant 0 : index
    %2 = vector.load %arg1[%c0, %c0_1] : memref<8x128xf32, #tpu.memory_space<vmem>>, vector<8x128xf32>
    %3 = math.tanh %0 : vector<8x128xf32>
    %c1 = arith.constant 1 : index
    %c0_2 = arith.constant 0 : index
    %c0_3 = arith.constant 0 : index
    %4 = vector.load %arg3[%c1, %c0_2, %c0_3] : memref<3x128x128xf32, #tpu.memory_space<vmem>>, vector<1x128x128xf32>
    %5 = vector.shape_cast %4 : vector<1x128x128xf32> to vector<128x128xf32>
    %cst_4 = arith.constant dense<0.000000e+00> : vector<8x128xf32>
    %6 = tpu.matmul %3, %5, %cst_4 {dimension_numbers = #tpu.dot_dimension_numbers<[1], [0], [0], [1], [0, 0, 1, 1], [], []>} : vector<8x128xf32>, vector<128x128xf32>, vector<8x128xf32> -> vector<8x128xf32>
    %c1_5 = arith.constant 1 : index
    %c0_6 = arith.constant 0 : index
    %c0_7 = arith.constant 0 : index
    %7 = vector.load %arg4[%c1_5, %c0_6, %c0_7] : memref<3x1x128xf32, #tpu.memory_space<vmem>>, vector<1x1x128xf32>
    %8 = vector.shape_cast %7 : vector<1x1x128xf32> to vector<1x128xf32>
    %9 = vector.broadcast %8 : vector<1x128xf32> to vector<8x128xf32>
    %10 = arith.addf %6, %9 : vector<8x128xf32>
    %11 = arith.subf %2, %10 : vector<8x128xf32>
    %12 = math.tanh %1 : vector<8x128xf32>
    %c2 = arith.constant 2 : index
    %c0_8 = arith.constant 0 : index
    %c0_9 = arith.constant 0 : index
    %13 = vector.load %arg3[%c2, %c0_8, %c0_9] : memref<3x128x128xf32, #tpu.memory_space<vmem>>, vector<1x128x128xf32>
    %14 = vector.shape_cast %13 : vector<1x128x128xf32> to vector<128x128xf32>
    %cst_10 = arith.constant dense<0.000000e+00> : vector<8x128xf32>
    %15 = tpu.matmul %12, %14, %cst_10 {dimension_numbers = #tpu.dot_dimension_numbers<[1], [0], [0], [1], [0, 0, 1, 1], [], []>} : vector<8x128xf32>, vector<128x128xf32>, vector<8x128xf32> -> vector<8x128xf32>
    %c2_11 = arith.constant 2 : index
    %c0_12 = arith.constant 0 : index
    %c0_13 = arith.constant 0 : index
    %16 = vector.load %arg4[%c2_11, %c0_12, %c0_13] : memref<3x1x128xf32, #tpu.memory_space<vmem>>, vector<1x1x128xf32>
    %17 = vector.shape_cast %16 : vector<1x1x128xf32> to vector<1x128xf32>
    %18 = vector.broadcast %17 : vector<1x128xf32> to vector<8x128xf32>
    %19 = arith.addf %15, %18 : vector<8x128xf32>
    %20 = arith.subf %0, %19 : vector<8x128xf32>
    %cst_14 = arith.constant 1.000000e-01 : f32
    %21 = vector.broadcast %cst_14 : f32 to vector<8x128xf32>
    %cst_15 = arith.constant 0.000000e+00 : f32
    %22 = vector.broadcast %cst_15 : f32 to vector<8x128xf32>
    %23 = arith.subf %22, %20 : vector<8x128xf32>
    %c1_16 = arith.constant 1 : index
    %c0_17 = arith.constant 0 : index
    %c0_18 = arith.constant 0 : index
    %24 = vector.load %arg2[%c1_16, %c0_17, %c0_18] : memref<3x128x128xf32, #tpu.memory_space<vmem>>, vector<1x128x128xf32>
    %25 = vector.shape_cast %24 : vector<1x128x128xf32> to vector<128x128xf32>
    %cst_19 = arith.constant dense<0.000000e+00> : vector<8x128xf32>
    %26 = tpu.matmul %11, %25, %cst_19 {dimension_numbers = #tpu.dot_dimension_numbers<[1], [0], [0], [1], [0, 0, 1, 1], [], []>} : vector<8x128xf32>, vector<128x128xf32>, vector<8x128xf32> -> vector<8x128xf32>
    %27 = math.tanh %0 : vector<8x128xf32>
    %28 = arith.mulf %27, %27 : vector<8x128xf32>
    %cst_20 = arith.constant 1.000000e+00 : f32
    %29 = vector.broadcast %cst_20 : f32 to vector<8x128xf32>
    %30 = arith.subf %29, %28 : vector<8x128xf32>
    %31 = arith.mulf %26, %30 : vector<8x128xf32>
    %32 = arith.addf %23, %31 : vector<8x128xf32>
    %33 = arith.mulf %21, %32 : vector<8x128xf32>
    %34 = arith.addf %0, %33 : vector<8x128xf32>
    %c2_21 = arith.constant 2 : index
    %c0_22 = arith.constant 0 : index
    %c0_23 = arith.constant 0 : index
    %35 = vector.load %arg2[%c2_21, %c0_22, %c0_23] : memref<3x128x128xf32, #tpu.memory_space<vmem>>, vector<1x128x128xf32>
    %36 = vector.shape_cast %35 : vector<1x128x128xf32> to vector<128x128xf32>
    %cst_24 = arith.constant dense<0.000000e+00> : vector<8x128xf32>
    %37 = tpu.matmul %20, %36, %cst_24 {dimension_numbers = #tpu.dot_dimension_numbers<[1], [0], [0], [1], [0, 0, 1, 1], [], []>} : vector<8x128xf32>, vector<128x128xf32>, vector<8x128xf32> -> vector<8x128xf32>
    %38 = math.tanh %1 : vector<8x128xf32>
    %39 = arith.mulf %38, %38 : vector<8x128xf32>
    %cst_25 = arith.constant 1.000000e+00 : f32
    %40 = vector.broadcast %cst_25 : f32 to vector<8x128xf32>
    %41 = arith.subf %40, %39 : vector<8x128xf32>
    %42 = arith.mulf %37, %41 : vector<8x128xf32>
    %43 = arith.mulf %21, %42 : vector<8x128xf32>
    %44 = arith.addf %1, %43 : vector<8x128xf32>
    %cst_26 = arith.constant 0.000000e+00 : f32
    %45 = vector.broadcast %cst_26 : f32 to vector<8x1xf32>
    %46 = math.tanh %34 : vector<8x128xf32>
    %c1_27 = arith.constant 1 : index
    %c0_28 = arith.constant 0 : index
    %c0_29 = arith.constant 0 : index
    %47 = vector.load %arg3[%c1_27, %c0_28, %c0_29] : memref<3x128x128xf32, #tpu.memory_space<vmem>>, vector<1x128x128xf32>
    %48 = vector.shape_cast %47 : vector<1x128x128xf32> to vector<128x128xf32>
    %cst_30 = arith.constant dense<0.000000e+00> : vector<8x128xf32>
    %49 = tpu.matmul %46, %48, %cst_30 {dimension_numbers = #tpu.dot_dimension_numbers<[1], [0], [0], [1], [0, 0, 1, 1], [], []>} : vector<8x128xf32>, vector<128x128xf32>, vector<8x128xf32> -> vector<8x128xf32>
    %c1_31 = arith.constant 1 : index
    %c0_32 = arith.constant 0 : index
    %c0_33 = arith.constant 0 : index
    %50 = vector.load %arg4[%c1_31, %c0_32, %c0_33] : memref<3x1x128xf32, #tpu.memory_space<vmem>>, vector<1x1x128xf32>
    %51 = vector.shape_cast %50 : vector<1x1x128xf32> to vector<1x128xf32>
    %52 = vector.broadcast %51 : vector<1x128xf32> to vector<8x128xf32>
    %53 = arith.addf %49, %52 : vector<8x128xf32>
    %54 = arith.subf %2, %53 : vector<8x128xf32>
    %55 = arith.mulf %54, %54 : vector<8x128xf32>
    %cst_34 = arith.constant dense<0.000000e+00> : vector<8xf32>
    %56 = vector.multi_reduction <add>, %55, %cst_34 [1] : vector<8x128xf32> to vector<8xf32>
    %57 = vector.shape_cast %56 : vector<8xf32> to vector<8x1xf32>
    %cst_35 = arith.constant 5.000000e-01 : f32
    %58 = vector.broadcast %cst_35 : f32 to vector<8x1xf32>
    %59 = arith.mulf %58, %57 : vector<8x1xf32>
    %60 = arith.addf %45, %59 : vector<8x1xf32>
    %61 = math.tanh %44 : vector<8x128xf32>
    %c2_36 = arith.constant 2 : index
    %c0_37 = arith.constant 0 : index
    %c0_38 = arith.constant 0 : index
    %62 = vector.load %arg3[%c2_36, %c0_37, %c0_38] : memref<3x128x128xf32, #tpu.memory_space<vmem>>, vector<1x128x128xf32>
    %63 = vector.shape_cast %62 : vector<1x128x128xf32> to vector<128x128xf32>
    %cst_39 = arith.constant dense<0.000000e+00> : vector<8x128xf32>
    %64 = tpu.matmul %61, %63, %cst_39 {dimension_numbers = #tpu.dot_dimension_numbers<[1], [0], [0], [1], [0, 0, 1, 1], [], []>} : vector<8x128xf32>, vector<128x128xf32>, vector<8x128xf32> -> vector<8x128xf32>
    %c2_40 = arith.constant 2 : index
    %c0_41 = arith.constant 0 : index
    %c0_42 = arith.constant 0 : index
    %65 = vector.load %arg4[%c2_40, %c0_41, %c0_42] : memref<3x1x128xf32, #tpu.memory_space<vmem>>, vector<1x1x128xf32>
    %66 = vector.shape_cast %65 : vector<1x1x128xf32> to vector<1x128xf32>
    %67 = vector.broadcast %66 : vector<1x128xf32> to vector<8x128xf32>
    %68 = arith.addf %64, %67 : vector<8x128xf32>
    %69 = arith.subf %34, %68 : vector<8x128xf32>
    %70 = arith.mulf %69, %69 : vector<8x128xf32>
    %cst_43 = arith.constant dense<0.000000e+00> : vector<8xf32>
    %71 = vector.multi_reduction <add>, %70, %cst_43 [1] : vector<8x128xf32> to vector<8xf32>
    %72 = vector.shape_cast %71 : vector<8xf32> to vector<8x1xf32>
    %cst_44 = arith.constant 5.000000e-01 : f32
    %73 = vector.broadcast %cst_44 : f32 to vector<8x1xf32>
    %74 = arith.mulf %73, %72 : vector<8x1xf32>
    %75 = arith.addf %60, %74 : vector<8x1xf32>
    %cst_45 = arith.constant 0.000000e+00 : f32
    %76 = vector.broadcast %cst_45 : f32 to vector<8x128xf32>
    %77 = arith.subf %76, %69 : vector<8x128xf32>
    %c1_46 = arith.constant 1 : index
    %c0_47 = arith.constant 0 : index
    %c0_48 = arith.constant 0 : index
    %78 = vector.load %arg2[%c1_46, %c0_47, %c0_48] : memref<3x128x128xf32, #tpu.memory_space<vmem>>, vector<1x128x128xf32>
    %79 = vector.shape_cast %78 : vector<1x128x128xf32> to vector<128x128xf32>
    %cst_49 = arith.constant dense<0.000000e+00> : vector<8x128xf32>
    %80 = tpu.matmul %54, %79, %cst_49 {dimension_numbers = #tpu.dot_dimension_numbers<[1], [0], [0], [1], [0, 0, 1, 1], [], []>} : vector<8x128xf32>, vector<128x128xf32>, vector<8x128xf32> -> vector<8x128xf32>
    %81 = math.tanh %34 : vector<8x128xf32>
    %82 = arith.mulf %81, %81 : vector<8x128xf32>
    %cst_50 = arith.constant 1.000000e+00 : f32
    %83 = vector.broadcast %cst_50 : f32 to vector<8x128xf32>
    %84 = arith.subf %83, %82 : vector<8x128xf32>
    %85 = arith.mulf %80, %84 : vector<8x128xf32>
    %86 = arith.addf %77, %85 : vector<8x128xf32>
    %87 = arith.mulf %21, %86 : vector<8x128xf32>
    %88 = arith.addf %34, %87 : vector<8x128xf32>
    %c2_51 = arith.constant 2 : index
    %c0_52 = arith.constant 0 : index
    %c0_53 = arith.constant 0 : index
    %89 = vector.load %arg2[%c2_51, %c0_52, %c0_53] : memref<3x128x128xf32, #tpu.memory_space<vmem>>, vector<1x128x128xf32>
    %90 = vector.shape_cast %89 : vector<1x128x128xf32> to vector<128x128xf32>
    %cst_54 = arith.constant dense<0.000000e+00> : vector<8x128xf32>
    %91 = tpu.matmul %69, %90, %cst_54 {dimension_numbers = #tpu.dot_dimension_numbers<[1], [0], [0], [1], [0, 0, 1, 1], [], []>} : vector<8x128xf32>, vector<128x128xf32>, vector<8x128xf32> -> vector<8x128xf32>
    %92 = math.tanh %44 : vector<8x128xf32>
    %93 = arith.mulf %92, %92 : vector<8x128xf32>
    %cst_55 = arith.constant 1.000000e+00 : f32
    %94 = vector.broadcast %cst_55 : f32 to vector<8x128xf32>
    %95 = arith.subf %94, %93 : vector<8x128xf32>
    %96 = arith.mulf %91, %95 : vector<8x128xf32>
    %97 = arith.mulf %21, %96 : vector<8x128xf32>
    %98 = arith.addf %44, %97 : vector<8x128xf32>
    %cst_56 = arith.constant 0.000000e+00 : f32
    %99 = vector.broadcast %cst_56 : f32 to vector<8x1xf32>
    %100 = math.tanh %88 : vector<8x128xf32>
    %c1_57 = arith.constant 1 : index
    %c0_58 = arith.constant 0 : index
    %c0_59 = arith.constant 0 : index
    %101 = vector.load %arg3[%c1_57, %c0_58, %c0_59] : memref<3x128x128xf32, #tpu.memory_space<vmem>>, vector<1x128x128xf32>
    %102 = vector.shape_cast %101 : vector<1x128x128xf32> to vector<128x128xf32>
    %cst_60 = arith.constant dense<0.000000e+00> : vector<8x128xf32>
    %103 = tpu.matmul %100, %102, %cst_60 {dimension_numbers = #tpu.dot_dimension_numbers<[1], [0], [0], [1], [0, 0, 1, 1], [], []>} : vector<8x128xf32>, vector<128x128xf32>, vector<8x128xf32> -> vector<8x128xf32>
    %c1_61 = arith.constant 1 : index
    %c0_62 = arith.constant 0 : index
    %c0_63 = arith.constant 0 : index
    %104 = vector.load %arg4[%c1_61, %c0_62, %c0_63] : memref<3x1x128xf32, #tpu.memory_space<vmem>>, vector<1x1x128xf32>
    %105 = vector.shape_cast %104 : vector<1x1x128xf32> to vector<1x128xf32>
    %106 = vector.broadcast %105 : vector<1x128xf32> to vector<8x128xf32>
    %107 = arith.addf %103, %106 : vector<8x128xf32>
    %108 = arith.subf %2, %107 : vector<8x128xf32>
    %109 = arith.mulf %108, %108 : vector<8x128xf32>
    %cst_64 = arith.constant dense<0.000000e+00> : vector<8xf32>
    %110 = vector.multi_reduction <add>, %109, %cst_64 [1] : vector<8x128xf32> to vector<8xf32>
    %111 = vector.shape_cast %110 : vector<8xf32> to vector<8x1xf32>
    %cst_65 = arith.constant 5.000000e-01 : f32
    %112 = vector.broadcast %cst_65 : f32 to vector<8x1xf32>
    %113 = arith.mulf %112, %111 : vector<8x1xf32>
    %114 = arith.addf %99, %113 : vector<8x1xf32>
    %115 = math.tanh %98 : vector<8x128xf32>
    %c2_66 = arith.constant 2 : index
    %c0_67 = arith.constant 0 : index
    %c0_68 = arith.constant 0 : index
    %116 = vector.load %arg3[%c2_66, %c0_67, %c0_68] : memref<3x128x128xf32, #tpu.memory_space<vmem>>, vector<1x128x128xf32>
    %117 = vector.shape_cast %116 : vector<1x128x128xf32> to vector<128x128xf32>
    %cst_69 = arith.constant dense<0.000000e+00> : vector<8x128xf32>
    %118 = tpu.matmul %115, %117, %cst_69 {dimension_numbers = #tpu.dot_dimension_numbers<[1], [0], [0], [1], [0, 0, 1, 1], [], []>} : vector<8x128xf32>, vector<128x128xf32>, vector<8x128xf32> -> vector<8x128xf32>
    %c2_70 = arith.constant 2 : index
    %c0_71 = arith.constant 0 : index
    %c0_72 = arith.constant 0 : index
    %119 = vector.load %arg4[%c2_70, %c0_71, %c0_72] : memref<3x1x128xf32, #tpu.memory_space<vmem>>, vector<1x1x128xf32>
    %120 = vector.shape_cast %119 : vector<1x1x128xf32> to vector<1x128xf32>
    %121 = vector.broadcast %120 : vector<1x128xf32> to vector<8x128xf32>
    %122 = arith.addf %118, %121 : vector<8x128xf32>
    %123 = arith.subf %88, %122 : vector<8x128xf32>
    %124 = arith.mulf %123, %123 : vector<8x128xf32>
    %cst_73 = arith.constant dense<0.000000e+00> : vector<8xf32>
    %125 = vector.multi_reduction <add>, %124, %cst_73 [1] : vector<8x128xf32> to vector<8xf32>
    %126 = vector.shape_cast %125 : vector<8xf32> to vector<8x1xf32>
    %cst_74 = arith.constant 5.000000e-01 : f32
    %127 = vector.broadcast %cst_74 : f32 to vector<8x1xf32>
    %128 = arith.mulf %127, %126 : vector<8x1xf32>
    %129 = arith.addf %114, %128 : vector<8x1xf32>
    %130 = arith.cmpf olt, %129, %75 : vector<8x1xf32>
    %cst_75 = arith.constant 1.000000e+00 : f32
    %cst_76 = arith.constant 0.899999976 : f32
    %131 = vector.broadcast %cst_75 : f32 to vector<8x1xf32>
    %132 = vector.broadcast %cst_76 : f32 to vector<8x1xf32>
    %133 = arith.select %130, %131, %132 : vector<8x1xi1>, vector<8x1xf32>
    %134 = vector.broadcast %133 : vector<8x1xf32> to vector<8x128xf32>
    %135 = arith.mulf %21, %134 : vector<8x128xf32>
    %cst_77 = arith.constant 0.000000e+00 : f32
    %136 = vector.broadcast %cst_77 : f32 to vector<8x128xf32>
    %137 = arith.subf %136, %123 : vector<8x128xf32>
    %c1_78 = arith.constant 1 : index
    %c0_79 = arith.constant 0 : index
    %c0_80 = arith.constant 0 : index
    %138 = vector.load %arg2[%c1_78, %c0_79, %c0_80] : memref<3x128x128xf32, #tpu.memory_space<vmem>>, vector<1x128x128xf32>
    %139 = vector.shape_cast %138 : vector<1x128x128xf32> to vector<128x128xf32>
    %cst_81 = arith.constant dense<0.000000e+00> : vector<8x128xf32>
    %140 = tpu.matmul %108, %139, %cst_81 {dimension_numbers = #tpu.dot_dimension_numbers<[1], [0], [0], [1], [0, 0, 1, 1], [], []>} : vector<8x128xf32>, vector<128x128xf32>, vector<8x128xf32> -> vector<8x128xf32>
    %141 = math.tanh %88 : vector<8x128xf32>
    %142 = arith.mulf %141, %141 : vector<8x128xf32>
    %cst_82 = arith.constant 1.000000e+00 : f32
    %143 = vector.broadcast %cst_82 : f32 to vector<8x128xf32>
    %144 = arith.subf %143, %142 : vector<8x128xf32>
    %145 = arith.mulf %140, %144 : vector<8x128xf32>
    %146 = arith.addf %137, %145 : vector<8x128xf32>
    %147 = arith.mulf %135, %146 : vector<8x128xf32>
    %148 = arith.addf %88, %147 : vector<8x128xf32>
    %c2_83 = arith.constant 2 : index
    %c0_84 = arith.constant 0 : index
    %c0_85 = arith.constant 0 : index
    %149 = vector.load %arg2[%c2_83, %c0_84, %c0_85] : memref<3x128x128xf32, #tpu.memory_space<vmem>>, vector<1x128x128xf32>
    %150 = vector.shape_cast %149 : vector<1x128x128xf32> to vector<128x128xf32>
    %cst_86 = arith.constant dense<0.000000e+00> : vector<8x128xf32>
    %151 = tpu.matmul %123, %150, %cst_86 {dimension_numbers = #tpu.dot_dimension_numbers<[1], [0], [0], [1], [0, 0, 1, 1], [], []>} : vector<8x128xf32>, vector<128x128xf32>, vector<8x128xf32> -> vector<8x128xf32>
    %152 = math.tanh %98 : vector<8x128xf32>
    %153 = arith.mulf %152, %152 : vector<8x128xf32>
    %cst_87 = arith.constant 1.000000e+00 : f32
    %154 = vector.broadcast %cst_87 : f32 to vector<8x128xf32>
    %155 = arith.subf %154, %153 : vector<8x128xf32>
    %156 = arith.mulf %151, %155 : vector<8x128xf32>
    %157 = arith.mulf %135, %156 : vector<8x128xf32>
    %158 = arith.addf %98, %157 : vector<8x128xf32>
    %cst_88 = arith.constant 0.000000e+00 : f32
    %159 = vector.broadcast %cst_88 : f32 to vector<8x1xf32>
    %160 = math.tanh %148 : vector<8x128xf32>
    %c1_89 = arith.constant 1 : index
    %c0_90 = arith.constant 0 : index
    %c0_91 = arith.constant 0 : index
    %161 = vector.load %arg3[%c1_89, %c0_90, %c0_91] : memref<3x128x128xf32, #tpu.memory_space<vmem>>, vector<1x128x128xf32>
    %162 = vector.shape_cast %161 : vector<1x128x128xf32> to vector<128x128xf32>
    %cst_92 = arith.constant dense<0.000000e+00> : vector<8x128xf32>
    %163 = tpu.matmul %160, %162, %cst_92 {dimension_numbers = #tpu.dot_dimension_numbers<[1], [0], [0], [1], [0, 0, 1, 1], [], []>} : vector<8x128xf32>, vector<128x128xf32>, vector<8x128xf32> -> vector<8x128xf32>
    %c1_93 = arith.constant 1 : index
    %c0_94 = arith.constant 0 : index
    %c0_95 = arith.constant 0 : index
    %164 = vector.load %arg4[%c1_93, %c0_94, %c0_95] : memref<3x1x128xf32, #tpu.memory_space<vmem>>, vector<1x1x128xf32>
    %165 = vector.shape_cast %164 : vector<1x1x128xf32> to vector<1x128xf32>
    %166 = vector.broadcast %165 : vector<1x128xf32> to vector<8x128xf32>
    %167 = arith.addf %163, %166 : vector<8x128xf32>
    %168 = arith.subf %2, %167 : vector<8x128xf32>
    %169 = arith.mulf %168, %168 : vector<8x128xf32>
    %cst_96 = arith.constant dense<0.000000e+00> : vector<8xf32>
    %170 = vector.multi_reduction <add>, %169, %cst_96 [1] : vector<8x128xf32> to vector<8xf32>
    %171 = vector.shape_cast %170 : vector<8xf32> to vector<8x1xf32>
    %cst_97 = arith.constant 5.000000e-01 : f32
    %172 = vector.broadcast %cst_97 : f32 to vector<8x1xf32>
    %173 = arith.mulf %172, %171 : vector<8x1xf32>
    %174 = arith.addf %159, %173 : vector<8x1xf32>
    %175 = math.tanh %158 : vector<8x128xf32>
    %c2_98 = arith.constant 2 : index
    %c0_99 = arith.constant 0 : index
    %c0_100 = arith.constant 0 : index
    %176 = vector.load %arg3[%c2_98, %c0_99, %c0_100] : memref<3x128x128xf32, #tpu.memory_space<vmem>>, vector<1x128x128xf32>
    %177 = vector.shape_cast %176 : vector<1x128x128xf32> to vector<128x128xf32>
    %cst_101 = arith.constant dense<0.000000e+00> : vector<8x128xf32>
    %178 = tpu.matmul %175, %177, %cst_101 {dimension_numbers = #tpu.dot_dimension_numbers<[1], [0], [0], [1], [0, 0, 1, 1], [], []>} : vector<8x128xf32>, vector<128x128xf32>, vector<8x128xf32> -> vector<8x128xf32>
    %c2_102 = arith.constant 2 : index
    %c0_103 = arith.constant 0 : index
    %c0_104 = arith.constant 0 : index
    %179 = vector.load %arg4[%c2_102, %c0_103, %c0_104] : memref<3x1x128xf32, #tpu.memory_space<vmem>>, vector<1x1x128xf32>
    %180 = vector.shape_cast %179 : vector<1x1x128xf32> to vector<1x128xf32>
    %181 = vector.broadcast %180 : vector<1x128xf32> to vector<8x128xf32>
    %182 = arith.addf %178, %181 : vector<8x128xf32>
    %183 = arith.subf %148, %182 : vector<8x128xf32>
    %184 = arith.mulf %183, %183 : vector<8x128xf32>
    %cst_105 = arith.constant dense<0.000000e+00> : vector<8xf32>
    %185 = vector.multi_reduction <add>, %184, %cst_105 [1] : vector<8x128xf32> to vector<8xf32>
    %186 = vector.shape_cast %185 : vector<8xf32> to vector<8x1xf32>
    %cst_106 = arith.constant 5.000000e-01 : f32
    %187 = vector.broadcast %cst_106 : f32 to vector<8x1xf32>
    %188 = arith.mulf %187, %186 : vector<8x1xf32>
    %189 = arith.addf %174, %188 : vector<8x1xf32>
    %190 = arith.cmpf olt, %189, %129 : vector<8x1xf32>
    %cst_107 = arith.constant 1.000000e+00 : f32
    %cst_108 = arith.constant 0.899999976 : f32
    %191 = vector.broadcast %cst_107 : f32 to vector<8x1xf32>
    %192 = vector.broadcast %cst_108 : f32 to vector<8x1xf32>
    %193 = arith.select %190, %191, %192 : vector<8x1xi1>, vector<8x1xf32>
    %194 = vector.broadcast %193 : vector<8x1xf32> to vector<8x128xf32>
    %195 = arith.mulf %135, %194 : vector<8x128xf32>
    %cst_109 = arith.constant 0.000000e+00 : f32
    %196 = vector.broadcast %cst_109 : f32 to vector<8x128xf32>
    %197 = arith.subf %196, %183 : vector<8x128xf32>
    %c1_110 = arith.constant 1 : index
    %c0_111 = arith.constant 0 : index
    %c0_112 = arith.constant 0 : index
    %198 = vector.load %arg2[%c1_110, %c0_111, %c0_112] : memref<3x128x128xf32, #tpu.memory_space<vmem>>, vector<1x128x128xf32>
    %199 = vector.shape_cast %198 : vector<1x128x128xf32> to vector<128x128xf32>
    %cst_113 = arith.constant dense<0.000000e+00> : vector<8x128xf32>
    %200 = tpu.matmul %168, %199, %cst_113 {dimension_numbers = #tpu.dot_dimension_numbers<[1], [0], [0], [1], [0, 0, 1, 1], [], []>} : vector<8x128xf32>, vector<128x128xf32>, vector<8x128xf32> -> vector<8x128xf32>
    %201 = math.tanh %148 : vector<8x128xf32>
    %202 = arith.mulf %201, %201 : vector<8x128xf32>
    %cst_114 = arith.constant 1.000000e+00 : f32
    %203 = vector.broadcast %cst_114 : f32 to vector<8x128xf32>
    %204 = arith.subf %203, %202 : vector<8x128xf32>
    %205 = arith.mulf %200, %204 : vector<8x128xf32>
    %206 = arith.addf %197, %205 : vector<8x128xf32>
    %207 = arith.mulf %195, %206 : vector<8x128xf32>
    %208 = arith.addf %148, %207 : vector<8x128xf32>
    %c2_115 = arith.constant 2 : index
    %c0_116 = arith.constant 0 : index
    %c0_117 = arith.constant 0 : index
    %209 = vector.load %arg2[%c2_115, %c0_116, %c0_117] : memref<3x128x128xf32, #tpu.memory_space<vmem>>, vector<1x128x128xf32>
    %210 = vector.shape_cast %209 : vector<1x128x128xf32> to vector<128x128xf32>
    %cst_118 = arith.constant dense<0.000000e+00> : vector<8x128xf32>
    %211 = tpu.matmul %183, %210, %cst_118 {dimension_numbers = #tpu.dot_dimension_numbers<[1], [0], [0], [1], [0, 0, 1, 1], [], []>} : vector<8x128xf32>, vector<128x128xf32>, vector<8x128xf32> -> vector<8x128xf32>
    %212 = math.tanh %158 : vector<8x128xf32>
    %213 = arith.mulf %212, %212 : vector<8x128xf32>
    %cst_119 = arith.constant 1.000000e+00 : f32
    %214 = vector.broadcast %cst_119 : f32 to vector<8x128xf32>
    %215 = arith.subf %214, %213 : vector<8x128xf32>
    %216 = arith.mulf %211, %215 : vector<8x128xf32>
    %217 = arith.mulf %195, %216 : vector<8x128xf32>
    %218 = arith.addf %158, %217 : vector<8x128xf32>
    %cst_120 = arith.constant 0.000000e+00 : f32
    %219 = vector.broadcast %cst_120 : f32 to vector<8x1xf32>
    %220 = math.tanh %208 : vector<8x128xf32>
    %c1_121 = arith.constant 1 : index
    %c0_122 = arith.constant 0 : index
    %c0_123 = arith.constant 0 : index
    %221 = vector.load %arg3[%c1_121, %c0_122, %c0_123] : memref<3x128x128xf32, #tpu.memory_space<vmem>>, vector<1x128x128xf32>
    %222 = vector.shape_cast %221 : vector<1x128x128xf32> to vector<128x128xf32>
    %cst_124 = arith.constant dense<0.000000e+00> : vector<8x128xf32>
    %223 = tpu.matmul %220, %222, %cst_124 {dimension_numbers = #tpu.dot_dimension_numbers<[1], [0], [0], [1], [0, 0, 1, 1], [], []>} : vector<8x128xf32>, vector<128x128xf32>, vector<8x128xf32> -> vector<8x128xf32>
    %c1_125 = arith.constant 1 : index
    %c0_126 = arith.constant 0 : index
    %c0_127 = arith.constant 0 : index
    %224 = vector.load %arg4[%c1_125, %c0_126, %c0_127] : memref<3x1x128xf32, #tpu.memory_space<vmem>>, vector<1x1x128xf32>
    %225 = vector.shape_cast %224 : vector<1x1x128xf32> to vector<1x128xf32>
    %226 = vector.broadcast %225 : vector<1x128xf32> to vector<8x128xf32>
    %227 = arith.addf %223, %226 : vector<8x128xf32>
    %228 = arith.subf %2, %227 : vector<8x128xf32>
    %229 = arith.mulf %228, %228 : vector<8x128xf32>
    %cst_128 = arith.constant dense<0.000000e+00> : vector<8xf32>
    %230 = vector.multi_reduction <add>, %229, %cst_128 [1] : vector<8x128xf32> to vector<8xf32>
    %231 = vector.shape_cast %230 : vector<8xf32> to vector<8x1xf32>
    %cst_129 = arith.constant 5.000000e-01 : f32
    %232 = vector.broadcast %cst_129 : f32 to vector<8x1xf32>
    %233 = arith.mulf %232, %231 : vector<8x1xf32>
    %234 = arith.addf %219, %233 : vector<8x1xf32>
    %235 = math.tanh %218 : vector<8x128xf32>
    %c2_130 = arith.constant 2 : index
    %c0_131 = arith.constant 0 : index
    %c0_132 = arith.constant 0 : index
    %236 = vector.load %arg3[%c2_130, %c0_131, %c0_132] : memref<3x128x128xf32, #tpu.memory_space<vmem>>, vector<1x128x128xf32>
    %237 = vector.shape_cast %236 : vector<1x128x128xf32> to vector<128x128xf32>
    %cst_133 = arith.constant dense<0.000000e+00> : vector<8x128xf32>
    %238 = tpu.matmul %235, %237, %cst_133 {dimension_numbers = #tpu.dot_dimension_numbers<[1], [0], [0], [1], [0, 0, 1, 1], [], []>} : vector<8x128xf32>, vector<128x128xf32>, vector<8x128xf32> -> vector<8x128xf32>
    %c2_134 = arith.constant 2 : index
    %c0_135 = arith.constant 0 : index
    %c0_136 = arith.constant 0 : index
    %239 = vector.load %arg4[%c2_134, %c0_135, %c0_136] : memref<3x1x128xf32, #tpu.memory_space<vmem>>, vector<1x1x128xf32>
    %240 = vector.shape_cast %239 : vector<1x1x128xf32> to vector<1x128xf32>
    %241 = vector.broadcast %240 : vector<1x128xf32> to vector<8x128xf32>
    %242 = arith.addf %238, %241 : vector<8x128xf32>
    %243 = arith.subf %208, %242 : vector<8x128xf32>
    %244 = arith.mulf %243, %243 : vector<8x128xf32>
    %cst_137 = arith.constant dense<0.000000e+00> : vector<8xf32>
    %245 = vector.multi_reduction <add>, %244, %cst_137 [1] : vector<8x128xf32> to vector<8xf32>
    %246 = vector.shape_cast %245 : vector<8xf32> to vector<8x1xf32>
    %cst_138 = arith.constant 5.000000e-01 : f32
    %247 = vector.broadcast %cst_138 : f32 to vector<8x1xf32>
    %248 = arith.mulf %247, %246 : vector<8x1xf32>
    %249 = arith.addf %234, %248 : vector<8x1xf32>
    %250 = arith.cmpf olt, %249, %189 : vector<8x1xf32>
    %cst_139 = arith.constant 1.000000e+00 : f32
    %cst_140 = arith.constant 0.899999976 : f32
    %251 = vector.broadcast %cst_139 : f32 to vector<8x1xf32>
    %252 = vector.broadcast %cst_140 : f32 to vector<8x1xf32>
    %253 = arith.select %250, %251, %252 : vector<8x1xi1>, vector<8x1xf32>
    %254 = vector.broadcast %253 : vector<8x1xf32> to vector<8x128xf32>
    %255 = arith.mulf %195, %254 : vector<8x128xf32>
    %cst_141 = arith.constant 0.000000e+00 : f32
    %256 = vector.broadcast %cst_141 : f32 to vector<8x128xf32>
    %257 = arith.subf %256, %243 : vector<8x128xf32>
    %c1_142 = arith.constant 1 : index
    %c0_143 = arith.constant 0 : index
    %c0_144 = arith.constant 0 : index
    %258 = vector.load %arg2[%c1_142, %c0_143, %c0_144] : memref<3x128x128xf32, #tpu.memory_space<vmem>>, vector<1x128x128xf32>
    %259 = vector.shape_cast %258 : vector<1x128x128xf32> to vector<128x128xf32>
    %cst_145 = arith.constant dense<0.000000e+00> : vector<8x128xf32>
    %260 = tpu.matmul %228, %259, %cst_145 {dimension_numbers = #tpu.dot_dimension_numbers<[1], [0], [0], [1], [0, 0, 1, 1], [], []>} : vector<8x128xf32>, vector<128x128xf32>, vector<8x128xf32> -> vector<8x128xf32>
    %261 = math.tanh %208 : vector<8x128xf32>
    %262 = arith.mulf %261, %261 : vector<8x128xf32>
    %cst_146 = arith.constant 1.000000e+00 : f32
    %263 = vector.broadcast %cst_146 : f32 to vector<8x128xf32>
    %264 = arith.subf %263, %262 : vector<8x128xf32>
    %265 = arith.mulf %260, %264 : vector<8x128xf32>
    %266 = arith.addf %257, %265 : vector<8x128xf32>
    %267 = arith.mulf %255, %266 : vector<8x128xf32>
    %268 = arith.addf %208, %267 : vector<8x128xf32>
    %c2_147 = arith.constant 2 : index
    %c0_148 = arith.constant 0 : index
    %c0_149 = arith.constant 0 : index
    %269 = vector.load %arg2[%c2_147, %c0_148, %c0_149] : memref<3x128x128xf32, #tpu.memory_space<vmem>>, vector<1x128x128xf32>
    %270 = vector.shape_cast %269 : vector<1x128x128xf32> to vector<128x128xf32>
    %cst_150 = arith.constant dense<0.000000e+00> : vector<8x128xf32>
    %271 = tpu.matmul %243, %270, %cst_150 {dimension_numbers = #tpu.dot_dimension_numbers<[1], [0], [0], [1], [0, 0, 1, 1], [], []>} : vector<8x128xf32>, vector<128x128xf32>, vector<8x128xf32> -> vector<8x128xf32>
    %272 = math.tanh %218 : vector<8x128xf32>
    %273 = arith.mulf %272, %272 : vector<8x128xf32>
    %cst_151 = arith.constant 1.000000e+00 : f32
    %274 = vector.broadcast %cst_151 : f32 to vector<8x128xf32>
    %275 = arith.subf %274, %273 : vector<8x128xf32>
    %276 = arith.mulf %271, %275 : vector<8x128xf32>
    %277 = arith.mulf %255, %276 : vector<8x128xf32>
    %278 = arith.addf %218, %277 : vector<8x128xf32>
    %cst_152 = arith.constant 0.000000e+00 : f32
    %279 = vector.broadcast %cst_152 : f32 to vector<8x1xf32>
    %280 = math.tanh %268 : vector<8x128xf32>
    %c1_153 = arith.constant 1 : index
    %c0_154 = arith.constant 0 : index
    %c0_155 = arith.constant 0 : index
    %281 = vector.load %arg3[%c1_153, %c0_154, %c0_155] : memref<3x128x128xf32, #tpu.memory_space<vmem>>, vector<1x128x128xf32>
    %282 = vector.shape_cast %281 : vector<1x128x128xf32> to vector<128x128xf32>
    %cst_156 = arith.constant dense<0.000000e+00> : vector<8x128xf32>
    %283 = tpu.matmul %280, %282, %cst_156 {dimension_numbers = #tpu.dot_dimension_numbers<[1], [0], [0], [1], [0, 0, 1, 1], [], []>} : vector<8x128xf32>, vector<128x128xf32>, vector<8x128xf32> -> vector<8x128xf32>
    %c1_157 = arith.constant 1 : index
    %c0_158 = arith.constant 0 : index
    %c0_159 = arith.constant 0 : index
    %284 = vector.load %arg4[%c1_157, %c0_158, %c0_159] : memref<3x1x128xf32, #tpu.memory_space<vmem>>, vector<1x1x128xf32>
    %285 = vector.shape_cast %284 : vector<1x1x128xf32> to vector<1x128xf32>
    %286 = vector.broadcast %285 : vector<1x128xf32> to vector<8x128xf32>
    %287 = arith.addf %283, %286 : vector<8x128xf32>
    %288 = arith.subf %2, %287 : vector<8x128xf32>
    %289 = arith.mulf %288, %288 : vector<8x128xf32>
    %cst_160 = arith.constant dense<0.000000e+00> : vector<8xf32>
    %290 = vector.multi_reduction <add>, %289, %cst_160 [1] : vector<8x128xf32> to vector<8xf32>
    %291 = vector.shape_cast %290 : vector<8xf32> to vector<8x1xf32>
    %cst_161 = arith.constant 5.000000e-01 : f32
    %292 = vector.broadcast %cst_161 : f32 to vector<8x1xf32>
    %293 = arith.mulf %292, %291 : vector<8x1xf32>
    %294 = arith.addf %279, %293 : vector<8x1xf32>
    %295 = math.tanh %278 : vector<8x128xf32>
    %c2_162 = arith.constant 2 : index
    %c0_163 = arith.constant 0 : index
    %c0_164 = arith.constant 0 : index
    %296 = vector.load %arg3[%c2_162, %c0_163, %c0_164] : memref<3x128x128xf32, #tpu.memory_space<vmem>>, vector<1x128x128xf32>
    %297 = vector.shape_cast %296 : vector<1x128x128xf32> to vector<128x128xf32>
    %cst_165 = arith.constant dense<0.000000e+00> : vector<8x128xf32>
    %298 = tpu.matmul %295, %297, %cst_165 {dimension_numbers = #tpu.dot_dimension_numbers<[1], [0], [0], [1], [0, 0, 1, 1], [], []>} : vector<8x128xf32>, vector<128x128xf32>, vector<8x128xf32> -> vector<8x128xf32>
    %c2_166 = arith.constant 2 : index
    %c0_167 = arith.constant 0 : index
    %c0_168 = arith.constant 0 : index
    %299 = vector.load %arg4[%c2_166, %c0_167, %c0_168] : memref<3x1x128xf32, #tpu.memory_space<vmem>>, vector<1x1x128xf32>
    %300 = vector.shape_cast %299 : vector<1x1x128xf32> to vector<1x128xf32>
    %301 = vector.broadcast %300 : vector<1x128xf32> to vector<8x128xf32>
    %302 = arith.addf %298, %301 : vector<8x128xf32>
    %303 = arith.subf %268, %302 : vector<8x128xf32>
    %304 = arith.mulf %303, %303 : vector<8x128xf32>
    %cst_169 = arith.constant dense<0.000000e+00> : vector<8xf32>
    %305 = vector.multi_reduction <add>, %304, %cst_169 [1] : vector<8x128xf32> to vector<8xf32>
    %306 = vector.shape_cast %305 : vector<8xf32> to vector<8x1xf32>
    %cst_170 = arith.constant 5.000000e-01 : f32
    %307 = vector.broadcast %cst_170 : f32 to vector<8x1xf32>
    %308 = arith.mulf %307, %306 : vector<8x1xf32>
    %309 = arith.addf %294, %308 : vector<8x1xf32>
    %310 = arith.cmpf olt, %309, %249 : vector<8x1xf32>
    %cst_171 = arith.constant 1.000000e+00 : f32
    %cst_172 = arith.constant 0.899999976 : f32
    %311 = vector.broadcast %cst_171 : f32 to vector<8x1xf32>
    %312 = vector.broadcast %cst_172 : f32 to vector<8x1xf32>
    %313 = arith.select %310, %311, %312 : vector<8x1xi1>, vector<8x1xf32>
    %314 = vector.broadcast %313 : vector<8x1xf32> to vector<8x128xf32>
    %315 = arith.mulf %255, %314 : vector<8x128xf32>
    %cst_173 = arith.constant 0.000000e+00 : f32
    %316 = vector.broadcast %cst_173 : f32 to vector<8x128xf32>
    %317 = arith.subf %316, %303 : vector<8x128xf32>
    %c1_174 = arith.constant 1 : index
    %c0_175 = arith.constant 0 : index
    %c0_176 = arith.constant 0 : index
    %318 = vector.load %arg2[%c1_174, %c0_175, %c0_176] : memref<3x128x128xf32, #tpu.memory_space<vmem>>, vector<1x128x128xf32>
    %319 = vector.shape_cast %318 : vector<1x128x128xf32> to vector<128x128xf32>
    %cst_177 = arith.constant dense<0.000000e+00> : vector<8x128xf32>
    %320 = tpu.matmul %288, %319, %cst_177 {dimension_numbers = #tpu.dot_dimension_numbers<[1], [0], [0], [1], [0, 0, 1, 1], [], []>} : vector<8x128xf32>, vector<128x128xf32>, vector<8x128xf32> -> vector<8x128xf32>
    %321 = math.tanh %268 : vector<8x128xf32>
    %322 = arith.mulf %321, %321 : vector<8x128xf32>
    %cst_178 = arith.constant 1.000000e+00 : f32
    %323 = vector.broadcast %cst_178 : f32 to vector<8x128xf32>
    %324 = arith.subf %323, %322 : vector<8x128xf32>
    %325 = arith.mulf %320, %324 : vector<8x128xf32>
    %326 = arith.addf %317, %325 : vector<8x128xf32>
    %327 = arith.mulf %315, %326 : vector<8x128xf32>
    %328 = arith.addf %268, %327 : vector<8x128xf32>
    %c2_179 = arith.constant 2 : index
    %c0_180 = arith.constant 0 : index
    %c0_181 = arith.constant 0 : index
    %329 = vector.load %arg2[%c2_179, %c0_180, %c0_181] : memref<3x128x128xf32, #tpu.memory_space<vmem>>, vector<1x128x128xf32>
    %330 = vector.shape_cast %329 : vector<1x128x128xf32> to vector<128x128xf32>
    %cst_182 = arith.constant dense<0.000000e+00> : vector<8x128xf32>
    %331 = tpu.matmul %303, %330, %cst_182 {dimension_numbers = #tpu.dot_dimension_numbers<[1], [0], [0], [1], [0, 0, 1, 1], [], []>} : vector<8x128xf32>, vector<128x128xf32>, vector<8x128xf32> -> vector<8x128xf32>
    %332 = math.tanh %278 : vector<8x128xf32>
    %333 = arith.mulf %332, %332 : vector<8x128xf32>
    %cst_183 = arith.constant 1.000000e+00 : f32
    %334 = vector.broadcast %cst_183 : f32 to vector<8x128xf32>
    %335 = arith.subf %334, %333 : vector<8x128xf32>
    %336 = arith.mulf %331, %335 : vector<8x128xf32>
    %337 = arith.mulf %315, %336 : vector<8x128xf32>
    %338 = arith.addf %278, %337 : vector<8x128xf32>
    %cst_184 = arith.constant 0.000000e+00 : f32
    %339 = vector.broadcast %cst_184 : f32 to vector<8x1xf32>
    %340 = math.tanh %328 : vector<8x128xf32>
    %c1_185 = arith.constant 1 : index
    %c0_186 = arith.constant 0 : index
    %c0_187 = arith.constant 0 : index
    %341 = vector.load %arg3[%c1_185, %c0_186, %c0_187] : memref<3x128x128xf32, #tpu.memory_space<vmem>>, vector<1x128x128xf32>
    %342 = vector.shape_cast %341 : vector<1x128x128xf32> to vector<128x128xf32>
    %cst_188 = arith.constant dense<0.000000e+00> : vector<8x128xf32>
    %343 = tpu.matmul %340, %342, %cst_188 {dimension_numbers = #tpu.dot_dimension_numbers<[1], [0], [0], [1], [0, 0, 1, 1], [], []>} : vector<8x128xf32>, vector<128x128xf32>, vector<8x128xf32> -> vector<8x128xf32>
    %c1_189 = arith.constant 1 : index
    %c0_190 = arith.constant 0 : index
    %c0_191 = arith.constant 0 : index
    %344 = vector.load %arg4[%c1_189, %c0_190, %c0_191] : memref<3x1x128xf32, #tpu.memory_space<vmem>>, vector<1x1x128xf32>
    %345 = vector.shape_cast %344 : vector<1x1x128xf32> to vector<1x128xf32>
    %346 = vector.broadcast %345 : vector<1x128xf32> to vector<8x128xf32>
    %347 = arith.addf %343, %346 : vector<8x128xf32>
    %348 = arith.subf %2, %347 : vector<8x128xf32>
    %349 = arith.mulf %348, %348 : vector<8x128xf32>
    %cst_192 = arith.constant dense<0.000000e+00> : vector<8xf32>
    %350 = vector.multi_reduction <add>, %349, %cst_192 [1] : vector<8x128xf32> to vector<8xf32>
    %351 = vector.shape_cast %350 : vector<8xf32> to vector<8x1xf32>
    %cst_193 = arith.constant 5.000000e-01 : f32
    %352 = vector.broadcast %cst_193 : f32 to vector<8x1xf32>
    %353 = arith.mulf %352, %351 : vector<8x1xf32>
    %354 = arith.addf %339, %353 : vector<8x1xf32>
    %355 = math.tanh %338 : vector<8x128xf32>
    %c2_194 = arith.constant 2 : index
    %c0_195 = arith.constant 0 : index
    %c0_196 = arith.constant 0 : index
    %356 = vector.load %arg3[%c2_194, %c0_195, %c0_196] : memref<3x128x128xf32, #tpu.memory_space<vmem>>, vector<1x128x128xf32>
    %357 = vector.shape_cast %356 : vector<1x128x128xf32> to vector<128x128xf32>
    %cst_197 = arith.constant dense<0.000000e+00> : vector<8x128xf32>
    %358 = tpu.matmul %355, %357, %cst_197 {dimension_numbers = #tpu.dot_dimension_numbers<[1], [0], [0], [1], [0, 0, 1, 1], [], []>} : vector<8x128xf32>, vector<128x128xf32>, vector<8x128xf32> -> vector<8x128xf32>
    %c2_198 = arith.constant 2 : index
    %c0_199 = arith.constant 0 : index
    %c0_200 = arith.constant 0 : index
    %359 = vector.load %arg4[%c2_198, %c0_199, %c0_200] : memref<3x1x128xf32, #tpu.memory_space<vmem>>, vector<1x1x128xf32>
    %360 = vector.shape_cast %359 : vector<1x1x128xf32> to vector<1x128xf32>
    %361 = vector.broadcast %360 : vector<1x128xf32> to vector<8x128xf32>
    %362 = arith.addf %358, %361 : vector<8x128xf32>
    %363 = arith.subf %328, %362 : vector<8x128xf32>
    %364 = arith.mulf %363, %363 : vector<8x128xf32>
    %cst_201 = arith.constant dense<0.000000e+00> : vector<8xf32>
    %365 = vector.multi_reduction <add>, %364, %cst_201 [1] : vector<8x128xf32> to vector<8xf32>
    %366 = vector.shape_cast %365 : vector<8xf32> to vector<8x1xf32>
    %cst_202 = arith.constant 5.000000e-01 : f32
    %367 = vector.broadcast %cst_202 : f32 to vector<8x1xf32>
    %368 = arith.mulf %367, %366 : vector<8x1xf32>
    %369 = arith.addf %354, %368 : vector<8x1xf32>
    %370 = arith.cmpf olt, %369, %309 : vector<8x1xf32>
    %cst_203 = arith.constant 1.000000e+00 : f32
    %cst_204 = arith.constant 0.899999976 : f32
    %371 = vector.broadcast %cst_203 : f32 to vector<8x1xf32>
    %372 = vector.broadcast %cst_204 : f32 to vector<8x1xf32>
    %373 = arith.select %370, %371, %372 : vector<8x1xi1>, vector<8x1xf32>
    %374 = vector.broadcast %373 : vector<8x1xf32> to vector<8x128xf32>
    %375 = arith.mulf %315, %374 : vector<8x128xf32>
    %cst_205 = arith.constant 0.000000e+00 : f32
    %376 = vector.broadcast %cst_205 : f32 to vector<8x128xf32>
    %377 = arith.subf %376, %363 : vector<8x128xf32>
    %c1_206 = arith.constant 1 : index
    %c0_207 = arith.constant 0 : index
    %c0_208 = arith.constant 0 : index
    %378 = vector.load %arg2[%c1_206, %c0_207, %c0_208] : memref<3x128x128xf32, #tpu.memory_space<vmem>>, vector<1x128x128xf32>
    %379 = vector.shape_cast %378 : vector<1x128x128xf32> to vector<128x128xf32>
    %cst_209 = arith.constant dense<0.000000e+00> : vector<8x128xf32>
    %380 = tpu.matmul %348, %379, %cst_209 {dimension_numbers = #tpu.dot_dimension_numbers<[1], [0], [0], [1], [0, 0, 1, 1], [], []>} : vector<8x128xf32>, vector<128x128xf32>, vector<8x128xf32> -> vector<8x128xf32>
    %381 = math.tanh %328 : vector<8x128xf32>
    %382 = arith.mulf %381, %381 : vector<8x128xf32>
    %cst_210 = arith.constant 1.000000e+00 : f32
    %383 = vector.broadcast %cst_210 : f32 to vector<8x128xf32>
    %384 = arith.subf %383, %382 : vector<8x128xf32>
    %385 = arith.mulf %380, %384 : vector<8x128xf32>
    %386 = arith.addf %377, %385 : vector<8x128xf32>
    %387 = arith.mulf %375, %386 : vector<8x128xf32>
    %388 = arith.addf %328, %387 : vector<8x128xf32>
    %c2_211 = arith.constant 2 : index
    %c0_212 = arith.constant 0 : index
    %c0_213 = arith.constant 0 : index
    %389 = vector.load %arg2[%c2_211, %c0_212, %c0_213] : memref<3x128x128xf32, #tpu.memory_space<vmem>>, vector<1x128x128xf32>
    %390 = vector.shape_cast %389 : vector<1x128x128xf32> to vector<128x128xf32>
    %cst_214 = arith.constant dense<0.000000e+00> : vector<8x128xf32>
    %391 = tpu.matmul %363, %390, %cst_214 {dimension_numbers = #tpu.dot_dimension_numbers<[1], [0], [0], [1], [0, 0, 1, 1], [], []>} : vector<8x128xf32>, vector<128x128xf32>, vector<8x128xf32> -> vector<8x128xf32>
    %392 = math.tanh %338 : vector<8x128xf32>
    %393 = arith.mulf %392, %392 : vector<8x128xf32>
    %cst_215 = arith.constant 1.000000e+00 : f32
    %394 = vector.broadcast %cst_215 : f32 to vector<8x128xf32>
    %395 = arith.subf %394, %393 : vector<8x128xf32>
    %396 = arith.mulf %391, %395 : vector<8x128xf32>
    %397 = arith.mulf %375, %396 : vector<8x128xf32>
    %398 = arith.addf %338, %397 : vector<8x128xf32>
    %cst_216 = arith.constant 0.000000e+00 : f32
    %399 = vector.broadcast %cst_216 : f32 to vector<8x1xf32>
    %400 = math.tanh %388 : vector<8x128xf32>
    %c1_217 = arith.constant 1 : index
    %c0_218 = arith.constant 0 : index
    %c0_219 = arith.constant 0 : index
    %401 = vector.load %arg3[%c1_217, %c0_218, %c0_219] : memref<3x128x128xf32, #tpu.memory_space<vmem>>, vector<1x128x128xf32>
    %402 = vector.shape_cast %401 : vector<1x128x128xf32> to vector<128x128xf32>
    %cst_220 = arith.constant dense<0.000000e+00> : vector<8x128xf32>
    %403 = tpu.matmul %400, %402, %cst_220 {dimension_numbers = #tpu.dot_dimension_numbers<[1], [0], [0], [1], [0, 0, 1, 1], [], []>} : vector<8x128xf32>, vector<128x128xf32>, vector<8x128xf32> -> vector<8x128xf32>
    %c1_221 = arith.constant 1 : index
    %c0_222 = arith.constant 0 : index
    %c0_223 = arith.constant 0 : index
    %404 = vector.load %arg4[%c1_221, %c0_222, %c0_223] : memref<3x1x128xf32, #tpu.memory_space<vmem>>, vector<1x1x128xf32>
    %405 = vector.shape_cast %404 : vector<1x1x128xf32> to vector<1x128xf32>
    %406 = vector.broadcast %405 : vector<1x128xf32> to vector<8x128xf32>
    %407 = arith.addf %403, %406 : vector<8x128xf32>
    %408 = arith.subf %2, %407 : vector<8x128xf32>
    %409 = arith.mulf %408, %408 : vector<8x128xf32>
    %cst_224 = arith.constant dense<0.000000e+00> : vector<8xf32>
    %410 = vector.multi_reduction <add>, %409, %cst_224 [1] : vector<8x128xf32> to vector<8xf32>
    %411 = vector.shape_cast %410 : vector<8xf32> to vector<8x1xf32>
    %cst_225 = arith.constant 5.000000e-01 : f32
    %412 = vector.broadcast %cst_225 : f32 to vector<8x1xf32>
    %413 = arith.mulf %412, %411 : vector<8x1xf32>
    %414 = arith.addf %399, %413 : vector<8x1xf32>
    %415 = math.tanh %398 : vector<8x128xf32>
    %c2_226 = arith.constant 2 : index
    %c0_227 = arith.constant 0 : index
    %c0_228 = arith.constant 0 : index
    %416 = vector.load %arg3[%c2_226, %c0_227, %c0_228] : memref<3x128x128xf32, #tpu.memory_space<vmem>>, vector<1x128x128xf32>
    %417 = vector.shape_cast %416 : vector<1x128x128xf32> to vector<128x128xf32>
    %cst_229 = arith.constant dense<0.000000e+00> : vector<8x128xf32>
    %418 = tpu.matmul %415, %417, %cst_229 {dimension_numbers = #tpu.dot_dimension_numbers<[1], [0], [0], [1], [0, 0, 1, 1], [], []>} : vector<8x128xf32>, vector<128x128xf32>, vector<8x128xf32> -> vector<8x128xf32>
    %c2_230 = arith.constant 2 : index
    %c0_231 = arith.constant 0 : index
    %c0_232 = arith.constant 0 : index
    %419 = vector.load %arg4[%c2_230, %c0_231, %c0_232] : memref<3x1x128xf32, #tpu.memory_space<vmem>>, vector<1x1x128xf32>
    %420 = vector.shape_cast %419 : vector<1x1x128xf32> to vector<1x128xf32>
    %421 = vector.broadcast %420 : vector<1x128xf32> to vector<8x128xf32>
    %422 = arith.addf %418, %421 : vector<8x128xf32>
    %423 = arith.subf %388, %422 : vector<8x128xf32>
    %424 = arith.mulf %423, %423 : vector<8x128xf32>
    %cst_233 = arith.constant dense<0.000000e+00> : vector<8xf32>
    %425 = vector.multi_reduction <add>, %424, %cst_233 [1] : vector<8x128xf32> to vector<8xf32>
    %426 = vector.shape_cast %425 : vector<8xf32> to vector<8x1xf32>
    %cst_234 = arith.constant 5.000000e-01 : f32
    %427 = vector.broadcast %cst_234 : f32 to vector<8x1xf32>
    %428 = arith.mulf %427, %426 : vector<8x1xf32>
    %429 = arith.addf %414, %428 : vector<8x1xf32>
    %430 = arith.cmpf olt, %429, %369 : vector<8x1xf32>
    %cst_235 = arith.constant 1.000000e+00 : f32
    %cst_236 = arith.constant 0.899999976 : f32
    %431 = vector.broadcast %cst_235 : f32 to vector<8x1xf32>
    %432 = vector.broadcast %cst_236 : f32 to vector<8x1xf32>
    %433 = arith.select %430, %431, %432 : vector<8x1xi1>, vector<8x1xf32>
    %434 = vector.broadcast %433 : vector<8x1xf32> to vector<8x128xf32>
    %435 = arith.mulf %375, %434 : vector<8x128xf32>
    %cst_237 = arith.constant 0.000000e+00 : f32
    %436 = vector.broadcast %cst_237 : f32 to vector<8x128xf32>
    %437 = arith.subf %436, %423 : vector<8x128xf32>
    %c1_238 = arith.constant 1 : index
    %c0_239 = arith.constant 0 : index
    %c0_240 = arith.constant 0 : index
    %438 = vector.load %arg2[%c1_238, %c0_239, %c0_240] : memref<3x128x128xf32, #tpu.memory_space<vmem>>, vector<1x128x128xf32>
    %439 = vector.shape_cast %438 : vector<1x128x128xf32> to vector<128x128xf32>
    %cst_241 = arith.constant dense<0.000000e+00> : vector<8x128xf32>
    %440 = tpu.matmul %408, %439, %cst_241 {dimension_numbers = #tpu.dot_dimension_numbers<[1], [0], [0], [1], [0, 0, 1, 1], [], []>} : vector<8x128xf32>, vector<128x128xf32>, vector<8x128xf32> -> vector<8x128xf32>
    %441 = math.tanh %388 : vector<8x128xf32>
    %442 = arith.mulf %441, %441 : vector<8x128xf32>
    %cst_242 = arith.constant 1.000000e+00 : f32
    %443 = vector.broadcast %cst_242 : f32 to vector<8x128xf32>
    %444 = arith.subf %443, %442 : vector<8x128xf32>
    %445 = arith.mulf %440, %444 : vector<8x128xf32>
    %446 = arith.addf %437, %445 : vector<8x128xf32>
    %447 = arith.mulf %435, %446 : vector<8x128xf32>
    %448 = arith.addf %388, %447 : vector<8x128xf32>
    %c2_243 = arith.constant 2 : index
    %c0_244 = arith.constant 0 : index
    %c0_245 = arith.constant 0 : index
    %449 = vector.load %arg2[%c2_243, %c0_244, %c0_245] : memref<3x128x128xf32, #tpu.memory_space<vmem>>, vector<1x128x128xf32>
    %450 = vector.shape_cast %449 : vector<1x128x128xf32> to vector<128x128xf32>
    %cst_246 = arith.constant dense<0.000000e+00> : vector<8x128xf32>
    %451 = tpu.matmul %423, %450, %cst_246 {dimension_numbers = #tpu.dot_dimension_numbers<[1], [0], [0], [1], [0, 0, 1, 1], [], []>} : vector<8x128xf32>, vector<128x128xf32>, vector<8x128xf32> -> vector<8x128xf32>
    %452 = math.tanh %398 : vector<8x128xf32>
    %453 = arith.mulf %452, %452 : vector<8x128xf32>
    %cst_247 = arith.constant 1.000000e+00 : f32
    %454 = vector.broadcast %cst_247 : f32 to vector<8x128xf32>
    %455 = arith.subf %454, %453 : vector<8x128xf32>
    %456 = arith.mulf %451, %455 : vector<8x128xf32>
    %457 = arith.mulf %435, %456 : vector<8x128xf32>
    %458 = arith.addf %398, %457 : vector<8x128xf32>
    %cst_248 = arith.constant 0.000000e+00 : f32
    %459 = vector.broadcast %cst_248 : f32 to vector<8x1xf32>
    %460 = math.tanh %448 : vector<8x128xf32>
    %c1_249 = arith.constant 1 : index
    %c0_250 = arith.constant 0 : index
    %c0_251 = arith.constant 0 : index
    %461 = vector.load %arg3[%c1_249, %c0_250, %c0_251] : memref<3x128x128xf32, #tpu.memory_space<vmem>>, vector<1x128x128xf32>
    %462 = vector.shape_cast %461 : vector<1x128x128xf32> to vector<128x128xf32>
    %cst_252 = arith.constant dense<0.000000e+00> : vector<8x128xf32>
    %463 = tpu.matmul %460, %462, %cst_252 {dimension_numbers = #tpu.dot_dimension_numbers<[1], [0], [0], [1], [0, 0, 1, 1], [], []>} : vector<8x128xf32>, vector<128x128xf32>, vector<8x128xf32> -> vector<8x128xf32>
    %c1_253 = arith.constant 1 : index
    %c0_254 = arith.constant 0 : index
    %c0_255 = arith.constant 0 : index
    %464 = vector.load %arg4[%c1_253, %c0_254, %c0_255] : memref<3x1x128xf32, #tpu.memory_space<vmem>>, vector<1x1x128xf32>
    %465 = vector.shape_cast %464 : vector<1x1x128xf32> to vector<1x128xf32>
    %466 = vector.broadcast %465 : vector<1x128xf32> to vector<8x128xf32>
    %467 = arith.addf %463, %466 : vector<8x128xf32>
    %468 = arith.subf %2, %467 : vector<8x128xf32>
    %469 = arith.mulf %468, %468 : vector<8x128xf32>
    %cst_256 = arith.constant dense<0.000000e+00> : vector<8xf32>
    %470 = vector.multi_reduction <add>, %469, %cst_256 [1] : vector<8x128xf32> to vector<8xf32>
    %471 = vector.shape_cast %470 : vector<8xf32> to vector<8x1xf32>
    %cst_257 = arith.constant 5.000000e-01 : f32
    %472 = vector.broadcast %cst_257 : f32 to vector<8x1xf32>
    %473 = arith.mulf %472, %471 : vector<8x1xf32>
    %474 = arith.addf %459, %473 : vector<8x1xf32>
    %475 = math.tanh %458 : vector<8x128xf32>
    %c2_258 = arith.constant 2 : index
    %c0_259 = arith.constant 0 : index
    %c0_260 = arith.constant 0 : index
    %476 = vector.load %arg3[%c2_258, %c0_259, %c0_260] : memref<3x128x128xf32, #tpu.memory_space<vmem>>, vector<1x128x128xf32>
    %477 = vector.shape_cast %476 : vector<1x128x128xf32> to vector<128x128xf32>
    %cst_261 = arith.constant dense<0.000000e+00> : vector<8x128xf32>
    %478 = tpu.matmul %475, %477, %cst_261 {dimension_numbers = #tpu.dot_dimension_numbers<[1], [0], [0], [1], [0, 0, 1, 1], [], []>} : vector<8x128xf32>, vector<128x128xf32>, vector<8x128xf32> -> vector<8x128xf32>
    %c2_262 = arith.constant 2 : index
    %c0_263 = arith.constant 0 : index
    %c0_264 = arith.constant 0 : index
    %479 = vector.load %arg4[%c2_262, %c0_263, %c0_264] : memref<3x1x128xf32, #tpu.memory_space<vmem>>, vector<1x1x128xf32>
    %480 = vector.shape_cast %479 : vector<1x1x128xf32> to vector<1x128xf32>
    %481 = vector.broadcast %480 : vector<1x128xf32> to vector<8x128xf32>
    %482 = arith.addf %478, %481 : vector<8x128xf32>
    %483 = arith.subf %448, %482 : vector<8x128xf32>
    %484 = arith.mulf %483, %483 : vector<8x128xf32>
    %cst_265 = arith.constant dense<0.000000e+00> : vector<8xf32>
    %485 = vector.multi_reduction <add>, %484, %cst_265 [1] : vector<8x128xf32> to vector<8xf32>
    %486 = vector.shape_cast %485 : vector<8xf32> to vector<8x1xf32>
    %cst_266 = arith.constant 5.000000e-01 : f32
    %487 = vector.broadcast %cst_266 : f32 to vector<8x1xf32>
    %488 = arith.mulf %487, %486 : vector<8x1xf32>
    %489 = arith.addf %474, %488 : vector<8x1xf32>
    %490 = arith.cmpf olt, %489, %429 : vector<8x1xf32>
    %cst_267 = arith.constant 1.000000e+00 : f32
    %cst_268 = arith.constant 0.899999976 : f32
    %491 = vector.broadcast %cst_267 : f32 to vector<8x1xf32>
    %492 = vector.broadcast %cst_268 : f32 to vector<8x1xf32>
    %493 = arith.select %490, %491, %492 : vector<8x1xi1>, vector<8x1xf32>
    %494 = vector.broadcast %493 : vector<8x1xf32> to vector<8x128xf32>
    %495 = arith.mulf %435, %494 : vector<8x128xf32>
    %cst_269 = arith.constant 0.000000e+00 : f32
    %496 = vector.broadcast %cst_269 : f32 to vector<8x128xf32>
    %497 = arith.subf %496, %483 : vector<8x128xf32>
    %c1_270 = arith.constant 1 : index
    %c0_271 = arith.constant 0 : index
    %c0_272 = arith.constant 0 : index
    %498 = vector.load %arg2[%c1_270, %c0_271, %c0_272] : memref<3x128x128xf32, #tpu.memory_space<vmem>>, vector<1x128x128xf32>
    %499 = vector.shape_cast %498 : vector<1x128x128xf32> to vector<128x128xf32>
    %cst_273 = arith.constant dense<0.000000e+00> : vector<8x128xf32>
    %500 = tpu.matmul %468, %499, %cst_273 {dimension_numbers = #tpu.dot_dimension_numbers<[1], [0], [0], [1], [0, 0, 1, 1], [], []>} : vector<8x128xf32>, vector<128x128xf32>, vector<8x128xf32> -> vector<8x128xf32>
    %501 = math.tanh %448 : vector<8x128xf32>
    %502 = arith.mulf %501, %501 : vector<8x128xf32>
    %cst_274 = arith.constant 1.000000e+00 : f32
    %503 = vector.broadcast %cst_274 : f32 to vector<8x128xf32>
    %504 = arith.subf %503, %502 : vector<8x128xf32>
    %505 = arith.mulf %500, %504 : vector<8x128xf32>
    %506 = arith.addf %497, %505 : vector<8x128xf32>
    %507 = arith.mulf %495, %506 : vector<8x128xf32>
    %508 = arith.addf %448, %507 : vector<8x128xf32>
    %c2_275 = arith.constant 2 : index
    %c0_276 = arith.constant 0 : index
    %c0_277 = arith.constant 0 : index
    %509 = vector.load %arg2[%c2_275, %c0_276, %c0_277] : memref<3x128x128xf32, #tpu.memory_space<vmem>>, vector<1x128x128xf32>
    %510 = vector.shape_cast %509 : vector<1x128x128xf32> to vector<128x128xf32>
    %cst_278 = arith.constant dense<0.000000e+00> : vector<8x128xf32>
    %511 = tpu.matmul %483, %510, %cst_278 {dimension_numbers = #tpu.dot_dimension_numbers<[1], [0], [0], [1], [0, 0, 1, 1], [], []>} : vector<8x128xf32>, vector<128x128xf32>, vector<8x128xf32> -> vector<8x128xf32>
    %512 = math.tanh %458 : vector<8x128xf32>
    %513 = arith.mulf %512, %512 : vector<8x128xf32>
    %cst_279 = arith.constant 1.000000e+00 : f32
    %514 = vector.broadcast %cst_279 : f32 to vector<8x128xf32>
    %515 = arith.subf %514, %513 : vector<8x128xf32>
    %516 = arith.mulf %511, %515 : vector<8x128xf32>
    %517 = arith.mulf %495, %516 : vector<8x128xf32>
    %518 = arith.addf %458, %517 : vector<8x128xf32>
    %cst_280 = arith.constant 0.000000e+00 : f32
    %519 = vector.broadcast %cst_280 : f32 to vector<8x1xf32>
    %520 = math.tanh %508 : vector<8x128xf32>
    %c1_281 = arith.constant 1 : index
    %c0_282 = arith.constant 0 : index
    %c0_283 = arith.constant 0 : index
    %521 = vector.load %arg3[%c1_281, %c0_282, %c0_283] : memref<3x128x128xf32, #tpu.memory_space<vmem>>, vector<1x128x128xf32>
    %522 = vector.shape_cast %521 : vector<1x128x128xf32> to vector<128x128xf32>
    %cst_284 = arith.constant dense<0.000000e+00> : vector<8x128xf32>
    %523 = tpu.matmul %520, %522, %cst_284 {dimension_numbers = #tpu.dot_dimension_numbers<[1], [0], [0], [1], [0, 0, 1, 1], [], []>} : vector<8x128xf32>, vector<128x128xf32>, vector<8x128xf32> -> vector<8x128xf32>
    %c1_285 = arith.constant 1 : index
    %c0_286 = arith.constant 0 : index
    %c0_287 = arith.constant 0 : index
    %524 = vector.load %arg4[%c1_285, %c0_286, %c0_287] : memref<3x1x128xf32, #tpu.memory_space<vmem>>, vector<1x1x128xf32>
    %525 = vector.shape_cast %524 : vector<1x1x128xf32> to vector<1x128xf32>
    %526 = vector.broadcast %525 : vector<1x128xf32> to vector<8x128xf32>
    %527 = arith.addf %523, %526 : vector<8x128xf32>
    %528 = arith.subf %2, %527 : vector<8x128xf32>
    %529 = arith.mulf %528, %528 : vector<8x128xf32>
    %cst_288 = arith.constant dense<0.000000e+00> : vector<8xf32>
    %530 = vector.multi_reduction <add>, %529, %cst_288 [1] : vector<8x128xf32> to vector<8xf32>
    %531 = vector.shape_cast %530 : vector<8xf32> to vector<8x1xf32>
    %cst_289 = arith.constant 5.000000e-01 : f32
    %532 = vector.broadcast %cst_289 : f32 to vector<8x1xf32>
    %533 = arith.mulf %532, %531 : vector<8x1xf32>
    %534 = arith.addf %519, %533 : vector<8x1xf32>
    %535 = math.tanh %518 : vector<8x128xf32>
    %c2_290 = arith.constant 2 : index
    %c0_291 = arith.constant 0 : index
    %c0_292 = arith.constant 0 : index
    %536 = vector.load %arg3[%c2_290, %c0_291, %c0_292] : memref<3x128x128xf32, #tpu.memory_space<vmem>>, vector<1x128x128xf32>
    %537 = vector.shape_cast %536 : vector<1x128x128xf32> to vector<128x128xf32>
    %cst_293 = arith.constant dense<0.000000e+00> : vector<8x128xf32>
    %538 = tpu.matmul %535, %537, %cst_293 {dimension_numbers = #tpu.dot_dimension_numbers<[1], [0], [0], [1], [0, 0, 1, 1], [], []>} : vector<8x128xf32>, vector<128x128xf32>, vector<8x128xf32> -> vector<8x128xf32>
    %c2_294 = arith.constant 2 : index
    %c0_295 = arith.constant 0 : index
    %c0_296 = arith.constant 0 : index
    %539 = vector.load %arg4[%c2_294, %c0_295, %c0_296] : memref<3x1x128xf32, #tpu.memory_space<vmem>>, vector<1x1x128xf32>
    %540 = vector.shape_cast %539 : vector<1x1x128xf32> to vector<1x128xf32>
    %541 = vector.broadcast %540 : vector<1x128xf32> to vector<8x128xf32>
    %542 = arith.addf %538, %541 : vector<8x128xf32>
    %543 = arith.subf %508, %542 : vector<8x128xf32>
    %544 = arith.mulf %543, %543 : vector<8x128xf32>
    %cst_297 = arith.constant dense<0.000000e+00> : vector<8xf32>
    %545 = vector.multi_reduction <add>, %544, %cst_297 [1] : vector<8x128xf32> to vector<8xf32>
    %546 = vector.shape_cast %545 : vector<8xf32> to vector<8x1xf32>
    %cst_298 = arith.constant 5.000000e-01 : f32
    %547 = vector.broadcast %cst_298 : f32 to vector<8x1xf32>
    %548 = arith.mulf %547, %546 : vector<8x1xf32>
    %549 = arith.addf %534, %548 : vector<8x1xf32>
    %550 = arith.cmpf olt, %549, %489 : vector<8x1xf32>
    %cst_299 = arith.constant 1.000000e+00 : f32
    %cst_300 = arith.constant 0.899999976 : f32
    %551 = vector.broadcast %cst_299 : f32 to vector<8x1xf32>
    %552 = vector.broadcast %cst_300 : f32 to vector<8x1xf32>
    %553 = arith.select %550, %551, %552 : vector<8x1xi1>, vector<8x1xf32>
    %554 = vector.broadcast %553 : vector<8x1xf32> to vector<8x128xf32>
    %555 = arith.mulf %495, %554 : vector<8x128xf32>
    %cst_301 = arith.constant 0.000000e+00 : f32
    %556 = vector.broadcast %cst_301 : f32 to vector<8x128xf32>
    %557 = arith.subf %556, %543 : vector<8x128xf32>
    %c1_302 = arith.constant 1 : index
    %c0_303 = arith.constant 0 : index
    %c0_304 = arith.constant 0 : index
    %558 = vector.load %arg2[%c1_302, %c0_303, %c0_304] : memref<3x128x128xf32, #tpu.memory_space<vmem>>, vector<1x128x128xf32>
    %559 = vector.shape_cast %558 : vector<1x128x128xf32> to vector<128x128xf32>
    %cst_305 = arith.constant dense<0.000000e+00> : vector<8x128xf32>
    %560 = tpu.matmul %528, %559, %cst_305 {dimension_numbers = #tpu.dot_dimension_numbers<[1], [0], [0], [1], [0, 0, 1, 1], [], []>} : vector<8x128xf32>, vector<128x128xf32>, vector<8x128xf32> -> vector<8x128xf32>
    %561 = math.tanh %508 : vector<8x128xf32>
    %562 = arith.mulf %561, %561 : vector<8x128xf32>
    %cst_306 = arith.constant 1.000000e+00 : f32
    %563 = vector.broadcast %cst_306 : f32 to vector<8x128xf32>
    %564 = arith.subf %563, %562 : vector<8x128xf32>
    %565 = arith.mulf %560, %564 : vector<8x128xf32>
    %566 = arith.addf %557, %565 : vector<8x128xf32>
    %567 = arith.mulf %555, %566 : vector<8x128xf32>
    %568 = arith.addf %508, %567 : vector<8x128xf32>
    %c2_307 = arith.constant 2 : index
    %c0_308 = arith.constant 0 : index
    %c0_309 = arith.constant 0 : index
    %569 = vector.load %arg2[%c2_307, %c0_308, %c0_309] : memref<3x128x128xf32, #tpu.memory_space<vmem>>, vector<1x128x128xf32>
    %570 = vector.shape_cast %569 : vector<1x128x128xf32> to vector<128x128xf32>
    %cst_310 = arith.constant dense<0.000000e+00> : vector<8x128xf32>
    %571 = tpu.matmul %543, %570, %cst_310 {dimension_numbers = #tpu.dot_dimension_numbers<[1], [0], [0], [1], [0, 0, 1, 1], [], []>} : vector<8x128xf32>, vector<128x128xf32>, vector<8x128xf32> -> vector<8x128xf32>
    %572 = math.tanh %518 : vector<8x128xf32>
    %573 = arith.mulf %572, %572 : vector<8x128xf32>
    %cst_311 = arith.constant 1.000000e+00 : f32
    %574 = vector.broadcast %cst_311 : f32 to vector<8x128xf32>
    %575 = arith.subf %574, %573 : vector<8x128xf32>
    %576 = arith.mulf %571, %575 : vector<8x128xf32>
    %577 = arith.mulf %555, %576 : vector<8x128xf32>
    %578 = arith.addf %518, %577 : vector<8x128xf32>
    %cst_312 = arith.constant 0.000000e+00 : f32
    %579 = vector.broadcast %cst_312 : f32 to vector<8x1xf32>
    %580 = math.tanh %568 : vector<8x128xf32>
    %c1_313 = arith.constant 1 : index
    %c0_314 = arith.constant 0 : index
    %c0_315 = arith.constant 0 : index
    %581 = vector.load %arg3[%c1_313, %c0_314, %c0_315] : memref<3x128x128xf32, #tpu.memory_space<vmem>>, vector<1x128x128xf32>
    %582 = vector.shape_cast %581 : vector<1x128x128xf32> to vector<128x128xf32>
    %cst_316 = arith.constant dense<0.000000e+00> : vector<8x128xf32>
    %583 = tpu.matmul %580, %582, %cst_316 {dimension_numbers = #tpu.dot_dimension_numbers<[1], [0], [0], [1], [0, 0, 1, 1], [], []>} : vector<8x128xf32>, vector<128x128xf32>, vector<8x128xf32> -> vector<8x128xf32>
    %c1_317 = arith.constant 1 : index
    %c0_318 = arith.constant 0 : index
    %c0_319 = arith.constant 0 : index
    %584 = vector.load %arg4[%c1_317, %c0_318, %c0_319] : memref<3x1x128xf32, #tpu.memory_space<vmem>>, vector<1x1x128xf32>
    %585 = vector.shape_cast %584 : vector<1x1x128xf32> to vector<1x128xf32>
    %586 = vector.broadcast %585 : vector<1x128xf32> to vector<8x128xf32>
    %587 = arith.addf %583, %586 : vector<8x128xf32>
    %588 = arith.subf %2, %587 : vector<8x128xf32>
    %589 = arith.mulf %588, %588 : vector<8x128xf32>
    %cst_320 = arith.constant dense<0.000000e+00> : vector<8xf32>
    %590 = vector.multi_reduction <add>, %589, %cst_320 [1] : vector<8x128xf32> to vector<8xf32>
    %591 = vector.shape_cast %590 : vector<8xf32> to vector<8x1xf32>
    %cst_321 = arith.constant 5.000000e-01 : f32
    %592 = vector.broadcast %cst_321 : f32 to vector<8x1xf32>
    %593 = arith.mulf %592, %591 : vector<8x1xf32>
    %594 = arith.addf %579, %593 : vector<8x1xf32>
    %595 = math.tanh %578 : vector<8x128xf32>
    %c2_322 = arith.constant 2 : index
    %c0_323 = arith.constant 0 : index
    %c0_324 = arith.constant 0 : index
    %596 = vector.load %arg3[%c2_322, %c0_323, %c0_324] : memref<3x128x128xf32, #tpu.memory_space<vmem>>, vector<1x128x128xf32>
    %597 = vector.shape_cast %596 : vector<1x128x128xf32> to vector<128x128xf32>
    %cst_325 = arith.constant dense<0.000000e+00> : vector<8x128xf32>
    %598 = tpu.matmul %595, %597, %cst_325 {dimension_numbers = #tpu.dot_dimension_numbers<[1], [0], [0], [1], [0, 0, 1, 1], [], []>} : vector<8x128xf32>, vector<128x128xf32>, vector<8x128xf32> -> vector<8x128xf32>
    %c2_326 = arith.constant 2 : index
    %c0_327 = arith.constant 0 : index
    %c0_328 = arith.constant 0 : index
    %599 = vector.load %arg4[%c2_326, %c0_327, %c0_328] : memref<3x1x128xf32, #tpu.memory_space<vmem>>, vector<1x1x128xf32>
    %600 = vector.shape_cast %599 : vector<1x1x128xf32> to vector<1x128xf32>
    %601 = vector.broadcast %600 : vector<1x128xf32> to vector<8x128xf32>
    %602 = arith.addf %598, %601 : vector<8x128xf32>
    %603 = arith.subf %568, %602 : vector<8x128xf32>
    %604 = arith.mulf %603, %603 : vector<8x128xf32>
    %cst_329 = arith.constant dense<0.000000e+00> : vector<8xf32>
    %605 = vector.multi_reduction <add>, %604, %cst_329 [1] : vector<8x128xf32> to vector<8xf32>
    %606 = vector.shape_cast %605 : vector<8xf32> to vector<8x1xf32>
    %cst_330 = arith.constant 5.000000e-01 : f32
    %607 = vector.broadcast %cst_330 : f32 to vector<8x1xf32>
    %608 = arith.mulf %607, %606 : vector<8x1xf32>
    %609 = arith.addf %594, %608 : vector<8x1xf32>
    %610 = arith.cmpf olt, %609, %549 : vector<8x1xf32>
    %cst_331 = arith.constant 1.000000e+00 : f32
    %cst_332 = arith.constant 0.899999976 : f32
    %611 = vector.broadcast %cst_331 : f32 to vector<8x1xf32>
    %612 = vector.broadcast %cst_332 : f32 to vector<8x1xf32>
    %613 = arith.select %610, %611, %612 : vector<8x1xi1>, vector<8x1xf32>
    %614 = vector.broadcast %613 : vector<8x1xf32> to vector<8x128xf32>
    %615 = arith.mulf %555, %614 : vector<8x128xf32>
    %cst_333 = arith.constant 0.000000e+00 : f32
    %616 = vector.broadcast %cst_333 : f32 to vector<8x128xf32>
    %617 = arith.subf %616, %603 : vector<8x128xf32>
    %c1_334 = arith.constant 1 : index
    %c0_335 = arith.constant 0 : index
    %c0_336 = arith.constant 0 : index
    %618 = vector.load %arg2[%c1_334, %c0_335, %c0_336] : memref<3x128x128xf32, #tpu.memory_space<vmem>>, vector<1x128x128xf32>
    %619 = vector.shape_cast %618 : vector<1x128x128xf32> to vector<128x128xf32>
    %cst_337 = arith.constant dense<0.000000e+00> : vector<8x128xf32>
    %620 = tpu.matmul %588, %619, %cst_337 {dimension_numbers = #tpu.dot_dimension_numbers<[1], [0], [0], [1], [0, 0, 1, 1], [], []>} : vector<8x128xf32>, vector<128x128xf32>, vector<8x128xf32> -> vector<8x128xf32>
    %621 = math.tanh %568 : vector<8x128xf32>
    %622 = arith.mulf %621, %621 : vector<8x128xf32>
    %cst_338 = arith.constant 1.000000e+00 : f32
    %623 = vector.broadcast %cst_338 : f32 to vector<8x128xf32>
    %624 = arith.subf %623, %622 : vector<8x128xf32>
    %625 = arith.mulf %620, %624 : vector<8x128xf32>
    %626 = arith.addf %617, %625 : vector<8x128xf32>
    %627 = arith.mulf %615, %626 : vector<8x128xf32>
    %628 = arith.addf %568, %627 : vector<8x128xf32>
    %c2_339 = arith.constant 2 : index
    %c0_340 = arith.constant 0 : index
    %c0_341 = arith.constant 0 : index
    %629 = vector.load %arg2[%c2_339, %c0_340, %c0_341] : memref<3x128x128xf32, #tpu.memory_space<vmem>>, vector<1x128x128xf32>
    %630 = vector.shape_cast %629 : vector<1x128x128xf32> to vector<128x128xf32>
    %cst_342 = arith.constant dense<0.000000e+00> : vector<8x128xf32>
    %631 = tpu.matmul %603, %630, %cst_342 {dimension_numbers = #tpu.dot_dimension_numbers<[1], [0], [0], [1], [0, 0, 1, 1], [], []>} : vector<8x128xf32>, vector<128x128xf32>, vector<8x128xf32> -> vector<8x128xf32>
    %632 = math.tanh %578 : vector<8x128xf32>
    %633 = arith.mulf %632, %632 : vector<8x128xf32>
    %cst_343 = arith.constant 1.000000e+00 : f32
    %634 = vector.broadcast %cst_343 : f32 to vector<8x128xf32>
    %635 = arith.subf %634, %633 : vector<8x128xf32>
    %636 = arith.mulf %631, %635 : vector<8x128xf32>
    %637 = arith.mulf %615, %636 : vector<8x128xf32>
    %638 = arith.addf %578, %637 : vector<8x128xf32>
    %cst_344 = arith.constant 0.000000e+00 : f32
    %639 = vector.broadcast %cst_344 : f32 to vector<8x1xf32>
    %640 = math.tanh %628 : vector<8x128xf32>
    %c1_345 = arith.constant 1 : index
    %c0_346 = arith.constant 0 : index
    %c0_347 = arith.constant 0 : index
    %641 = vector.load %arg3[%c1_345, %c0_346, %c0_347] : memref<3x128x128xf32, #tpu.memory_space<vmem>>, vector<1x128x128xf32>
    %642 = vector.shape_cast %641 : vector<1x128x128xf32> to vector<128x128xf32>
    %cst_348 = arith.constant dense<0.000000e+00> : vector<8x128xf32>
    %643 = tpu.matmul %640, %642, %cst_348 {dimension_numbers = #tpu.dot_dimension_numbers<[1], [0], [0], [1], [0, 0, 1, 1], [], []>} : vector<8x128xf32>, vector<128x128xf32>, vector<8x128xf32> -> vector<8x128xf32>
    %c1_349 = arith.constant 1 : index
    %c0_350 = arith.constant 0 : index
    %c0_351 = arith.constant 0 : index
    %644 = vector.load %arg4[%c1_349, %c0_350, %c0_351] : memref<3x1x128xf32, #tpu.memory_space<vmem>>, vector<1x1x128xf32>
    %645 = vector.shape_cast %644 : vector<1x1x128xf32> to vector<1x128xf32>
    %646 = vector.broadcast %645 : vector<1x128xf32> to vector<8x128xf32>
    %647 = arith.addf %643, %646 : vector<8x128xf32>
    %648 = arith.subf %2, %647 : vector<8x128xf32>
    %649 = arith.mulf %648, %648 : vector<8x128xf32>
    %cst_352 = arith.constant dense<0.000000e+00> : vector<8xf32>
    %650 = vector.multi_reduction <add>, %649, %cst_352 [1] : vector<8x128xf32> to vector<8xf32>
    %651 = vector.shape_cast %650 : vector<8xf32> to vector<8x1xf32>
    %cst_353 = arith.constant 5.000000e-01 : f32
    %652 = vector.broadcast %cst_353 : f32 to vector<8x1xf32>
    %653 = arith.mulf %652, %651 : vector<8x1xf32>
    %654 = arith.addf %639, %653 : vector<8x1xf32>
    %655 = math.tanh %638 : vector<8x128xf32>
    %c2_354 = arith.constant 2 : index
    %c0_355 = arith.constant 0 : index
    %c0_356 = arith.constant 0 : index
    %656 = vector.load %arg3[%c2_354, %c0_355, %c0_356] : memref<3x128x128xf32, #tpu.memory_space<vmem>>, vector<1x128x128xf32>
    %657 = vector.shape_cast %656 : vector<1x128x128xf32> to vector<128x128xf32>
    %cst_357 = arith.constant dense<0.000000e+00> : vector<8x128xf32>
    %658 = tpu.matmul %655, %657, %cst_357 {dimension_numbers = #tpu.dot_dimension_numbers<[1], [0], [0], [1], [0, 0, 1, 1], [], []>} : vector<8x128xf32>, vector<128x128xf32>, vector<8x128xf32> -> vector<8x128xf32>
    %c2_358 = arith.constant 2 : index
    %c0_359 = arith.constant 0 : index
    %c0_360 = arith.constant 0 : index
    %659 = vector.load %arg4[%c2_358, %c0_359, %c0_360] : memref<3x1x128xf32, #tpu.memory_space<vmem>>, vector<1x1x128xf32>
    %660 = vector.shape_cast %659 : vector<1x1x128xf32> to vector<1x128xf32>
    %661 = vector.broadcast %660 : vector<1x128xf32> to vector<8x128xf32>
    %662 = arith.addf %658, %661 : vector<8x128xf32>
    %663 = arith.subf %628, %662 : vector<8x128xf32>
    %664 = arith.mulf %663, %663 : vector<8x128xf32>
    %cst_361 = arith.constant dense<0.000000e+00> : vector<8xf32>
    %665 = vector.multi_reduction <add>, %664, %cst_361 [1] : vector<8x128xf32> to vector<8xf32>
    %666 = vector.shape_cast %665 : vector<8xf32> to vector<8x1xf32>
    %cst_362 = arith.constant 5.000000e-01 : f32
    %667 = vector.broadcast %cst_362 : f32 to vector<8x1xf32>
    %668 = arith.mulf %667, %666 : vector<8x1xf32>
    %669 = arith.addf %654, %668 : vector<8x1xf32>
    %670 = arith.cmpf olt, %669, %609 : vector<8x1xf32>
    %cst_363 = arith.constant 1.000000e+00 : f32
    %cst_364 = arith.constant 0.899999976 : f32
    %671 = vector.broadcast %cst_363 : f32 to vector<8x1xf32>
    %672 = vector.broadcast %cst_364 : f32 to vector<8x1xf32>
    %673 = arith.select %670, %671, %672 : vector<8x1xi1>, vector<8x1xf32>
    %674 = vector.broadcast %673 : vector<8x1xf32> to vector<8x128xf32>
    %675 = arith.mulf %615, %674 : vector<8x128xf32>
    %cst_365 = arith.constant 0.000000e+00 : f32
    %676 = vector.broadcast %cst_365 : f32 to vector<8x128xf32>
    %677 = arith.subf %676, %663 : vector<8x128xf32>
    %c1_366 = arith.constant 1 : index
    %c0_367 = arith.constant 0 : index
    %c0_368 = arith.constant 0 : index
    %678 = vector.load %arg2[%c1_366, %c0_367, %c0_368] : memref<3x128x128xf32, #tpu.memory_space<vmem>>, vector<1x128x128xf32>
    %679 = vector.shape_cast %678 : vector<1x128x128xf32> to vector<128x128xf32>
    %cst_369 = arith.constant dense<0.000000e+00> : vector<8x128xf32>
    %680 = tpu.matmul %648, %679, %cst_369 {dimension_numbers = #tpu.dot_dimension_numbers<[1], [0], [0], [1], [0, 0, 1, 1], [], []>} : vector<8x128xf32>, vector<128x128xf32>, vector<8x128xf32> -> vector<8x128xf32>
    %681 = math.tanh %628 : vector<8x128xf32>
    %682 = arith.mulf %681, %681 : vector<8x128xf32>
    %cst_370 = arith.constant 1.000000e+00 : f32
    %683 = vector.broadcast %cst_370 : f32 to vector<8x128xf32>
    %684 = arith.subf %683, %682 : vector<8x128xf32>
    %685 = arith.mulf %680, %684 : vector<8x128xf32>
    %686 = arith.addf %677, %685 : vector<8x128xf32>
    %687 = arith.mulf %675, %686 : vector<8x128xf32>
    %688 = arith.addf %628, %687 : vector<8x128xf32>
    %c2_371 = arith.constant 2 : index
    %c0_372 = arith.constant 0 : index
    %c0_373 = arith.constant 0 : index
    %689 = vector.load %arg2[%c2_371, %c0_372, %c0_373] : memref<3x128x128xf32, #tpu.memory_space<vmem>>, vector<1x128x128xf32>
    %690 = vector.shape_cast %689 : vector<1x128x128xf32> to vector<128x128xf32>
    %cst_374 = arith.constant dense<0.000000e+00> : vector<8x128xf32>
    %691 = tpu.matmul %663, %690, %cst_374 {dimension_numbers = #tpu.dot_dimension_numbers<[1], [0], [0], [1], [0, 0, 1, 1], [], []>} : vector<8x128xf32>, vector<128x128xf32>, vector<8x128xf32> -> vector<8x128xf32>
    %692 = math.tanh %638 : vector<8x128xf32>
    %693 = arith.mulf %692, %692 : vector<8x128xf32>
    %cst_375 = arith.constant 1.000000e+00 : f32
    %694 = vector.broadcast %cst_375 : f32 to vector<8x128xf32>
    %695 = arith.subf %694, %693 : vector<8x128xf32>
    %696 = arith.mulf %691, %695 : vector<8x128xf32>
    %697 = arith.mulf %675, %696 : vector<8x128xf32>
    %698 = arith.addf %638, %697 : vector<8x128xf32>
    %cst_376 = arith.constant 0.000000e+00 : f32
    %699 = vector.broadcast %cst_376 : f32 to vector<8x1xf32>
    %700 = math.tanh %688 : vector<8x128xf32>
    %c1_377 = arith.constant 1 : index
    %c0_378 = arith.constant 0 : index
    %c0_379 = arith.constant 0 : index
    %701 = vector.load %arg3[%c1_377, %c0_378, %c0_379] : memref<3x128x128xf32, #tpu.memory_space<vmem>>, vector<1x128x128xf32>
    %702 = vector.shape_cast %701 : vector<1x128x128xf32> to vector<128x128xf32>
    %cst_380 = arith.constant dense<0.000000e+00> : vector<8x128xf32>
    %703 = tpu.matmul %700, %702, %cst_380 {dimension_numbers = #tpu.dot_dimension_numbers<[1], [0], [0], [1], [0, 0, 1, 1], [], []>} : vector<8x128xf32>, vector<128x128xf32>, vector<8x128xf32> -> vector<8x128xf32>
    %c1_381 = arith.constant 1 : index
    %c0_382 = arith.constant 0 : index
    %c0_383 = arith.constant 0 : index
    %704 = vector.load %arg4[%c1_381, %c0_382, %c0_383] : memref<3x1x128xf32, #tpu.memory_space<vmem>>, vector<1x1x128xf32>
    %705 = vector.shape_cast %704 : vector<1x1x128xf32> to vector<1x128xf32>
    %706 = vector.broadcast %705 : vector<1x128xf32> to vector<8x128xf32>
    %707 = arith.addf %703, %706 : vector<8x128xf32>
    %708 = arith.subf %2, %707 : vector<8x128xf32>
    %709 = arith.mulf %708, %708 : vector<8x128xf32>
    %cst_384 = arith.constant dense<0.000000e+00> : vector<8xf32>
    %710 = vector.multi_reduction <add>, %709, %cst_384 [1] : vector<8x128xf32> to vector<8xf32>
    %711 = vector.shape_cast %710 : vector<8xf32> to vector<8x1xf32>
    %cst_385 = arith.constant 5.000000e-01 : f32
    %712 = vector.broadcast %cst_385 : f32 to vector<8x1xf32>
    %713 = arith.mulf %712, %711 : vector<8x1xf32>
    %714 = arith.addf %699, %713 : vector<8x1xf32>
    %715 = math.tanh %698 : vector<8x128xf32>
    %c2_386 = arith.constant 2 : index
    %c0_387 = arith.constant 0 : index
    %c0_388 = arith.constant 0 : index
    %716 = vector.load %arg3[%c2_386, %c0_387, %c0_388] : memref<3x128x128xf32, #tpu.memory_space<vmem>>, vector<1x128x128xf32>
    %717 = vector.shape_cast %716 : vector<1x128x128xf32> to vector<128x128xf32>
    %cst_389 = arith.constant dense<0.000000e+00> : vector<8x128xf32>
    %718 = tpu.matmul %715, %717, %cst_389 {dimension_numbers = #tpu.dot_dimension_numbers<[1], [0], [0], [1], [0, 0, 1, 1], [], []>} : vector<8x128xf32>, vector<128x128xf32>, vector<8x128xf32> -> vector<8x128xf32>
    %c2_390 = arith.constant 2 : index
    %c0_391 = arith.constant 0 : index
    %c0_392 = arith.constant 0 : index
    %719 = vector.load %arg4[%c2_390, %c0_391, %c0_392] : memref<3x1x128xf32, #tpu.memory_space<vmem>>, vector<1x1x128xf32>
    %720 = vector.shape_cast %719 : vector<1x1x128xf32> to vector<1x128xf32>
    %721 = vector.broadcast %720 : vector<1x128xf32> to vector<8x128xf32>
    %722 = arith.addf %718, %721 : vector<8x128xf32>
    %723 = arith.subf %688, %722 : vector<8x128xf32>
    %724 = arith.mulf %723, %723 : vector<8x128xf32>
    %cst_393 = arith.constant dense<0.000000e+00> : vector<8xf32>
    %725 = vector.multi_reduction <add>, %724, %cst_393 [1] : vector<8x128xf32> to vector<8xf32>
    %726 = vector.shape_cast %725 : vector<8xf32> to vector<8x1xf32>
    %cst_394 = arith.constant 5.000000e-01 : f32
    %727 = vector.broadcast %cst_394 : f32 to vector<8x1xf32>
    %728 = arith.mulf %727, %726 : vector<8x1xf32>
    %729 = arith.addf %714, %728 : vector<8x1xf32>
    %730 = arith.cmpf olt, %729, %669 : vector<8x1xf32>
    %cst_395 = arith.constant 1.000000e+00 : f32
    %cst_396 = arith.constant 0.899999976 : f32
    %731 = vector.broadcast %cst_395 : f32 to vector<8x1xf32>
    %732 = vector.broadcast %cst_396 : f32 to vector<8x1xf32>
    %733 = arith.select %730, %731, %732 : vector<8x1xi1>, vector<8x1xf32>
    %734 = vector.broadcast %733 : vector<8x1xf32> to vector<8x128xf32>
    %735 = arith.mulf %675, %734 : vector<8x128xf32>
    %cst_397 = arith.constant 0.000000e+00 : f32
    %736 = vector.broadcast %cst_397 : f32 to vector<8x128xf32>
    %737 = arith.subf %736, %723 : vector<8x128xf32>
    %c1_398 = arith.constant 1 : index
    %c0_399 = arith.constant 0 : index
    %c0_400 = arith.constant 0 : index
    %738 = vector.load %arg2[%c1_398, %c0_399, %c0_400] : memref<3x128x128xf32, #tpu.memory_space<vmem>>, vector<1x128x128xf32>
    %739 = vector.shape_cast %738 : vector<1x128x128xf32> to vector<128x128xf32>
    %cst_401 = arith.constant dense<0.000000e+00> : vector<8x128xf32>
    %740 = tpu.matmul %708, %739, %cst_401 {dimension_numbers = #tpu.dot_dimension_numbers<[1], [0], [0], [1], [0, 0, 1, 1], [], []>} : vector<8x128xf32>, vector<128x128xf32>, vector<8x128xf32> -> vector<8x128xf32>
    %741 = math.tanh %688 : vector<8x128xf32>
    %742 = arith.mulf %741, %741 : vector<8x128xf32>
    %cst_402 = arith.constant 1.000000e+00 : f32
    %743 = vector.broadcast %cst_402 : f32 to vector<8x128xf32>
    %744 = arith.subf %743, %742 : vector<8x128xf32>
    %745 = arith.mulf %740, %744 : vector<8x128xf32>
    %746 = arith.addf %737, %745 : vector<8x128xf32>
    %747 = arith.mulf %735, %746 : vector<8x128xf32>
    %748 = arith.addf %688, %747 : vector<8x128xf32>
    %c2_403 = arith.constant 2 : index
    %c0_404 = arith.constant 0 : index
    %c0_405 = arith.constant 0 : index
    %749 = vector.load %arg2[%c2_403, %c0_404, %c0_405] : memref<3x128x128xf32, #tpu.memory_space<vmem>>, vector<1x128x128xf32>
    %750 = vector.shape_cast %749 : vector<1x128x128xf32> to vector<128x128xf32>
    %cst_406 = arith.constant dense<0.000000e+00> : vector<8x128xf32>
    %751 = tpu.matmul %723, %750, %cst_406 {dimension_numbers = #tpu.dot_dimension_numbers<[1], [0], [0], [1], [0, 0, 1, 1], [], []>} : vector<8x128xf32>, vector<128x128xf32>, vector<8x128xf32> -> vector<8x128xf32>
    %752 = math.tanh %698 : vector<8x128xf32>
    %753 = arith.mulf %752, %752 : vector<8x128xf32>
    %cst_407 = arith.constant 1.000000e+00 : f32
    %754 = vector.broadcast %cst_407 : f32 to vector<8x128xf32>
    %755 = arith.subf %754, %753 : vector<8x128xf32>
    %756 = arith.mulf %751, %755 : vector<8x128xf32>
    %757 = arith.mulf %735, %756 : vector<8x128xf32>
    %758 = arith.addf %698, %757 : vector<8x128xf32>
    %cst_408 = arith.constant 0.000000e+00 : f32
    %759 = vector.broadcast %cst_408 : f32 to vector<8x1xf32>
    %760 = math.tanh %748 : vector<8x128xf32>
    %c1_409 = arith.constant 1 : index
    %c0_410 = arith.constant 0 : index
    %c0_411 = arith.constant 0 : index
    %761 = vector.load %arg3[%c1_409, %c0_410, %c0_411] : memref<3x128x128xf32, #tpu.memory_space<vmem>>, vector<1x128x128xf32>
    %762 = vector.shape_cast %761 : vector<1x128x128xf32> to vector<128x128xf32>
    %cst_412 = arith.constant dense<0.000000e+00> : vector<8x128xf32>
    %763 = tpu.matmul %760, %762, %cst_412 {dimension_numbers = #tpu.dot_dimension_numbers<[1], [0], [0], [1], [0, 0, 1, 1], [], []>} : vector<8x128xf32>, vector<128x128xf32>, vector<8x128xf32> -> vector<8x128xf32>
    %c1_413 = arith.constant 1 : index
    %c0_414 = arith.constant 0 : index
    %c0_415 = arith.constant 0 : index
    %764 = vector.load %arg4[%c1_413, %c0_414, %c0_415] : memref<3x1x128xf32, #tpu.memory_space<vmem>>, vector<1x1x128xf32>
    %765 = vector.shape_cast %764 : vector<1x1x128xf32> to vector<1x128xf32>
    %766 = vector.broadcast %765 : vector<1x128xf32> to vector<8x128xf32>
    %767 = arith.addf %763, %766 : vector<8x128xf32>
    %768 = arith.subf %2, %767 : vector<8x128xf32>
    %769 = arith.mulf %768, %768 : vector<8x128xf32>
    %cst_416 = arith.constant dense<0.000000e+00> : vector<8xf32>
    %770 = vector.multi_reduction <add>, %769, %cst_416 [1] : vector<8x128xf32> to vector<8xf32>
    %771 = vector.shape_cast %770 : vector<8xf32> to vector<8x1xf32>
    %cst_417 = arith.constant 5.000000e-01 : f32
    %772 = vector.broadcast %cst_417 : f32 to vector<8x1xf32>
    %773 = arith.mulf %772, %771 : vector<8x1xf32>
    %774 = arith.addf %759, %773 : vector<8x1xf32>
    %775 = math.tanh %758 : vector<8x128xf32>
    %c2_418 = arith.constant 2 : index
    %c0_419 = arith.constant 0 : index
    %c0_420 = arith.constant 0 : index
    %776 = vector.load %arg3[%c2_418, %c0_419, %c0_420] : memref<3x128x128xf32, #tpu.memory_space<vmem>>, vector<1x128x128xf32>
    %777 = vector.shape_cast %776 : vector<1x128x128xf32> to vector<128x128xf32>
    %cst_421 = arith.constant dense<0.000000e+00> : vector<8x128xf32>
    %778 = tpu.matmul %775, %777, %cst_421 {dimension_numbers = #tpu.dot_dimension_numbers<[1], [0], [0], [1], [0, 0, 1, 1], [], []>} : vector<8x128xf32>, vector<128x128xf32>, vector<8x128xf32> -> vector<8x128xf32>
    %c2_422 = arith.constant 2 : index
    %c0_423 = arith.constant 0 : index
    %c0_424 = arith.constant 0 : index
    %779 = vector.load %arg4[%c2_422, %c0_423, %c0_424] : memref<3x1x128xf32, #tpu.memory_space<vmem>>, vector<1x1x128xf32>
    %780 = vector.shape_cast %779 : vector<1x1x128xf32> to vector<1x128xf32>
    %781 = vector.broadcast %780 : vector<1x128xf32> to vector<8x128xf32>
    %782 = arith.addf %778, %781 : vector<8x128xf32>
    %783 = arith.subf %748, %782 : vector<8x128xf32>
    %784 = arith.mulf %783, %783 : vector<8x128xf32>
    %cst_425 = arith.constant dense<0.000000e+00> : vector<8xf32>
    %785 = vector.multi_reduction <add>, %784, %cst_425 [1] : vector<8x128xf32> to vector<8xf32>
    %786 = vector.shape_cast %785 : vector<8xf32> to vector<8x1xf32>
    %cst_426 = arith.constant 5.000000e-01 : f32
    %787 = vector.broadcast %cst_426 : f32 to vector<8x1xf32>
    %788 = arith.mulf %787, %786 : vector<8x1xf32>
    %789 = arith.addf %774, %788 : vector<8x1xf32>
    %790 = arith.cmpf olt, %789, %729 : vector<8x1xf32>
    %cst_427 = arith.constant 1.000000e+00 : f32
    %cst_428 = arith.constant 0.899999976 : f32
    %791 = vector.broadcast %cst_427 : f32 to vector<8x1xf32>
    %792 = vector.broadcast %cst_428 : f32 to vector<8x1xf32>
    %793 = arith.select %790, %791, %792 : vector<8x1xi1>, vector<8x1xf32>
    %794 = vector.broadcast %793 : vector<8x1xf32> to vector<8x128xf32>
    %795 = arith.mulf %735, %794 : vector<8x128xf32>
    %cst_429 = arith.constant 0.000000e+00 : f32
    %796 = vector.broadcast %cst_429 : f32 to vector<8x128xf32>
    %797 = arith.subf %796, %783 : vector<8x128xf32>
    %c1_430 = arith.constant 1 : index
    %c0_431 = arith.constant 0 : index
    %c0_432 = arith.constant 0 : index
    %798 = vector.load %arg2[%c1_430, %c0_431, %c0_432] : memref<3x128x128xf32, #tpu.memory_space<vmem>>, vector<1x128x128xf32>
    %799 = vector.shape_cast %798 : vector<1x128x128xf32> to vector<128x128xf32>
    %cst_433 = arith.constant dense<0.000000e+00> : vector<8x128xf32>
    %800 = tpu.matmul %768, %799, %cst_433 {dimension_numbers = #tpu.dot_dimension_numbers<[1], [0], [0], [1], [0, 0, 1, 1], [], []>} : vector<8x128xf32>, vector<128x128xf32>, vector<8x128xf32> -> vector<8x128xf32>
    %801 = math.tanh %748 : vector<8x128xf32>
    %802 = arith.mulf %801, %801 : vector<8x128xf32>
    %cst_434 = arith.constant 1.000000e+00 : f32
    %803 = vector.broadcast %cst_434 : f32 to vector<8x128xf32>
    %804 = arith.subf %803, %802 : vector<8x128xf32>
    %805 = arith.mulf %800, %804 : vector<8x128xf32>
    %806 = arith.addf %797, %805 : vector<8x128xf32>
    %807 = arith.mulf %795, %806 : vector<8x128xf32>
    %808 = arith.addf %748, %807 : vector<8x128xf32>
    %c2_435 = arith.constant 2 : index
    %c0_436 = arith.constant 0 : index
    %c0_437 = arith.constant 0 : index
    %809 = vector.load %arg2[%c2_435, %c0_436, %c0_437] : memref<3x128x128xf32, #tpu.memory_space<vmem>>, vector<1x128x128xf32>
    %810 = vector.shape_cast %809 : vector<1x128x128xf32> to vector<128x128xf32>
    %cst_438 = arith.constant dense<0.000000e+00> : vector<8x128xf32>
    %811 = tpu.matmul %783, %810, %cst_438 {dimension_numbers = #tpu.dot_dimension_numbers<[1], [0], [0], [1], [0, 0, 1, 1], [], []>} : vector<8x128xf32>, vector<128x128xf32>, vector<8x128xf32> -> vector<8x128xf32>
    %812 = math.tanh %758 : vector<8x128xf32>
    %813 = arith.mulf %812, %812 : vector<8x128xf32>
    %cst_439 = arith.constant 1.000000e+00 : f32
    %814 = vector.broadcast %cst_439 : f32 to vector<8x128xf32>
    %815 = arith.subf %814, %813 : vector<8x128xf32>
    %816 = arith.mulf %811, %815 : vector<8x128xf32>
    %817 = arith.mulf %795, %816 : vector<8x128xf32>
    %818 = arith.addf %758, %817 : vector<8x128xf32>
    %cst_440 = arith.constant 0.000000e+00 : f32
    %819 = vector.broadcast %cst_440 : f32 to vector<8x1xf32>
    %820 = math.tanh %808 : vector<8x128xf32>
    %c1_441 = arith.constant 1 : index
    %c0_442 = arith.constant 0 : index
    %c0_443 = arith.constant 0 : index
    %821 = vector.load %arg3[%c1_441, %c0_442, %c0_443] : memref<3x128x128xf32, #tpu.memory_space<vmem>>, vector<1x128x128xf32>
    %822 = vector.shape_cast %821 : vector<1x128x128xf32> to vector<128x128xf32>
    %cst_444 = arith.constant dense<0.000000e+00> : vector<8x128xf32>
    %823 = tpu.matmul %820, %822, %cst_444 {dimension_numbers = #tpu.dot_dimension_numbers<[1], [0], [0], [1], [0, 0, 1, 1], [], []>} : vector<8x128xf32>, vector<128x128xf32>, vector<8x128xf32> -> vector<8x128xf32>
    %c1_445 = arith.constant 1 : index
    %c0_446 = arith.constant 0 : index
    %c0_447 = arith.constant 0 : index
    %824 = vector.load %arg4[%c1_445, %c0_446, %c0_447] : memref<3x1x128xf32, #tpu.memory_space<vmem>>, vector<1x1x128xf32>
    %825 = vector.shape_cast %824 : vector<1x1x128xf32> to vector<1x128xf32>
    %826 = vector.broadcast %825 : vector<1x128xf32> to vector<8x128xf32>
    %827 = arith.addf %823, %826 : vector<8x128xf32>
    %828 = arith.subf %2, %827 : vector<8x128xf32>
    %829 = arith.mulf %828, %828 : vector<8x128xf32>
    %cst_448 = arith.constant dense<0.000000e+00> : vector<8xf32>
    %830 = vector.multi_reduction <add>, %829, %cst_448 [1] : vector<8x128xf32> to vector<8xf32>
    %831 = vector.shape_cast %830 : vector<8xf32> to vector<8x1xf32>
    %cst_449 = arith.constant 5.000000e-01 : f32
    %832 = vector.broadcast %cst_449 : f32 to vector<8x1xf32>
    %833 = arith.mulf %832, %831 : vector<8x1xf32>
    %834 = arith.addf %819, %833 : vector<8x1xf32>
    %835 = math.tanh %818 : vector<8x128xf32>
    %c2_450 = arith.constant 2 : index
    %c0_451 = arith.constant 0 : index
    %c0_452 = arith.constant 0 : index
    %836 = vector.load %arg3[%c2_450, %c0_451, %c0_452] : memref<3x128x128xf32, #tpu.memory_space<vmem>>, vector<1x128x128xf32>
    %837 = vector.shape_cast %836 : vector<1x128x128xf32> to vector<128x128xf32>
    %cst_453 = arith.constant dense<0.000000e+00> : vector<8x128xf32>
    %838 = tpu.matmul %835, %837, %cst_453 {dimension_numbers = #tpu.dot_dimension_numbers<[1], [0], [0], [1], [0, 0, 1, 1], [], []>} : vector<8x128xf32>, vector<128x128xf32>, vector<8x128xf32> -> vector<8x128xf32>
    %c2_454 = arith.constant 2 : index
    %c0_455 = arith.constant 0 : index
    %c0_456 = arith.constant 0 : index
    %839 = vector.load %arg4[%c2_454, %c0_455, %c0_456] : memref<3x1x128xf32, #tpu.memory_space<vmem>>, vector<1x1x128xf32>
    %840 = vector.shape_cast %839 : vector<1x1x128xf32> to vector<1x128xf32>
    %841 = vector.broadcast %840 : vector<1x128xf32> to vector<8x128xf32>
    %842 = arith.addf %838, %841 : vector<8x128xf32>
    %843 = arith.subf %808, %842 : vector<8x128xf32>
    %844 = arith.mulf %843, %843 : vector<8x128xf32>
    %cst_457 = arith.constant dense<0.000000e+00> : vector<8xf32>
    %845 = vector.multi_reduction <add>, %844, %cst_457 [1] : vector<8x128xf32> to vector<8xf32>
    %846 = vector.shape_cast %845 : vector<8xf32> to vector<8x1xf32>
    %cst_458 = arith.constant 5.000000e-01 : f32
    %847 = vector.broadcast %cst_458 : f32 to vector<8x1xf32>
    %848 = arith.mulf %847, %846 : vector<8x1xf32>
    %849 = arith.addf %834, %848 : vector<8x1xf32>
    %850 = arith.cmpf olt, %849, %789 : vector<8x1xf32>
    %cst_459 = arith.constant 1.000000e+00 : f32
    %cst_460 = arith.constant 0.899999976 : f32
    %851 = vector.broadcast %cst_459 : f32 to vector<8x1xf32>
    %852 = vector.broadcast %cst_460 : f32 to vector<8x1xf32>
    %853 = arith.select %850, %851, %852 : vector<8x1xi1>, vector<8x1xf32>
    %854 = vector.broadcast %853 : vector<8x1xf32> to vector<8x128xf32>
    %855 = arith.mulf %795, %854 : vector<8x128xf32>
    %cst_461 = arith.constant 0.000000e+00 : f32
    %856 = vector.broadcast %cst_461 : f32 to vector<8x128xf32>
    %857 = arith.subf %856, %843 : vector<8x128xf32>
    %c1_462 = arith.constant 1 : index
    %c0_463 = arith.constant 0 : index
    %c0_464 = arith.constant 0 : index
    %858 = vector.load %arg2[%c1_462, %c0_463, %c0_464] : memref<3x128x128xf32, #tpu.memory_space<vmem>>, vector<1x128x128xf32>
    %859 = vector.shape_cast %858 : vector<1x128x128xf32> to vector<128x128xf32>
    %cst_465 = arith.constant dense<0.000000e+00> : vector<8x128xf32>
    %860 = tpu.matmul %828, %859, %cst_465 {dimension_numbers = #tpu.dot_dimension_numbers<[1], [0], [0], [1], [0, 0, 1, 1], [], []>} : vector<8x128xf32>, vector<128x128xf32>, vector<8x128xf32> -> vector<8x128xf32>
    %861 = math.tanh %808 : vector<8x128xf32>
    %862 = arith.mulf %861, %861 : vector<8x128xf32>
    %cst_466 = arith.constant 1.000000e+00 : f32
    %863 = vector.broadcast %cst_466 : f32 to vector<8x128xf32>
    %864 = arith.subf %863, %862 : vector<8x128xf32>
    %865 = arith.mulf %860, %864 : vector<8x128xf32>
    %866 = arith.addf %857, %865 : vector<8x128xf32>
    %867 = arith.mulf %855, %866 : vector<8x128xf32>
    %868 = arith.addf %808, %867 : vector<8x128xf32>
    %c2_467 = arith.constant 2 : index
    %c0_468 = arith.constant 0 : index
    %c0_469 = arith.constant 0 : index
    %869 = vector.load %arg2[%c2_467, %c0_468, %c0_469] : memref<3x128x128xf32, #tpu.memory_space<vmem>>, vector<1x128x128xf32>
    %870 = vector.shape_cast %869 : vector<1x128x128xf32> to vector<128x128xf32>
    %cst_470 = arith.constant dense<0.000000e+00> : vector<8x128xf32>
    %871 = tpu.matmul %843, %870, %cst_470 {dimension_numbers = #tpu.dot_dimension_numbers<[1], [0], [0], [1], [0, 0, 1, 1], [], []>} : vector<8x128xf32>, vector<128x128xf32>, vector<8x128xf32> -> vector<8x128xf32>
    %872 = math.tanh %818 : vector<8x128xf32>
    %873 = arith.mulf %872, %872 : vector<8x128xf32>
    %cst_471 = arith.constant 1.000000e+00 : f32
    %874 = vector.broadcast %cst_471 : f32 to vector<8x128xf32>
    %875 = arith.subf %874, %873 : vector<8x128xf32>
    %876 = arith.mulf %871, %875 : vector<8x128xf32>
    %877 = arith.mulf %855, %876 : vector<8x128xf32>
    %878 = arith.addf %818, %877 : vector<8x128xf32>
    %cst_472 = arith.constant 0.000000e+00 : f32
    %879 = vector.broadcast %cst_472 : f32 to vector<8x1xf32>
    %880 = math.tanh %868 : vector<8x128xf32>
    %c1_473 = arith.constant 1 : index
    %c0_474 = arith.constant 0 : index
    %c0_475 = arith.constant 0 : index
    %881 = vector.load %arg3[%c1_473, %c0_474, %c0_475] : memref<3x128x128xf32, #tpu.memory_space<vmem>>, vector<1x128x128xf32>
    %882 = vector.shape_cast %881 : vector<1x128x128xf32> to vector<128x128xf32>
    %cst_476 = arith.constant dense<0.000000e+00> : vector<8x128xf32>
    %883 = tpu.matmul %880, %882, %cst_476 {dimension_numbers = #tpu.dot_dimension_numbers<[1], [0], [0], [1], [0, 0, 1, 1], [], []>} : vector<8x128xf32>, vector<128x128xf32>, vector<8x128xf32> -> vector<8x128xf32>
    %c1_477 = arith.constant 1 : index
    %c0_478 = arith.constant 0 : index
    %c0_479 = arith.constant 0 : index
    %884 = vector.load %arg4[%c1_477, %c0_478, %c0_479] : memref<3x1x128xf32, #tpu.memory_space<vmem>>, vector<1x1x128xf32>
    %885 = vector.shape_cast %884 : vector<1x1x128xf32> to vector<1x128xf32>
    %886 = vector.broadcast %885 : vector<1x128xf32> to vector<8x128xf32>
    %887 = arith.addf %883, %886 : vector<8x128xf32>
    %888 = arith.subf %2, %887 : vector<8x128xf32>
    %889 = arith.mulf %888, %888 : vector<8x128xf32>
    %cst_480 = arith.constant dense<0.000000e+00> : vector<8xf32>
    %890 = vector.multi_reduction <add>, %889, %cst_480 [1] : vector<8x128xf32> to vector<8xf32>
    %891 = vector.shape_cast %890 : vector<8xf32> to vector<8x1xf32>
    %cst_481 = arith.constant 5.000000e-01 : f32
    %892 = vector.broadcast %cst_481 : f32 to vector<8x1xf32>
    %893 = arith.mulf %892, %891 : vector<8x1xf32>
    %894 = arith.addf %879, %893 : vector<8x1xf32>
    %895 = math.tanh %878 : vector<8x128xf32>
    %c2_482 = arith.constant 2 : index
    %c0_483 = arith.constant 0 : index
    %c0_484 = arith.constant 0 : index
    %896 = vector.load %arg3[%c2_482, %c0_483, %c0_484] : memref<3x128x128xf32, #tpu.memory_space<vmem>>, vector<1x128x128xf32>
    %897 = vector.shape_cast %896 : vector<1x128x128xf32> to vector<128x128xf32>
    %cst_485 = arith.constant dense<0.000000e+00> : vector<8x128xf32>
    %898 = tpu.matmul %895, %897, %cst_485 {dimension_numbers = #tpu.dot_dimension_numbers<[1], [0], [0], [1], [0, 0, 1, 1], [], []>} : vector<8x128xf32>, vector<128x128xf32>, vector<8x128xf32> -> vector<8x128xf32>
    %c2_486 = arith.constant 2 : index
    %c0_487 = arith.constant 0 : index
    %c0_488 = arith.constant 0 : index
    %899 = vector.load %arg4[%c2_486, %c0_487, %c0_488] : memref<3x1x128xf32, #tpu.memory_space<vmem>>, vector<1x1x128xf32>
    %900 = vector.shape_cast %899 : vector<1x1x128xf32> to vector<1x128xf32>
    %901 = vector.broadcast %900 : vector<1x128xf32> to vector<8x128xf32>
    %902 = arith.addf %898, %901 : vector<8x128xf32>
    %903 = arith.subf %868, %902 : vector<8x128xf32>
    %904 = arith.mulf %903, %903 : vector<8x128xf32>
    %cst_489 = arith.constant dense<0.000000e+00> : vector<8xf32>
    %905 = vector.multi_reduction <add>, %904, %cst_489 [1] : vector<8x128xf32> to vector<8xf32>
    %906 = vector.shape_cast %905 : vector<8xf32> to vector<8x1xf32>
    %cst_490 = arith.constant 5.000000e-01 : f32
    %907 = vector.broadcast %cst_490 : f32 to vector<8x1xf32>
    %908 = arith.mulf %907, %906 : vector<8x1xf32>
    %909 = arith.addf %894, %908 : vector<8x1xf32>
    %910 = arith.cmpf olt, %909, %849 : vector<8x1xf32>
    %cst_491 = arith.constant 1.000000e+00 : f32
    %cst_492 = arith.constant 0.899999976 : f32
    %911 = vector.broadcast %cst_491 : f32 to vector<8x1xf32>
    %912 = vector.broadcast %cst_492 : f32 to vector<8x1xf32>
    %913 = arith.select %910, %911, %912 : vector<8x1xi1>, vector<8x1xf32>
    %914 = vector.broadcast %913 : vector<8x1xf32> to vector<8x128xf32>
    %915 = arith.mulf %855, %914 : vector<8x128xf32>
    %cst_493 = arith.constant 0.000000e+00 : f32
    %916 = vector.broadcast %cst_493 : f32 to vector<8x128xf32>
    %917 = arith.subf %916, %903 : vector<8x128xf32>
    %c1_494 = arith.constant 1 : index
    %c0_495 = arith.constant 0 : index
    %c0_496 = arith.constant 0 : index
    %918 = vector.load %arg2[%c1_494, %c0_495, %c0_496] : memref<3x128x128xf32, #tpu.memory_space<vmem>>, vector<1x128x128xf32>
    %919 = vector.shape_cast %918 : vector<1x128x128xf32> to vector<128x128xf32>
    %cst_497 = arith.constant dense<0.000000e+00> : vector<8x128xf32>
    %920 = tpu.matmul %888, %919, %cst_497 {dimension_numbers = #tpu.dot_dimension_numbers<[1], [0], [0], [1], [0, 0, 1, 1], [], []>} : vector<8x128xf32>, vector<128x128xf32>, vector<8x128xf32> -> vector<8x128xf32>
    %921 = math.tanh %868 : vector<8x128xf32>
    %922 = arith.mulf %921, %921 : vector<8x128xf32>
    %cst_498 = arith.constant 1.000000e+00 : f32
    %923 = vector.broadcast %cst_498 : f32 to vector<8x128xf32>
    %924 = arith.subf %923, %922 : vector<8x128xf32>
    %925 = arith.mulf %920, %924 : vector<8x128xf32>
    %926 = arith.addf %917, %925 : vector<8x128xf32>
    %927 = arith.mulf %915, %926 : vector<8x128xf32>
    %928 = arith.addf %868, %927 : vector<8x128xf32>
    %c2_499 = arith.constant 2 : index
    %c0_500 = arith.constant 0 : index
    %c0_501 = arith.constant 0 : index
    %929 = vector.load %arg2[%c2_499, %c0_500, %c0_501] : memref<3x128x128xf32, #tpu.memory_space<vmem>>, vector<1x128x128xf32>
    %930 = vector.shape_cast %929 : vector<1x128x128xf32> to vector<128x128xf32>
    %cst_502 = arith.constant dense<0.000000e+00> : vector<8x128xf32>
    %931 = tpu.matmul %903, %930, %cst_502 {dimension_numbers = #tpu.dot_dimension_numbers<[1], [0], [0], [1], [0, 0, 1, 1], [], []>} : vector<8x128xf32>, vector<128x128xf32>, vector<8x128xf32> -> vector<8x128xf32>
    %932 = math.tanh %878 : vector<8x128xf32>
    %933 = arith.mulf %932, %932 : vector<8x128xf32>
    %cst_503 = arith.constant 1.000000e+00 : f32
    %934 = vector.broadcast %cst_503 : f32 to vector<8x128xf32>
    %935 = arith.subf %934, %933 : vector<8x128xf32>
    %936 = arith.mulf %931, %935 : vector<8x128xf32>
    %937 = arith.mulf %915, %936 : vector<8x128xf32>
    %938 = arith.addf %878, %937 : vector<8x128xf32>
    %cst_504 = arith.constant 0.000000e+00 : f32
    %939 = vector.broadcast %cst_504 : f32 to vector<8x1xf32>
    %940 = math.tanh %928 : vector<8x128xf32>
    %c1_505 = arith.constant 1 : index
    %c0_506 = arith.constant 0 : index
    %c0_507 = arith.constant 0 : index
    %941 = vector.load %arg3[%c1_505, %c0_506, %c0_507] : memref<3x128x128xf32, #tpu.memory_space<vmem>>, vector<1x128x128xf32>
    %942 = vector.shape_cast %941 : vector<1x128x128xf32> to vector<128x128xf32>
    %cst_508 = arith.constant dense<0.000000e+00> : vector<8x128xf32>
    %943 = tpu.matmul %940, %942, %cst_508 {dimension_numbers = #tpu.dot_dimension_numbers<[1], [0], [0], [1], [0, 0, 1, 1], [], []>} : vector<8x128xf32>, vector<128x128xf32>, vector<8x128xf32> -> vector<8x128xf32>
    %c1_509 = arith.constant 1 : index
    %c0_510 = arith.constant 0 : index
    %c0_511 = arith.constant 0 : index
    %944 = vector.load %arg4[%c1_509, %c0_510, %c0_511] : memref<3x1x128xf32, #tpu.memory_space<vmem>>, vector<1x1x128xf32>
    %945 = vector.shape_cast %944 : vector<1x1x128xf32> to vector<1x128xf32>
    %946 = vector.broadcast %945 : vector<1x128xf32> to vector<8x128xf32>
    %947 = arith.addf %943, %946 : vector<8x128xf32>
    %948 = arith.subf %2, %947 : vector<8x128xf32>
    %949 = arith.mulf %948, %948 : vector<8x128xf32>
    %cst_512 = arith.constant dense<0.000000e+00> : vector<8xf32>
    %950 = vector.multi_reduction <add>, %949, %cst_512 [1] : vector<8x128xf32> to vector<8xf32>
    %951 = vector.shape_cast %950 : vector<8xf32> to vector<8x1xf32>
    %cst_513 = arith.constant 5.000000e-01 : f32
    %952 = vector.broadcast %cst_513 : f32 to vector<8x1xf32>
    %953 = arith.mulf %952, %951 : vector<8x1xf32>
    %954 = arith.addf %939, %953 : vector<8x1xf32>
    %955 = math.tanh %938 : vector<8x128xf32>
    %c2_514 = arith.constant 2 : index
    %c0_515 = arith.constant 0 : index
    %c0_516 = arith.constant 0 : index
    %956 = vector.load %arg3[%c2_514, %c0_515, %c0_516] : memref<3x128x128xf32, #tpu.memory_space<vmem>>, vector<1x128x128xf32>
    %957 = vector.shape_cast %956 : vector<1x128x128xf32> to vector<128x128xf32>
    %cst_517 = arith.constant dense<0.000000e+00> : vector<8x128xf32>
    %958 = tpu.matmul %955, %957, %cst_517 {dimension_numbers = #tpu.dot_dimension_numbers<[1], [0], [0], [1], [0, 0, 1, 1], [], []>} : vector<8x128xf32>, vector<128x128xf32>, vector<8x128xf32> -> vector<8x128xf32>
    %c2_518 = arith.constant 2 : index
    %c0_519 = arith.constant 0 : index
    %c0_520 = arith.constant 0 : index
    %959 = vector.load %arg4[%c2_518, %c0_519, %c0_520] : memref<3x1x128xf32, #tpu.memory_space<vmem>>, vector<1x1x128xf32>
    %960 = vector.shape_cast %959 : vector<1x1x128xf32> to vector<1x128xf32>
    %961 = vector.broadcast %960 : vector<1x128xf32> to vector<8x128xf32>
    %962 = arith.addf %958, %961 : vector<8x128xf32>
    %963 = arith.subf %928, %962 : vector<8x128xf32>
    %964 = arith.mulf %963, %963 : vector<8x128xf32>
    %cst_521 = arith.constant dense<0.000000e+00> : vector<8xf32>
    %965 = vector.multi_reduction <add>, %964, %cst_521 [1] : vector<8x128xf32> to vector<8xf32>
    %966 = vector.shape_cast %965 : vector<8xf32> to vector<8x1xf32>
    %cst_522 = arith.constant 5.000000e-01 : f32
    %967 = vector.broadcast %cst_522 : f32 to vector<8x1xf32>
    %968 = arith.mulf %967, %966 : vector<8x1xf32>
    %969 = arith.addf %954, %968 : vector<8x1xf32>
    %970 = arith.cmpf olt, %969, %909 : vector<8x1xf32>
    %cst_523 = arith.constant 1.000000e+00 : f32
    %cst_524 = arith.constant 0.899999976 : f32
    %971 = vector.broadcast %cst_523 : f32 to vector<8x1xf32>
    %972 = vector.broadcast %cst_524 : f32 to vector<8x1xf32>
    %973 = arith.select %970, %971, %972 : vector<8x1xi1>, vector<8x1xf32>
    %974 = vector.broadcast %973 : vector<8x1xf32> to vector<8x128xf32>
    %975 = arith.mulf %915, %974 : vector<8x128xf32>
    %cst_525 = arith.constant 0.000000e+00 : f32
    %976 = vector.broadcast %cst_525 : f32 to vector<8x128xf32>
    %977 = arith.subf %976, %963 : vector<8x128xf32>
    %c1_526 = arith.constant 1 : index
    %c0_527 = arith.constant 0 : index
    %c0_528 = arith.constant 0 : index
    %978 = vector.load %arg2[%c1_526, %c0_527, %c0_528] : memref<3x128x128xf32, #tpu.memory_space<vmem>>, vector<1x128x128xf32>
    %979 = vector.shape_cast %978 : vector<1x128x128xf32> to vector<128x128xf32>
    %cst_529 = arith.constant dense<0.000000e+00> : vector<8x128xf32>
    %980 = tpu.matmul %948, %979, %cst_529 {dimension_numbers = #tpu.dot_dimension_numbers<[1], [0], [0], [1], [0, 0, 1, 1], [], []>} : vector<8x128xf32>, vector<128x128xf32>, vector<8x128xf32> -> vector<8x128xf32>
    %981 = math.tanh %928 : vector<8x128xf32>
    %982 = arith.mulf %981, %981 : vector<8x128xf32>
    %cst_530 = arith.constant 1.000000e+00 : f32
    %983 = vector.broadcast %cst_530 : f32 to vector<8x128xf32>
    %984 = arith.subf %983, %982 : vector<8x128xf32>
    %985 = arith.mulf %980, %984 : vector<8x128xf32>
    %986 = arith.addf %977, %985 : vector<8x128xf32>
    %987 = arith.mulf %975, %986 : vector<8x128xf32>
    %988 = arith.addf %928, %987 : vector<8x128xf32>
    %c2_531 = arith.constant 2 : index
    %c0_532 = arith.constant 0 : index
    %c0_533 = arith.constant 0 : index
    %989 = vector.load %arg2[%c2_531, %c0_532, %c0_533] : memref<3x128x128xf32, #tpu.memory_space<vmem>>, vector<1x128x128xf32>
    %990 = vector.shape_cast %989 : vector<1x128x128xf32> to vector<128x128xf32>
    %cst_534 = arith.constant dense<0.000000e+00> : vector<8x128xf32>
    %991 = tpu.matmul %963, %990, %cst_534 {dimension_numbers = #tpu.dot_dimension_numbers<[1], [0], [0], [1], [0, 0, 1, 1], [], []>} : vector<8x128xf32>, vector<128x128xf32>, vector<8x128xf32> -> vector<8x128xf32>
    %992 = math.tanh %938 : vector<8x128xf32>
    %993 = arith.mulf %992, %992 : vector<8x128xf32>
    %cst_535 = arith.constant 1.000000e+00 : f32
    %994 = vector.broadcast %cst_535 : f32 to vector<8x128xf32>
    %995 = arith.subf %994, %993 : vector<8x128xf32>
    %996 = arith.mulf %991, %995 : vector<8x128xf32>
    %997 = arith.mulf %975, %996 : vector<8x128xf32>
    %998 = arith.addf %938, %997 : vector<8x128xf32>
    %cst_536 = arith.constant 0.000000e+00 : f32
    %999 = vector.broadcast %cst_536 : f32 to vector<8x1xf32>
    %1000 = math.tanh %988 : vector<8x128xf32>
    %c1_537 = arith.constant 1 : index
    %c0_538 = arith.constant 0 : index
    %c0_539 = arith.constant 0 : index
    %1001 = vector.load %arg3[%c1_537, %c0_538, %c0_539] : memref<3x128x128xf32, #tpu.memory_space<vmem>>, vector<1x128x128xf32>
    %1002 = vector.shape_cast %1001 : vector<1x128x128xf32> to vector<128x128xf32>
    %cst_540 = arith.constant dense<0.000000e+00> : vector<8x128xf32>
    %1003 = tpu.matmul %1000, %1002, %cst_540 {dimension_numbers = #tpu.dot_dimension_numbers<[1], [0], [0], [1], [0, 0, 1, 1], [], []>} : vector<8x128xf32>, vector<128x128xf32>, vector<8x128xf32> -> vector<8x128xf32>
    %c1_541 = arith.constant 1 : index
    %c0_542 = arith.constant 0 : index
    %c0_543 = arith.constant 0 : index
    %1004 = vector.load %arg4[%c1_541, %c0_542, %c0_543] : memref<3x1x128xf32, #tpu.memory_space<vmem>>, vector<1x1x128xf32>
    %1005 = vector.shape_cast %1004 : vector<1x1x128xf32> to vector<1x128xf32>
    %1006 = vector.broadcast %1005 : vector<1x128xf32> to vector<8x128xf32>
    %1007 = arith.addf %1003, %1006 : vector<8x128xf32>
    %1008 = arith.subf %2, %1007 : vector<8x128xf32>
    %1009 = arith.mulf %1008, %1008 : vector<8x128xf32>
    %cst_544 = arith.constant dense<0.000000e+00> : vector<8xf32>
    %1010 = vector.multi_reduction <add>, %1009, %cst_544 [1] : vector<8x128xf32> to vector<8xf32>
    %1011 = vector.shape_cast %1010 : vector<8xf32> to vector<8x1xf32>
    %cst_545 = arith.constant 5.000000e-01 : f32
    %1012 = vector.broadcast %cst_545 : f32 to vector<8x1xf32>
    %1013 = arith.mulf %1012, %1011 : vector<8x1xf32>
    %1014 = arith.addf %999, %1013 : vector<8x1xf32>
    %1015 = math.tanh %998 : vector<8x128xf32>
    %c2_546 = arith.constant 2 : index
    %c0_547 = arith.constant 0 : index
    %c0_548 = arith.constant 0 : index
    %1016 = vector.load %arg3[%c2_546, %c0_547, %c0_548] : memref<3x128x128xf32, #tpu.memory_space<vmem>>, vector<1x128x128xf32>
    %1017 = vector.shape_cast %1016 : vector<1x128x128xf32> to vector<128x128xf32>
    %cst_549 = arith.constant dense<0.000000e+00> : vector<8x128xf32>
    %1018 = tpu.matmul %1015, %1017, %cst_549 {dimension_numbers = #tpu.dot_dimension_numbers<[1], [0], [0], [1], [0, 0, 1, 1], [], []>} : vector<8x128xf32>, vector<128x128xf32>, vector<8x128xf32> -> vector<8x128xf32>
    %c2_550 = arith.constant 2 : index
    %c0_551 = arith.constant 0 : index
    %c0_552 = arith.constant 0 : index
    %1019 = vector.load %arg4[%c2_550, %c0_551, %c0_552] : memref<3x1x128xf32, #tpu.memory_space<vmem>>, vector<1x1x128xf32>
    %1020 = vector.shape_cast %1019 : vector<1x1x128xf32> to vector<1x128xf32>
    %1021 = vector.broadcast %1020 : vector<1x128xf32> to vector<8x128xf32>
    %1022 = arith.addf %1018, %1021 : vector<8x128xf32>
    %1023 = arith.subf %988, %1022 : vector<8x128xf32>
    %1024 = arith.mulf %1023, %1023 : vector<8x128xf32>
    %cst_553 = arith.constant dense<0.000000e+00> : vector<8xf32>
    %1025 = vector.multi_reduction <add>, %1024, %cst_553 [1] : vector<8x128xf32> to vector<8xf32>
    %1026 = vector.shape_cast %1025 : vector<8xf32> to vector<8x1xf32>
    %cst_554 = arith.constant 5.000000e-01 : f32
    %1027 = vector.broadcast %cst_554 : f32 to vector<8x1xf32>
    %1028 = arith.mulf %1027, %1026 : vector<8x1xf32>
    %1029 = arith.addf %1014, %1028 : vector<8x1xf32>
    %1030 = arith.cmpf olt, %1029, %969 : vector<8x1xf32>
    %cst_555 = arith.constant 1.000000e+00 : f32
    %cst_556 = arith.constant 0.899999976 : f32
    %1031 = vector.broadcast %cst_555 : f32 to vector<8x1xf32>
    %1032 = vector.broadcast %cst_556 : f32 to vector<8x1xf32>
    %1033 = arith.select %1030, %1031, %1032 : vector<8x1xi1>, vector<8x1xf32>
    %1034 = vector.broadcast %1033 : vector<8x1xf32> to vector<8x128xf32>
    %1035 = arith.mulf %975, %1034 : vector<8x128xf32>
    %cst_557 = arith.constant 0.000000e+00 : f32
    %1036 = vector.broadcast %cst_557 : f32 to vector<8x128xf32>
    %1037 = arith.subf %1036, %1023 : vector<8x128xf32>
    %c1_558 = arith.constant 1 : index
    %c0_559 = arith.constant 0 : index
    %c0_560 = arith.constant 0 : index
    %1038 = vector.load %arg2[%c1_558, %c0_559, %c0_560] : memref<3x128x128xf32, #tpu.memory_space<vmem>>, vector<1x128x128xf32>
    %1039 = vector.shape_cast %1038 : vector<1x128x128xf32> to vector<128x128xf32>
    %cst_561 = arith.constant dense<0.000000e+00> : vector<8x128xf32>
    %1040 = tpu.matmul %1008, %1039, %cst_561 {dimension_numbers = #tpu.dot_dimension_numbers<[1], [0], [0], [1], [0, 0, 1, 1], [], []>} : vector<8x128xf32>, vector<128x128xf32>, vector<8x128xf32> -> vector<8x128xf32>
    %1041 = math.tanh %988 : vector<8x128xf32>
    %1042 = arith.mulf %1041, %1041 : vector<8x128xf32>
    %cst_562 = arith.constant 1.000000e+00 : f32
    %1043 = vector.broadcast %cst_562 : f32 to vector<8x128xf32>
    %1044 = arith.subf %1043, %1042 : vector<8x128xf32>
    %1045 = arith.mulf %1040, %1044 : vector<8x128xf32>
    %1046 = arith.addf %1037, %1045 : vector<8x128xf32>
    %1047 = arith.mulf %1035, %1046 : vector<8x128xf32>
    %1048 = arith.addf %988, %1047 : vector<8x128xf32>
    %c2_563 = arith.constant 2 : index
    %c0_564 = arith.constant 0 : index
    %c0_565 = arith.constant 0 : index
    %1049 = vector.load %arg2[%c2_563, %c0_564, %c0_565] : memref<3x128x128xf32, #tpu.memory_space<vmem>>, vector<1x128x128xf32>
    %1050 = vector.shape_cast %1049 : vector<1x128x128xf32> to vector<128x128xf32>
    %cst_566 = arith.constant dense<0.000000e+00> : vector<8x128xf32>
    %1051 = tpu.matmul %1023, %1050, %cst_566 {dimension_numbers = #tpu.dot_dimension_numbers<[1], [0], [0], [1], [0, 0, 1, 1], [], []>} : vector<8x128xf32>, vector<128x128xf32>, vector<8x128xf32> -> vector<8x128xf32>
    %1052 = math.tanh %998 : vector<8x128xf32>
    %1053 = arith.mulf %1052, %1052 : vector<8x128xf32>
    %cst_567 = arith.constant 1.000000e+00 : f32
    %1054 = vector.broadcast %cst_567 : f32 to vector<8x128xf32>
    %1055 = arith.subf %1054, %1053 : vector<8x128xf32>
    %1056 = arith.mulf %1051, %1055 : vector<8x128xf32>
    %1057 = arith.mulf %1035, %1056 : vector<8x128xf32>
    %1058 = arith.addf %998, %1057 : vector<8x128xf32>
    %cst_568 = arith.constant 0.000000e+00 : f32
    %1059 = vector.broadcast %cst_568 : f32 to vector<8x1xf32>
    %1060 = math.tanh %1048 : vector<8x128xf32>
    %c1_569 = arith.constant 1 : index
    %c0_570 = arith.constant 0 : index
    %c0_571 = arith.constant 0 : index
    %1061 = vector.load %arg3[%c1_569, %c0_570, %c0_571] : memref<3x128x128xf32, #tpu.memory_space<vmem>>, vector<1x128x128xf32>
    %1062 = vector.shape_cast %1061 : vector<1x128x128xf32> to vector<128x128xf32>
    %cst_572 = arith.constant dense<0.000000e+00> : vector<8x128xf32>
    %1063 = tpu.matmul %1060, %1062, %cst_572 {dimension_numbers = #tpu.dot_dimension_numbers<[1], [0], [0], [1], [0, 0, 1, 1], [], []>} : vector<8x128xf32>, vector<128x128xf32>, vector<8x128xf32> -> vector<8x128xf32>
    %c1_573 = arith.constant 1 : index
    %c0_574 = arith.constant 0 : index
    %c0_575 = arith.constant 0 : index
    %1064 = vector.load %arg4[%c1_573, %c0_574, %c0_575] : memref<3x1x128xf32, #tpu.memory_space<vmem>>, vector<1x1x128xf32>
    %1065 = vector.shape_cast %1064 : vector<1x1x128xf32> to vector<1x128xf32>
    %1066 = vector.broadcast %1065 : vector<1x128xf32> to vector<8x128xf32>
    %1067 = arith.addf %1063, %1066 : vector<8x128xf32>
    %1068 = arith.subf %2, %1067 : vector<8x128xf32>
    %1069 = arith.mulf %1068, %1068 : vector<8x128xf32>
    %cst_576 = arith.constant dense<0.000000e+00> : vector<8xf32>
    %1070 = vector.multi_reduction <add>, %1069, %cst_576 [1] : vector<8x128xf32> to vector<8xf32>
    %1071 = vector.shape_cast %1070 : vector<8xf32> to vector<8x1xf32>
    %cst_577 = arith.constant 5.000000e-01 : f32
    %1072 = vector.broadcast %cst_577 : f32 to vector<8x1xf32>
    %1073 = arith.mulf %1072, %1071 : vector<8x1xf32>
    %1074 = arith.addf %1059, %1073 : vector<8x1xf32>
    %1075 = math.tanh %1058 : vector<8x128xf32>
    %c2_578 = arith.constant 2 : index
    %c0_579 = arith.constant 0 : index
    %c0_580 = arith.constant 0 : index
    %1076 = vector.load %arg3[%c2_578, %c0_579, %c0_580] : memref<3x128x128xf32, #tpu.memory_space<vmem>>, vector<1x128x128xf32>
    %1077 = vector.shape_cast %1076 : vector<1x128x128xf32> to vector<128x128xf32>
    %cst_581 = arith.constant dense<0.000000e+00> : vector<8x128xf32>
    %1078 = tpu.matmul %1075, %1077, %cst_581 {dimension_numbers = #tpu.dot_dimension_numbers<[1], [0], [0], [1], [0, 0, 1, 1], [], []>} : vector<8x128xf32>, vector<128x128xf32>, vector<8x128xf32> -> vector<8x128xf32>
    %c2_582 = arith.constant 2 : index
    %c0_583 = arith.constant 0 : index
    %c0_584 = arith.constant 0 : index
    %1079 = vector.load %arg4[%c2_582, %c0_583, %c0_584] : memref<3x1x128xf32, #tpu.memory_space<vmem>>, vector<1x1x128xf32>
    %1080 = vector.shape_cast %1079 : vector<1x1x128xf32> to vector<1x128xf32>
    %1081 = vector.broadcast %1080 : vector<1x128xf32> to vector<8x128xf32>
    %1082 = arith.addf %1078, %1081 : vector<8x128xf32>
    %1083 = arith.subf %1048, %1082 : vector<8x128xf32>
    %1084 = arith.mulf %1083, %1083 : vector<8x128xf32>
    %cst_585 = arith.constant dense<0.000000e+00> : vector<8xf32>
    %1085 = vector.multi_reduction <add>, %1084, %cst_585 [1] : vector<8x128xf32> to vector<8xf32>
    %1086 = vector.shape_cast %1085 : vector<8xf32> to vector<8x1xf32>
    %cst_586 = arith.constant 5.000000e-01 : f32
    %1087 = vector.broadcast %cst_586 : f32 to vector<8x1xf32>
    %1088 = arith.mulf %1087, %1086 : vector<8x1xf32>
    %1089 = arith.addf %1074, %1088 : vector<8x1xf32>
    %1090 = arith.cmpf olt, %1089, %1029 : vector<8x1xf32>
    %cst_587 = arith.constant 1.000000e+00 : f32
    %cst_588 = arith.constant 0.899999976 : f32
    %1091 = vector.broadcast %cst_587 : f32 to vector<8x1xf32>
    %1092 = vector.broadcast %cst_588 : f32 to vector<8x1xf32>
    %1093 = arith.select %1090, %1091, %1092 : vector<8x1xi1>, vector<8x1xf32>
    %1094 = vector.broadcast %1093 : vector<8x1xf32> to vector<8x128xf32>
    %1095 = arith.mulf %1035, %1094 : vector<8x128xf32>
    %cst_589 = arith.constant 0.000000e+00 : f32
    %1096 = vector.broadcast %cst_589 : f32 to vector<8x128xf32>
    %1097 = arith.subf %1096, %1083 : vector<8x128xf32>
    %c1_590 = arith.constant 1 : index
    %c0_591 = arith.constant 0 : index
    %c0_592 = arith.constant 0 : index
    %1098 = vector.load %arg2[%c1_590, %c0_591, %c0_592] : memref<3x128x128xf32, #tpu.memory_space<vmem>>, vector<1x128x128xf32>
    %1099 = vector.shape_cast %1098 : vector<1x128x128xf32> to vector<128x128xf32>
    %cst_593 = arith.constant dense<0.000000e+00> : vector<8x128xf32>
    %1100 = tpu.matmul %1068, %1099, %cst_593 {dimension_numbers = #tpu.dot_dimension_numbers<[1], [0], [0], [1], [0, 0, 1, 1], [], []>} : vector<8x128xf32>, vector<128x128xf32>, vector<8x128xf32> -> vector<8x128xf32>
    %1101 = math.tanh %1048 : vector<8x128xf32>
    %1102 = arith.mulf %1101, %1101 : vector<8x128xf32>
    %cst_594 = arith.constant 1.000000e+00 : f32
    %1103 = vector.broadcast %cst_594 : f32 to vector<8x128xf32>
    %1104 = arith.subf %1103, %1102 : vector<8x128xf32>
    %1105 = arith.mulf %1100, %1104 : vector<8x128xf32>
    %1106 = arith.addf %1097, %1105 : vector<8x128xf32>
    %1107 = arith.mulf %1095, %1106 : vector<8x128xf32>
    %1108 = arith.addf %1048, %1107 : vector<8x128xf32>
    %c2_595 = arith.constant 2 : index
    %c0_596 = arith.constant 0 : index
    %c0_597 = arith.constant 0 : index
    %1109 = vector.load %arg2[%c2_595, %c0_596, %c0_597] : memref<3x128x128xf32, #tpu.memory_space<vmem>>, vector<1x128x128xf32>
    %1110 = vector.shape_cast %1109 : vector<1x128x128xf32> to vector<128x128xf32>
    %cst_598 = arith.constant dense<0.000000e+00> : vector<8x128xf32>
    %1111 = tpu.matmul %1083, %1110, %cst_598 {dimension_numbers = #tpu.dot_dimension_numbers<[1], [0], [0], [1], [0, 0, 1, 1], [], []>} : vector<8x128xf32>, vector<128x128xf32>, vector<8x128xf32> -> vector<8x128xf32>
    %1112 = math.tanh %1058 : vector<8x128xf32>
    %1113 = arith.mulf %1112, %1112 : vector<8x128xf32>
    %cst_599 = arith.constant 1.000000e+00 : f32
    %1114 = vector.broadcast %cst_599 : f32 to vector<8x128xf32>
    %1115 = arith.subf %1114, %1113 : vector<8x128xf32>
    %1116 = arith.mulf %1111, %1115 : vector<8x128xf32>
    %1117 = arith.mulf %1095, %1116 : vector<8x128xf32>
    %1118 = arith.addf %1058, %1117 : vector<8x128xf32>
    %cst_600 = arith.constant 0.000000e+00 : f32
    %1119 = vector.broadcast %cst_600 : f32 to vector<8x1xf32>
    %1120 = math.tanh %1108 : vector<8x128xf32>
    %c1_601 = arith.constant 1 : index
    %c0_602 = arith.constant 0 : index
    %c0_603 = arith.constant 0 : index
    %1121 = vector.load %arg3[%c1_601, %c0_602, %c0_603] : memref<3x128x128xf32, #tpu.memory_space<vmem>>, vector<1x128x128xf32>
    %1122 = vector.shape_cast %1121 : vector<1x128x128xf32> to vector<128x128xf32>
    %cst_604 = arith.constant dense<0.000000e+00> : vector<8x128xf32>
    %1123 = tpu.matmul %1120, %1122, %cst_604 {dimension_numbers = #tpu.dot_dimension_numbers<[1], [0], [0], [1], [0, 0, 1, 1], [], []>} : vector<8x128xf32>, vector<128x128xf32>, vector<8x128xf32> -> vector<8x128xf32>
    %c1_605 = arith.constant 1 : index
    %c0_606 = arith.constant 0 : index
    %c0_607 = arith.constant 0 : index
    %1124 = vector.load %arg4[%c1_605, %c0_606, %c0_607] : memref<3x1x128xf32, #tpu.memory_space<vmem>>, vector<1x1x128xf32>
    %1125 = vector.shape_cast %1124 : vector<1x1x128xf32> to vector<1x128xf32>
    %1126 = vector.broadcast %1125 : vector<1x128xf32> to vector<8x128xf32>
    %1127 = arith.addf %1123, %1126 : vector<8x128xf32>
    %1128 = arith.subf %2, %1127 : vector<8x128xf32>
    %1129 = arith.mulf %1128, %1128 : vector<8x128xf32>
    %cst_608 = arith.constant dense<0.000000e+00> : vector<8xf32>
    %1130 = vector.multi_reduction <add>, %1129, %cst_608 [1] : vector<8x128xf32> to vector<8xf32>
    %1131 = vector.shape_cast %1130 : vector<8xf32> to vector<8x1xf32>
    %cst_609 = arith.constant 5.000000e-01 : f32
    %1132 = vector.broadcast %cst_609 : f32 to vector<8x1xf32>
    %1133 = arith.mulf %1132, %1131 : vector<8x1xf32>
    %1134 = arith.addf %1119, %1133 : vector<8x1xf32>
    %1135 = math.tanh %1118 : vector<8x128xf32>
    %c2_610 = arith.constant 2 : index
    %c0_611 = arith.constant 0 : index
    %c0_612 = arith.constant 0 : index
    %1136 = vector.load %arg3[%c2_610, %c0_611, %c0_612] : memref<3x128x128xf32, #tpu.memory_space<vmem>>, vector<1x128x128xf32>
    %1137 = vector.shape_cast %1136 : vector<1x128x128xf32> to vector<128x128xf32>
    %cst_613 = arith.constant dense<0.000000e+00> : vector<8x128xf32>
    %1138 = tpu.matmul %1135, %1137, %cst_613 {dimension_numbers = #tpu.dot_dimension_numbers<[1], [0], [0], [1], [0, 0, 1, 1], [], []>} : vector<8x128xf32>, vector<128x128xf32>, vector<8x128xf32> -> vector<8x128xf32>
    %c2_614 = arith.constant 2 : index
    %c0_615 = arith.constant 0 : index
    %c0_616 = arith.constant 0 : index
    %1139 = vector.load %arg4[%c2_614, %c0_615, %c0_616] : memref<3x1x128xf32, #tpu.memory_space<vmem>>, vector<1x1x128xf32>
    %1140 = vector.shape_cast %1139 : vector<1x1x128xf32> to vector<1x128xf32>
    %1141 = vector.broadcast %1140 : vector<1x128xf32> to vector<8x128xf32>
    %1142 = arith.addf %1138, %1141 : vector<8x128xf32>
    %1143 = arith.subf %1108, %1142 : vector<8x128xf32>
    %1144 = arith.mulf %1143, %1143 : vector<8x128xf32>
    %cst_617 = arith.constant dense<0.000000e+00> : vector<8xf32>
    %1145 = vector.multi_reduction <add>, %1144, %cst_617 [1] : vector<8x128xf32> to vector<8xf32>
    %1146 = vector.shape_cast %1145 : vector<8xf32> to vector<8x1xf32>
    %cst_618 = arith.constant 5.000000e-01 : f32
    %1147 = vector.broadcast %cst_618 : f32 to vector<8x1xf32>
    %1148 = arith.mulf %1147, %1146 : vector<8x1xf32>
    %1149 = arith.addf %1134, %1148 : vector<8x1xf32>
    %1150 = arith.cmpf olt, %1149, %1089 : vector<8x1xf32>
    %cst_619 = arith.constant 1.000000e+00 : f32
    %cst_620 = arith.constant 0.899999976 : f32
    %1151 = vector.broadcast %cst_619 : f32 to vector<8x1xf32>
    %1152 = vector.broadcast %cst_620 : f32 to vector<8x1xf32>
    %1153 = arith.select %1150, %1151, %1152 : vector<8x1xi1>, vector<8x1xf32>
    %1154 = vector.broadcast %1153 : vector<8x1xf32> to vector<8x128xf32>
    %1155 = arith.mulf %1095, %1154 : vector<8x128xf32>
    %cst_621 = arith.constant 0.000000e+00 : f32
    %1156 = vector.broadcast %cst_621 : f32 to vector<8x128xf32>
    %1157 = arith.subf %1156, %1143 : vector<8x128xf32>
    %c1_622 = arith.constant 1 : index
    %c0_623 = arith.constant 0 : index
    %c0_624 = arith.constant 0 : index
    %1158 = vector.load %arg2[%c1_622, %c0_623, %c0_624] : memref<3x128x128xf32, #tpu.memory_space<vmem>>, vector<1x128x128xf32>
    %1159 = vector.shape_cast %1158 : vector<1x128x128xf32> to vector<128x128xf32>
    %cst_625 = arith.constant dense<0.000000e+00> : vector<8x128xf32>
    %1160 = tpu.matmul %1128, %1159, %cst_625 {dimension_numbers = #tpu.dot_dimension_numbers<[1], [0], [0], [1], [0, 0, 1, 1], [], []>} : vector<8x128xf32>, vector<128x128xf32>, vector<8x128xf32> -> vector<8x128xf32>
    %1161 = math.tanh %1108 : vector<8x128xf32>
    %1162 = arith.mulf %1161, %1161 : vector<8x128xf32>
    %cst_626 = arith.constant 1.000000e+00 : f32
    %1163 = vector.broadcast %cst_626 : f32 to vector<8x128xf32>
    %1164 = arith.subf %1163, %1162 : vector<8x128xf32>
    %1165 = arith.mulf %1160, %1164 : vector<8x128xf32>
    %1166 = arith.addf %1157, %1165 : vector<8x128xf32>
    %1167 = arith.mulf %1155, %1166 : vector<8x128xf32>
    %1168 = arith.addf %1108, %1167 : vector<8x128xf32>
    %c2_627 = arith.constant 2 : index
    %c0_628 = arith.constant 0 : index
    %c0_629 = arith.constant 0 : index
    %1169 = vector.load %arg2[%c2_627, %c0_628, %c0_629] : memref<3x128x128xf32, #tpu.memory_space<vmem>>, vector<1x128x128xf32>
    %1170 = vector.shape_cast %1169 : vector<1x128x128xf32> to vector<128x128xf32>
    %cst_630 = arith.constant dense<0.000000e+00> : vector<8x128xf32>
    %1171 = tpu.matmul %1143, %1170, %cst_630 {dimension_numbers = #tpu.dot_dimension_numbers<[1], [0], [0], [1], [0, 0, 1, 1], [], []>} : vector<8x128xf32>, vector<128x128xf32>, vector<8x128xf32> -> vector<8x128xf32>
    %1172 = math.tanh %1118 : vector<8x128xf32>
    %1173 = arith.mulf %1172, %1172 : vector<8x128xf32>
    %cst_631 = arith.constant 1.000000e+00 : f32
    %1174 = vector.broadcast %cst_631 : f32 to vector<8x128xf32>
    %1175 = arith.subf %1174, %1173 : vector<8x128xf32>
    %1176 = arith.mulf %1171, %1175 : vector<8x128xf32>
    %1177 = arith.mulf %1155, %1176 : vector<8x128xf32>
    %1178 = arith.addf %1118, %1177 : vector<8x128xf32>
    %1179 = math.tanh %1168 : vector<8x128xf32>
    %c1_632 = arith.constant 1 : index
    %c0_633 = arith.constant 0 : index
    %c0_634 = arith.constant 0 : index
    %1180 = vector.load %arg3[%c1_632, %c0_633, %c0_634] : memref<3x128x128xf32, #tpu.memory_space<vmem>>, vector<1x128x128xf32>
    %1181 = vector.shape_cast %1180 : vector<1x128x128xf32> to vector<128x128xf32>
    %cst_635 = arith.constant dense<0.000000e+00> : vector<8x128xf32>
    %1182 = tpu.matmul %1179, %1181, %cst_635 {dimension_numbers = #tpu.dot_dimension_numbers<[1], [0], [0], [1], [0, 0, 1, 1], [], []>} : vector<8x128xf32>, vector<128x128xf32>, vector<8x128xf32> -> vector<8x128xf32>
    %c1_636 = arith.constant 1 : index
    %c0_637 = arith.constant 0 : index
    %c0_638 = arith.constant 0 : index
    %1183 = vector.load %arg4[%c1_636, %c0_637, %c0_638] : memref<3x1x128xf32, #tpu.memory_space<vmem>>, vector<1x1x128xf32>
    %1184 = vector.shape_cast %1183 : vector<1x1x128xf32> to vector<1x128xf32>
    %1185 = vector.broadcast %1184 : vector<1x128xf32> to vector<8x128xf32>
    %1186 = arith.addf %1182, %1185 : vector<8x128xf32>
    %1187 = arith.subf %2, %1186 : vector<8x128xf32>
    %1188 = math.tanh %1178 : vector<8x128xf32>
    %c2_639 = arith.constant 2 : index
    %c0_640 = arith.constant 0 : index
    %c0_641 = arith.constant 0 : index
    %1189 = vector.load %arg3[%c2_639, %c0_640, %c0_641] : memref<3x128x128xf32, #tpu.memory_space<vmem>>, vector<1x128x128xf32>
    %1190 = vector.shape_cast %1189 : vector<1x128x128xf32> to vector<128x128xf32>
    %cst_642 = arith.constant dense<0.000000e+00> : vector<8x128xf32>
    %1191 = tpu.matmul %1188, %1190, %cst_642 {dimension_numbers = #tpu.dot_dimension_numbers<[1], [0], [0], [1], [0, 0, 1, 1], [], []>} : vector<8x128xf32>, vector<128x128xf32>, vector<8x128xf32> -> vector<8x128xf32>
    %c2_643 = arith.constant 2 : index
    %c0_644 = arith.constant 0 : index
    %c0_645 = arith.constant 0 : index
    %1192 = vector.load %arg4[%c2_643, %c0_644, %c0_645] : memref<3x1x128xf32, #tpu.memory_space<vmem>>, vector<1x1x128xf32>
    %1193 = vector.shape_cast %1192 : vector<1x1x128xf32> to vector<1x128xf32>
    %1194 = vector.broadcast %1193 : vector<1x128xf32> to vector<8x128xf32>
    %1195 = arith.addf %1191, %1194 : vector<8x128xf32>
    %1196 = arith.subf %1168, %1195 : vector<8x128xf32>
    %c0_646 = arith.constant 0 : index
    %c0_647 = arith.constant 0 : index
    %c0_648 = arith.constant 0 : index
    %1197 = vector.load %arg5[%c0_646, %c0_647, %c0_648] : memref<3x8x128xf32, #tpu.memory_space<vmem>>, vector<1x8x128xf32>
    %1198 = vector.shape_cast %1197 : vector<1x8x128xf32> to vector<8x128xf32>
    %1199 = vector.shape_cast %2 : vector<8x128xf32> to vector<1x8x128xf32>
    tpu.vector_store %arg5[%c0_646, %c0_647, %c0_648], %1199 {strides = array<i32>} : memref<3x8x128xf32, #tpu.memory_space<vmem>>, vector<1x8x128xf32>,
    %c1_649 = arith.constant 1 : index
    %c0_650 = arith.constant 0 : index
    %c0_651 = arith.constant 0 : index
    %1200 = vector.load %arg5[%c1_649, %c0_650, %c0_651] : memref<3x8x128xf32, #tpu.memory_space<vmem>>, vector<1x8x128xf32>
    %1201 = vector.shape_cast %1200 : vector<1x8x128xf32> to vector<8x128xf32>
    %1202 = vector.shape_cast %1168 : vector<8x128xf32> to vector<1x8x128xf32>
    tpu.vector_store %arg5[%c1_649, %c0_650, %c0_651], %1202 {strides = array<i32>} : memref<3x8x128xf32, #tpu.memory_space<vmem>>, vector<1x8x128xf32>,
    %c2_652 = arith.constant 2 : index
    %c0_653 = arith.constant 0 : index
    %c0_654 = arith.constant 0 : index
    %1203 = vector.load %arg5[%c2_652, %c0_653, %c0_654] : memref<3x8x128xf32, #tpu.memory_space<vmem>>, vector<1x8x128xf32>
    %1204 = vector.shape_cast %1203 : vector<1x8x128xf32> to vector<8x128xf32>
    %1205 = vector.shape_cast %1178 : vector<8x128xf32> to vector<1x8x128xf32>
    tpu.vector_store %arg5[%c2_652, %c0_653, %c0_654], %1205 {strides = array<i32>} : memref<3x8x128xf32, #tpu.memory_space<vmem>>, vector<1x8x128xf32>,
    %c0_655 = arith.constant 0 : index
    %c0_656 = arith.constant 0 : index
    %c0_657 = arith.constant 0 : index
    %1206 = vector.load %arg6[%c0_655, %c0_656, %c0_657] : memref<3x8x128xf32, #tpu.memory_space<vmem>>, vector<1x8x128xf32>
    %1207 = vector.shape_cast %1206 : vector<1x8x128xf32> to vector<8x128xf32>
    %1208 = vector.shape_cast %1187 : vector<8x128xf32> to vector<1x8x128xf32>
    tpu.vector_store %arg6[%c0_655, %c0_656, %c0_657], %1208 {strides = array<i32>} : memref<3x8x128xf32, #tpu.memory_space<vmem>>, vector<1x8x128xf32>,
    %c1_658 = arith.constant 1 : index
    %c0_659 = arith.constant 0 : index
    %c0_660 = arith.constant 0 : index
    %1209 = vector.load %arg6[%c1_658, %c0_659, %c0_660] : memref<3x8x128xf32, #tpu.memory_space<vmem>>, vector<1x8x128xf32>
    %1210 = vector.shape_cast %1209 : vector<1x8x128xf32> to vector<8x128xf32>
    %1211 = vector.shape_cast %1196 : vector<8x128xf32> to vector<1x8x128xf32>
    tpu.vector_store %arg6[%c1_658, %c0_659, %c0_660], %1211 {strides = array<i32>} : memref<3x8x128xf32, #tpu.memory_space<vmem>>, vector<1x8x128xf32>,
    %cst_661 = arith.constant 0.000000e+00 : f32
    %1212 = vector.broadcast %cst_661 : f32 to vector<8x128xf32>
    %c2_662 = arith.constant 2 : index
    %c0_663 = arith.constant 0 : index
    %c0_664 = arith.constant 0 : index
    %1213 = vector.load %arg6[%c2_662, %c0_663, %c0_664] : memref<3x8x128xf32, #tpu.memory_space<vmem>>, vector<1x8x128xf32>
    %1214 = vector.shape_cast %1213 : vector<1x8x128xf32> to vector<8x128xf32>
    %1215 = vector.shape_cast %1212 : vector<8x128xf32> to vector<1x8x128xf32>
    tpu.vector_store %arg6[%c2_662, %c0_663, %c0_664], %1215 {strides = array<i32>} : memref<3x8x128xf32, #tpu.memory_space<vmem>>, vector<1x8x128xf32>,
    return
  }
  func.func @transform_0(%arg0: i32) -> (i32, i32) {
    %c0_i32 = arith.constant 0 : i32
    %c0_i32_0 = arith.constant 0 : i32
    %c0_i32_1 = arith.constant 0 : i32
    return %c0_i32, %c0_i32_0 : i32, i32
  }
  func.func @transform_1(%arg0: i32) -> (i32, i32, i32) {
    %c0_i32 = arith.constant 0 : i32
    %c0_i32_0 = arith.constant 0 : i32
    %c0_i32_1 = arith.constant 0 : i32
    %c0_i32_2 = arith.constant 0 : i32
    return %c0_i32, %c0_i32_0, %c0_i32_1 : i32, i32, i32
  }
  func.func @transform_2(%arg0: i32) -> (i32, i32, i32) {
    %c0_i32 = arith.constant 0 : i32
    %c0_i32_0 = arith.constant 0 : i32
    %c0_i32_1 = arith.constant 0 : i32
    %c0_i32_2 = arith.constant 0 : i32
    return %c0_i32, %c0_i32_0, %c0_i32_1 : i32, i32, i32
  }
  func.func @transform_3(%arg0: i32) -> (i32, i32, i32) {
    %c0_i32 = arith.constant 0 : i32
    %c0_i32_0 = arith.constant 0 : i32
    %c0_i32_1 = arith.constant 0 : i32
    %c0_i32_2 = arith.constant 0 : i32
    return %c0_i32, %c0_i32_0, %c0_i32_1 : i32, i32, i32
  }
  func.func @transform_4(%arg0: i32) -> (i32, i32, i32) {
    %c0_i32 = arith.constant 0 : i32
    %c0_i32_0 = arith.constant 0 : i32
    %c0_i32_1 = arith.constant 0 : i32
    %c0_i32_2 = arith.constant 0 : i32
    return %c0_i32, %c0_i32_0, %c0_i32_1 : i32, i32, i32
  }
  func.func @transform_5(%arg0: i32) -> (i32, i32, i32) {
    %c0_i32 = arith.constant 0 : i32
    %c0_i32_0 = arith.constant 0 : i32
    %c0_i32_1 = arith.constant 0 : i32
    %c0_i32_2 = arith.constant 0 : i32
    return %c0_i32, %c0_i32_0, %c0_i32_1 : i32, i32, i32
  }
}

</mosaic_0001>

<bundles_post_ra>
// kernel: tpu_custom_call.1
= control target key start
LH: loop header
LB: loop body
LE: loop exit
PB: predicated region body
PF: predicated region fallthrough
CT: control target
= control target key end

     0   :  { %11 = vsyncpa [#allocation3], 0  ;;  %s15921_s0 = inlined_call_operand.hbm [shape: f32[8,128], index: 0, kind: input, shape index: {}]   ;;  %s15922_s1 = inlined_call_operand.hbm [shape: f32[3,128,128], index: 1, kind: input, shape index: {}]   ;;  %s15923_s2 = inlined_call_operand.hbm [shape: f32[3,128,128], index: 2, kind: input, shape index: {}]   ;;  %s15924_s3 = inlined_call_operand.vmem [shape: f32[3,1,128], index: 3, kind: input, shape index: {}]   ;;  %s15925_s4 = inlined_call_operand.hbm [shape: f32[3,8,128], index: 4, kind: output, shape index: {0}]   ;;  %s15926_s5 = inlined_call_operand.hbm [shape: f32[3,8,128], index: 5, kind: output, shape index: {1}]  }
   0x1   :  { %12 = vsyncpa [#allocation6], 0 }
   0x2   :  { %13 = vsyncpa [#allocation4], 0 }
   0x3   :  { %14 = vsyncpa [#allocation10], 0  ;;  %s11363_s18 = smov [#allocation5]  }
   0x4   :  { %s30_s19 = sshll.u32 %s11363_s18, 4  ;;  %s31_s19 = int_to_ptr.vmem [resolvable:$true] %s30_s19 }
   0x5   :  { %s11263_s20 = scalar_lea.vmem %s31_s19, 6144  ;;  %p11268_p1 = scmp.lt.s32.totalorder %s31_s19, %s31_s19 }
   0x6   :  { %p11264_p0 = scmp.ne.s32.totalorder %s31_s19, %s11263_s20  ;;  %p11269_p2 = scmp.lt.s32.totalorder %s11263_s20, %s11263_s20 }
   0x8   :  { %p11270_p3 = por %p11269_p2, %p11268_p1 }
   0xa   :  { %p11271_p4 = pnand %p11270_p3, %p11264_p0 }
   0xc   :  { %11274 = shalt.err (!%p11271_p4)
}
   0xd   :  { %s11364_s21 = smov 128   ;;  %s11365_s22 = smov 8  }
   0xe   :  { %36 = dma.hbm_to_vmem [thread:$0]  %s15922_s1, 6144, %s31_s19, [#allocation6], %s11364_s21, %s11364_s21, %s11365_s22  }
   0xf   :  { %s11366_s25 = smov [#allocation2]   ;;  %s11367_s27 = smov [#allocation7]  }
  0x10   :  { %s21_s26 = sshll.u32 %s11366_s25, 4  ;;  %s42_s28 = sshll.u32 %s11367_s27, 4  ;;  %s22_s26 = int_to_ptr.vmem [resolvable:$true] %s21_s26  ;;  %s43_s28 = int_to_ptr.vmem [resolvable:$true] %s42_s28 }
  0x11   :  { %s11283_s29 = scalar_lea.vmem %s22_s26, 128  ;;  %p11288_p6 = scmp.lt.s32.totalorder %s22_s26, %s22_s26 }
  0x12   :  { %p11284_p5 = scmp.ne.s32.totalorder %s22_s26, %s11283_s29  ;;  %p11289_p7 = scmp.lt.s32.totalorder %s11283_s29, %s11283_s29 }
  0x14   :  { %p11290_p8 = por %p11289_p7, %p11288_p6 }
  0x16   :  { %p11291_p9 = pnand %p11290_p8, %p11284_p5 }
  0x18   :  { %11294 = shalt.err (!%p11291_p9)
}
  0x19   :  { %24 = dma.hbm_to_vmem [thread:$0]  %s15921_s0, 128, %s22_s26, [#allocation3]  }
  0x1a   :  { %s11303_s7 = scalar_lea.vmem %s43_s28, 6144  ;;  %p11308_p11 = scmp.lt.s32.totalorder %s43_s28, %s43_s28 }
  0x1b   :  { %p11304_p10 = scmp.ne.s32.totalorder %s43_s28, %s11303_s7  ;;  %p11309_p12 = scmp.lt.s32.totalorder %s11303_s7, %s11303_s7 }
  0x1d   :  { %p11310_p13 = por %p11309_p12, %p11308_p11 }
  0x1f   :  { %p11311_p0 = pnand %p11310_p13, %p11304_p10 }
  0x21   :  { %11314 = shalt.err (!%p11311_p0)
}
  0x22   :  { %48 = dma.hbm_to_vmem [thread:$0]  %s15923_s2, 6144, %s43_s28, [#allocation6], %s11364_s21, %s11364_s21, %s11365_s22  }
  0x23   :  { %11355 = dma.done.wait [#allocation3], 128  }
  0x24   :  { %11356 = vsyncadd [#allocation3], 4294967168 }
  0x25   :  { %11357 = dma.done.wait [#allocation6], 12288  }
  0x26   :  { %11358 = vsyncadd [#allocation6], 4294955008  ;;  %v15947_v0 = vmov 0.0   ;;  %vm11369_vm0 = vmmov 0   ;;  %v11425_v1 = vld [vmem:[#allocation7 + $0xf8] sm:$0xff]  ;;  %v11429_v3 = vld [vmem:[#allocation7 + $0xf0] sm:$0xff] }
  0x27   :  { %7887 = vmatprep.subr.mxu0 %v15947_v0  ;;  %6454 = vst [vmem:[#allocation9 + $0x10] sm:$0xff] %v15947_v0  ;;  %7922 = vmatprep.subr.mxu1 %v15947_v0  ;;  %v11427_v2 = vld [vmem:[#allocation7 + $0x178] sm:$0xff]  ;;  %v11433_v4 = vld [vmem:[#allocation7 + $0x170] sm:$0xff]  ;;  %v11437_v5 = vld [vmem:[#allocation7 + $0xe8] sm:$0xff] }
  0x28   :  { %7919 = vmatprep.mubr.msk.f32.mxu0 %vm11369_vm0, %v15947_v0  ;;  %7954 = vmatprep.mubr.msk.f32.mxu1 %vm11369_vm0, %v15947_v0  ;;  %v11439_v6 = vld [vmem:[#allocation7 + $0x168] sm:$0xff]  ;;  %v11445_v7 = vld [vmem:[#allocation7 + $0xe0] sm:$0xff]  ;;  %v11453_v9 = vld [vmem:[#allocation7 + $0xd8] sm:$0xff] }
  0x29   :  { %7888 = vmatpush3.msra.mxu0 %v11425_v1  ;;  %7923 = vmatpush3.msra.mxu1 %v11427_v2  ;;  %v11447_v8 = vld [vmem:[#allocation7 + $0x160] sm:$0xff]  ;;  %v11455_v10 = vld [vmem:[#allocation7 + $0x158] sm:$0xff]  ;;  %v11461_v11 = vld [vmem:[#allocation7 + $0xd0] sm:$0xff] }
  0x2a   :  { %7889 = vmatprep.subr.mxu0 %v15947_v0  ;;  %7924 = vmatprep.subr.mxu1 %v15947_v0  ;;  %v11463_v12 = vld [vmem:[#allocation7 + $0x150] sm:$0xff]  ;;  %v11469_v13 = vld [vmem:[#allocation7 + $0xc8] sm:$0xff]  ;;  %v11477_v15 = vld [vmem:[#allocation7 + $0xc0] sm:$0xff] }
  0x2b   :  { %7890 = vmatpush3.msra.mxu0 %v11429_v3  ;;  %7925 = vmatpush3.msra.mxu1 %v11433_v4  ;;  %v11471_v14 = vld [vmem:[#allocation7 + $0x148] sm:$0xff]  ;;  %v11479_v16 = vld [vmem:[#allocation7 + $0x140] sm:$0xff]  ;;  %v11485_v17 = vld [vmem:[#allocation7 + $0xb8] sm:$0xff] }
  0x2c   :  { %7891 = vmatprep.subr.mxu0 %v15947_v0  ;;  %7926 = vmatprep.subr.mxu1 %v15947_v0  ;;  %v11487_v18 = vld [vmem:[#allocation7 + $0x138] sm:$0xff]  ;;  %v11493_v19 = vld [vmem:[#allocation7 + $0xb0] sm:$0xff]  ;;  %v11501_v21 = vld [vmem:[#allocation7 + $0xa8] sm:$0xff] }
  0x2d   :  { %7892 = vmatpush3.msra.mxu0 %v11437_v5  ;;  %7927 = vmatpush3.msra.mxu1 %v11439_v6  ;;  %v11495_v20 = vld [vmem:[#allocation7 + $0x130] sm:$0xff]  ;;  %v11503_v22 = vld [vmem:[#allocation7 + $0x128] sm:$0xff]  ;;  %v11507_v23 = vld [vmem:[#allocation2] sm:$0xff] }
  0x2e   :  { %7893 = vmatprep.subr.mxu0 %v15947_v0  ;;  %7928 = vmatprep.subr.mxu1 %v15947_v0  ;;  %v11511_v24 = vld [vmem:[#allocation7 + $0xa0] sm:$0xff]  ;;  %6445 = vst [vmem:[#allocation8] sm:$0xff] %v11507_v23  ;;  %v11520_v26 = vld [vmem:[#allocation7 + $0x98] sm:$0xff]  ;;  %v11528_v28 = vld [vmem:[#allocation7 + $0x90] sm:$0xff] }
  0x2f   :  { %7894 = vmatpush3.msra.mxu0 %v11445_v7  ;;  %7929 = vmatpush3.msra.mxu1 %v11447_v8  ;;  %v11513_v25 = vld [vmem:[#allocation7 + $0x120] sm:$0xff]  ;;  %v11522_v27 = vld [vmem:[#allocation7 + $0x118] sm:$0xff]  ;;  %16125 = vst [vmem:[#allocation15_spill] sm:$0xff] %v11528_v28  ;;  %v11530_v29 = vld [vmem:[#allocation7 + $0x110] sm:$0xff] }
  0x30   :  { %7895 = vmatprep.subr.mxu0 %v15947_v0  ;;  %7930 = vmatprep.subr.mxu1 %v15947_v0  ;;  %v11536_v30 = vld [vmem:[#allocation7 + $0x88] sm:$0xff]  ;;  %v11544_v32 = vld [vmem:[#allocation7 + $0x80] sm:$0xff]  ;;  %v11554_v34 = vld [vmem:[#allocation5 + $0xf8] sm:$0xff] }
  0x31   :  { %7896 = vmatpush3.msra.mxu0 %v11453_v9  ;;  %7931 = vmatpush3.msra.mxu1 %v11455_v10  ;;  %16126 = vst [vmem:[#allocation16_spill] sm:$0xff] %v11536_v30  ;;  %v11538_v31 = vld [vmem:[#allocation7 + $0x108] sm:$0xff]  ;;  %16127 = vst [vmem:[#allocation17_spill] sm:$0xff] %v11544_v32  ;;  %v11546_v33 = vld [vmem:[#allocation7 + $0x100] sm:$0xff] }
  0x32   :  { %7897 = vmatprep.subr.mxu0 %v15947_v0  ;;  %7932 = vmatprep.subr.mxu1 %v15947_v0  ;;  %16128 = vst [vmem:[#allocation18_spill] sm:$0xff] %v11546_v33  ;;  %v11556_v35 = vld [vmem:[#allocation5 + $0x178] sm:$0xff]  ;;  %v11562_v36 = vld [vmem:[#allocation5 + $0xf0] sm:$0xff]  ;;  %v11570_v38 = vld [vmem:[#allocation5 + $0xe8] sm:$0xff] }
  0x33   :  { %7898 = vmatpush3.msra.mxu0 %v11461_v11  ;;  %7933 = vmatpush3.msra.mxu1 %v11463_v12  ;;  %v11564_v37 = vld [vmem:[#allocation5 + $0x170] sm:$0xff]  ;;  %v11572_v39 = vld [vmem:[#allocation5 + $0x168] sm:$0xff]  ;;  %v11578_v40 = vld [vmem:[#allocation5 + $0xe0] sm:$0xff] }
  0x34   :  { %7899 = vmatprep.subr.mxu0 %v15947_v0  ;;  %7934 = vmatprep.subr.mxu1 %v15947_v0  ;;  %v11580_v41 = vld [vmem:[#allocation5 + $0x160] sm:$0xff]  ;;  %v11586_v42 = vld [vmem:[#allocation5 + $0xd8] sm:$0xff]  ;;  %v11594_v44 = vld [vmem:[#allocation5 + $0xd0] sm:$0xff] }
  0x35   :  { %7900 = vmatpush3.msra.mxu0 %v11469_v13  ;;  %7935 = vmatpush3.msra.mxu1 %v11471_v14  ;;  %v11588_v43 = vld [vmem:[#allocation5 + $0x158] sm:$0xff]  ;;  %v11596_v45 = vld [vmem:[#allocation5 + $0x150] sm:$0xff]  ;;  %v11602_v46 = vld [vmem:[#allocation5 + $0xc8] sm:$0xff] }
  0x36   :  { %7901 = vmatprep.subr.mxu0 %v15947_v0  ;;  %7936 = vmatprep.subr.mxu1 %v15947_v0  ;;  %v11604_v47 = vld [vmem:[#allocation5 + $0x148] sm:$0xff]  ;;  %v11610_v48 = vld [vmem:[#allocation5 + $0xc0] sm:$0xff]  ;;  %v11618_v50 = vld [vmem:[#allocation5 + $0xb8] sm:$0xff] }
  0x37   :  { %7902 = vmatpush3.msra.mxu0 %v11477_v15  ;;  %7937 = vmatpush3.msra.mxu1 %v11479_v16  ;;  %v11612_v49 = vld [vmem:[#allocation5 + $0x140] sm:$0xff]  ;;  %v11620_v51 = vld [vmem:[#allocation5 + $0x138] sm:$0xff]  ;;  %v11626_v52 = vld [vmem:[#allocation5 + $0xb0] sm:$0xff] }
  0x38   :  { %7903 = vmatprep.subr.mxu0 %v15947_v0  ;;  %7938 = vmatprep.subr.mxu1 %v15947_v0  ;;  %16129 = vst [vmem:[#allocation19_spill] sm:$0xff] %v11626_v52  ;;  %v11628_v53 = vld [vmem:[#allocation5 + $0x130] sm:$0xff]  ;;  %v11634_v54 = vld [vmem:[#allocation5 + $0xa8] sm:$0xff]  ;;  %v11642_v56 = vld [vmem:[#allocation5 + $0xa0] sm:$0xff] }
  0x39   :  { %7904 = vmatpush3.msra.mxu0 %v11485_v17  ;;  %7939 = vmatpush3.msra.mxu1 %v11487_v18  ;;  %16130 = vst [vmem:[#allocation20_spill] sm:$0xff] %v11634_v54  ;;  %v11636_v55 = vld [vmem:[#allocation5 + $0x128] sm:$0xff]  ;;  %16132 = vst [vmem:[#allocation22_spill] sm:$0xff] %v11642_v56  ;;  %v11644_v57 = vld [vmem:[#allocation5 + $0x120] sm:$0xff] }
  0x3a   :  { %7905 = vmatprep.subr.mxu0 %v15947_v0  ;;  %7940 = vmatprep.subr.mxu1 %v15947_v0  ;;  %16131 = vst [vmem:[#allocation21_spill] sm:$0xff] %v11636_v55  ;;  %16133 = vst [vmem:[#allocation23_spill] sm:$0xff] %v11644_v57  ;;  %v11650_v58 = vld [vmem:[#allocation5 + $0x98] sm:$0xff]  ;;  %v11666_v60 = vld [vmem:[#allocation5 + $0x90] sm:$0xff] }
  0x3b   :  { %7906 = vmatpush3.msra.mxu0 %v11493_v19  ;;  %7941 = vmatpush3.msra.mxu1 %v11495_v20  ;;  %16134 = vst [vmem:[#allocation24_spill] sm:$0xff] %v11650_v58  ;;  %v11652_v59 = vld [vmem:[#allocation5 + $0x118] sm:$0xff]  ;;  %16136 = vst [vmem:[#allocation26_spill] sm:$0xff] %v11666_v60  ;;  %v11668_v61 = vld [vmem:[#allocation5 + $0x110] sm:$0xff] }
  0x3c   :  { %7907 = vmatprep.subr.mxu0 %v15947_v0  ;;  %7942 = vmatprep.subr.mxu1 %v15947_v0  ;;  %16135 = vst [vmem:[#allocation25_spill] sm:$0xff] %v11652_v59  ;;  %16137 = vst [vmem:[#allocation27_spill] sm:$0xff] %v11668_v61  ;;  %v11674_v62 = vld [vmem:[#allocation5 + $0x88] sm:$0xff] }
  0x3d   :  { %7908 = vmatpush3.msra.mxu0 %v11501_v21  ;;  %7943 = vmatpush3.msra.mxu1 %v11503_v22  ;;  %16138 = vst [vmem:[#allocation28_spill] sm:$0xff] %v11674_v62  ;;  %v11676_v63 = vld [vmem:[#allocation5 + $0x108] sm:$0xff] }
  0x3e   :  { %7909 = vmatprep.subr.mxu0 %v15947_v0  ;;  %7944 = vmatprep.subr.mxu1 %v15947_v0  ;;  %16139 = vst [vmem:[#allocation29_spill] sm:$0xff] %v11676_v63 }
  0x3f   :  { %7910 = vmatpush3.msra.mxu0 %v11511_v24  ;;  %7945 = vmatpush3.msra.mxu1 %v11513_v25 }
  0x40   :  { %7911 = vmatprep.subr.mxu0 %v15947_v0  ;;  %7946 = vmatprep.subr.mxu1 %v15947_v0 }
  0x41   :  { %7912 = vmatpush3.msra.mxu0 %v11520_v26  ;;  %7947 = vmatpush3.msra.mxu1 %v11522_v27 }
  0x42   :  { %7913 = vmatprep.subr.mxu0 %v15947_v0  ;;  %7948 = vmatprep.subr.mxu1 %v15947_v0 }
  0x43   :  { %7914 = vmatpush3.msra.mxu0 %v11528_v28  ;;  %7949 = vmatpush3.msra.mxu1 %v11530_v29 }
  0x44   :  { %7915 = vmatprep.subr.mxu0 %v15947_v0  ;;  %7950 = vmatprep.subr.mxu1 %v15947_v0 }
  0x45   :  { %7916 = vmatpush3.msra.mxu0 %v11536_v30  ;;  %7951 = vmatpush3.msra.mxu1 %v11538_v31 }
  0x46   :  { %7917 = vmatprep.subr.mxu0 %v15947_v0  ;;  %7952 = vmatprep.subr.mxu1 %v15947_v0 }
  0x47   :  { %7918 = vmatpush3.msra.mxu0 %v11544_v32  ;;  %7953 = vmatpush3.msra.mxu1 %v11546_v33 }
  0x48   :  { %7920 = vmatmul.mubr.f32.vlgmr.msra.gmra.mxu0 %v15947_v0  ;;  %7955 = vmatmul.mubr.f32.vlgmr.msra.gmra.mxu1 %v15947_v0 }
  0x49   :  { %7957 = vmatprep.subr.mxu0 %v15947_v0  ;;  %7992 = vmatprep.subr.mxu1 %v15947_v0 }
  0x4a   :  { %7958 = vmatpush3.msra.mxu0 %v11554_v34  ;;  %7993 = vmatpush3.msra.mxu1 %v11556_v35 }
  0x4b   :  { %7959 = vmatprep.subr.mxu0 %v15947_v0  ;;  %7994 = vmatprep.subr.mxu1 %v15947_v0 }
  0x4c   :  { %7960 = vmatpush3.msra.mxu0 %v11562_v36  ;;  %7995 = vmatpush3.msra.mxu1 %v11564_v37 }
  0x4d   :  { %7961 = vmatprep.subr.mxu0 %v15947_v0  ;;  %7996 = vmatprep.subr.mxu1 %v15947_v0 }
  0x4e   :  { %7962 = vmatpush3.msra.mxu0 %v11570_v38  ;;  %7997 = vmatpush3.msra.mxu1 %v11572_v39 }
  0x4f   :  { %7963 = vmatprep.subr.mxu0 %v15947_v0  ;;  %7998 = vmatprep.subr.mxu1 %v15947_v0 }
  0x50   :  { %7964 = vmatpush3.msra.mxu0 %v11578_v40  ;;  %7999 = vmatpush3.msra.mxu1 %v11580_v41 }
  0x51   :  { %7965 = vmatprep.subr.mxu0 %v15947_v0  ;;  %8000 = vmatprep.subr.mxu1 %v15947_v0 }
  0x52   :  { %7966 = vmatpush3.msra.mxu0 %v11586_v42  ;;  %8001 = vmatpush3.msra.mxu1 %v11588_v43 }
  0x53   :  { %7967 = vmatprep.subr.mxu0 %v15947_v0  ;;  %8002 = vmatprep.subr.mxu1 %v15947_v0 }
  0x54   :  { %7968 = vmatpush3.msra.mxu0 %v11594_v44  ;;  %8003 = vmatpush3.msra.mxu1 %v11596_v45 }
  0x55   :  { %7969 = vmatprep.subr.mxu0 %v15947_v0  ;;  %8004 = vmatprep.subr.mxu1 %v15947_v0 }
  0x56   :  { %7970 = vmatpush3.msra.mxu0 %v11602_v46  ;;  %8005 = vmatpush3.msra.mxu1 %v11604_v47 }
  0x57   :  { %7971 = vmatprep.subr.mxu0 %v15947_v0  ;;  %8006 = vmatprep.subr.mxu1 %v15947_v0 }
  0x58   :  { %7972 = vmatpush3.msra.mxu0 %v11610_v48  ;;  %8007 = vmatpush3.msra.mxu1 %v11612_v49 }
  0x59   :  { %7973 = vmatprep.subr.mxu0 %v15947_v0  ;;  %8008 = vmatprep.subr.mxu1 %v15947_v0 }
  0x5a   :  { %7974 = vmatpush3.msra.mxu0 %v11618_v50  ;;  %8009 = vmatpush3.msra.mxu1 %v11620_v51 }
  0x5b   :  { %7975 = vmatprep.subr.mxu0 %v15947_v0  ;;  %8010 = vmatprep.subr.mxu1 %v15947_v0 }
  0x5c   :  { %7976 = vmatpush3.msra.mxu0 %v11626_v52  ;;  %8011 = vmatpush3.msra.mxu1 %v11628_v53 }
  0x5d   :  { %7977 = vmatprep.subr.mxu0 %v15947_v0  ;;  %8012 = vmatprep.subr.mxu1 %v15947_v0 }
  0x5e   :  { %7978 = vmatpush3.msra.mxu0 %v11634_v54  ;;  %8013 = vmatpush3.msra.mxu1 %v11636_v55  ;;  %v16142_v55 = vmov 0.0  }
  0x5f   :  { %7979 = vmatprep.subr.mxu0 %v15947_v0  ;;  %8014 = vmatprep.subr.mxu1 %v15947_v0 }
  0x60   :  { %7980 = vmatpush3.msra.mxu0 %v11642_v56  ;;  %8015 = vmatpush3.msra.mxu1 %v11644_v57 }
  0x61   :  { %7981 = vmatprep.subr.mxu0 %v15947_v0  ;;  %8016 = vmatprep.subr.mxu1 %v15947_v0 }
  0x62   :  { %7982 = vmatpush3.msra.mxu0 %v11650_v58  ;;  %8017 = vmatpush3.msra.mxu1 %v11652_v59  ;;  %v11682_v58 = vld [vmem:[#allocation5 + $0x80] sm:$0xff] }
  0x63   :  { %7983 = vmatprep.subr.mxu0 %v15947_v0  ;;  %8018 = vmatprep.subr.mxu1 %v15947_v0  ;;  %16140 = vst [vmem:[#allocation30_spill] sm:$0xff] %v11682_v58 }
  0x64   :  { %7989 = vmatprep.mubr.msk.f32.mxu0 %vm11369_vm0, %v15947_v0  ;;  %8024 = vmatprep.mubr.msk.f32.mxu1 %vm11369_vm0, %v15947_v0 }
  0x65   :  { %7984 = vmatpush3.msra.mxu0 %v11666_v60  ;;  %8019 = vmatpush3.msra.mxu1 %v11668_v61  ;;  %v11684_v60 = vld [vmem:[#allocation5 + $0x100] sm:$0xff] }
  0x66   :  { %7985 = vmatprep.subr.mxu0 %v15947_v0  ;;  %8020 = vmatprep.subr.mxu1 %v15947_v0  ;;  %16141 = vst [vmem:[#allocation31_spill] sm:$0xff] %v11684_v60 }
  0x67   :  { %7986 = vmatpush3.msra.mxu0 %v11674_v62  ;;  %8021 = vmatpush3.msra.mxu1 %v11676_v63  ;;  %v11693_v62 = vld [vmem:[%s15924_s3 + $0x1] ss:$0 sm:$0xff]  ;;  %v11698_v63 = vld [vmem:[%s15924_s3 + $0x2] ss:$0 sm:$0xff] }
  0x68   :  { %7987 = vmatprep.subr.mxu0 %v15947_v0  ;;  %8022 = vmatprep.subr.mxu1 %v15947_v0 }
  0x69   :  { %7988 = vmatpush3.msra.mxu0 %v11682_v58  ;;  %8023 = vmatpush3.msra.mxu1 %v11684_v60 }
  0x6a   :  { %8062 = vmatprep.subr.mxu1 %v15947_v0  ;;  %8027 = vmatprep.subr.mxu0 %v15947_v0 }
 0x108   :  { %v152_v61 = vpop.f32.mrf.mxu0  ;;  %v248_v59 = vpop.f32.mrf.mxu1 }
 0x109   :  { %v153_v58 = vadd.f32 %v11693_v62, %v152_v61  ;;  %v11702_v60 = vadd.f32 %v11698_v63, %v248_v59 }
 0x10a   :  { %v7921_v56 = vpop.f32.mrf.mxu0  ;;  %v7956_v57 = vpop.f32.mrf.mxu1 }
 0x10b   :  { %v156_v0 = vsub.f32 %v11507_v23, %v153_v58  ;;  %v252_v54 = vsub.f32 0.0, %v11702_v60  ;;  %v16145_v60 = vld [vmem:[#allocation23_spill] sm:$0xff] }
 0x10d   :  { %7990 = vmatmul.mubr.f32.vlgmr.msra.gmra.mxu0 %v156_v0  ;;  %8025 = vmatmul.mubr.f32.vlgmr.msra.gmra.mxu1 %v252_v54  ;;  %v253_v0 = vsub.f32 0.0, %v252_v54  ;;  %v16144_v54 = vld [vmem:[#allocation20_spill] sm:$0xff] }
 0x10e   :  { %8063 = vmatpush3.msra.mxu1 %v11427_v2  ;;  %8028 = vmatpush3.msra.mxu0 %v11425_v1 }
 0x10f   :  { %8064 = vmatprep.subr.mxu1 %v16142_v55  ;;  %8029 = vmatprep.subr.mxu0 %v16142_v55 }
 0x110   :  { %8065 = vmatpush3.msra.mxu1 %v11433_v4  ;;  %8030 = vmatpush3.msra.mxu0 %v11429_v3 }
 0x111   :  { %8066 = vmatprep.subr.mxu1 %v16142_v55  ;;  %8031 = vmatprep.subr.mxu0 %v16142_v55 }
 0x112   :  { %8067 = vmatpush3.msra.mxu1 %v11439_v6  ;;  %8032 = vmatpush3.msra.mxu0 %v11437_v5 }
 0x113   :  { %8068 = vmatprep.subr.mxu1 %v16142_v55  ;;  %8033 = vmatprep.subr.mxu0 %v16142_v55 }
 0x114   :  { %8069 = vmatpush3.msra.mxu1 %v11447_v8  ;;  %8034 = vmatpush3.msra.mxu0 %v11445_v7 }
 0x115   :  { %8070 = vmatprep.subr.mxu1 %v16142_v55  ;;  %8035 = vmatprep.subr.mxu0 %v16142_v55 }
 0x116   :  { %8071 = vmatpush3.msra.mxu1 %v11455_v10  ;;  %8036 = vmatpush3.msra.mxu0 %v11453_v9 }
 0x117   :  { %8072 = vmatprep.subr.mxu1 %v16142_v55  ;;  %8037 = vmatprep.subr.mxu0 %v16142_v55 }
 0x118   :  { %8073 = vmatpush3.msra.mxu1 %v11463_v12  ;;  %8038 = vmatpush3.msra.mxu0 %v11461_v11 }
 0x119   :  { %8074 = vmatprep.subr.mxu1 %v16142_v55  ;;  %8039 = vmatprep.subr.mxu0 %v16142_v55 }
 0x11a   :  { %8075 = vmatpush3.msra.mxu1 %v11471_v14  ;;  %8040 = vmatpush3.msra.mxu0 %v11469_v13 }
 0x11b   :  { %8076 = vmatprep.subr.mxu1 %v16142_v55  ;;  %8041 = vmatprep.subr.mxu0 %v16142_v55 }
 0x11c   :  { %8077 = vmatpush3.msra.mxu1 %v11479_v16  ;;  %8042 = vmatpush3.msra.mxu0 %v11477_v15 }
 0x11d   :  { %8078 = vmatprep.subr.mxu1 %v16142_v55  ;;  %8043 = vmatprep.subr.mxu0 %v16142_v55 }
 0x11e   :  { %8079 = vmatpush3.msra.mxu1 %v11487_v18  ;;  %8044 = vmatpush3.msra.mxu0 %v11485_v17 }
 0x11f   :  { %8080 = vmatprep.subr.mxu1 %v16142_v55  ;;  %8045 = vmatprep.subr.mxu0 %v16142_v55 }
 0x120   :  { %8081 = vmatpush3.msra.mxu1 %v11495_v20  ;;  %8046 = vmatpush3.msra.mxu0 %v11493_v19 }
 0x121   :  { %8082 = vmatprep.subr.mxu1 %v16142_v55  ;;  %8047 = vmatprep.subr.mxu0 %v16142_v55 }
 0x122   :  { %8083 = vmatpush3.msra.mxu1 %v11503_v22  ;;  %8048 = vmatpush3.msra.mxu0 %v11501_v21 }
 0x123   :  { %8084 = vmatprep.subr.mxu1 %v16142_v55  ;;  %8049 = vmatprep.subr.mxu0 %v16142_v55 }
 0x124   :  { %8085 = vmatpush3.msra.mxu1 %v11513_v25  ;;  %8050 = vmatpush3.msra.mxu0 %v11511_v24 }
 0x125   :  { %8086 = vmatprep.subr.mxu1 %v16142_v55  ;;  %8051 = vmatprep.subr.mxu0 %v16142_v55 }
 0x126   :  { %8087 = vmatpush3.msra.mxu1 %v11522_v27  ;;  %8052 = vmatpush3.msra.mxu0 %v11520_v26 }
 0x127   :  { %8088 = vmatprep.subr.mxu1 %v16142_v55  ;;  %8053 = vmatprep.subr.mxu0 %v16142_v55 }
 0x128   :  { %8089 = vmatpush3.msra.mxu1 %v11530_v29  ;;  %8054 = vmatpush3.msra.mxu0 %v11528_v28 }
 0x129   :  { %8090 = vmatprep.subr.mxu1 %v16142_v55  ;;  %8055 = vmatprep.subr.mxu0 %v16142_v55 }
 0x12a   :  { %8091 = vmatpush3.msra.mxu1 %v11538_v31  ;;  %8056 = vmatpush3.msra.mxu0 %v11536_v30 }
 0x12b   :  { %8092 = vmatprep.subr.mxu1 %v16142_v55  ;;  %8094 = vmatprep.mubr.msk.f32.mxu1 %vm11369_vm0, %v16142_v55 }
 0x12c   :  { %8093 = vmatpush3.msra.mxu1 %v11546_v33  ;;  %8057 = vmatprep.subr.mxu0 %v16142_v55 }
 0x12d   :  { %8058 = vmatpush3.msra.mxu0 %v11544_v32  ;;  %8059 = vmatprep.mubr.msk.f32.mxu0 %vm11369_vm0, %v16142_v55 }
 0x12e   :  { %8132 = vmatprep.subr.mxu1 %v16142_v55  ;;  %8097 = vmatprep.subr.mxu0 %v16142_v55 }
 0x1cd   :  { %v337_v56 = vpop.f32.mrf.mxu0  ;;  %v427_v57 = vpop.f32.mrf.mxu1 }
 0x1ce   :  { %v341_v58 = vadd.f32 %v337_v56, %v253_v0  ;;  %v11778_v59 = vmul.f32 0.1, %v427_v57  ;;  %v16146_v0 = vld [vmem:[#allocation22_spill] sm:$0xff]  ;;  %v16147_v56 = vld [vmem:[#allocation25_spill] sm:$0xff]  ;;  %v16148_v57 = vld [vmem:[#allocation24_spill] sm:$0xff] }
 0x1cf   :  { %v7991_v61 = vpop.f32.mrf.mxu0  ;;  %v8026_v30 = vpop.f32.mrf.mxu1 }
 0x1d0   :  { %v11780_v33 = vmul.f32 0.1, %v341_v58  ;;  %10767 = vtanh.f32 %v11778_v59  ;;  %v16143_v30 = vld [vmem:[#allocation21_spill] sm:$0xff]  ;;  %v16149_v58 = vld [vmem:[#allocation27_spill] sm:$0xff]  ;;  %v16150_v61 = vld [vmem:[#allocation26_spill] sm:$0xff] }
 0x1d2   :  { %10769 = vtanh.f32 %v11780_v33 }
 0x1dd   :  { %v11784_v32 = vpop.eup %10767 }
 0x1de   :  { %8095 = vmatmul.mubr.f32.vlgmr.msra.gmra.mxu1 %v11784_v32 }
 0x1df   :  { %v11787_v28 = vpop.eup %10769  ;;  %8133 = vmatpush3.msra.mxu1 %v11556_v35  ;;  %8164 = vmatprep.mubr.msk.f32.mxu1 %vm11369_vm0, %v16142_v55 }
 0x1e0   :  { %8060 = vmatmul.mubr.f32.vlgmr.msra.gmra.mxu0 %v11787_v28  ;;  %8134 = vmatprep.subr.mxu1 %v16142_v55 }
 0x1e1   :  { %8098 = vmatpush3.msra.mxu0 %v11554_v34  ;;  %8135 = vmatpush3.msra.mxu1 %v11564_v37 }
 0x1e2   :  { %8099 = vmatprep.subr.mxu0 %v16142_v55  ;;  %8136 = vmatprep.subr.mxu1 %v16142_v55 }
 0x1e3   :  { %8100 = vmatpush3.msra.mxu0 %v11562_v36  ;;  %8137 = vmatpush3.msra.mxu1 %v11572_v39 }
 0x1e4   :  { %8101 = vmatprep.subr.mxu0 %v16142_v55  ;;  %8138 = vmatprep.subr.mxu1 %v16142_v55 }
 0x1e5   :  { %8102 = vmatpush3.msra.mxu0 %v11570_v38  ;;  %8139 = vmatpush3.msra.mxu1 %v11580_v41 }
 0x1e6   :  { %8103 = vmatprep.subr.mxu0 %v16142_v55  ;;  %8140 = vmatprep.subr.mxu1 %v16142_v55 }
 0x1e7   :  { %8104 = vmatpush3.msra.mxu0 %v11578_v40  ;;  %8141 = vmatpush3.msra.mxu1 %v11588_v43 }
 0x1e8   :  { %8105 = vmatprep.subr.mxu0 %v16142_v55  ;;  %8142 = vmatprep.subr.mxu1 %v16142_v55 }
 0x1e9   :  { %8106 = vmatpush3.msra.mxu0 %v11586_v42  ;;  %8143 = vmatpush3.msra.mxu1 %v11596_v45 }
 0x1ea   :  { %8107 = vmatprep.subr.mxu0 %v16142_v55  ;;  %8144 = vmatprep.subr.mxu1 %v16142_v55 }
 0x1eb   :  { %8108 = vmatpush3.msra.mxu0 %v11594_v44  ;;  %8145 = vmatpush3.msra.mxu1 %v11604_v47 }
 0x1ec   :  { %8109 = vmatprep.subr.mxu0 %v16142_v55  ;;  %8146 = vmatprep.subr.mxu1 %v16142_v55 }
 0x1ed   :  { %8110 = vmatpush3.msra.mxu0 %v11602_v46  ;;  %8147 = vmatpush3.msra.mxu1 %v11612_v49 }
 0x1ee   :  { %8111 = vmatprep.subr.mxu0 %v16142_v55  ;;  %8148 = vmatprep.subr.mxu1 %v16142_v55 }
 0x1ef   :  { %8112 = vmatpush3.msra.mxu0 %v11610_v48  ;;  %8149 = vmatpush3.msra.mxu1 %v11620_v51 }
 0x1f0   :  { %8113 = vmatprep.subr.mxu0 %v16142_v55  ;;  %8150 = vmatprep.subr.mxu1 %v16142_v55 }
 0x1f1   :  { %8114 = vmatpush3.msra.mxu0 %v11618_v50  ;;  %8151 = vmatpush3.msra.mxu1 %v11628_v53 }
 0x1f2   :  { %8115 = vmatprep.subr.mxu0 %v16142_v55  ;;  %8152 = vmatprep.subr.mxu1 %v16142_v55 }
 0x1f3   :  { %8116 = vmatpush3.msra.mxu0 %v11626_v52  ;;  %8153 = vmatpush3.msra.mxu1 %v16143_v30 }
 0x1f4   :  { %8117 = vmatprep.subr.mxu0 %v16142_v55  ;;  %8154 = vmatprep.subr.mxu1 %v16142_v55 }
 0x1f5   :  { %8118 = vmatpush3.msra.mxu0 %v16144_v54  ;;  %8155 = vmatpush3.msra.mxu1 %v16145_v60  ;;  %v16151_v54 = vld [vmem:[#allocation29_spill] sm:$0xff] }
 0x1f6   :  { %8119 = vmatprep.subr.mxu0 %v16142_v55  ;;  %8156 = vmatprep.subr.mxu1 %v16142_v55 }
 0x1f7   :  { %8120 = vmatpush3.msra.mxu0 %v16146_v0  ;;  %8157 = vmatpush3.msra.mxu1 %v16147_v56  ;;  %v16152_v0 = vld [vmem:[#allocation28_spill] sm:$0xff]  ;;  %v16153_v56 = vld [vmem:[#allocation31_spill] sm:$0xff] }
 0x1f8   :  { %8121 = vmatprep.subr.mxu0 %v16142_v55  ;;  %8158 = vmatprep.subr.mxu1 %v16142_v55 }
 0x1f9   :  { %8122 = vmatpush3.msra.mxu0 %v16148_v57  ;;  %8159 = vmatpush3.msra.mxu1 %v16149_v58  ;;  %v16154_v57 = vld [vmem:[#allocation30_spill] sm:$0xff] }
 0x1fa   :  { %8123 = vmatprep.subr.mxu0 %v16142_v55  ;;  %8160 = vmatprep.subr.mxu1 %v16142_v55 }
 0x1fb   :  { %8124 = vmatpush3.msra.mxu0 %v16150_v61  ;;  %8161 = vmatpush3.msra.mxu1 %v16151_v54 }
 0x1fc   :  { %8125 = vmatprep.subr.mxu0 %v16142_v55  ;;  %8162 = vmatprep.subr.mxu1 %v16142_v55 }
 0x1fd   :  { %8126 = vmatpush3.msra.mxu0 %v16152_v0  ;;  %8163 = vmatpush3.msra.mxu1 %v16153_v56 }
 0x1fe   :  { %8127 = vmatprep.subr.mxu0 %v16142_v55  ;;  %8129 = vmatprep.mubr.msk.f32.mxu0 %vm11369_vm0, %v16142_v55 }
 0x1ff   :  { %8128 = vmatpush3.msra.mxu0 %v16154_v57  ;;  %8202 = vmatprep.subr.mxu1 %v16142_v55 }
 0x200   :  { %8167 = vmatprep.subr.mxu0 %v16142_v55 }
 0x29e   :  { %v577_v61 = vpop.f32.mrf.mxu1 }
 0x29f   :  { %v578_v54 = vadd.f32 %v11698_v63, %v577_v61  ;;  %v12082_v61 = vld [vmem:[#allocation7 + $0x140] sm:$0xff] }
 0x2a0   :  { %v500_v58 = vpop.f32.mrf.mxu0  ;;  %v8096_v60 = vpop.f32.mrf.mxu1 }
 0x2a1   :  { %v11860_v0 = vsub.f32 %v11780_v33, %v578_v54  ;;  %v501_v56 = vadd.f32 %v11693_v62, %v500_v58  ;;  %v12058_v54 = vld [vmem:[#allocation7 + $0x158] sm:$0xff]  ;;  %v12063_v60 = vld [vmem:[#allocation7 + $0xe8] sm:$0xff] }
 0x2a2   :  { %v8061_v52 = vpop.f32.mrf.mxu0  ;;  %v12079_v58 = vld [vmem:[#allocation7 + $0xd8] sm:$0xff] }
 0x2a3   :  { %v504_v30 = vsub.f32 %v11507_v23, %v501_v56  ;;  %8165 = vmatmul.mubr.f32.vlgmr.msra.gmra.mxu1 %v11860_v0  ;;  %v12037_v52 = vld [vmem:[#allocation7 + $0x170] sm:$0xff]  ;;  %v12071_v56 = vld [vmem:[#allocation7 + $0xe0] sm:$0xff] }
 0x2a4   :  { %8203 = vmatpush3.msra.mxu1 %v11427_v2  ;;  %8234 = vmatprep.mubr.msk.f32.mxu1 %vm11369_vm0, %v16142_v55  ;;  %v582_v2 = vmul.f32 %v11860_v0, %v11860_v0 }
 0x2a5   :  { %8130 = vmatmul.mubr.f32.vlgmr.msra.gmra.mxu0 %v504_v30  ;;  %v505_v57 = vmul.f32 %v504_v30, %v504_v30  ;;  %8204 = vmatprep.subr.mxu1 %v16142_v55  ;;  %v12055_v30 = vld [vmem:[#allocation7 + $0xf0] sm:$0xff] }
 0x2a6   :  { %8205 = vmatpush3.msra.mxu1 %v11433_v4  ;;  %8168 = vmatpush3.msra.mxu0 %v11425_v1  ;;  %v16155_v1 = vld [vmem:[#allocation15_spill] sm:$0xff]  ;;  %v16157_v4 = vld [vmem:[#allocation16_spill] sm:$0xff] }
 0x2a7   :  { %506 = vadd.xlane.f32.xlu0 %v505_v57  ;;  %8206 = vmatprep.subr.mxu1 %v16142_v55  ;;  %v12074_v57 = vld [vmem:[#allocation7 + $0x148] sm:$0xff] }
 0x2a8   :  { %8207 = vmatpush3.msra.mxu1 %v11439_v6  ;;  %8169 = vmatprep.subr.mxu0 %v16142_v55  ;;  %v734_v6 = vmul.f32 %v11784_v32, %v11784_v32  ;;  %v16162_v32 = vld [vmem:[#allocation20_spill] sm:$0xff] }
 0x2a9   :  { %8208 = vmatprep.subr.mxu1 %v16142_v55  ;;  %8170 = vmatpush3.msra.mxu0 %v11429_v3  ;;  %v16156_v3 = vld [vmem:[#allocation18_spill] sm:$0xff] }
 0x2aa   :  { %8209 = vmatpush3.msra.mxu1 %v11447_v8  ;;  %8171 = vmatprep.subr.mxu0 %v16142_v55  ;;  %v735_v8 = vsub.f32 1.0, %v734_v6  ;;  %v12103_v6 = vld [vmem:[#allocation7 + $0xc0] sm:$0xff] }
 0x2ab   :  { %583 = vadd.xlane.f32.xlu0 %v582_v2  ;;  %8210 = vmatprep.subr.mxu1 %v16142_v55  ;;  %v12087_v2 = vld [vmem:[#allocation7 + $0xd0] sm:$0xff] }
 0x2ac   :  { %8172 = vmatpush3.msra.mxu0 %v11437_v5  ;;  %8211 = vmatpush3.msra.mxu1 %v11455_v10  ;;  %v16158_v5 = vld [vmem:[#allocation17_spill] sm:$0xff] }
 0x2ad   :  { %8173 = vmatprep.subr.mxu0 %v16142_v55  ;;  %8212 = vmatprep.subr.mxu1 %v16142_v55 }
 0x2ae   :  { %8174 = vmatpush3.msra.mxu0 %v11445_v7  ;;  %8213 = vmatpush3.msra.mxu1 %v11463_v12  ;;  %v658_v7 = vmul.f32 %v11787_v28, %v11787_v28  ;;  %v16161_v28 = vld [vmem:[#allocation23_spill] sm:$0xff] }
 0x2af   :  { %8175 = vmatprep.subr.mxu0 %v16142_v55  ;;  %8214 = vmatprep.subr.mxu1 %v16142_v55 }
 0x2b0   :  { %8176 = vmatpush3.msra.mxu0 %v11453_v9  ;;  %8215 = vmatpush3.msra.mxu1 %v11471_v14 }
 0x2b1   :  { %8177 = vmatprep.subr.mxu0 %v16142_v55  ;;  %8216 = vmatprep.subr.mxu1 %v16142_v55 }
 0x2b2   :  { %8178 = vmatpush3.msra.mxu0 %v11461_v11  ;;  %8217 = vmatpush3.msra.mxu1 %v11479_v16  ;;  %v659_v11 = vsub.f32 1.0, %v658_v7  ;;  %v12106_v7 = vld [vmem:[#allocation7 + $0x128] sm:$0xff] }
 0x2b3   :  { %8179 = vmatprep.subr.mxu0 %v16142_v55  ;;  %8218 = vmatprep.subr.mxu1 %v16142_v55 }
 0x2b4   :  { %8180 = vmatpush3.msra.mxu0 %v11469_v13  ;;  %8219 = vmatpush3.msra.mxu1 %v11487_v18 }
 0x2b5   :  { %8181 = vmatprep.subr.mxu0 %v16142_v55  ;;  %8220 = vmatprep.subr.mxu1 %v16142_v55 }
 0x2b6   :  { %8182 = vmatpush3.msra.mxu0 %v11477_v15  ;;  %8221 = vmatpush3.msra.mxu1 %v11495_v20  ;;  %v587_v15 = vsub.f32 0.0, %v11860_v0  ;;  %v12066_v0 = vld [vmem:[#allocation7 + $0x150] sm:$0xff] }
 0x2b7   :  { %8183 = vmatprep.subr.mxu0 %v16142_v55  ;;  %8222 = vmatprep.subr.mxu1 %v16142_v55 }
 0x2b8   :  { %8184 = vmatpush3.msra.mxu0 %v11485_v17  ;;  %8223 = vmatpush3.msra.mxu1 %v11503_v22 }
 0x2b9   :  { %8185 = vmatprep.subr.mxu0 %v16142_v55  ;;  %8224 = vmatprep.subr.mxu1 %v16142_v55 }
 0x2ba   :  { %8186 = vmatpush3.msra.mxu0 %v11493_v19  ;;  %8225 = vmatpush3.msra.mxu1 %v11513_v25  ;;  %v16159_v25 = vld [vmem:[#allocation21_spill] sm:$0xff] }
 0x2bb   :  { %8187 = vmatprep.subr.mxu0 %v16142_v55  ;;  %8226 = vmatprep.subr.mxu1 %v16142_v55 }
 0x2bc   :  { %8188 = vmatpush3.msra.mxu0 %v11501_v21  ;;  %8227 = vmatpush3.msra.mxu1 %v11522_v27 }
 0x2bd   :  { %8189 = vmatprep.subr.mxu0 %v16142_v55  ;;  %8228 = vmatprep.subr.mxu1 %v16142_v55 }
 0x2be   :  { %8190 = vmatpush3.msra.mxu0 %v11511_v24  ;;  %8229 = vmatpush3.msra.mxu1 %v11530_v29 }
 0x2bf   :  { %8191 = vmatprep.subr.mxu0 %v16142_v55  ;;  %8230 = vmatprep.subr.mxu1 %v16142_v55 }
 0x2c0   :  { %8192 = vmatpush3.msra.mxu0 %v11520_v26  ;;  %8231 = vmatpush3.msra.mxu1 %v11538_v31  ;;  %v16160_v26 = vld [vmem:[#allocation19_spill] sm:$0xff] }
 0x2c1   :  { %8193 = vmatprep.subr.mxu0 %v16142_v55  ;;  %8232 = vmatprep.subr.mxu1 %v16142_v55 }
 0x2c2   :  { %8194 = vmatpush3.msra.mxu0 %v16155_v1  ;;  %8233 = vmatpush3.msra.mxu1 %v16156_v3  ;;  %v12090_v1 = vld [vmem:[#allocation7 + $0x138] sm:$0xff] }
 0x2c3   :  { %8195 = vmatprep.subr.mxu0 %v16142_v55  ;;  %8199 = vmatprep.mubr.msk.f32.mxu0 %vm11369_vm0, %v16142_v55 }
 0x2c4   :  { %8196 = vmatpush3.msra.mxu0 %v16157_v4  ;;  %8272 = vmatprep.subr.mxu1 %v16142_v55  ;;  %v12095_v4 = vld [vmem:[#allocation7 + $0xc8] sm:$0xff] }
 0x2c5   :  { %8197 = vmatprep.subr.mxu0 %v16142_v55 }
 0x2c6   :  { %8198 = vmatpush3.msra.mxu0 %v16158_v5  ;;  %v12098_v5 = vld [vmem:[#allocation7 + $0x130] sm:$0xff] }
 0x2c7   :  { %8237 = vmatprep.subr.mxu0 %v16142_v55 }
 0x363   :  { %v730_v9 = vpop.f32.mrf.mxu1 }
 0x364   :  { %v736_v10 = vmul.f32 %v735_v8, %v730_v9  ;;  %v12111_v8 = vld [vmem:[#allocation7 + $0xb8] sm:$0xff]  ;;  %v12114_v9 = vld [vmem:[#allocation7 + $0x120] sm:$0xff] }
 0x365   :  { %v654_v12 = vpop.f32.mrf.mxu0  ;;  %v8166_v13 = vpop.f32.mrf.mxu1 }
 0x366   :  { %v737_v14 = vmul.f32 0.1, %v736_v10  ;;  %v660_v16 = vmul.f32 %v659_v11, %v654_v12  ;;  %v12119_v10 = vld [vmem:[#allocation7 + $0xb0] sm:$0xff]  ;;  %v12125_v11 = vld [vmem:[#allocation7 + $0xa8] sm:$0xff]  ;;  %v12131_v12 = vld [vmem:[#allocation7 + $0xa0] sm:$0xff] }
 0x367   :  { %v8131_v17 = vpop.f32.mrf.mxu0  ;;  %16173 = vst [vmem:[#allocation18_spill] sm:$0xff] %v12119_v10  ;;  %16174 = vst [vmem:[#allocation16_spill] sm:$0xff] %v12125_v11 }
 0x368   :  { %v11941_v18 = vadd.f32 %v737_v14, %v11778_v59  ;;  %v661_v19 = vadd.f32 %v660_v16, %v587_v15  ;;  %16175 = vst [vmem:[#allocation17_spill] sm:$0xff] %v12131_v12  ;;  %v507_v14 = vpop.xlane.xlu0 %506 }
 0x36a   :  { %10771 = vtanh.f32 %v11941_v18  ;;  %v662_v20 = vmul.f32 0.1, %v661_v19 }
 0x36c   :  { %v11945_v21 = vadd.f32 %v662_v20, %v11780_v33  ;;  %v16163_v33 = vld [vmem:[#allocation25_spill] sm:$0xff]  ;;  %v584_v16 = vpop.xlane.xlu0 %583 }
 0x36d   :  { %v585_v19 = vmul.f32 0.5, %v584_v16  ;;  %v12198_v16 = vld [vmem:[#allocation5 + $0xf8] sm:$0xff] }
 0x36e   :  { %10773 = vtanh.f32 %v11945_v21 }
 0x377   :  { %v11948_v22 = vpop.eup %10771 }
 0x378   :  { %8235 = vmatmul.mubr.f32.vlgmr.msra.gmra.mxu1 %v11948_v22 }
 0x379   :  { %8273 = vmatpush3.msra.mxu1 %v11556_v35  ;;  %8304 = vmatprep.mubr.msk.f32.mxu1 %vm11369_vm0, %v16142_v55  ;;  %v16165_v35 = vld [vmem:[#allocation27_spill] sm:$0xff] }
 0x37a   :  { %8274 = vmatprep.subr.mxu1 %v16142_v55 }
 0x37b   :  { %v11955_v24 = vpop.eup %10773  ;;  %8275 = vmatpush3.msra.mxu1 %v11564_v37  ;;  %v16166_v37 = vld [vmem:[#allocation24_spill] sm:$0xff] }
 0x37c   :  { %8200 = vmatmul.mubr.f32.vlgmr.msra.gmra.mxu0 %v11955_v24  ;;  %8276 = vmatprep.subr.mxu1 %v16142_v55 }
 0x37d   :  { %8238 = vmatpush3.msra.mxu0 %v11554_v34  ;;  %8277 = vmatpush3.msra.mxu1 %v11572_v39  ;;  %v16164_v34 = vld [vmem:[#allocation22_spill] sm:$0xff] }
 0x37e   :  { %8239 = vmatprep.subr.mxu0 %v16142_v55  ;;  %8278 = vmatprep.subr.mxu1 %v16142_v55  ;;  %v16168_v39 = vld [vmem:[#allocation26_spill] sm:$0xff] }
 0x37f   :  { %8240 = vmatpush3.msra.mxu0 %v11562_v36  ;;  %8279 = vmatpush3.msra.mxu1 %v11580_v41  ;;  %v12006_v36 = vld [vmem:[#allocation9 + $0x10] sm:$0xff]  ;;  %v16170_v41 = vld [vmem:[#allocation28_spill] sm:$0xff] }
 0x380   :  { %8241 = vmatprep.subr.mxu0 %v16142_v55  ;;  %8280 = vmatprep.subr.mxu1 %v16142_v55 }
 0x381   :  { %8242 = vmatpush3.msra.mxu0 %v11570_v38  ;;  %8281 = vmatpush3.msra.mxu1 %v11588_v43  ;;  %v16167_v38 = vld [vmem:[#allocation29_spill] sm:$0xff] }
 0x382   :  { %8243 = vmatprep.subr.mxu0 %v16142_v55  ;;  %8282 = vmatprep.subr.mxu1 %v16142_v55 }
 0x383   :  { %8244 = vmatpush3.msra.mxu0 %v11578_v40  ;;  %8283 = vmatpush3.msra.mxu1 %v11596_v45  ;;  %v16169_v40 = vld [vmem:[#allocation31_spill] sm:$0xff] }
 0x384   :  { %8245 = vmatprep.subr.mxu0 %v16142_v55  ;;  %8284 = vmatprep.subr.mxu1 %v16142_v55 }
 0x385   :  { %8246 = vmatpush3.msra.mxu0 %v11586_v42  ;;  %8285 = vmatpush3.msra.mxu1 %v11604_v47  ;;  %v16171_v42 = vld [vmem:[#allocation30_spill] sm:$0xff] }
 0x386   :  { %8247 = vmatprep.subr.mxu0 %v16142_v55  ;;  %8286 = vmatprep.subr.mxu1 %v16142_v55 }
 0x387   :  { %8248 = vmatpush3.msra.mxu0 %v11594_v44  ;;  %8287 = vmatpush3.msra.mxu1 %v11612_v49 }
 0x388   :  { %8249 = vmatprep.subr.mxu0 %v16142_v55  ;;  %8288 = vmatprep.subr.mxu1 %v16142_v55 }
 0x389   :  { %8250 = vmatpush3.msra.mxu0 %v11602_v46  ;;  %8289 = vmatpush3.msra.mxu1 %v11620_v51 }
 0x38a   :  { %8251 = vmatprep.subr.mxu0 %v16142_v55  ;;  %8290 = vmatprep.subr.mxu1 %v16142_v55 }
 0x38b   :  { %8252 = vmatpush3.msra.mxu0 %v11610_v48  ;;  %8291 = vmatpush3.msra.mxu1 %v11628_v53 }
 0x38c   :  { %8253 = vmatprep.subr.mxu0 %v16142_v55  ;;  %8292 = vmatprep.subr.mxu1 %v16142_v55 }
 0x38d   :  { %8254 = vmatpush3.msra.mxu0 %v11618_v50  ;;  %8293 = vmatpush3.msra.mxu1 %v16159_v25  ;;  %v12030_v50 = vld [vmem:[#allocation7 + $0x178] sm:$0xff]  ;;  %v508_v25 = vmul.f32 0.5, %v507_v14 }
 0x38e   :  { %8255 = vmatprep.subr.mxu0 %v16142_v55  ;;  %8294 = vmatprep.subr.mxu1 %v16142_v55  ;;  %16172 = vst [vmem:[#allocation15_spill] sm:$0xff] %v12030_v50 }
 0x38f   :  { %8256 = vmatpush3.msra.mxu0 %v16160_v26  ;;  %8295 = vmatpush3.msra.mxu1 %v16161_v28  ;;  %v586_v28 = vadd.f32 %v585_v19, %v508_v25  ;;  %v12206_v19 = vld [vmem:[#allocation5 + $0xf0] sm:$0xff]  ;;  %v12214_v25 = vld [vmem:[#allocation5 + $0xe8] sm:$0xff] }
 0x390   :  { %8257 = vmatprep.subr.mxu0 %v16142_v55  ;;  %8296 = vmatprep.subr.mxu1 %v16142_v55 }
 0x391   :  { %8258 = vmatpush3.msra.mxu0 %v16162_v32  ;;  %8297 = vmatpush3.msra.mxu1 %v16163_v33  ;;  %v1043_v32 = vmul.f32 %v11948_v22, %v11948_v22  ;;  %v15959_v33 = vmov 0.9  }
 0x392   :  { %8259 = vmatprep.subr.mxu0 %v16142_v55  ;;  %8298 = vmatprep.subr.mxu1 %v16142_v55  ;;  %v12041_v55 = vld [vmem:[#allocation7 + $0x168] sm:$0xff] }
 0x393   :  { %8260 = vmatpush3.msra.mxu0 %v16164_v34  ;;  %8299 = vmatpush3.msra.mxu1 %v16165_v35 }
 0x394   :  { %8261 = vmatprep.subr.mxu0 %v12006_v36  ;;  %8300 = vmatprep.subr.mxu1 %v12006_v36 }
 0x395   :  { %8262 = vmatpush3.msra.mxu0 %v16166_v37  ;;  %8301 = vmatpush3.msra.mxu1 %v16167_v38  ;;  %v1044_v37 = vsub.f32 1.0, %v1043_v32  ;;  %v12222_v32 = vld [vmem:[#allocation5 + $0xe0] sm:$0xff] }
 0x396   :  { %8263 = vmatprep.subr.mxu0 %v12006_v36  ;;  %8302 = vmatprep.subr.mxu1 %v12006_v36 }
 0x397   :  { %8264 = vmatpush3.msra.mxu0 %v16168_v39  ;;  %8303 = vmatpush3.msra.mxu1 %v16169_v40  ;;  %v967_v39 = vmul.f32 %v11955_v24, %v11955_v24 }
 0x398   :  { %8265 = vmatprep.subr.mxu0 %v12006_v36  ;;  %8269 = vmatprep.mubr.msk.f32.mxu0 %vm11369_vm0, %v12006_v36 }
 0x399   :  { %8266 = vmatpush3.msra.mxu0 %v16170_v41  ;;  %8342 = vmatprep.subr.mxu1 %v12006_v36 }
 0x39a   :  { %8267 = vmatprep.subr.mxu0 %v12006_v36 }
 0x39b   :  { %8268 = vmatpush3.msra.mxu0 %v16171_v42 }
 0x39c   :  { %8307 = vmatprep.subr.mxu0 %v12006_v36 }
 0x438   :  { %v883_v43 = vpop.f32.mrf.mxu1 }
 0x439   :  { %v884_v44 = vadd.f32 %v11698_v63, %v883_v43 }
 0x43a   :  { %v8236_v45 = vpop.f32.mrf.mxu1 }
 0x43b   :  { %v12026_v46 = vsub.f32 %v11945_v21, %v884_v44 }
 0x43c   :  { %v806_v47 = vpop.f32.mrf.mxu0 }
 0x43d   :  { %v807_v48 = vadd.f32 %v11693_v62, %v806_v47  ;;  %8305 = vmatmul.mubr.f32.vlgmr.msra.gmra.mxu1 %v12026_v46  ;;  %v12044_v62 = vld [vmem:[#allocation7 + $0xf8] sm:$0xff]  ;;  %v888_v59 = vmul.f32 %v12026_v46, %v12026_v46  ;;  %v968_v47 = vsub.f32 1.0, %v967_v39  ;;  %v896_v22 = vsub.f32 0.0, %v12026_v46  ;;  %v12187_v46 = vld [vmem:[#allocation5 + $0x170] sm:$0xff]  ;;  %v12233_v39 = vld [vmem:[#allocation5 + $0x140] sm:$0xff] }
 0x43e   :  { %v8201_v49 = vpop.f32.mrf.mxu0  ;;  %8343 = vmatpush3.msra.mxu1 %v12030_v50  ;;  %8374 = vmatprep.mubr.msk.f32.mxu1 %vm11369_vm0, %v12006_v36 }
 0x43f   :  { %v810_v51 = vsub.f32 %v11507_v23, %v807_v48  ;;  %8344 = vmatprep.subr.mxu1 %v12006_v36  ;;  %v12048_v23 = vld [vmem:[#allocation7 + $0x160] sm:$0xff] }
 0x440   :  { %8345 = vmatpush3.msra.mxu1 %v12037_v52 }
 0x441   :  { %8270 = vmatmul.mubr.f32.vlgmr.msra.gmra.mxu0 %v810_v51  ;;  %v811_v53 = vmul.f32 %v810_v51, %v810_v51  ;;  %8346 = vmatprep.subr.mxu1 %v12006_v36 }
 0x442   :  { %8347 = vmatpush3.msra.mxu1 %v12041_v55  ;;  %8308 = vmatpush3.msra.mxu0 %v12044_v62 }
 0x443   :  { %812 = vadd.xlane.f32.xlu1 %v811_v53  ;;  %8348 = vmatprep.subr.mxu1 %v12006_v36 }
 0x444   :  { %8349 = vmatpush3.msra.mxu1 %v12048_v23  ;;  %8309 = vmatprep.subr.mxu0 %v12006_v36 }
 0x445   :  { %8350 = vmatprep.subr.mxu1 %v12006_v36  ;;  %8310 = vmatpush3.msra.mxu0 %v12055_v30 }
 0x446   :  { %8351 = vmatpush3.msra.mxu1 %v12058_v54  ;;  %8311 = vmatprep.subr.mxu0 %v12006_v36 }
 0x447   :  { %889 = vadd.xlane.f32.xlu1 %v888_v59  ;;  %8352 = vmatprep.subr.mxu1 %v12006_v36 }
 0x448   :  { %8312 = vmatpush3.msra.mxu0 %v12063_v60  ;;  %8353 = vmatpush3.msra.mxu1 %v12066_v0 }
 0x449   :  { %8313 = vmatprep.subr.mxu0 %v12006_v36  ;;  %8354 = vmatprep.subr.mxu1 %v12006_v36 }
 0x44a   :  { %8314 = vmatpush3.msra.mxu0 %v12071_v56  ;;  %8355 = vmatpush3.msra.mxu1 %v12074_v57 }
 0x44b   :  { %8315 = vmatprep.subr.mxu0 %v12006_v36  ;;  %8356 = vmatprep.subr.mxu1 %v12006_v36 }
 0x44c   :  { %8316 = vmatpush3.msra.mxu0 %v12079_v58  ;;  %8357 = vmatpush3.msra.mxu1 %v12082_v61 }
 0x44d   :  { %8317 = vmatprep.subr.mxu0 %v12006_v36  ;;  %8358 = vmatprep.subr.mxu1 %v12006_v36 }
 0x44e   :  { %8318 = vmatpush3.msra.mxu0 %v12087_v2  ;;  %8359 = vmatpush3.msra.mxu1 %v12090_v1 }
 0x44f   :  { %8319 = vmatprep.subr.mxu0 %v12006_v36  ;;  %8360 = vmatprep.subr.mxu1 %v12006_v36 }
 0x450   :  { %8320 = vmatpush3.msra.mxu0 %v12095_v4  ;;  %8361 = vmatpush3.msra.mxu1 %v12098_v5 }
 0x451   :  { %8321 = vmatprep.subr.mxu0 %v12006_v36  ;;  %8362 = vmatprep.subr.mxu1 %v12006_v36 }
 0x452   :  { %8322 = vmatpush3.msra.mxu0 %v12103_v6  ;;  %8363 = vmatpush3.msra.mxu1 %v12106_v7 }
 0x453   :  { %8323 = vmatprep.subr.mxu0 %v12006_v36  ;;  %8364 = vmatprep.subr.mxu1 %v12006_v36 }
 0x454   :  { %8324 = vmatpush3.msra.mxu0 %v12111_v8  ;;  %8365 = vmatpush3.msra.mxu1 %v12114_v9 }
 0x455   :  { %8325 = vmatprep.subr.mxu0 %v12006_v36  ;;  %8366 = vmatprep.subr.mxu1 %v12006_v36 }
 0x456   :  { %8326 = vmatpush3.msra.mxu0 %v12119_v10  ;;  %8367 = vmatpush3.msra.mxu1 %v11522_v27  ;;  %v12137_v27 = vld [vmem:[#allocation7 + $0x98] sm:$0xff] }
 0x457   :  { %8327 = vmatprep.subr.mxu0 %v12006_v36  ;;  %8368 = vmatprep.subr.mxu1 %v12006_v36  ;;  %16176 = vst [vmem:[#allocation21_spill] sm:$0xff] %v12137_v27 }
 0x458   :  { %8328 = vmatpush3.msra.mxu0 %v12125_v11  ;;  %8369 = vmatpush3.msra.mxu1 %v11530_v29  ;;  %v12144_v29 = vld [vmem:[#allocation7 + $0x90] sm:$0xff] }
 0x459   :  { %8329 = vmatprep.subr.mxu0 %v12006_v36  ;;  %8370 = vmatprep.subr.mxu1 %v12006_v36  ;;  %16177 = vst [vmem:[#allocation19_spill] sm:$0xff] %v12144_v29 }
 0x45a   :  { %8330 = vmatpush3.msra.mxu0 %v12131_v12  ;;  %8371 = vmatpush3.msra.mxu1 %v11538_v31  ;;  %v12149_v31 = vld [vmem:[#allocation7 + $0x88] sm:$0xff] }
 0x45b   :  { %8331 = vmatprep.subr.mxu0 %v12006_v36  ;;  %8372 = vmatprep.subr.mxu1 %v12006_v36  ;;  %16178 = vst [vmem:[#allocation23_spill] sm:$0xff] %v12149_v31 }
 0x45c   :  { %8332 = vmatpush3.msra.mxu0 %v12137_v27  ;;  %8373 = vmatpush3.msra.mxu1 %v16156_v3  ;;  %v12153_v3 = vld [vmem:[#allocation7 + $0x80] sm:$0xff] }
 0x45d   :  { %8333 = vmatprep.subr.mxu0 %v12006_v36  ;;  %8339 = vmatprep.mubr.msk.f32.mxu0 %vm11369_vm0, %v12006_v36  ;;  %16179 = vst [vmem:[#allocation20_spill] sm:$0xff] %v12153_v3 }
 0x45e   :  { %8334 = vmatpush3.msra.mxu0 %v12144_v29  ;;  %8412 = vmatprep.subr.mxu1 %v12006_v36 }
 0x45f   :  { %8335 = vmatprep.subr.mxu0 %v12006_v36 }
 0x460   :  { %8336 = vmatpush3.msra.mxu0 %v12149_v31 }
 0x461   :  { %8337 = vmatprep.subr.mxu0 %v12006_v36 }
 0x462   :  { %8338 = vmatpush3.msra.mxu0 %v12153_v3 }
 0x463   :  { %8377 = vmatprep.subr.mxu0 %v12006_v36 }
 0x4cc   :  { %v813_v13 = vpop.xlane.xlu1 %812 }
 0x4cd   :  { %v814_v20 = vmul.f32 0.5, %v813_v13 }
 0x4d0   :  { %v890_v15 = vpop.xlane.xlu1 %889 }
 0x4d1   :  { %v891_v17 = vmul.f32 0.5, %v890_v15  ;;  %v12193_v15 = vld [vmem:[#allocation5 + $0x168] sm:$0xff] }
 0x4d3   :  { %v12157_v26 = vadd.f32 %v891_v17, %v814_v20  ;;  %v12201_v17 = vld [vmem:[#allocation5 + $0x160] sm:$0xff]  ;;  %v12209_v20 = vld [vmem:[#allocation5 + $0x158] sm:$0xff] }
 0x4d5   :  { %vm893_vm1 = vcmp.lt.f32.partialorder %v12157_v26, %v586_v28  ;;  %v12217_v28 = vld [vmem:[#allocation5 + $0x150] sm:$0xff] }
 0x4d6   :  { %v894_v34 = vsel %vm893_vm1, 1.0, %v15959_v33  ;;  %v12284_v33 = vld [vmem:[#allocation5 + $0xa0] sm:$0xff] }
 0x4d7   :  { %v12165_v42 = vmul.f32 0.1, %v894_v34  ;;  %v12225_v34 = vld [vmem:[#allocation5 + $0x148] sm:$0xff]  ;;  %16183 = vst [vmem:[#allocation24_spill] sm:$0xff] %v12284_v33 }
 0x4fd   :  { %v1039_v41 = vpop.f32.mrf.mxu1 }
 0x4fe   :  { %v1045_v43 = vmul.f32 %v1044_v37, %v1039_v41  ;;  %v12230_v37 = vld [vmem:[#allocation5 + $0xd8] sm:$0xff]  ;;  %v12238_v41 = vld [vmem:[#allocation5 + $0xd0] sm:$0xff] }
 0x4ff   :  { %v8306_v44 = vpop.f32.mrf.mxu1 }
 0x500   :  { %v1046_v45 = vmul.f32 %v1045_v43, %v12165_v42  ;;  %v12241_v43 = vld [vmem:[#allocation5 + $0x138] sm:$0xff]  ;;  %v12246_v44 = vld [vmem:[#allocation5 + $0xc8] sm:$0xff] }
 0x501   :  { %v963_v48 = vpop.f32.mrf.mxu0 }
 0x502   :  { %v12169_v49 = vadd.f32 %v1046_v45, %v11941_v18  ;;  %v969_v51 = vmul.f32 %v968_v47, %v963_v48  ;;  %v12181_v18 = vld [vmem:[#allocation5 + $0x178] sm:$0xff]  ;;  %v12249_v45 = vld [vmem:[#allocation5 + $0x130] sm:$0xff]  ;;  %v12254_v47 = vld [vmem:[#allocation5 + $0xc0] sm:$0xff] }
 0x503   :  { %v8271_v53 = vpop.f32.mrf.mxu0  ;;  %v12257_v48 = vld [vmem:[#allocation5 + $0x128] sm:$0xff] }
 0x504   :  { %10775 = vtanh.f32 %v12169_v49  ;;  %v970_v59 = vadd.f32 %v969_v51, %v896_v22  ;;  %v12262_v22 = vld [vmem:[#allocation5 + $0xb8] sm:$0xff]  ;;  %v12265_v51 = vld [vmem:[#allocation5 + $0x120] sm:$0xff]  ;;  %v12270_v53 = vld [vmem:[#allocation5 + $0xb0] sm:$0xff] }
 0x505   :  { %16180 = vst [vmem:[#allocation25_spill] sm:$0xff] %v12270_v53 }
 0x506   :  { %v971_v24 = vmul.f32 %v970_v59, %v12165_v42  ;;  %v12273_v59 = vld [vmem:[#allocation5 + $0x118] sm:$0xff] }
 0x507   :  { %16181 = vst [vmem:[#allocation22_spill] sm:$0xff] %v12273_v59 }
 0x508   :  { %v12175_v13 = vadd.f32 %v971_v24, %v11945_v21  ;;  %v12278_v24 = vld [vmem:[#allocation5 + $0xa8] sm:$0xff] }
 0x509   :  { %16182 = vst [vmem:[#allocation27_spill] sm:$0xff] %v12278_v24 }
 0x50a   :  { %10777 = vtanh.f32 %v12175_v13 }
 0x511   :  { %v12178_v14 = vpop.eup %10775 }
 0x512   :  { %8375 = vmatmul.mubr.f32.vlgmr.msra.gmra.mxu1 %v12178_v14 }
 0x513   :  { %8413 = vmatpush3.msra.mxu1 %v12181_v18  ;;  %8444 = vmatprep.mubr.msk.f32.mxu1 %vm11369_vm0, %v12006_v36 }
 0x514   :  { %8414 = vmatprep.subr.mxu1 %v12006_v36 }
 0x515   :  { %8415 = vmatpush3.msra.mxu1 %v12187_v46 }
 0x516   :  { %8416 = vmatprep.subr.mxu1 %v12006_v36 }
 0x517   :  { %v12191_v21 = vpop.eup %10777  ;;  %8417 = vmatpush3.msra.mxu1 %v12193_v15 }
 0x518   :  { %8340 = vmatmul.mubr.f32.vlgmr.msra.gmra.mxu0 %v12191_v21  ;;  %8418 = vmatprep.subr.mxu1 %v12006_v36 }
 0x519   :  { %8378 = vmatpush3.msra.mxu0 %v12198_v16  ;;  %8419 = vmatpush3.msra.mxu1 %v12201_v17 }
 0x51a   :  { %8379 = vmatprep.subr.mxu0 %v12006_v36  ;;  %8420 = vmatprep.subr.mxu1 %v12006_v36 }
 0x51b   :  { %8380 = vmatpush3.msra.mxu0 %v12206_v19  ;;  %8421 = vmatpush3.msra.mxu1 %v12209_v20 }
 0x51c   :  { %8381 = vmatprep.subr.mxu0 %v12006_v36  ;;  %8422 = vmatprep.subr.mxu1 %v12006_v36 }
 0x51d   :  { %8382 = vmatpush3.msra.mxu0 %v12214_v25  ;;  %8423 = vmatpush3.msra.mxu1 %v12217_v28 }
 0x51e   :  { %8383 = vmatprep.subr.mxu0 %v12006_v36  ;;  %8424 = vmatprep.subr.mxu1 %v12006_v36 }
 0x51f   :  { %8384 = vmatpush3.msra.mxu0 %v12222_v32  ;;  %8425 = vmatpush3.msra.mxu1 %v12225_v34 }
 0x520   :  { %8385 = vmatprep.subr.mxu0 %v12006_v36  ;;  %8426 = vmatprep.subr.mxu1 %v12006_v36 }
 0x521   :  { %8386 = vmatpush3.msra.mxu0 %v12230_v37  ;;  %8427 = vmatpush3.msra.mxu1 %v12233_v39 }
 0x522   :  { %8387 = vmatprep.subr.mxu0 %v12006_v36  ;;  %8428 = vmatprep.subr.mxu1 %v12006_v36 }
 0x523   :  { %8388 = vmatpush3.msra.mxu0 %v12238_v41  ;;  %8429 = vmatpush3.msra.mxu1 %v12241_v43 }
 0x524   :  { %8389 = vmatprep.subr.mxu0 %v12006_v36  ;;  %8430 = vmatprep.subr.mxu1 %v12006_v36 }
 0x525   :  { %8390 = vmatpush3.msra.mxu0 %v12246_v44  ;;  %8431 = vmatpush3.msra.mxu1 %v12249_v45 }
 0x526   :  { %8391 = vmatprep.subr.mxu0 %v12006_v36  ;;  %8432 = vmatprep.subr.mxu1 %v12006_v36 }
 0x527   :  { %8392 = vmatpush3.msra.mxu0 %v12254_v47  ;;  %8433 = vmatpush3.msra.mxu1 %v12257_v48 }
 0x528   :  { %8393 = vmatprep.subr.mxu0 %v12006_v36  ;;  %8434 = vmatprep.subr.mxu1 %v12006_v36 }
 0x529   :  { %8394 = vmatpush3.msra.mxu0 %v12262_v22  ;;  %8435 = vmatpush3.msra.mxu1 %v12265_v51 }
 0x52a   :  { %8395 = vmatprep.subr.mxu0 %v12006_v36  ;;  %8436 = vmatprep.subr.mxu1 %v12006_v36 }
 0x52b   :  { %8396 = vmatpush3.msra.mxu0 %v12270_v53  ;;  %8437 = vmatpush3.msra.mxu1 %v12273_v59  ;;  %v12290_v53 = vld [vmem:[#allocation5 + $0x98] sm:$0xff] }
 0x52c   :  { %8397 = vmatprep.subr.mxu0 %v12006_v36  ;;  %8438 = vmatprep.subr.mxu1 %v12006_v36  ;;  %16184 = vst [vmem:[#allocation29_spill] sm:$0xff] %v12290_v53 }
 0x52d   :  { %8398 = vmatpush3.msra.mxu0 %v12278_v24  ;;  %8439 = vmatpush3.msra.mxu1 %v16165_v35  ;;  %v12297_v35 = vld [vmem:[#allocation5 + $0x90] sm:$0xff] }
 0x52e   :  { %8399 = vmatprep.subr.mxu0 %v12006_v36  ;;  %8440 = vmatprep.subr.mxu1 %v12006_v36  ;;  %16185 = vst [vmem:[#allocation26_spill] sm:$0xff] %v12297_v35 }
 0x52f   :  { %8400 = vmatpush3.msra.mxu0 %v12284_v33  ;;  %8441 = vmatpush3.msra.mxu1 %v16167_v38  ;;  %v12302_v38 = vld [vmem:[#allocation5 + $0x88] sm:$0xff] }
 0x530   :  { %8401 = vmatprep.subr.mxu0 %v12006_v36  ;;  %8442 = vmatprep.subr.mxu1 %v12006_v36  ;;  %16186 = vst [vmem:[#allocation31_spill] sm:$0xff] %v12302_v38 }
 0x531   :  { %8402 = vmatpush3.msra.mxu0 %v12290_v53  ;;  %8443 = vmatpush3.msra.mxu1 %v16169_v40  ;;  %v12306_v40 = vld [vmem:[#allocation5 + $0x80] sm:$0xff] }
 0x532   :  { %8403 = vmatprep.subr.mxu0 %v12006_v36  ;;  %8409 = vmatprep.mubr.msk.f32.mxu0 %vm11369_vm0, %v12006_v36  ;;  %16187 = vst [vmem:[#allocation28_spill] sm:$0xff] %v12306_v40 }
 0x533   :  { %8404 = vmatpush3.msra.mxu0 %v12297_v35  ;;  %8482 = vmatprep.subr.mxu1 %v12006_v36 }
 0x534   :  { %8405 = vmatprep.subr.mxu0 %v12006_v36 }
 0x535   :  { %8406 = vmatpush3.msra.mxu0 %v12302_v38 }
 0x536   :  { %8407 = vmatprep.subr.mxu0 %v12006_v36 }
 0x537   :  { %8408 = vmatpush3.msra.mxu0 %v12306_v40  ;;  %v12323_v40 = vld [vmem:[%s15924_s3 + $0x1] ss:$0 sm:$0xff] }
 0x538   :  { %8447 = vmatprep.subr.mxu0 %v12006_v36 }
 0x5d2   :  { %v1192_v53 = vpop.f32.mrf.mxu1 }
 0x5d3   :  { %v1193_v33 = vadd.f32 %v11698_v63, %v1192_v53  ;;  %v12328_v53 = vld [vmem:[#allocation8] sm:$0xff] }
 0x5d4   :  { %v8376_v35 = vpop.f32.mrf.mxu1 }
 0x5d5   :  { %v12312_v24 = vsub.f32 %v12175_v13, %v1193_v33 }
 0x5d7   :  { %8445 = vmatmul.mubr.f32.vlgmr.msra.gmra.mxu1 %v12312_v24  ;;  %v1197_v38 = vmul.f32 %v12312_v24, %v12312_v24 }
 0x5d8   :  { %v1115_v59 = vpop.f32.mrf.mxu0  ;;  %8483 = vmatpush3.msra.mxu1 %v12030_v50  ;;  %8514 = vmatprep.mubr.msk.f32.mxu1 %vm11369_vm0, %v12006_v36 }
 0x5d9   :  { %v1116_v63 = vadd.f32 %v12323_v40, %v1115_v59  ;;  %1198 = vadd.xlane.f32.xlu1 %v1197_v38  ;;  %8484 = vmatprep.subr.mxu1 %v12006_v36  ;;  %v12375_v59 = vld [vmem:[#allocation7 + $0x110] sm:$0xff]  ;;  %v12381_v38 = vld [vmem:[#allocation7 + $0x108] sm:$0xff] }
 0x5da   :  { %v8341_v33 = vpop.f32.mrf.mxu0  ;;  %8485 = vmatpush3.msra.mxu1 %v12037_v52  ;;  %16188 = vst [vmem:[#allocation30_spill] sm:$0xff] %v12375_v59  ;;  %16189 = vst [vmem:[#allocation32_spill] sm:$0xff] %v12381_v38 }
 0x5db   :  { %v1119_v35 = vsub.f32 %v12328_v53, %v1116_v63  ;;  %8486 = vmatprep.subr.mxu1 %v12006_v36  ;;  %v12387_v63 = vld [vmem:[#allocation7 + $0x100] sm:$0xff] }
 0x5dc   :  { %8487 = vmatpush3.msra.mxu1 %v12041_v55  ;;  %16190 = vst [vmem:[#allocation33_spill] sm:$0xff] %v12387_v63 }
 0x5dd   :  { %8410 = vmatmul.mubr.f32.vlgmr.msra.gmra.mxu0 %v1119_v35  ;;  %v1120_v50 = vmul.f32 %v1119_v35, %v1119_v35  ;;  %8488 = vmatprep.subr.mxu1 %v12006_v36 }
 0x5de   :  { %8489 = vmatpush3.msra.mxu1 %v12048_v23  ;;  %8448 = vmatpush3.msra.mxu0 %v12044_v62 }
 0x5df   :  { %1121 = vadd.xlane.f32.xlu0 %v1120_v50  ;;  %8490 = vmatprep.subr.mxu1 %v12006_v36  ;;  %v12369_v50 = vld [vmem:[#allocation7 + $0x118] sm:$0xff] }
 0x5e0   :  { %8491 = vmatpush3.msra.mxu1 %v12058_v54  ;;  %8449 = vmatprep.subr.mxu0 %v12006_v36 }
 0x5e1   :  { %8492 = vmatprep.subr.mxu1 %v12006_v36  ;;  %8450 = vmatpush3.msra.mxu0 %v12055_v30 }
 0x5e2   :  { %8493 = vmatpush3.msra.mxu1 %v12066_v0  ;;  %8451 = vmatprep.subr.mxu0 %v12006_v36 }
 0x5e3   :  { %8494 = vmatprep.subr.mxu1 %v12006_v36  ;;  %8452 = vmatpush3.msra.mxu0 %v12063_v60 }
 0x5e4   :  { %8495 = vmatpush3.msra.mxu1 %v12074_v57  ;;  %8453 = vmatprep.subr.mxu0 %v12006_v36 }
 0x5e5   :  { %8496 = vmatprep.subr.mxu1 %v12006_v36  ;;  %8454 = vmatpush3.msra.mxu0 %v12071_v56 }
 0x5e6   :  { %8497 = vmatpush3.msra.mxu1 %v12082_v61  ;;  %8455 = vmatprep.subr.mxu0 %v12006_v36 }
 0x5e7   :  { %8498 = vmatprep.subr.mxu1 %v12006_v36  ;;  %8456 = vmatpush3.msra.mxu0 %v12079_v58 }
 0x5e8   :  { %8499 = vmatpush3.msra.mxu1 %v12090_v1  ;;  %8457 = vmatprep.subr.mxu0 %v12006_v36 }
 0x5e9   :  { %8500 = vmatprep.subr.mxu1 %v12006_v36  ;;  %8458 = vmatpush3.msra.mxu0 %v12087_v2 }
 0x5ea   :  { %8501 = vmatpush3.msra.mxu1 %v12098_v5  ;;  %8459 = vmatprep.subr.mxu0 %v12006_v36 }
 0x5eb   :  { %8502 = vmatprep.subr.mxu1 %v12006_v36  ;;  %8460 = vmatpush3.msra.mxu0 %v12095_v4 }
 0x5ec   :  { %8503 = vmatpush3.msra.mxu1 %v12106_v7  ;;  %8461 = vmatprep.subr.mxu0 %v12006_v36 }
 0x5ed   :  { %8504 = vmatprep.subr.mxu1 %v12006_v36  ;;  %8462 = vmatpush3.msra.mxu0 %v12103_v6 }
 0x5ee   :  { %8505 = vmatpush3.msra.mxu1 %v12114_v9  ;;  %8463 = vmatprep.subr.mxu0 %v12006_v36 }
 0x5ef   :  { %8506 = vmatprep.subr.mxu1 %v12006_v36  ;;  %8464 = vmatpush3.msra.mxu0 %v12111_v8 }
 0x5f0   :  { %8507 = vmatpush3.msra.mxu1 %v12369_v50  ;;  %8465 = vmatprep.subr.mxu0 %v12006_v36 }
 0x5f1   :  { %8508 = vmatprep.subr.mxu1 %v12006_v36  ;;  %8466 = vmatpush3.msra.mxu0 %v12119_v10 }
 0x5f2   :  { %8509 = vmatpush3.msra.mxu1 %v12375_v59  ;;  %8467 = vmatprep.subr.mxu0 %v12006_v36 }
 0x5f3   :  { %8510 = vmatprep.subr.mxu1 %v12006_v36  ;;  %8468 = vmatpush3.msra.mxu0 %v12125_v11  ;;  %v16192_v11 = vmov 0.9  }
 0x5f4   :  { %8511 = vmatpush3.msra.mxu1 %v12381_v38  ;;  %8469 = vmatprep.subr.mxu0 %v12006_v36 }
 0x5f5   :  { %8512 = vmatprep.subr.mxu1 %v12006_v36  ;;  %8470 = vmatpush3.msra.mxu0 %v12131_v12 }
 0x5f6   :  { %8513 = vmatpush3.msra.mxu1 %v12387_v63  ;;  %8471 = vmatprep.subr.mxu0 %v12006_v36 }
 0x5f7   :  { %8472 = vmatpush3.msra.mxu0 %v12137_v27  ;;  %8479 = vmatprep.mubr.msk.f32.mxu0 %vm11369_vm0, %v12006_v36 }
 0x5f8   :  { %8473 = vmatprep.subr.mxu0 %v12006_v36  ;;  %8552 = vmatprep.subr.mxu1 %v12006_v36 }
 0x5f9   :  { %8474 = vmatpush3.msra.mxu0 %v12144_v29  ;;  %v1352_v29 = vmul.f32 %v12178_v14, %v12178_v14 }
 0x5fa   :  { %8475 = vmatprep.subr.mxu0 %v12006_v36 }
 0x5fb   :  { %8476 = vmatpush3.msra.mxu0 %v12149_v31  ;;  %v1353_v38 = vsub.f32 1.0, %v1352_v29  ;;  %v1205_v29 = vsub.f32 0.0, %v12312_v24  ;;  %v12478_v24 = vld [vmem:[#allocation5 + $0x110] sm:$0xff] }
 0x5fc   :  { %8477 = vmatprep.subr.mxu0 %v12006_v36 }
 0x5fd   :  { %8478 = vmatpush3.msra.mxu0 %v12153_v3 }
 0x5fe   :  { %8517 = vmatprep.subr.mxu0 %v12006_v36 }
 0x662   :  { %v1199_v35 = vpop.xlane.xlu1 %1198 }
 0x663   :  { %v1200_v12 = vmul.f32 0.5, %v1199_v35 }
 0x668   :  { %v1122_v33 = vpop.xlane.xlu0 %1121 }
 0x669   :  { %v1123_v27 = vmul.f32 0.5, %v1122_v33  ;;  %v1276_v33 = vmul.f32 %v12191_v21, %v12191_v21 }
 0x66b   :  { %v12402_v63 = vadd.f32 %v1200_v12, %v1123_v27 }
 0x66d   :  { %16191 = vst [vmem:[#allocation34_spill] sm:$0xff] %v12402_v63  ;;  %vm1202_vm2 = vcmp.lt.f32.partialorder %v12402_v63, %v12157_v26  ;;  %v1277_v26 = vsub.f32 1.0, %v1276_v33  ;;  %v12490_v33 = vld [vmem:[#allocation5 + $0x100] sm:$0xff] }
 0x66e   :  { %v1203_v31 = vsel %vm1202_vm2, 1.0, %v16192_v11 }
 0x66f   :  { %v12410_v3 = vmul.f32 %v1203_v31, %v12165_v42 }
 0x697   :  { %v1348_v10 = vpop.f32.mrf.mxu1 }
 0x698   :  { %v1354_v59 = vmul.f32 %v1353_v38, %v1348_v10  ;;  %v12484_v38 = vld [vmem:[#allocation5 + $0x108] sm:$0xff] }
 0x699   :  { %v8446_v35 = vpop.f32.mrf.mxu1 }
 0x69a   :  { %v1355_v12 = vmul.f32 %v1354_v59, %v12410_v3  ;;  %v16195_v59 = vld [vmem:[#allocation27_spill] sm:$0xff]  ;;  %v16197_v35 = vld [vmem:[#allocation29_spill] sm:$0xff] }
 0x69c   :  { %v12416_v27 = vadd.f32 %v1355_v12, %v12169_v49  ;;  %v16193_v49 = vld [vmem:[#allocation22_spill] sm:$0xff] }
 0x69d   :  { %v1272_v63 = vpop.f32.mrf.mxu0  ;;  %v16198_v12 = vld [vmem:[#allocation26_spill] sm:$0xff] }
 0x69e   :  { %10779 = vtanh.f32 %v12416_v27  ;;  %v1278_v14 = vmul.f32 %v1277_v26, %v1272_v63  ;;  %v16196_v63 = vld [vmem:[#allocation24_spill] sm:$0xff]  ;;  %v16199_v26 = vld [vmem:[#allocation31_spill] sm:$0xff] }
 0x69f   :  { %v8411_v11 = vpop.f32.mrf.mxu0 }
 0x6a0   :  { %v1279_v31 = vadd.f32 %v1278_v14, %v1205_v29  ;;  %v16200_v29 = vld [vmem:[#allocation28_spill] sm:$0xff] }
 0x6a2   :  { %v1280_v10 = vmul.f32 %v1279_v31, %v12410_v3  ;;  %v12508_v31 = vld [vmem:[%s15924_s3 + $0x2] ss:$0 sm:$0xff] }
 0x6a4   :  { %v12422_v42 = vadd.f32 %v1280_v10, %v12175_v13  ;;  %v16194_v13 = vld [vmem:[#allocation25_spill] sm:$0xff] }
 0x6a6   :  { %10781 = vtanh.f32 %v12422_v42 }
 0x6ab   :  { %v12425_v21 = vpop.eup %10779 }
 0x6ac   :  { %8515 = vmatmul.mubr.f32.vlgmr.msra.gmra.mxu1 %v12425_v21 }
 0x6ad   :  { %8553 = vmatpush3.msra.mxu1 %v12181_v18  ;;  %8584 = vmatprep.mubr.msk.f32.mxu1 %vm11369_vm0, %v12006_v36 }
 0x6ae   :  { %8554 = vmatprep.subr.mxu1 %v12006_v36 }
 0x6af   :  { %8555 = vmatpush3.msra.mxu1 %v12187_v46 }
 0x6b0   :  { %8556 = vmatprep.subr.mxu1 %v12006_v36 }
 0x6b1   :  { %8557 = vmatpush3.msra.mxu1 %v12193_v15 }
 0x6b2   :  { %8558 = vmatprep.subr.mxu1 %v12006_v36 }
 0x6b3   :  { %v12436_v11 = vpop.eup %10781  ;;  %8559 = vmatpush3.msra.mxu1 %v12201_v17 }
 0x6b4   :  { %8480 = vmatmul.mubr.f32.vlgmr.msra.gmra.mxu0 %v12436_v11  ;;  %8560 = vmatprep.subr.mxu1 %v12006_v36 }
 0x6b5   :  { %8518 = vmatpush3.msra.mxu0 %v12198_v16  ;;  %8561 = vmatpush3.msra.mxu1 %v12209_v20 }
 0x6b6   :  { %8519 = vmatprep.subr.mxu0 %v12006_v36  ;;  %8562 = vmatprep.subr.mxu1 %v12006_v36 }
 0x6b7   :  { %8520 = vmatpush3.msra.mxu0 %v12206_v19  ;;  %8563 = vmatpush3.msra.mxu1 %v12217_v28 }
 0x6b8   :  { %8521 = vmatprep.subr.mxu0 %v12006_v36  ;;  %8564 = vmatprep.subr.mxu1 %v12006_v36 }
 0x6b9   :  { %8522 = vmatpush3.msra.mxu0 %v12214_v25  ;;  %8565 = vmatpush3.msra.mxu1 %v12225_v34 }
 0x6ba   :  { %8523 = vmatprep.subr.mxu0 %v12006_v36  ;;  %8566 = vmatprep.subr.mxu1 %v12006_v36 }
 0x6bb   :  { %8524 = vmatpush3.msra.mxu0 %v12222_v32  ;;  %8567 = vmatpush3.msra.mxu1 %v12233_v39 }
 0x6bc   :  { %8525 = vmatprep.subr.mxu0 %v12006_v36  ;;  %8568 = vmatprep.subr.mxu1 %v12006_v36 }
 0x6bd   :  { %8526 = vmatpush3.msra.mxu0 %v12230_v37  ;;  %8569 = vmatpush3.msra.mxu1 %v12241_v43 }
 0x6be   :  { %8527 = vmatprep.subr.mxu0 %v12006_v36  ;;  %8570 = vmatprep.subr.mxu1 %v12006_v36 }
 0x6bf   :  { %8528 = vmatpush3.msra.mxu0 %v12238_v41  ;;  %8571 = vmatpush3.msra.mxu1 %v12249_v45 }
 0x6c0   :  { %8529 = vmatprep.subr.mxu0 %v12006_v36  ;;  %8572 = vmatprep.subr.mxu1 %v12006_v36 }
 0x6c1   :  { %8530 = vmatpush3.msra.mxu0 %v12246_v44  ;;  %8573 = vmatpush3.msra.mxu1 %v12257_v48 }
 0x6c2   :  { %8531 = vmatprep.subr.mxu0 %v12006_v36  ;;  %8574 = vmatprep.subr.mxu1 %v12006_v36 }
 0x6c3   :  { %8532 = vmatpush3.msra.mxu0 %v12254_v47  ;;  %8575 = vmatpush3.msra.mxu1 %v12265_v51 }
 0x6c4   :  { %8533 = vmatprep.subr.mxu0 %v12006_v36  ;;  %8576 = vmatprep.subr.mxu1 %v12006_v36 }
 0x6c5   :  { %8534 = vmatpush3.msra.mxu0 %v12262_v22  ;;  %8577 = vmatpush3.msra.mxu1 %v16193_v49 }
 0x6c6   :  { %8535 = vmatprep.subr.mxu0 %v12006_v36  ;;  %8578 = vmatprep.subr.mxu1 %v12006_v36 }
 0x6c7   :  { %8536 = vmatpush3.msra.mxu0 %v16194_v13  ;;  %8579 = vmatpush3.msra.mxu1 %v12478_v24 }
 0x6c8   :  { %8537 = vmatprep.subr.mxu0 %v12006_v36  ;;  %8580 = vmatprep.subr.mxu1 %v12006_v36 }
 0x6c9   :  { %8538 = vmatpush3.msra.mxu0 %v16195_v59  ;;  %8581 = vmatpush3.msra.mxu1 %v12484_v38 }
 0x6ca   :  { %8539 = vmatprep.subr.mxu0 %v12006_v36  ;;  %8582 = vmatprep.subr.mxu1 %v12006_v36 }
 0x6cb   :  { %8540 = vmatpush3.msra.mxu0 %v16196_v63  ;;  %8583 = vmatpush3.msra.mxu1 %v12490_v33 }
 0x6cc   :  { %8541 = vmatprep.subr.mxu0 %v12006_v36  ;;  %8549 = vmatprep.mubr.msk.f32.mxu0 %vm11369_vm0, %v12006_v36 }
 0x6cd   :  { %8542 = vmatpush3.msra.mxu0 %v16197_v35  ;;  %8622 = vmatprep.subr.mxu1 %v12006_v36 }
 0x6ce   :  { %8543 = vmatprep.subr.mxu0 %v12006_v36 }
 0x6cf   :  { %8544 = vmatpush3.msra.mxu0 %v16198_v12 }
 0x6d0   :  { %8545 = vmatprep.subr.mxu0 %v12006_v36 }
 0x6d1   :  { %8546 = vmatpush3.msra.mxu0 %v16199_v26 }
 0x6d2   :  { %8547 = vmatprep.subr.mxu0 %v12006_v36 }
 0x6d3   :  { %8548 = vmatpush3.msra.mxu0 %v16200_v29  ;;  %v16201_v29 = vld [vmem:[#allocation15_spill] sm:$0xff] }
 0x6d4   :  { %8587 = vmatprep.subr.mxu0 %v12006_v36 }
 0x76c   :  { %v1501_v14 = vpop.f32.mrf.mxu1 }
 0x76d   :  { %v1502_v10 = vadd.f32 %v12508_v31, %v1501_v14 }
 0x76e   :  { %v8516_v35 = vpop.f32.mrf.mxu1 }
 0x76f   :  { %v12512_v12 = vsub.f32 %v12422_v42, %v1502_v10 }
 0x771   :  { %8585 = vmatmul.mubr.f32.vlgmr.msra.gmra.mxu1 %v12512_v12  ;;  %v1506_v26 = vmul.f32 %v12512_v12, %v12512_v12 }
 0x772   :  { %8623 = vmatpush3.msra.mxu1 %v16201_v29  ;;  %8654 = vmatprep.mubr.msk.f32.mxu1 %vm11369_vm0, %v12006_v36 }
 0x773   :  { %1507 = vadd.xlane.f32.xlu1 %v1506_v26  ;;  %8624 = vmatprep.subr.mxu1 %v12006_v36 }
 0x774   :  { %v1424_v63 = vpop.f32.mrf.mxu0  ;;  %8625 = vmatpush3.msra.mxu1 %v12037_v52  ;;  %v16202_v52 = vld [vmem:[#allocation30_spill] sm:$0xff] }
 0x775   :  { %v1425_v35 = vadd.f32 %v12323_v40, %v1424_v63  ;;  %8626 = vmatprep.subr.mxu1 %v12006_v36 }
 0x776   :  { %v8481_v14 = vpop.f32.mrf.mxu0  ;;  %8627 = vmatpush3.msra.mxu1 %v12041_v55  ;;  %v16203_v55 = vld [vmem:[#allocation18_spill] sm:$0xff] }
 0x777   :  { %v1428_v10 = vsub.f32 %v12328_v53, %v1425_v35  ;;  %8628 = vmatprep.subr.mxu1 %v12006_v36 }
 0x778   :  { %8629 = vmatpush3.msra.mxu1 %v12048_v23  ;;  %v16205_v23 = vld [vmem:[#allocation16_spill] sm:$0xff] }
 0x779   :  { %8550 = vmatmul.mubr.f32.vlgmr.msra.gmra.mxu0 %v1428_v10  ;;  %v1429_v26 = vmul.f32 %v1428_v10, %v1428_v10  ;;  %8630 = vmatprep.subr.mxu1 %v12006_v36 }
 0x77a   :  { %8631 = vmatpush3.msra.mxu1 %v12058_v54  ;;  %8588 = vmatpush3.msra.mxu0 %v12044_v62  ;;  %v16204_v62 = vld [vmem:[#allocation32_spill] sm:$0xff]  ;;  %v16207_v54 = vld [vmem:[#allocation17_spill] sm:$0xff] }
 0x77b   :  { %1430 = vadd.xlane.f32.xlu0 %v1429_v26  ;;  %8632 = vmatprep.subr.mxu1 %v12006_v36  ;;  %v1585_v26 = vmul.f32 %v12436_v11, %v12436_v11 }
 0x77c   :  { %8633 = vmatpush3.msra.mxu1 %v12066_v0  ;;  %8589 = vmatprep.subr.mxu0 %v12006_v36  ;;  %v16209_v0 = vld [vmem:[#allocation19_spill] sm:$0xff] }
 0x77d   :  { %8634 = vmatprep.subr.mxu1 %v12006_v36  ;;  %8590 = vmatpush3.msra.mxu0 %v12055_v30  ;;  %v16206_v30 = vld [vmem:[#allocation33_spill] sm:$0xff] }
 0x77e   :  { %8635 = vmatpush3.msra.mxu1 %v12074_v57  ;;  %8591 = vmatprep.subr.mxu0 %v12006_v36  ;;  %v16211_v57 = vld [vmem:[#allocation20_spill] sm:$0xff] }
 0x77f   :  { %8636 = vmatprep.subr.mxu1 %v12006_v36  ;;  %8592 = vmatpush3.msra.mxu0 %v12063_v60  ;;  %v16208_v60 = vld [vmem:[#allocation21_spill] sm:$0xff] }
 0x780   :  { %8637 = vmatpush3.msra.mxu1 %v12082_v61  ;;  %8593 = vmatprep.subr.mxu0 %v12006_v36 }
 0x781   :  { %8638 = vmatprep.subr.mxu1 %v12006_v36  ;;  %8594 = vmatpush3.msra.mxu0 %v12071_v56  ;;  %v16210_v56 = vld [vmem:[#allocation23_spill] sm:$0xff] }
 0x782   :  { %8639 = vmatpush3.msra.mxu1 %v12090_v1  ;;  %8595 = vmatprep.subr.mxu0 %v12006_v36 }
 0x783   :  { %8640 = vmatprep.subr.mxu1 %v12006_v36  ;;  %8596 = vmatpush3.msra.mxu0 %v12079_v58 }
 0x784   :  { %8641 = vmatpush3.msra.mxu1 %v12098_v5  ;;  %8597 = vmatprep.subr.mxu0 %v12006_v36  ;;  %v16212_v5 = vld [vmem:[#allocation34_spill] sm:$0xff] }
 0x785   :  { %8642 = vmatprep.subr.mxu1 %v12006_v36  ;;  %8598 = vmatpush3.msra.mxu0 %v12087_v2 }
 0x786   :  { %8643 = vmatpush3.msra.mxu1 %v12106_v7  ;;  %8599 = vmatprep.subr.mxu0 %v12006_v36  ;;  %v16213_v7 = vmov 0.9  }
 0x787   :  { %8644 = vmatprep.subr.mxu1 %v12006_v36  ;;  %8600 = vmatpush3.msra.mxu0 %v12095_v4 }
 0x788   :  { %8645 = vmatpush3.msra.mxu1 %v12114_v9  ;;  %8601 = vmatprep.subr.mxu0 %v12006_v36 }
 0x789   :  { %8646 = vmatprep.subr.mxu1 %v12006_v36  ;;  %8602 = vmatpush3.msra.mxu0 %v12103_v6  ;;  %v1661_v6 = vmul.f32 %v12425_v21, %v12425_v21  ;;  %v1586_v21 = vsub.f32 1.0, %v1585_v26 }
 0x78a   :  { %8647 = vmatpush3.msra.mxu1 %v12369_v50  ;;  %8603 = vmatprep.subr.mxu0 %v12006_v36 }
 0x78b   :  { %8648 = vmatprep.subr.mxu1 %v12006_v36  ;;  %8604 = vmatpush3.msra.mxu0 %v12111_v8  ;;  %v1662_v9 = vsub.f32 1.0, %v1661_v6  ;;  %v12769_v6 = vld [vmem:[#allocation7 + $0xc8] sm:$0xff] }
 0x78c   :  { %8649 = vmatpush3.msra.mxu1 %v16202_v52  ;;  %8605 = vmatprep.subr.mxu0 %v12006_v36 }
 0x78d   :  { %8650 = vmatprep.subr.mxu1 %v12006_v36  ;;  %8606 = vmatpush3.msra.mxu0 %v16203_v55 }
 0x78e   :  { %8651 = vmatpush3.msra.mxu1 %v16204_v62  ;;  %8607 = vmatprep.subr.mxu0 %v12006_v36 }
 0x78f   :  { %8652 = vmatprep.subr.mxu1 %v12006_v36  ;;  %8608 = vmatpush3.msra.mxu0 %v16205_v23 }
 0x790   :  { %8653 = vmatpush3.msra.mxu1 %v16206_v30  ;;  %8609 = vmatprep.subr.mxu0 %v12006_v36 }
 0x791   :  { %8610 = vmatpush3.msra.mxu0 %v16207_v54  ;;  %8619 = vmatprep.mubr.msk.f32.mxu0 %vm11369_vm0, %v12006_v36  ;;  %v1514_v54 = vsub.f32 0.0, %v12512_v12  ;;  %v12745_v12 = vld [vmem:[#allocation7 + $0xe0] sm:$0xff] }
 0x792   :  { %8611 = vmatprep.subr.mxu0 %v12006_v36  ;;  %8692 = vmatprep.subr.mxu1 %v12006_v36 }
 0x793   :  { %8612 = vmatpush3.msra.mxu0 %v16208_v60 }
 0x794   :  { %8613 = vmatprep.subr.mxu0 %v12006_v36 }
 0x795   :  { %8614 = vmatpush3.msra.mxu0 %v16209_v0 }
 0x796   :  { %8615 = vmatprep.subr.mxu0 %v12006_v36 }
 0x797   :  { %8616 = vmatpush3.msra.mxu0 %v16210_v56 }
 0x798   :  { %8617 = vmatprep.subr.mxu0 %v12006_v36 }
 0x799   :  { %8618 = vmatpush3.msra.mxu0 %v16211_v57 }
 0x79a   :  { %8657 = vmatprep.subr.mxu0 %v12006_v36 }
 0x7fc   :  { %v1508_v61 = vpop.xlane.xlu1 %1507 }
 0x7fd   :  { %v1509_v1 = vmul.f32 0.5, %v1508_v61  ;;  %v12753_v61 = vld [vmem:[#allocation7 + $0xd8] sm:$0xff] }
 0x804   :  { %v1431_v58 = vpop.xlane.xlu0 %1430 }
 0x805   :  { %v1432_v2 = vmul.f32 0.5, %v1431_v58  ;;  %v12748_v58 = vld [vmem:[#allocation7 + $0x130] sm:$0xff] }
 0x807   :  { %v12587_v4 = vadd.f32 %v1509_v1, %v1432_v2  ;;  %v12756_v2 = vld [vmem:[#allocation7 + $0x128] sm:$0xff]  ;;  %v12761_v1 = vld [vmem:[#allocation7 + $0xd0] sm:$0xff] }
 0x809   :  { %vm1511_vm3 = vcmp.lt.f32.partialorder %v12587_v4, %v16212_v5  ;;  %v12764_v5 = vld [vmem:[#allocation7 + $0x120] sm:$0xff] }
 0x80a   :  { %v1512_v8 = vsel %vm1511_vm3, 1.0, %v16213_v7 }
 0x80b   :  { %v12595_v29 = vmul.f32 %v1512_v8, %v12410_v3  ;;  %v12775_v8 = vld [vmem:[#allocation7 + $0xc0] sm:$0xff] }
 0x80c   :  { %16221 = vst [vmem:[#allocation27_spill] sm:$0xff] %v12775_v8 }
 0x831   :  { %v1657_v63 = vpop.f32.mrf.mxu1 }
 0x832   :  { %v1663_v35 = vmul.f32 %v1662_v9, %v1657_v63  ;;  %v12781_v9 = vld [vmem:[#allocation7 + $0xb8] sm:$0xff]  ;;  %v12807_v63 = vld [vmem:[#allocation7 + $0x90] sm:$0xff] }
 0x833   :  { %v8586_v14 = vpop.f32.mrf.mxu1  ;;  %16222 = vst [vmem:[#allocation15_spill] sm:$0xff] %v12781_v9  ;;  %16227 = vst [vmem:[#allocation33_spill] sm:$0xff] %v12807_v63 }
 0x834   :  { %v1664_v10 = vmul.f32 %v1663_v35, %v12595_v29  ;;  %v12811_v35 = vld [vmem:[#allocation7 + $0x88] sm:$0xff]  ;;  %v12815_v14 = vld [vmem:[#allocation7 + $0x80] sm:$0xff] }
 0x835   :  { %16228 = vst [vmem:[#allocation17_spill] sm:$0xff] %v12811_v35  ;;  %16229 = vst [vmem:[#allocation21_spill] sm:$0xff] %v12815_v14 }
 0x836   :  { %v12601_v55 = vadd.f32 %v1664_v10, %v12416_v27 }
 0x838   :  { %10783 = vtanh.f32 %v12601_v55 }
 0x839   :  { %v1581_v23 = vpop.f32.mrf.mxu0 }
 0x83a   :  { %v1587_v60 = vmul.f32 %v1586_v21, %v1581_v23 }
 0x83b   :  { %v8551_v0 = vpop.f32.mrf.mxu0 }
 0x83c   :  { %v1588_v3 = vadd.f32 %v1587_v60, %v1514_v54 }
 0x83e   :  { %v1589_v56 = vmul.f32 %v1588_v3, %v12595_v29 }
 0x840   :  { %v12607_v57 = vadd.f32 %v1589_v56, %v12422_v42  ;;  %v12729_v42 = vld [vmem:[#allocation7 + $0xf0] sm:$0xff] }
 0x842   :  { %10785 = vtanh.f32 %v12607_v57 }
 0x845   :  { %v12610_v11 = vpop.eup %10783 }
 0x846   :  { %8655 = vmatmul.mubr.f32.vlgmr.msra.gmra.mxu1 %v12610_v11  ;;  %v1970_v60 = vmul.f32 %v12610_v11, %v12610_v11 }
 0x847   :  { %8693 = vmatpush3.msra.mxu1 %v12181_v18  ;;  %8724 = vmatprep.mubr.msk.f32.mxu1 %vm11369_vm0, %v12006_v36  ;;  %v12646_v18 = vld [vmem:[#allocation9 + $0x10] sm:$0xff] }
 0x848   :  { %8694 = vmatprep.subr.mxu1 %v12006_v36  ;;  %v1971_v3 = vsub.f32 1.0, %v1970_v60  ;;  %v12885_v60 = vld [vmem:[#allocation5 + $0x140] sm:$0xff] }
 0x849   :  { %8695 = vmatpush3.msra.mxu1 %v12187_v46  ;;  %v16215_v46 = vld [vmem:[#allocation29_spill] sm:$0xff] }
 0x84a   :  { %8696 = vmatprep.subr.mxu1 %v12006_v36 }
 0x84b   :  { %8697 = vmatpush3.msra.mxu1 %v12193_v15  ;;  %v16216_v15 = vld [vmem:[#allocation26_spill] sm:$0xff] }
 0x84c   :  { %8698 = vmatprep.subr.mxu1 %v12006_v36 }
 0x84d   :  { %8699 = vmatpush3.msra.mxu1 %v12201_v17  ;;  %v16218_v17 = vld [vmem:[#allocation28_spill] sm:$0xff] }
 0x84e   :  { %8700 = vmatprep.subr.mxu1 %v12006_v36 }
 0x84f   :  { %v12623_v27 = vpop.eup %10785  ;;  %8701 = vmatpush3.msra.mxu1 %v12209_v20 }
 0x850   :  { %8620 = vmatmul.mubr.f32.vlgmr.msra.gmra.mxu0 %v12623_v27  ;;  %8702 = vmatprep.subr.mxu1 %v12006_v36 }
 0x851   :  { %8658 = vmatpush3.msra.mxu0 %v12198_v16  ;;  %8703 = vmatpush3.msra.mxu1 %v12217_v28  ;;  %v16217_v16 = vld [vmem:[#allocation31_spill] sm:$0xff] }
 0x852   :  { %8659 = vmatprep.subr.mxu0 %v12006_v36  ;;  %8704 = vmatprep.subr.mxu1 %v12006_v36 }
 0x853   :  { %8660 = vmatpush3.msra.mxu0 %v12206_v19  ;;  %8705 = vmatpush3.msra.mxu1 %v12225_v34  ;;  %v12693_v34 = vld [vmem:[#allocation7 + $0x178] sm:$0xff] }
 0x854   :  { %8661 = vmatprep.subr.mxu0 %v12006_v36  ;;  %8706 = vmatprep.subr.mxu1 %v12006_v36 }
 0x855   :  { %8662 = vmatpush3.msra.mxu0 %v12214_v25  ;;  %8707 = vmatpush3.msra.mxu1 %v12233_v39 }
 0x856   :  { %8663 = vmatprep.subr.mxu0 %v12006_v36  ;;  %8708 = vmatprep.subr.mxu1 %v12006_v36 }
 0x857   :  { %8664 = vmatpush3.msra.mxu0 %v12222_v32  ;;  %8709 = vmatpush3.msra.mxu1 %v12241_v43 }
 0x858   :  { %8665 = vmatprep.subr.mxu0 %v12006_v36  ;;  %8710 = vmatprep.subr.mxu1 %v12006_v36  ;;  %v16214_v36 = vld [vmem:[#allocation24_spill] sm:$0xff] }
 0x859   :  { %8666 = vmatpush3.msra.mxu0 %v12230_v37  ;;  %8711 = vmatpush3.msra.mxu1 %v12249_v45  ;;  %v12699_v37 = vld [vmem:[#allocation7 + $0x170] sm:$0xff]  ;;  %v12708_v45 = vld [vmem:[#allocation7 + $0x160] sm:$0xff] }
 0x85a   :  { %8667 = vmatprep.subr.mxu0 %v12646_v18  ;;  %8712 = vmatprep.subr.mxu1 %v12646_v18  ;;  %16220 = vst [vmem:[#allocation25_spill] sm:$0xff] %v12708_v45 }
 0x85b   :  { %8668 = vmatpush3.msra.mxu0 %v12238_v41  ;;  %8713 = vmatpush3.msra.mxu1 %v12257_v48  ;;  %v12703_v41 = vld [vmem:[#allocation7 + $0x168] sm:$0xff]  ;;  %v12713_v48 = vld [vmem:[#allocation7 + $0x158] sm:$0xff] }
 0x85c   :  { %8669 = vmatprep.subr.mxu0 %v12646_v18  ;;  %8714 = vmatprep.subr.mxu1 %v12646_v18  ;;  %16219 = vst [vmem:[#allocation22_spill] sm:$0xff] %v12703_v41 }
 0x85d   :  { %8670 = vmatpush3.msra.mxu0 %v12246_v44  ;;  %8715 = vmatpush3.msra.mxu1 %v12265_v51  ;;  %v12717_v51 = vld [vmem:[#allocation7 + $0x150] sm:$0xff] }
 0x85e   :  { %8671 = vmatprep.subr.mxu0 %v12646_v18  ;;  %8716 = vmatprep.subr.mxu1 %v12646_v18 }
 0x85f   :  { %8672 = vmatpush3.msra.mxu0 %v12254_v47  ;;  %8717 = vmatpush3.msra.mxu1 %v16193_v49  ;;  %v12732_v49 = vld [vmem:[#allocation7 + $0x140] sm:$0xff] }
 0x860   :  { %8673 = vmatprep.subr.mxu0 %v12646_v18  ;;  %8718 = vmatprep.subr.mxu1 %v12646_v18 }
 0x861   :  { %8674 = vmatpush3.msra.mxu0 %v12262_v22  ;;  %8719 = vmatpush3.msra.mxu1 %v12478_v24 }
 0x862   :  { %8675 = vmatprep.subr.mxu0 %v12646_v18  ;;  %8720 = vmatprep.subr.mxu1 %v12646_v18 }
 0x863   :  { %8676 = vmatpush3.msra.mxu0 %v16194_v13  ;;  %8721 = vmatpush3.msra.mxu1 %v12484_v38  ;;  %v12737_v13 = vld [vmem:[#allocation7 + $0xe8] sm:$0xff] }
 0x864   :  { %8677 = vmatprep.subr.mxu0 %v12646_v18  ;;  %8722 = vmatprep.subr.mxu1 %v12646_v18 }
 0x865   :  { %8678 = vmatpush3.msra.mxu0 %v16195_v59  ;;  %8723 = vmatpush3.msra.mxu1 %v12490_v33  ;;  %v12740_v59 = vld [vmem:[#allocation7 + $0x138] sm:$0xff] }
 0x866   :  { %8679 = vmatprep.subr.mxu0 %v12646_v18  ;;  %8689 = vmatprep.mubr.msk.f32.mxu0 %vm11369_vm0, %v12646_v18 }
 0x867   :  { %8680 = vmatpush3.msra.mxu0 %v16214_v36  ;;  %8762 = vmatprep.subr.mxu1 %v12646_v18 }
 0x868   :  { %8681 = vmatprep.subr.mxu0 %v12646_v18 }
 0x869   :  { %8682 = vmatpush3.msra.mxu0 %v16215_v46 }
 0x86a   :  { %8683 = vmatprep.subr.mxu0 %v12646_v18 }
 0x86b   :  { %8684 = vmatpush3.msra.mxu0 %v16216_v15 }
 0x86c   :  { %8685 = vmatprep.subr.mxu0 %v12646_v18 }
 0x86d   :  { %8686 = vmatpush3.msra.mxu0 %v16217_v16 }
 0x86e   :  { %8687 = vmatprep.subr.mxu0 %v12646_v18 }
 0x86f   :  { %8688 = vmatpush3.msra.mxu0 %v16218_v17 }
 0x870   :  { %8727 = vmatprep.subr.mxu0 %v12646_v18 }
 0x906   :  { %v1810_v19 = vpop.f32.mrf.mxu1 }
 0x907   :  { %v1811_v20 = vadd.f32 %v12508_v31, %v1810_v19 }
 0x908   :  { %v8656_v25 = vpop.f32.mrf.mxu1 }
 0x909   :  { %v12688_v28 = vsub.f32 %v12607_v57, %v1811_v20 }
 0x90b   :  { %8725 = vmatmul.mubr.f32.vlgmr.msra.gmra.mxu1 %v12688_v28  ;;  %v1815_v32 = vmul.f32 %v12688_v28, %v12688_v28  ;;  %v1823_v20 = vsub.f32 0.0, %v12688_v28  ;;  %v12851_v28 = vld [vmem:[#allocation5 + $0x170] sm:$0xff] }
 0x90c   :  { %8763 = vmatpush3.msra.mxu1 %v12693_v34  ;;  %8794 = vmatprep.mubr.msk.f32.mxu1 %vm11369_vm0, %v12646_v18 }
 0x90d   :  { %1816 = vadd.xlane.f32.xlu1 %v1815_v32  ;;  %8764 = vmatprep.subr.mxu1 %v12646_v18 }
 0x90e   :  { %8765 = vmatpush3.msra.mxu1 %v12699_v37 }
 0x90f   :  { %8766 = vmatprep.subr.mxu1 %v12646_v18 }
 0x910   :  { %v1733_v39 = vpop.f32.mrf.mxu0  ;;  %8767 = vmatpush3.msra.mxu1 %v12703_v41 }
 0x911   :  { %v1734_v43 = vadd.f32 %v12323_v40, %v1733_v39  ;;  %8768 = vmatprep.subr.mxu1 %v12646_v18  ;;  %v12720_v40 = vld [vmem:[#allocation7 + $0xf8] sm:$0xff] }
 0x912   :  { %v8621_v44 = vpop.f32.mrf.mxu0  ;;  %8769 = vmatpush3.msra.mxu1 %v12708_v45 }
 0x913   :  { %v1737_v47 = vsub.f32 %v12328_v53, %v1734_v43  ;;  %8770 = vmatprep.subr.mxu1 %v12646_v18  ;;  %v12724_v53 = vld [vmem:[#allocation7 + $0x148] sm:$0xff]  ;;  %v12859_v44 = vld [vmem:[#allocation5 + $0x160] sm:$0xff] }
 0x914   :  { %8771 = vmatpush3.msra.mxu1 %v12713_v48 }
 0x915   :  { %8690 = vmatmul.mubr.f32.vlgmr.msra.gmra.mxu0 %v1737_v47  ;;  %v1738_v22 = vmul.f32 %v1737_v47, %v1737_v47  ;;  %8772 = vmatprep.subr.mxu1 %v12646_v18  ;;  %v12863_v47 = vld [vmem:[#allocation5 + $0x158] sm:$0xff] }
 0x916   :  { %8773 = vmatpush3.msra.mxu1 %v12717_v51  ;;  %8728 = vmatpush3.msra.mxu0 %v12720_v40 }
 0x917   :  { %1739 = vadd.xlane.f32.xlu0 %v1738_v22  ;;  %8774 = vmatprep.subr.mxu1 %v12646_v18 }
 0x918   :  { %8775 = vmatpush3.msra.mxu1 %v12724_v53  ;;  %8729 = vmatprep.subr.mxu0 %v12646_v18 }
 0x919   :  { %8776 = vmatprep.subr.mxu1 %v12646_v18  ;;  %8730 = vmatpush3.msra.mxu0 %v12729_v42 }
 0x91a   :  { %8777 = vmatpush3.msra.mxu1 %v12732_v49  ;;  %8731 = vmatprep.subr.mxu0 %v12646_v18 }
 0x91b   :  { %8778 = vmatprep.subr.mxu1 %v12646_v18  ;;  %8732 = vmatpush3.msra.mxu0 %v12737_v13 }
 0x91c   :  { %8779 = vmatpush3.msra.mxu1 %v12740_v59  ;;  %8733 = vmatprep.subr.mxu0 %v12646_v18 }
 0x91d   :  { %8780 = vmatprep.subr.mxu1 %v12646_v18  ;;  %8734 = vmatpush3.msra.mxu0 %v12745_v12 }
 0x91e   :  { %8781 = vmatpush3.msra.mxu1 %v12748_v58  ;;  %8735 = vmatprep.subr.mxu0 %v12646_v18 }
 0x91f   :  { %8782 = vmatprep.subr.mxu1 %v12646_v18  ;;  %8736 = vmatpush3.msra.mxu0 %v12753_v61 }
 0x920   :  { %8783 = vmatpush3.msra.mxu1 %v12756_v2  ;;  %8737 = vmatprep.subr.mxu0 %v12646_v18 }
 0x921   :  { %8784 = vmatprep.subr.mxu1 %v12646_v18  ;;  %8738 = vmatpush3.msra.mxu0 %v12761_v1 }
 0x922   :  { %8785 = vmatpush3.msra.mxu1 %v12764_v5  ;;  %8739 = vmatprep.subr.mxu0 %v12646_v18 }
 0x923   :  { %8786 = vmatprep.subr.mxu1 %v12646_v18  ;;  %8740 = vmatpush3.msra.mxu0 %v12769_v6 }
 0x924   :  { %8787 = vmatpush3.msra.mxu1 %v12369_v50  ;;  %8741 = vmatprep.subr.mxu0 %v12646_v18  ;;  %v12787_v50 = vld [vmem:[#allocation7 + $0xb0] sm:$0xff] }
 0x925   :  { %8788 = vmatprep.subr.mxu1 %v12646_v18  ;;  %8742 = vmatpush3.msra.mxu0 %v12775_v8  ;;  %16223 = vst [vmem:[#allocation30_spill] sm:$0xff] %v12787_v50 }
 0x926   :  { %8789 = vmatpush3.msra.mxu1 %v16202_v52  ;;  %8743 = vmatprep.subr.mxu0 %v12646_v18  ;;  %v12792_v52 = vld [vmem:[#allocation7 + $0xa8] sm:$0xff] }
 0x927   :  { %8790 = vmatprep.subr.mxu1 %v12646_v18  ;;  %8744 = vmatpush3.msra.mxu0 %v12781_v9  ;;  %16224 = vst [vmem:[#allocation18_spill] sm:$0xff] %v12792_v52 }
 0x928   :  { %8791 = vmatpush3.msra.mxu1 %v16204_v62  ;;  %8745 = vmatprep.subr.mxu0 %v12646_v18  ;;  %v12799_v62 = vld [vmem:[#allocation7 + $0xa0] sm:$0xff] }
 0x929   :  { %8792 = vmatprep.subr.mxu1 %v12646_v18  ;;  %8746 = vmatpush3.msra.mxu0 %v12787_v50  ;;  %16225 = vst [vmem:[#allocation32_spill] sm:$0xff] %v12799_v62 }
 0x92a   :  { %8793 = vmatpush3.msra.mxu1 %v16206_v30  ;;  %8747 = vmatprep.subr.mxu0 %v12646_v18  ;;  %v12803_v30 = vld [vmem:[#allocation7 + $0x98] sm:$0xff] }
 0x92b   :  { %8748 = vmatpush3.msra.mxu0 %v12792_v52  ;;  %8759 = vmatprep.mubr.msk.f32.mxu0 %vm11369_vm0, %v12646_v18  ;;  %16226 = vst [vmem:[#allocation16_spill] sm:$0xff] %v12803_v30 }
 0x92c   :  { %8749 = vmatprep.subr.mxu0 %v12646_v18  ;;  %8832 = vmatprep.subr.mxu1 %v12646_v18 }
 0x92d   :  { %8750 = vmatpush3.msra.mxu0 %v12799_v62 }
 0x92e   :  { %8751 = vmatprep.subr.mxu0 %v12646_v18 }
 0x92f   :  { %8752 = vmatpush3.msra.mxu0 %v12803_v30 }
 0x930   :  { %8753 = vmatprep.subr.mxu0 %v12646_v18 }
 0x931   :  { %8754 = vmatpush3.msra.mxu0 %v12807_v63 }
 0x932   :  { %8755 = vmatprep.subr.mxu0 %v12646_v18 }
 0x933   :  { %8756 = vmatpush3.msra.mxu0 %v12811_v35 }
 0x934   :  { %8757 = vmatprep.subr.mxu0 %v12646_v18 }
 0x935   :  { %8758 = vmatpush3.msra.mxu0 %v12815_v14 }
 0x936   :  { %8797 = vmatprep.subr.mxu0 %v12646_v18 }
 0x996   :  { %v1817_v26 = vpop.xlane.xlu1 %1816 }
 0x997   :  { %v1818_v23 = vmul.f32 0.5, %v1817_v26  ;;  %v12874_v26 = vld [vmem:[#allocation5 + $0xf8] sm:$0xff] }
 0x9a0   :  { %v1740_v10 = vpop.xlane.xlu0 %1739 }
 0x9a1   :  { %v1741_v21 = vmul.f32 0.5, %v1740_v10  ;;  %v12869_v10 = vld [vmem:[#allocation5 + $0x150] sm:$0xff] }
 0x9a3   :  { %v12819_v54 = vadd.f32 %v1818_v23, %v1741_v21  ;;  %v12877_v21 = vld [vmem:[#allocation5 + $0x148] sm:$0xff]  ;;  %v12882_v23 = vld [vmem:[#allocation5 + $0xf0] sm:$0xff] }
 0x9a5   :  { %vm1820_vm4 = vcmp.lt.f32.partialorder %v12819_v54, %v12587_v4  ;;  %v1894_v4 = vmul.f32 %v12623_v27, %v12623_v27  ;;  %v12845_v27 = vld [vmem:[#allocation5 + $0x178] sm:$0xff] }
 0x9a6   :  { %v1821_v0 = vsel %vm1820_vm4, 1.0, %v16213_v7 }
 0x9a7   :  { %v12827_v36 = vmul.f32 %v1821_v0, %v12595_v29  ;;  %v1895_v11 = vsub.f32 1.0, %v1894_v4  ;;  %v12890_v0 = vld [vmem:[#allocation5 + $0xe8] sm:$0xff]  ;;  %v12914_v4 = vld [vmem:[#allocation5 + $0xd0] sm:$0xff] }
 0x9cb   :  { %v1966_v56 = vpop.f32.mrf.mxu1 }
 0x9cc   :  { %v1972_v46 = vmul.f32 %v1971_v3, %v1966_v56  ;;  %v12893_v3 = vld [vmem:[#allocation5 + $0x138] sm:$0xff]  ;;  %v12898_v56 = vld [vmem:[#allocation5 + $0xe0] sm:$0xff] }
 0x9cd   :  { %v8726_v15 = vpop.f32.mrf.mxu1 }
 0x9ce   :  { %v1973_v16 = vmul.f32 %v1972_v46, %v12827_v36  ;;  %v12901_v46 = vld [vmem:[#allocation5 + $0x130] sm:$0xff]  ;;  %v12906_v15 = vld [vmem:[#allocation5 + $0xd8] sm:$0xff] }
 0x9d0   :  { %v12831_v17 = vadd.f32 %v1973_v16, %v12601_v55  ;;  %v12909_v16 = vld [vmem:[#allocation5 + $0x128] sm:$0xff] }
 0x9d2   :  { %10787 = vtanh.f32 %v12831_v17 }
 0x9d5   :  { %v1890_v19 = vpop.f32.mrf.mxu0 }
 0x9d6   :  { %v1896_v25 = vmul.f32 %v1895_v11, %v1890_v19  ;;  %v12917_v11 = vld [vmem:[#allocation5 + $0x120] sm:$0xff]  ;;  %v12922_v19 = vld [vmem:[#allocation5 + $0xc8] sm:$0xff] }
 0x9d7   :  { %v8691_v32 = vpop.f32.mrf.mxu0 }
 0x9d8   :  { %v1897_v29 = vadd.f32 %v1896_v25, %v1823_v20  ;;  %v12925_v20 = vld [vmem:[#allocation5 + $0x118] sm:$0xff]  ;;  %v12930_v25 = vld [vmem:[#allocation5 + $0xc0] sm:$0xff] }
 0x9d9   :  { %v12936_v32 = vld [vmem:[#allocation5 + $0xb8] sm:$0xff] }
 0x9da   :  { %v1898_v39 = vmul.f32 %v1897_v29, %v12827_v36  ;;  %16230 = vst [vmem:[#allocation19_spill] sm:$0xff] %v12936_v32  ;;  %v12942_v29 = vld [vmem:[#allocation5 + $0xb0] sm:$0xff] }
 0x9db   :  { %16231 = vst [vmem:[#allocation23_spill] sm:$0xff] %v12942_v29 }
 0x9dc   :  { %v12839_v43 = vadd.f32 %v1898_v39, %v12607_v57  ;;  %v12855_v57 = vld [vmem:[#allocation5 + $0x168] sm:$0xff]  ;;  %v12962_v39 = vld [vmem:[#allocation5 + $0x90] sm:$0xff] }
 0x9dd   :  { %16235 = vst [vmem:[#allocation29_spill] sm:$0xff] %v12962_v39 }
 0x9de   :  { %10789 = vtanh.f32 %v12839_v43 }
 0x9df   :  { %v12842_v55 = vpop.eup %10787 }
 0x9e0   :  { %8795 = vmatmul.mubr.f32.vlgmr.msra.gmra.mxu1 %v12842_v55 }
 0x9e1   :  { %8833 = vmatpush3.msra.mxu1 %v12845_v27  ;;  %8864 = vmatprep.mubr.msk.f32.mxu1 %vm11369_vm0, %v12646_v18 }
 0x9e2   :  { %8834 = vmatprep.subr.mxu1 %v12646_v18 }
 0x9e3   :  { %8835 = vmatpush3.msra.mxu1 %v12851_v28 }
 0x9e4   :  { %8836 = vmatprep.subr.mxu1 %v12646_v18 }
 0x9e5   :  { %8837 = vmatpush3.msra.mxu1 %v12855_v57 }
 0x9e6   :  { %8838 = vmatprep.subr.mxu1 %v12646_v18 }
 0x9e7   :  { %8839 = vmatpush3.msra.mxu1 %v12859_v44 }
 0x9e8   :  { %8840 = vmatprep.subr.mxu1 %v12646_v18 }
 0x9e9   :  { %8841 = vmatpush3.msra.mxu1 %v12863_v47 }
 0x9ea   :  { %8842 = vmatprep.subr.mxu1 %v12646_v18 }
 0x9eb   :  { %v12867_v22 = vpop.eup %10789  ;;  %8843 = vmatpush3.msra.mxu1 %v12869_v10 }
 0x9ec   :  { %8760 = vmatmul.mubr.f32.vlgmr.msra.gmra.mxu0 %v12867_v22  ;;  %8844 = vmatprep.subr.mxu1 %v12646_v18 }
 0x9ed   :  { %8798 = vmatpush3.msra.mxu0 %v12874_v26  ;;  %8845 = vmatpush3.msra.mxu1 %v12877_v21 }
 0x9ee   :  { %8799 = vmatprep.subr.mxu0 %v12646_v18  ;;  %8846 = vmatprep.subr.mxu1 %v12646_v18 }
 0x9ef   :  { %8800 = vmatpush3.msra.mxu0 %v12882_v23  ;;  %8847 = vmatpush3.msra.mxu1 %v12885_v60 }
 0x9f0   :  { %8801 = vmatprep.subr.mxu0 %v12646_v18  ;;  %8848 = vmatprep.subr.mxu1 %v12646_v18 }
 0x9f1   :  { %8802 = vmatpush3.msra.mxu0 %v12890_v0  ;;  %8849 = vmatpush3.msra.mxu1 %v12893_v3 }
 0x9f2   :  { %8803 = vmatprep.subr.mxu0 %v12646_v18  ;;  %8850 = vmatprep.subr.mxu1 %v12646_v18 }
 0x9f3   :  { %8804 = vmatpush3.msra.mxu0 %v12898_v56  ;;  %8851 = vmatpush3.msra.mxu1 %v12901_v46 }
 0x9f4   :  { %8805 = vmatprep.subr.mxu0 %v12646_v18  ;;  %8852 = vmatprep.subr.mxu1 %v12646_v18 }
 0x9f5   :  { %8806 = vmatpush3.msra.mxu0 %v12906_v15  ;;  %8853 = vmatpush3.msra.mxu1 %v12909_v16 }
 0x9f6   :  { %8807 = vmatprep.subr.mxu0 %v12646_v18  ;;  %8854 = vmatprep.subr.mxu1 %v12646_v18 }
 0x9f7   :  { %8808 = vmatpush3.msra.mxu0 %v12914_v4  ;;  %8855 = vmatpush3.msra.mxu1 %v12917_v11 }
 0x9f8   :  { %8809 = vmatprep.subr.mxu0 %v12646_v18  ;;  %8856 = vmatprep.subr.mxu1 %v12646_v18 }
 0x9f9   :  { %8810 = vmatpush3.msra.mxu0 %v12922_v19  ;;  %8857 = vmatpush3.msra.mxu1 %v12925_v20 }
 0x9fa   :  { %8811 = vmatprep.subr.mxu0 %v12646_v18  ;;  %8858 = vmatprep.subr.mxu1 %v12646_v18 }
 0x9fb   :  { %8812 = vmatpush3.msra.mxu0 %v12930_v25  ;;  %8859 = vmatpush3.msra.mxu1 %v12478_v24  ;;  %v12949_v24 = vld [vmem:[#allocation5 + $0xa8] sm:$0xff] }
 0x9fc   :  { %8813 = vmatprep.subr.mxu0 %v12646_v18  ;;  %8860 = vmatprep.subr.mxu1 %v12646_v18  ;;  %16232 = vst [vmem:[#allocation20_spill] sm:$0xff] %v12949_v24 }
 0x9fd   :  { %8814 = vmatpush3.msra.mxu0 %v12936_v32  ;;  %8861 = vmatpush3.msra.mxu1 %v12484_v38  ;;  %v12954_v38 = vld [vmem:[#allocation5 + $0xa0] sm:$0xff] }
 0x9fe   :  { %8815 = vmatprep.subr.mxu0 %v12646_v18  ;;  %8862 = vmatprep.subr.mxu1 %v12646_v18  ;;  %16233 = vst [vmem:[#allocation34_spill] sm:$0xff] %v12954_v38 }
 0x9ff   :  { %8816 = vmatpush3.msra.mxu0 %v12942_v29  ;;  %8863 = vmatpush3.msra.mxu1 %v12490_v33  ;;  %v12958_v33 = vld [vmem:[#allocation5 + $0x98] sm:$0xff] }
 0xa00   :  { %8817 = vmatprep.subr.mxu0 %v12646_v18  ;;  %8829 = vmatprep.mubr.msk.f32.mxu0 %vm11369_vm0, %v12646_v18  ;;  %16234 = vst [vmem:[#allocation24_spill] sm:$0xff] %v12958_v33 }
 0xa01   :  { %8818 = vmatpush3.msra.mxu0 %v12949_v24  ;;  %8902 = vmatprep.subr.mxu1 %v12646_v18  ;;  %v12966_v24 = vld [vmem:[#allocation5 + $0x88] sm:$0xff] }
 0xa02   :  { %8819 = vmatprep.subr.mxu0 %v12646_v18  ;;  %16236 = vst [vmem:[#allocation26_spill] sm:$0xff] %v12966_v24 }
 0xa03   :  { %8820 = vmatpush3.msra.mxu0 %v12954_v38  ;;  %v12970_v38 = vld [vmem:[#allocation5 + $0x80] sm:$0xff] }
 0xa04   :  { %8821 = vmatprep.subr.mxu0 %v12646_v18 }
 0xa05   :  { %8822 = vmatpush3.msra.mxu0 %v12958_v33 }
 0xa06   :  { %8823 = vmatprep.subr.mxu0 %v12646_v18 }
 0xa07   :  { %8824 = vmatpush3.msra.mxu0 %v12962_v39 }
 0xa08   :  { %8825 = vmatprep.subr.mxu0 %v12646_v18 }
 0xa09   :  { %8826 = vmatpush3.msra.mxu0 %v12966_v24 }
 0xa0a   :  { %8827 = vmatprep.subr.mxu0 %v12646_v18 }
 0xa0b   :  { %8828 = vmatpush3.msra.mxu0 %v12970_v38 }
 0xa0c   :  { %8867 = vmatprep.subr.mxu0 %v12646_v18 }
 0xaa0   :  { %v2119_v33 = vpop.f32.mrf.mxu1 }
 0xaa1   :  { %v2120_v29 = vadd.f32 %v12508_v31, %v2119_v33  ;;  %v12998_v33 = vld [vmem:[#allocation8] sm:$0xff] }
 0xaa2   :  { %v8796_v32 = vpop.f32.mrf.mxu1 }
 0xaa3   :  { %v12976_v39 = vsub.f32 %v12839_v43, %v2120_v29  ;;  %v12993_v32 = vld [vmem:[%s15924_s3 + $0x1] ss:$0 sm:$0xff] }
 0xaa5   :  { %8865 = vmatmul.mubr.f32.vlgmr.msra.gmra.mxu1 %v12976_v39  ;;  %v2124_v24 = vmul.f32 %v12976_v39, %v12976_v39 }
 0xaa6   :  { %8903 = vmatpush3.msra.mxu1 %v12693_v34  ;;  %8934 = vmatprep.mubr.msk.f32.mxu1 %vm11369_vm0, %v12646_v18 }
 0xaa7   :  { %2125 = vadd.xlane.f32.xlu1 %v2124_v24  ;;  %8904 = vmatprep.subr.mxu1 %v12646_v18 }
 0xaa8   :  { %8905 = vmatpush3.msra.mxu1 %v12699_v37 }
 0xaa9   :  { %8906 = vmatprep.subr.mxu1 %v12646_v18 }
 0xaaa   :  { %8907 = vmatpush3.msra.mxu1 %v12703_v41 }
 0xaab   :  { %8908 = vmatprep.subr.mxu1 %v12646_v18 }
 0xaac   :  { %v2042_v31 = vpop.f32.mrf.mxu0  ;;  %8909 = vmatpush3.msra.mxu1 %v12708_v45 }
 0xaad   :  { %v2043_v29 = vadd.f32 %v12993_v32, %v2042_v31  ;;  %8910 = vmatprep.subr.mxu1 %v12646_v18  ;;  %v13039_v31 = vld [vmem:[#allocation7 + $0x108] sm:$0xff] }
 0xaae   :  { %v8761_v24 = vpop.f32.mrf.mxu0  ;;  %8911 = vmatpush3.msra.mxu1 %v12713_v48  ;;  %16237 = vst [vmem:[#allocation31_spill] sm:$0xff] %v13039_v31 }
 0xaaf   :  { %v2046_v41 = vsub.f32 %v12998_v33, %v2043_v29  ;;  %8912 = vmatprep.subr.mxu1 %v12646_v18  ;;  %v13045_v29 = vld [vmem:[#allocation7 + $0x100] sm:$0xff] }
 0xab0   :  { %8913 = vmatpush3.msra.mxu1 %v12717_v51  ;;  %16238 = vst [vmem:[#allocation28_spill] sm:$0xff] %v13045_v29 }
 0xab1   :  { %8830 = vmatmul.mubr.f32.vlgmr.msra.gmra.mxu0 %v2046_v41  ;;  %v2047_v45 = vmul.f32 %v2046_v41, %v2046_v41  ;;  %8914 = vmatprep.subr.mxu1 %v12646_v18  ;;  %v13027_v41 = vld [vmem:[#allocation7 + $0x118] sm:$0xff] }
 0xab2   :  { %8915 = vmatpush3.msra.mxu1 %v12724_v53  ;;  %8868 = vmatpush3.msra.mxu0 %v12720_v40 }
 0xab3   :  { %2048 = vadd.xlane.f32.xlu0 %v2047_v45  ;;  %8916 = vmatprep.subr.mxu1 %v12646_v18  ;;  %v13033_v45 = vld [vmem:[#allocation7 + $0x110] sm:$0xff] }
 0xab4   :  { %8917 = vmatpush3.msra.mxu1 %v12732_v49  ;;  %8869 = vmatprep.subr.mxu0 %v12646_v18 }
 0xab5   :  { %8918 = vmatprep.subr.mxu1 %v12646_v18  ;;  %8870 = vmatpush3.msra.mxu0 %v12729_v42 }
 0xab6   :  { %8919 = vmatpush3.msra.mxu1 %v12740_v59  ;;  %8871 = vmatprep.subr.mxu0 %v12646_v18 }
 0xab7   :  { %8920 = vmatprep.subr.mxu1 %v12646_v18  ;;  %8872 = vmatpush3.msra.mxu0 %v12737_v13 }
 0xab8   :  { %8921 = vmatpush3.msra.mxu1 %v12748_v58  ;;  %8873 = vmatprep.subr.mxu0 %v12646_v18 }
 0xab9   :  { %8922 = vmatprep.subr.mxu1 %v12646_v18  ;;  %8874 = vmatpush3.msra.mxu0 %v12745_v12 }
 0xaba   :  { %8923 = vmatpush3.msra.mxu1 %v12756_v2  ;;  %8875 = vmatprep.subr.mxu0 %v12646_v18 }
 0xabb   :  { %8924 = vmatprep.subr.mxu1 %v12646_v18  ;;  %8876 = vmatpush3.msra.mxu0 %v12753_v61 }
 0xabc   :  { %8925 = vmatpush3.msra.mxu1 %v12764_v5  ;;  %8877 = vmatprep.subr.mxu0 %v12646_v18 }
 0xabd   :  { %8926 = vmatprep.subr.mxu1 %v12646_v18  ;;  %8878 = vmatpush3.msra.mxu0 %v12761_v1 }
 0xabe   :  { %8927 = vmatpush3.msra.mxu1 %v13027_v41  ;;  %8879 = vmatprep.subr.mxu0 %v12646_v18 }
 0xabf   :  { %8928 = vmatprep.subr.mxu1 %v12646_v18  ;;  %8880 = vmatpush3.msra.mxu0 %v12769_v6 }
 0xac0   :  { %8929 = vmatpush3.msra.mxu1 %v13033_v45  ;;  %8881 = vmatprep.subr.mxu0 %v12646_v18 }
 0xac1   :  { %8930 = vmatprep.subr.mxu1 %v12646_v18  ;;  %8882 = vmatpush3.msra.mxu0 %v12775_v8 }
 0xac2   :  { %8931 = vmatpush3.msra.mxu1 %v13039_v31  ;;  %8883 = vmatprep.subr.mxu0 %v12646_v18 }
 0xac3   :  { %8932 = vmatprep.subr.mxu1 %v12646_v18  ;;  %8884 = vmatpush3.msra.mxu0 %v12781_v9 }
 0xac4   :  { %8933 = vmatpush3.msra.mxu1 %v13045_v29  ;;  %8885 = vmatprep.subr.mxu0 %v12646_v18 }
 0xac5   :  { %8886 = vmatpush3.msra.mxu0 %v12787_v50  ;;  %8899 = vmatprep.mubr.msk.f32.mxu0 %vm11369_vm0, %v12646_v18 }
 0xac6   :  { %8887 = vmatprep.subr.mxu0 %v12646_v18  ;;  %8972 = vmatprep.subr.mxu1 %v12646_v18 }
 0xac7   :  { %8888 = vmatpush3.msra.mxu0 %v12792_v52 }
 0xac8   :  { %8889 = vmatprep.subr.mxu0 %v12646_v18 }
 0xac9   :  { %8890 = vmatpush3.msra.mxu0 %v12799_v62 }
 0xaca   :  { %8891 = vmatprep.subr.mxu0 %v12646_v18 }
 0xacb   :  { %8892 = vmatpush3.msra.mxu0 %v12803_v30 }
 0xacc   :  { %8893 = vmatprep.subr.mxu0 %v12646_v18 }
 0xacd   :  { %8894 = vmatpush3.msra.mxu0 %v12807_v63  ;;  %v2279_v63 = vmul.f32 %v12842_v55, %v12842_v55 }
 0xace   :  { %8895 = vmatprep.subr.mxu0 %v12646_v18 }
 0xacf   :  { %8896 = vmatpush3.msra.mxu0 %v12811_v35  ;;  %v2280_v30 = vsub.f32 1.0, %v2279_v63  ;;  %v2132_v63 = vsub.f32 0.0, %v12976_v39  ;;  %v13148_v39 = vld [vmem:[#allocation5 + $0x100] sm:$0xff] }
 0xad0   :  { %8897 = vmatprep.subr.mxu0 %v12646_v18 }
 0xad1   :  { %8898 = vmatpush3.msra.mxu0 %v12815_v14 }
 0xad2   :  { %8937 = vmatprep.subr.mxu0 %v12646_v18 }
 0xb30   :  { %v2126_v62 = vpop.xlane.xlu1 %2125 }
 0xb31   :  { %v2127_v50 = vmul.f32 0.5, %v2126_v62 }
 0xb3c   :  { %v2049_v24 = vpop.xlane.xlu0 %2048 }
 0xb3d   :  { %v2050_v52 = vmul.f32 0.5, %v2049_v24 }
 0xb3f   :  { %v13066_v9 = vadd.f32 %v2127_v50, %v2050_v52  ;;  %v2203_v52 = vmul.f32 %v12867_v22, %v12867_v22  ;;  %v16239_v22 = vld [vmem:[#allocation19_spill] sm:$0xff] }
 0xb41   :  { %vm2129_vm5 = vcmp.lt.f32.partialorder %v13066_v9, %v12819_v54  ;;  %v2204_v62 = vsub.f32 1.0, %v2203_v52  ;;  %v16243_v52 = vld [vmem:[#allocation24_spill] sm:$0xff] }
 0xb42   :  { %v2130_v35 = vsel %vm2129_vm5, 1.0, %v16213_v7 }
 0xb43   :  { %v13074_v14 = vmul.f32 %v2130_v35, %v12827_v36 }
 0xb65   :  { %v2275_v29 = vpop.f32.mrf.mxu1 }
 0xb66   :  { %v2281_v8 = vmul.f32 %v2280_v30, %v2275_v29  ;;  %v16241_v29 = vld [vmem:[#allocation20_spill] sm:$0xff] }
 0xb67   :  { %v8866_v31 = vpop.f32.mrf.mxu1 }
 0xb68   :  { %v2282_v24 = vmul.f32 %v2281_v8, %v13074_v14  ;;  %v16240_v31 = vld [vmem:[#allocation23_spill] sm:$0xff] }
 0xb6a   :  { %v13078_v50 = vadd.f32 %v2282_v24, %v12831_v17  ;;  %v13136_v17 = vld [vmem:[#allocation5 + $0x110] sm:$0xff]  ;;  %v16242_v24 = vld [vmem:[#allocation34_spill] sm:$0xff] }
 0xb6c   :  { %10791 = vtanh.f32 %v13078_v50 }
 0xb71   :  { %v2199_v54 = vpop.f32.mrf.mxu0 }
 0xb72   :  { %v2205_v55 = vmul.f32 %v2204_v62, %v2199_v54  ;;  %v16244_v62 = vld [vmem:[#allocation29_spill] sm:$0xff]  ;;  %v16245_v54 = vld [vmem:[#allocation26_spill] sm:$0xff] }
 0xb73   :  { %v8831_v7 = vpop.f32.mrf.mxu0 }
 0xb74   :  { %v2206_v35 = vadd.f32 %v2205_v55, %v2132_v63  ;;  %v13172_v55 = vld [vmem:[%s15924_s3 + $0x2] ss:$0 sm:$0xff] }
 0xb76   :  { %v2207_v30 = vmul.f32 %v2206_v35, %v13074_v14 }
 0xb78   :  { %v13086_v36 = vadd.f32 %v2207_v30, %v12839_v43  ;;  %v13142_v43 = vld [vmem:[#allocation5 + $0x108] sm:$0xff] }
 0xb79   :  { %v13088_v8 = vpop.eup %10791 }
 0xb7a   :  { %10793 = vtanh.f32 %v13086_v36  ;;  %8935 = vmatmul.mubr.f32.vlgmr.msra.gmra.mxu1 %v13088_v8 }
 0xb7b   :  { %8973 = vmatpush3.msra.mxu1 %v12845_v27  ;;  %9004 = vmatprep.mubr.msk.f32.mxu1 %vm11369_vm0, %v12646_v18 }
 0xb7c   :  { %8974 = vmatprep.subr.mxu1 %v12646_v18 }
 0xb7d   :  { %8975 = vmatpush3.msra.mxu1 %v12851_v28 }
 0xb7e   :  { %8976 = vmatprep.subr.mxu1 %v12646_v18 }
 0xb7f   :  { %8977 = vmatpush3.msra.mxu1 %v12855_v57 }
 0xb80   :  { %8978 = vmatprep.subr.mxu1 %v12646_v18 }
 0xb81   :  { %8979 = vmatpush3.msra.mxu1 %v12859_v44 }
 0xb82   :  { %8980 = vmatprep.subr.mxu1 %v12646_v18 }
 0xb83   :  { %8981 = vmatpush3.msra.mxu1 %v12863_v47 }
 0xb84   :  { %8982 = vmatprep.subr.mxu1 %v12646_v18 }
 0xb85   :  { %8983 = vmatpush3.msra.mxu1 %v12869_v10 }
 0xb86   :  { %8984 = vmatprep.subr.mxu1 %v12646_v18 }
 0xb87   :  { %v13106_v7 = vpop.eup %10793  ;;  %8985 = vmatpush3.msra.mxu1 %v12877_v21 }
 0xb88   :  { %8900 = vmatmul.mubr.f32.vlgmr.msra.gmra.mxu0 %v13106_v7  ;;  %8986 = vmatprep.subr.mxu1 %v12646_v18 }
 0xb89   :  { %8938 = vmatpush3.msra.mxu0 %v12874_v26  ;;  %8987 = vmatpush3.msra.mxu1 %v12885_v60 }
 0xb8a   :  { %8939 = vmatprep.subr.mxu0 %v12646_v18  ;;  %8988 = vmatprep.subr.mxu1 %v12646_v18 }
 0xb8b   :  { %8940 = vmatpush3.msra.mxu0 %v12882_v23  ;;  %8989 = vmatpush3.msra.mxu1 %v12893_v3 }
 0xb8c   :  { %8941 = vmatprep.subr.mxu0 %v12646_v18  ;;  %8990 = vmatprep.subr.mxu1 %v12646_v18 }
 0xb8d   :  { %8942 = vmatpush3.msra.mxu0 %v12890_v0  ;;  %8991 = vmatpush3.msra.mxu1 %v12901_v46 }
 0xb8e   :  { %8943 = vmatprep.subr.mxu0 %v12646_v18  ;;  %8992 = vmatprep.subr.mxu1 %v12646_v18 }
 0xb8f   :  { %8944 = vmatpush3.msra.mxu0 %v12898_v56  ;;  %8993 = vmatpush3.msra.mxu1 %v12909_v16 }
 0xb90   :  { %8945 = vmatprep.subr.mxu0 %v12646_v18  ;;  %8994 = vmatprep.subr.mxu1 %v12646_v18 }
 0xb91   :  { %8946 = vmatpush3.msra.mxu0 %v12906_v15  ;;  %8995 = vmatpush3.msra.mxu1 %v12917_v11 }
 0xb92   :  { %8947 = vmatprep.subr.mxu0 %v12646_v18  ;;  %8996 = vmatprep.subr.mxu1 %v12646_v18 }
 0xb93   :  { %8948 = vmatpush3.msra.mxu0 %v12914_v4  ;;  %8997 = vmatpush3.msra.mxu1 %v12925_v20 }
 0xb94   :  { %8949 = vmatprep.subr.mxu0 %v12646_v18  ;;  %8998 = vmatprep.subr.mxu1 %v12646_v18 }
 0xb95   :  { %8950 = vmatpush3.msra.mxu0 %v12922_v19  ;;  %8999 = vmatpush3.msra.mxu1 %v13136_v17 }
 0xb96   :  { %8951 = vmatprep.subr.mxu0 %v12646_v18  ;;  %9000 = vmatprep.subr.mxu1 %v12646_v18 }
 0xb97   :  { %8952 = vmatpush3.msra.mxu0 %v12930_v25  ;;  %9001 = vmatpush3.msra.mxu1 %v13142_v43 }
 0xb98   :  { %8953 = vmatprep.subr.mxu0 %v12646_v18  ;;  %9002 = vmatprep.subr.mxu1 %v12646_v18 }
 0xb99   :  { %8954 = vmatpush3.msra.mxu0 %v16239_v22  ;;  %9003 = vmatpush3.msra.mxu1 %v13148_v39 }
 0xb9a   :  { %8955 = vmatprep.subr.mxu0 %v12646_v18  ;;  %8969 = vmatprep.mubr.msk.f32.mxu0 %vm11369_vm0, %v12646_v18 }
 0xb9b   :  { %8956 = vmatpush3.msra.mxu0 %v16240_v31  ;;  %9042 = vmatprep.subr.mxu1 %v12646_v18 }
 0xb9c   :  { %8957 = vmatprep.subr.mxu0 %v12646_v18 }
 0xb9d   :  { %8958 = vmatpush3.msra.mxu0 %v16241_v29 }
 0xb9e   :  { %8959 = vmatprep.subr.mxu0 %v12646_v18 }
 0xb9f   :  { %8960 = vmatpush3.msra.mxu0 %v16242_v24 }
 0xba0   :  { %8961 = vmatprep.subr.mxu0 %v12646_v18 }
 0xba1   :  { %8962 = vmatpush3.msra.mxu0 %v16243_v52 }
 0xba2   :  { %8963 = vmatprep.subr.mxu0 %v12646_v18 }
 0xba3   :  { %8964 = vmatpush3.msra.mxu0 %v16244_v62 }
 0xba4   :  { %8965 = vmatprep.subr.mxu0 %v12646_v18 }
 0xba5   :  { %8966 = vmatpush3.msra.mxu0 %v16245_v54 }
 0xba6   :  { %8967 = vmatprep.subr.mxu0 %v12646_v18 }
 0xba7   :  { %8968 = vmatpush3.msra.mxu0 %v12970_v38 }
 0xba8   :  { %9007 = vmatprep.subr.mxu0 %v12646_v18 }
 0xc3a   :  { %v2428_v63 = vpop.f32.mrf.mxu1 }
 0xc3b   :  { %v2429_v35 = vadd.f32 %v13172_v55, %v2428_v63  ;;  %v16246_v63 = vld [vmem:[#allocation22_spill] sm:$0xff] }
 0xc3c   :  { %v8936_v30 = vpop.f32.mrf.mxu1 }
 0xc3d   :  { %v13176_v62 = vsub.f32 %v13086_v36, %v2429_v35  ;;  %v16247_v35 = vld [vmem:[#allocation25_spill] sm:$0xff] }
 0xc3f   :  { %9005 = vmatmul.mubr.f32.vlgmr.msra.gmra.mxu1 %v13176_v62  ;;  %v2433_v54 = vmul.f32 %v13176_v62, %v13176_v62 }
 0xc40   :  { %9043 = vmatpush3.msra.mxu1 %v12693_v34  ;;  %9074 = vmatprep.mubr.msk.f32.mxu1 %vm11369_vm0, %v12646_v18 }
 0xc41   :  { %2434 = vadd.xlane.f32.xlu1 %v2433_v54  ;;  %9044 = vmatprep.subr.mxu1 %v12646_v18 }
 0xc42   :  { %9045 = vmatpush3.msra.mxu1 %v12699_v37 }
 0xc43   :  { %9046 = vmatprep.subr.mxu1 %v12646_v18 }
 0xc44   :  { %9047 = vmatpush3.msra.mxu1 %v16246_v63 }
 0xc45   :  { %9048 = vmatprep.subr.mxu1 %v12646_v18 }
 0xc46   :  { %9049 = vmatpush3.msra.mxu1 %v16247_v35 }
 0xc47   :  { %9050 = vmatprep.subr.mxu1 %v12646_v18 }
 0xc48   :  { %v2351_v30 = vpop.f32.mrf.mxu0  ;;  %9051 = vmatpush3.msra.mxu1 %v12713_v48  ;;  %v16248_v48 = vld [vmem:[#allocation31_spill] sm:$0xff] }
 0xc49   :  { %v2352_v34 = vadd.f32 %v12993_v32, %v2351_v30  ;;  %9052 = vmatprep.subr.mxu1 %v12646_v18  ;;  %v2588_v30 = vmul.f32 %v13088_v8, %v13088_v8 }
 0xc4a   :  { %v8901_v54 = vpop.f32.mrf.mxu0  ;;  %9053 = vmatpush3.msra.mxu1 %v12717_v51  ;;  %v16249_v51 = vld [vmem:[#allocation27_spill] sm:$0xff] }
 0xc4b   :  { %v2355_v37 = vsub.f32 %v12998_v33, %v2352_v34  ;;  %9054 = vmatprep.subr.mxu1 %v12646_v18  ;;  %v16259_v34 = vmov 0.9  }
 0xc4c   :  { %9055 = vmatpush3.msra.mxu1 %v12724_v53  ;;  %v16251_v53 = vld [vmem:[#allocation15_spill] sm:$0xff] }
 0xc4d   :  { %8970 = vmatmul.mubr.f32.vlgmr.msra.gmra.mxu0 %v2355_v37  ;;  %v2356_v63 = vmul.f32 %v2355_v37, %v2355_v37  ;;  %9056 = vmatprep.subr.mxu1 %v12646_v18  ;;  %v2589_v37 = vsub.f32 1.0, %v2588_v30  ;;  %v13471_v30 = vld [vmem:[#allocation7 + $0x90] sm:$0xff] }
 0xc4e   :  { %9057 = vmatpush3.msra.mxu1 %v12732_v49  ;;  %9008 = vmatpush3.msra.mxu0 %v12720_v40  ;;  %v16250_v40 = vld [vmem:[#allocation28_spill] sm:$0xff]  ;;  %v16253_v49 = vld [vmem:[#allocation18_spill] sm:$0xff]  ;;  %16272 = vst [vmem:[#allocation15_spill] sm:$0xff] %v13471_v30 }
 0xc4f   :  { %2357 = vadd.xlane.f32.xlu0 %v2356_v63  ;;  %9058 = vmatprep.subr.mxu1 %v12646_v18 }
 0xc50   :  { %9059 = vmatpush3.msra.mxu1 %v12740_v59  ;;  %9009 = vmatprep.subr.mxu0 %v12646_v18  ;;  %v16255_v59 = vld [vmem:[#allocation16_spill] sm:$0xff] }
 0xc51   :  { %9060 = vmatprep.subr.mxu1 %v12646_v18  ;;  %9010 = vmatpush3.msra.mxu0 %v12729_v42  ;;  %v16252_v42 = vld [vmem:[#allocation30_spill] sm:$0xff] }
 0xc52   :  { %9061 = vmatpush3.msra.mxu1 %v12748_v58  ;;  %9011 = vmatprep.subr.mxu0 %v12646_v18  ;;  %v16257_v58 = vld [vmem:[#allocation17_spill] sm:$0xff] }
 0xc53   :  { %9062 = vmatprep.subr.mxu1 %v12646_v18  ;;  %9012 = vmatpush3.msra.mxu0 %v12737_v13  ;;  %v16254_v13 = vld [vmem:[#allocation32_spill] sm:$0xff] }
 0xc54   :  { %9063 = vmatpush3.msra.mxu1 %v12756_v2  ;;  %9013 = vmatprep.subr.mxu0 %v12646_v18 }
 0xc55   :  { %9064 = vmatprep.subr.mxu1 %v12646_v18  ;;  %9014 = vmatpush3.msra.mxu0 %v12745_v12  ;;  %v16256_v12 = vld [vmem:[#allocation33_spill] sm:$0xff] }
 0xc56   :  { %9065 = vmatpush3.msra.mxu1 %v12764_v5  ;;  %9015 = vmatprep.subr.mxu0 %v12646_v18 }
 0xc57   :  { %9066 = vmatprep.subr.mxu1 %v12646_v18  ;;  %9016 = vmatpush3.msra.mxu0 %v12753_v61  ;;  %v16258_v61 = vld [vmem:[#allocation21_spill] sm:$0xff] }
 0xc58   :  { %9067 = vmatpush3.msra.mxu1 %v13027_v41  ;;  %9017 = vmatprep.subr.mxu0 %v12646_v18 }
 0xc59   :  { %9068 = vmatprep.subr.mxu1 %v12646_v18  ;;  %9018 = vmatpush3.msra.mxu0 %v12761_v1 }
 0xc5a   :  { %9069 = vmatpush3.msra.mxu1 %v13033_v45  ;;  %9019 = vmatprep.subr.mxu0 %v12646_v18 }
 0xc5b   :  { %9070 = vmatprep.subr.mxu1 %v12646_v18  ;;  %9020 = vmatpush3.msra.mxu0 %v12769_v6 }
 0xc5c   :  { %9071 = vmatpush3.msra.mxu1 %v16248_v48  ;;  %9021 = vmatprep.subr.mxu0 %v12646_v18 }
 0xc5d   :  { %9072 = vmatprep.subr.mxu1 %v12646_v18  ;;  %9022 = vmatpush3.msra.mxu0 %v16249_v51 }
 0xc5e   :  { %9073 = vmatpush3.msra.mxu1 %v16250_v40  ;;  %9023 = vmatprep.subr.mxu0 %v12646_v18 }
 0xc5f   :  { %9024 = vmatpush3.msra.mxu0 %v16251_v53  ;;  %9039 = vmatprep.mubr.msk.f32.mxu0 %vm11369_vm0, %v12646_v18 }
 0xc60   :  { %9025 = vmatprep.subr.mxu0 %v12646_v18  ;;  %9112 = vmatprep.subr.mxu1 %v12646_v18 }
 0xc61   :  { %9026 = vmatpush3.msra.mxu0 %v16252_v42 }
 0xc62   :  { %9027 = vmatprep.subr.mxu0 %v12646_v18 }
 0xc63   :  { %9028 = vmatpush3.msra.mxu0 %v16253_v49 }
 0xc64   :  { %9029 = vmatprep.subr.mxu0 %v12646_v18 }
 0xc65   :  { %9030 = vmatpush3.msra.mxu0 %v16254_v13 }
 0xc66   :  { %9031 = vmatprep.subr.mxu0 %v12646_v18 }
 0xc67   :  { %9032 = vmatpush3.msra.mxu0 %v16255_v59 }
 0xc68   :  { %9033 = vmatprep.subr.mxu0 %v12646_v18 }
 0xc69   :  { %9034 = vmatpush3.msra.mxu0 %v16256_v12  ;;  %v2441_v12 = vsub.f32 0.0, %v13176_v62  ;;  %v13455_v62 = vld [vmem:[#allocation7 + $0xb0] sm:$0xff] }
 0xc6a   :  { %9035 = vmatprep.subr.mxu0 %v12646_v18  ;;  %16268 = vst [vmem:[#allocation25_spill] sm:$0xff] %v13455_v62 }
 0xc6b   :  { %9036 = vmatpush3.msra.mxu0 %v16257_v58 }
 0xc6c   :  { %9037 = vmatprep.subr.mxu0 %v12646_v18 }
 0xc6d   :  { %9038 = vmatpush3.msra.mxu0 %v16258_v61 }
 0xc6e   :  { %9077 = vmatprep.subr.mxu0 %v12646_v18 }
 0xcca   :  { %v2435_v1 = vpop.xlane.xlu1 %2434 }
 0xccb   :  { %v2436_v6 = vmul.f32 0.5, %v2435_v1 }
 0xcd8   :  { %v2358_v2 = vpop.xlane.xlu0 %2357 }
 0xcd9   :  { %v2359_v5 = vmul.f32 0.5, %v2358_v2 }
 0xcdb   :  { %v13251_v35 = vadd.f32 %v2436_v6, %v2359_v5  ;;  %v13467_v6 = vld [vmem:[#allocation7 + $0x98] sm:$0xff] }
 0xcdc   :  { %16271 = vst [vmem:[#allocation28_spill] sm:$0xff] %v13467_v6 }
 0xcdd   :  { %vm2438_vm6 = vcmp.lt.f32.partialorder %v13251_v35, %v13066_v9  ;;  %v2512_v9 = vmul.f32 %v13106_v7, %v13106_v7  ;;  %v13413_v7 = vld [vmem:[#allocation7 + $0xe8] sm:$0xff] }
 0xcde   :  { %v2439_v54 = vsel %vm2438_vm6, 1.0, %v16259_v34 }
 0xcdf   :  { %v13259_v51 = vmul.f32 %v2439_v54, %v13074_v14  ;;  %v2513_v8 = vsub.f32 1.0, %v2512_v9  ;;  %v13475_v54 = vld [vmem:[#allocation7 + $0x88] sm:$0xff] }
 0xce0   :  { %16273 = vst [vmem:[#allocation30_spill] sm:$0xff] %v13475_v54 }
 0xcff   :  { %v2584_v63 = vpop.f32.mrf.mxu1 }
 0xd00   :  { %v2590_v53 = vmul.f32 %v2589_v37, %v2584_v63  ;;  %v13479_v37 = vld [vmem:[#allocation7 + $0x80] sm:$0xff] }
 0xd01   :  { %v9006_v42 = vpop.f32.mrf.mxu1  ;;  %16274 = vst [vmem:[#allocation18_spill] sm:$0xff] %v13479_v37 }
 0xd02   :  { %v2591_v49 = vmul.f32 %v2590_v53, %v13259_v51 }
 0xd04   :  { %v13263_v13 = vadd.f32 %v2591_v49, %v13078_v50  ;;  %v13405_v50 = vld [vmem:[#allocation7 + $0xf0] sm:$0xff] }
 0xd06   :  { %10795 = vtanh.f32 %v13263_v13 }
 0xd0d   :  { %v2508_v59 = vpop.f32.mrf.mxu0 }
 0xd0e   :  { %v2514_v58 = vmul.f32 %v2513_v8, %v2508_v59 }
 0xd0f   :  { %v8971_v61 = vpop.f32.mrf.mxu0 }
 0xd10   :  { %v2515_v14 = vadd.f32 %v2514_v58, %v2441_v12 }
 0xd12   :  { %v2516_v2 = vmul.f32 %v2515_v14, %v13259_v51 }
 0xd13   :  { %v13270_v1 = vpop.eup %10795 }
 0xd14   :  { %v13273_v5 = vadd.f32 %v2516_v2, %v13086_v36  ;;  %9075 = vmatmul.mubr.f32.vlgmr.msra.gmra.mxu1 %v13270_v1  ;;  %v13408_v36 = vld [vmem:[#allocation7 + $0x128] sm:$0xff]  ;;  %v2897_v8 = vmul.f32 %v13270_v1, %v13270_v1 }
 0xd15   :  { %9113 = vmatpush3.msra.mxu1 %v12845_v27  ;;  %9144 = vmatprep.mubr.msk.f32.mxu1 %vm11369_vm0, %v12646_v18 }
 0xd16   :  { %10797 = vtanh.f32 %v13273_v5  ;;  %9114 = vmatprep.subr.mxu1 %v12646_v18  ;;  %v2898_v12 = vsub.f32 1.0, %v2897_v8  ;;  %v13550_v8 = vld [vmem:[#allocation5 + $0xf8] sm:$0xff] }
 0xd17   :  { %9115 = vmatpush3.msra.mxu1 %v12851_v28  ;;  %v13297_v28 = vld [vmem:[#allocation9 + $0x10] sm:$0xff] }
 0xd18   :  { %9116 = vmatprep.subr.mxu1 %v12646_v18 }
 0xd19   :  { %9117 = vmatpush3.msra.mxu1 %v12855_v57  ;;  %v16261_v57 = vld [vmem:[#allocation26_spill] sm:$0xff] }
 0xd1a   :  { %9118 = vmatprep.subr.mxu1 %v12646_v18 }
 0xd1b   :  { %9119 = vmatpush3.msra.mxu1 %v12859_v44 }
 0xd1c   :  { %9120 = vmatprep.subr.mxu1 %v12646_v18 }
 0xd1d   :  { %9121 = vmatpush3.msra.mxu1 %v12863_v47 }
 0xd1e   :  { %9122 = vmatprep.subr.mxu1 %v12646_v18 }
 0xd1f   :  { %9123 = vmatpush3.msra.mxu1 %v12869_v10 }
 0xd20   :  { %9124 = vmatprep.subr.mxu1 %v12646_v18 }
 0xd21   :  { %9125 = vmatpush3.msra.mxu1 %v12877_v21 }
 0xd22   :  { %9126 = vmatprep.subr.mxu1 %v12646_v18  ;;  %v16260_v18 = vld [vmem:[#allocation29_spill] sm:$0xff] }
 0xd23   :  { %v13293_v27 = vpop.eup %10797  ;;  %9127 = vmatpush3.msra.mxu1 %v12885_v60  ;;  %v13363_v60 = vld [vmem:[#allocation7 + $0x170] sm:$0xff] }
 0xd24   :  { %9040 = vmatmul.mubr.f32.vlgmr.msra.gmra.mxu0 %v13293_v27  ;;  %9128 = vmatprep.subr.mxu1 %v13297_v28 }
 0xd25   :  { %9078 = vmatpush3.msra.mxu0 %v12874_v26  ;;  %9129 = vmatpush3.msra.mxu1 %v12893_v3  ;;  %v13371_v3 = vld [vmem:[#allocation7 + $0x160] sm:$0xff] }
 0xd26   :  { %9079 = vmatprep.subr.mxu0 %v13297_v28  ;;  %9130 = vmatprep.subr.mxu1 %v13297_v28 }
 0xd27   :  { %9080 = vmatpush3.msra.mxu0 %v12882_v23  ;;  %9131 = vmatpush3.msra.mxu1 %v12901_v46  ;;  %v13357_v23 = vld [vmem:[#allocation7 + $0x178] sm:$0xff] }
 0xd28   :  { %9081 = vmatprep.subr.mxu0 %v13297_v28  ;;  %9132 = vmatprep.subr.mxu1 %v13297_v28 }
 0xd29   :  { %9082 = vmatpush3.msra.mxu0 %v12890_v0  ;;  %9133 = vmatpush3.msra.mxu1 %v12909_v16  ;;  %v13367_v0 = vld [vmem:[#allocation7 + $0x168] sm:$0xff] }
 0xd2a   :  { %9083 = vmatprep.subr.mxu0 %v13297_v28  ;;  %9134 = vmatprep.subr.mxu1 %v13297_v28 }
 0xd2b   :  { %9084 = vmatpush3.msra.mxu0 %v12898_v56  ;;  %9135 = vmatpush3.msra.mxu1 %v12917_v11  ;;  %v13375_v56 = vld [vmem:[#allocation7 + $0x158] sm:$0xff]  ;;  %v13384_v11 = vld [vmem:[#allocation7 + $0x148] sm:$0xff] }
 0xd2c   :  { %9085 = vmatprep.subr.mxu0 %v13297_v28  ;;  %9136 = vmatprep.subr.mxu1 %v13297_v28  ;;  %16263 = vst [vmem:[#allocation23_spill] sm:$0xff] %v13384_v11 }
 0xd2d   :  { %9086 = vmatpush3.msra.mxu0 %v12906_v15  ;;  %9137 = vmatpush3.msra.mxu1 %v12925_v20  ;;  %v13379_v15 = vld [vmem:[#allocation7 + $0x150] sm:$0xff]  ;;  %v13389_v20 = vld [vmem:[#allocation7 + $0x140] sm:$0xff] }
 0xd2e   :  { %9087 = vmatprep.subr.mxu0 %v13297_v28  ;;  %9138 = vmatprep.subr.mxu1 %v13297_v28  ;;  %16262 = vst [vmem:[#allocation19_spill] sm:$0xff] %v13379_v15 }
 0xd2f   :  { %9088 = vmatpush3.msra.mxu0 %v12914_v4  ;;  %9139 = vmatpush3.msra.mxu1 %v13136_v17 }
 0xd30   :  { %9089 = vmatprep.subr.mxu0 %v13297_v28  ;;  %9140 = vmatprep.subr.mxu1 %v13297_v28 }
 0xd31   :  { %9090 = vmatpush3.msra.mxu0 %v12922_v19  ;;  %9141 = vmatpush3.msra.mxu1 %v13142_v43 }
 0xd32   :  { %9091 = vmatprep.subr.mxu0 %v13297_v28  ;;  %9142 = vmatprep.subr.mxu1 %v13297_v28 }
 0xd33   :  { %9092 = vmatpush3.msra.mxu0 %v12930_v25  ;;  %9143 = vmatpush3.msra.mxu1 %v13148_v39 }
 0xd34   :  { %9093 = vmatprep.subr.mxu0 %v13297_v28  ;;  %9109 = vmatprep.mubr.msk.f32.mxu0 %vm11369_vm0, %v13297_v28 }
 0xd35   :  { %9094 = vmatpush3.msra.mxu0 %v16239_v22  ;;  %9182 = vmatprep.subr.mxu1 %v13297_v28  ;;  %v13416_v22 = vld [vmem:[#allocation7 + $0x120] sm:$0xff] }
 0xd36   :  { %9095 = vmatprep.subr.mxu0 %v13297_v28 }
 0xd37   :  { %9096 = vmatpush3.msra.mxu0 %v16240_v31  ;;  %v13421_v31 = vld [vmem:[#allocation7 + $0xe0] sm:$0xff] }
 0xd38   :  { %9097 = vmatprep.subr.mxu0 %v13297_v28 }
 0xd39   :  { %9098 = vmatpush3.msra.mxu0 %v16241_v29  ;;  %v13427_v29 = vld [vmem:[#allocation7 + $0xd8] sm:$0xff] }
 0xd3a   :  { %9099 = vmatprep.subr.mxu0 %v13297_v28 }
 0xd3b   :  { %9100 = vmatpush3.msra.mxu0 %v16242_v24  ;;  %v13433_v24 = vld [vmem:[#allocation7 + $0xd0] sm:$0xff] }
 0xd3c   :  { %9101 = vmatprep.subr.mxu0 %v13297_v28  ;;  %16264 = vst [vmem:[#allocation20_spill] sm:$0xff] %v13433_v24 }
 0xd3d   :  { %9102 = vmatpush3.msra.mxu0 %v16243_v52  ;;  %v13451_v52 = vld [vmem:[#allocation7 + $0xb8] sm:$0xff] }
 0xd3e   :  { %9103 = vmatprep.subr.mxu0 %v13297_v28  ;;  %16267 = vst [vmem:[#allocation22_spill] sm:$0xff] %v13451_v52 }
 0xd3f   :  { %9104 = vmatpush3.msra.mxu0 %v16260_v18 }
 0xd40   :  { %9105 = vmatprep.subr.mxu0 %v13297_v28 }
 0xd41   :  { %9106 = vmatpush3.msra.mxu0 %v16261_v57 }
 0xd42   :  { %9107 = vmatprep.subr.mxu0 %v13297_v28 }
 0xd43   :  { %9108 = vmatpush3.msra.mxu0 %v12970_v38  ;;  %v13393_v38 = vld [vmem:[#allocation7 + $0x138] sm:$0xff] }
 0xd44   :  { %9147 = vmatprep.subr.mxu0 %v13297_v28 }
 0xdd4   :  { %v2737_v44 = vpop.f32.mrf.mxu1 }
 0xdd5   :  { %v2738_v47 = vadd.f32 %v13172_v55, %v2737_v44 }
 0xdd6   :  { %v9076_v10 = vpop.f32.mrf.mxu1 }
 0xdd7   :  { %v13352_v26 = vsub.f32 %v13273_v5, %v2738_v47 }
 0xdd9   :  { %9145 = vmatmul.mubr.f32.vlgmr.msra.gmra.mxu1 %v13352_v26  ;;  %v2742_v21 = vmul.f32 %v13352_v26, %v13352_v26  ;;  %v2750_v47 = vsub.f32 0.0, %v13352_v26  ;;  %v13514_v26 = vld [vmem:[#allocation5 + $0x170] sm:$0xff] }
 0xdda   :  { %9183 = vmatpush3.msra.mxu1 %v13357_v23  ;;  %9214 = vmatprep.mubr.msk.f32.mxu1 %vm11369_vm0, %v13297_v28 }
 0xddb   :  { %2743 = vadd.xlane.f32.xlu1 %v2742_v21  ;;  %9184 = vmatprep.subr.mxu1 %v13297_v28 }
 0xddc   :  { %9185 = vmatpush3.msra.mxu1 %v13363_v60 }
 0xddd   :  { %9186 = vmatprep.subr.mxu1 %v13297_v28 }
 0xdde   :  { %9187 = vmatpush3.msra.mxu1 %v13367_v0 }
 0xddf   :  { %9188 = vmatprep.subr.mxu1 %v13297_v28 }
 0xde0   :  { %9189 = vmatpush3.msra.mxu1 %v13371_v3 }
 0xde1   :  { %9190 = vmatprep.subr.mxu1 %v13297_v28 }
 0xde2   :  { %9191 = vmatpush3.msra.mxu1 %v13375_v56 }
 0xde3   :  { %9192 = vmatprep.subr.mxu1 %v13297_v28 }
 0xde4   :  { %v2660_v46 = vpop.f32.mrf.mxu0  ;;  %9193 = vmatpush3.msra.mxu1 %v13379_v15 }
 0xde5   :  { %v2661_v16 = vadd.f32 %v12993_v32, %v2660_v46  ;;  %9194 = vmatprep.subr.mxu1 %v13297_v28  ;;  %v13396_v32 = vld [vmem:[#allocation7 + $0xf8] sm:$0xff] }
 0xde6   :  { %v9041_v4 = vpop.f32.mrf.mxu0  ;;  %9195 = vmatpush3.msra.mxu1 %v13384_v11 }
 0xde7   :  { %v2664_v19 = vsub.f32 %v12998_v33, %v2661_v16  ;;  %9196 = vmatprep.subr.mxu1 %v13297_v28  ;;  %v13400_v33 = vld [vmem:[#allocation7 + $0x130] sm:$0xff]  ;;  %v13519_v4 = vld [vmem:[#allocation5 + $0x168] sm:$0xff] }
 0xde8   :  { %9197 = vmatpush3.msra.mxu1 %v13389_v20 }
 0xde9   :  { %9110 = vmatmul.mubr.f32.vlgmr.msra.gmra.mxu0 %v2664_v19  ;;  %v2665_v25 = vmul.f32 %v2664_v19, %v2664_v19  ;;  %9198 = vmatprep.subr.mxu1 %v13297_v28  ;;  %v13523_v19 = vld [vmem:[#allocation5 + $0x160] sm:$0xff] }
 0xdea   :  { %9199 = vmatpush3.msra.mxu1 %v13393_v38  ;;  %9148 = vmatpush3.msra.mxu0 %v13396_v32 }
 0xdeb   :  { %2666 = vadd.xlane.f32.xlu0 %v2665_v25  ;;  %9200 = vmatprep.subr.mxu1 %v13297_v28  ;;  %v13531_v25 = vld [vmem:[#allocation5 + $0x150] sm:$0xff] }
 0xdec   :  { %9201 = vmatpush3.msra.mxu1 %v13400_v33  ;;  %9149 = vmatprep.subr.mxu0 %v13297_v28 }
 0xded   :  { %9202 = vmatprep.subr.mxu1 %v13297_v28  ;;  %9150 = vmatpush3.msra.mxu0 %v13405_v50 }
 0xdee   :  { %9203 = vmatpush3.msra.mxu1 %v13408_v36  ;;  %9151 = vmatprep.subr.mxu0 %v13297_v28 }
 0xdef   :  { %9204 = vmatprep.subr.mxu1 %v13297_v28  ;;  %9152 = vmatpush3.msra.mxu0 %v13413_v7 }
 0xdf0   :  { %9205 = vmatpush3.msra.mxu1 %v13416_v22  ;;  %9153 = vmatprep.subr.mxu0 %v13297_v28 }
 0xdf1   :  { %9206 = vmatprep.subr.mxu1 %v13297_v28  ;;  %9154 = vmatpush3.msra.mxu0 %v13421_v31 }
 0xdf2   :  { %9207 = vmatpush3.msra.mxu1 %v13027_v41  ;;  %9155 = vmatprep.subr.mxu0 %v13297_v28  ;;  %v13439_v41 = vld [vmem:[#allocation7 + $0xc8] sm:$0xff] }
 0xdf3   :  { %9208 = vmatprep.subr.mxu1 %v13297_v28  ;;  %9156 = vmatpush3.msra.mxu0 %v13427_v29  ;;  %16265 = vst [vmem:[#allocation34_spill] sm:$0xff] %v13439_v41 }
 0xdf4   :  { %9209 = vmatpush3.msra.mxu1 %v13033_v45  ;;  %9157 = vmatprep.subr.mxu0 %v13297_v28  ;;  %v13444_v45 = vld [vmem:[#allocation7 + $0xc0] sm:$0xff] }
 0xdf5   :  { %9210 = vmatprep.subr.mxu1 %v13297_v28  ;;  %9158 = vmatpush3.msra.mxu0 %v13433_v24  ;;  %16266 = vst [vmem:[#allocation24_spill] sm:$0xff] %v13444_v45 }
 0xdf6   :  { %9211 = vmatpush3.msra.mxu1 %v16248_v48  ;;  %9159 = vmatprep.subr.mxu0 %v13297_v28  ;;  %v13459_v48 = vld [vmem:[#allocation7 + $0xa8] sm:$0xff] }
 0xdf7   :  { %9212 = vmatprep.subr.mxu1 %v13297_v28  ;;  %9160 = vmatpush3.msra.mxu0 %v13439_v41  ;;  %16269 = vst [vmem:[#allocation31_spill] sm:$0xff] %v13459_v48 }
 0xdf8   :  { %9213 = vmatpush3.msra.mxu1 %v16250_v40  ;;  %9161 = vmatprep.subr.mxu0 %v13297_v28  ;;  %v13463_v40 = vld [vmem:[#allocation7 + $0xa0] sm:$0xff] }
 0xdf9   :  { %9162 = vmatpush3.msra.mxu0 %v13444_v45  ;;  %9179 = vmatprep.mubr.msk.f32.mxu0 %vm11369_vm0, %v13297_v28  ;;  %16270 = vst [vmem:[#allocation27_spill] sm:$0xff] %v13463_v40 }
 0xdfa   :  { %9163 = vmatprep.subr.mxu0 %v13297_v28  ;;  %9252 = vmatprep.subr.mxu1 %v13297_v28 }
 0xdfb   :  { %9164 = vmatpush3.msra.mxu0 %v13451_v52 }
 0xdfc   :  { %9165 = vmatprep.subr.mxu0 %v13297_v28 }
 0xdfd   :  { %9166 = vmatpush3.msra.mxu0 %v13455_v62 }
 0xdfe   :  { %9167 = vmatprep.subr.mxu0 %v13297_v28 }
 0xdff   :  { %9168 = vmatpush3.msra.mxu0 %v13459_v48 }
 0xe00   :  { %9169 = vmatprep.subr.mxu0 %v13297_v28 }
 0xe01   :  { %9170 = vmatpush3.msra.mxu0 %v13463_v40 }
 0xe02   :  { %9171 = vmatprep.subr.mxu0 %v13297_v28 }
 0xe03   :  { %9172 = vmatpush3.msra.mxu0 %v13467_v6 }
 0xe04   :  { %9173 = vmatprep.subr.mxu0 %v13297_v28 }
 0xe05   :  { %9174 = vmatpush3.msra.mxu0 %v13471_v30 }
 0xe06   :  { %9175 = vmatprep.subr.mxu0 %v13297_v28 }
 0xe07   :  { %9176 = vmatpush3.msra.mxu0 %v13475_v54 }
 0xe08   :  { %9177 = vmatprep.subr.mxu0 %v13297_v28 }
 0xe09   :  { %9178 = vmatpush3.msra.mxu0 %v13479_v37 }
 0xe0a   :  { %9217 = vmatprep.subr.mxu0 %v13297_v28 }
 0xe64   :  { %v2744_v53 = vpop.xlane.xlu1 %2743 }
 0xe65   :  { %v2745_v49 = vmul.f32 0.5, %v2744_v53  ;;  %v13539_v53 = vld [vmem:[#allocation5 + $0x140] sm:$0xff] }
 0xe74   :  { %v2667_v63 = vpop.xlane.xlu0 %2666 }
 0xe75   :  { %v2668_v42 = vmul.f32 0.5, %v2667_v63  ;;  %v13535_v63 = vld [vmem:[#allocation5 + $0x148] sm:$0xff] }
 0xe77   :  { %v13483_v9 = vadd.f32 %v2745_v49, %v2668_v42  ;;  %v13545_v49 = vld [vmem:[#allocation5 + $0x138] sm:$0xff] }
 0xe79   :  { %vm2747_vm7 = vcmp.lt.f32.partialorder %v13483_v9, %v13251_v35  ;;  %v2821_v35 = vmul.f32 %v13293_v27, %v13293_v27 }
 0xe7a   :  { %v2748_v59 = vsel %vm2747_vm7, 1.0, %v16259_v34 }
 0xe7b   :  { %v13491_v61 = vmul.f32 %v2748_v59, %v13259_v51  ;;  %v2822_v1 = vsub.f32 1.0, %v2821_v35  ;;  %v13553_v59 = vld [vmem:[#allocation5 + $0x130] sm:$0xff]  ;;  %v13577_v35 = vld [vmem:[#allocation5 + $0x118] sm:$0xff] }
 0xe99   :  { %v2893_v58 = vpop.f32.mrf.mxu1 }
 0xe9a   :  { %v2899_v14 = vmul.f32 %v2898_v12, %v2893_v58  ;;  %v13558_v12 = vld [vmem:[#allocation5 + $0xf0] sm:$0xff]  ;;  %v13561_v58 = vld [vmem:[#allocation5 + $0x128] sm:$0xff] }
 0xe9b   :  { %v9146_v2 = vpop.f32.mrf.mxu1 }
 0xe9c   :  { %v2900_v18 = vmul.f32 %v2899_v14, %v13491_v61  ;;  %v13566_v14 = vld [vmem:[#allocation5 + $0xe8] sm:$0xff]  ;;  %v13569_v2 = vld [vmem:[#allocation5 + $0x120] sm:$0xff] }
 0xe9e   :  { %v13495_v57 = vadd.f32 %v2900_v18, %v13263_v13  ;;  %v13505_v13 = vld [vmem:[#allocation5 + $0x178] sm:$0xff]  ;;  %v13574_v18 = vld [vmem:[#allocation5 + $0xe0] sm:$0xff] }
 0xea0   :  { %10799 = vtanh.f32 %v13495_v57 }
 0xea9   :  { %v2817_v44 = vpop.f32.mrf.mxu0 }
 0xeaa   :  { %v2823_v10 = vmul.f32 %v2822_v1, %v2817_v44  ;;  %v13582_v1 = vld [vmem:[#allocation5 + $0xd8] sm:$0xff]  ;;  %v13588_v44 = vld [vmem:[#allocation5 + $0xd0] sm:$0xff] }
 0xeab   :  { %v9111_v21 = vpop.f32.mrf.mxu0 }
 0xeac   :  { %v2824_v51 = vadd.f32 %v2823_v10, %v2750_v47  ;;  %v13594_v47 = vld [vmem:[#allocation5 + $0xc8] sm:$0xff]  ;;  %v13618_v21 = vld [vmem:[#allocation5 + $0xa0] sm:$0xff] }
 0xead   :  { %v13501_v46 = vpop.eup %10799  ;;  %v13614_v10 = vld [vmem:[#allocation5 + $0xa8] sm:$0xff]  ;;  %16278 = vst [vmem:[#allocation17_spill] sm:$0xff] %v13618_v21 }
 0xeae   :  { %v2825_v16 = vmul.f32 %v2824_v51, %v13491_v61  ;;  %9215 = vmatmul.mubr.f32.vlgmr.msra.gmra.mxu1 %v13501_v46  ;;  %16277 = vst [vmem:[#allocation33_spill] sm:$0xff] %v13614_v10  ;;  %v13622_v51 = vld [vmem:[#allocation5 + $0x98] sm:$0xff] }
 0xeaf   :  { %9253 = vmatpush3.msra.mxu1 %v13505_v13  ;;  %9284 = vmatprep.mubr.msk.f32.mxu1 %vm11369_vm0, %v13297_v28  ;;  %16279 = vst [vmem:[#allocation21_spill] sm:$0xff] %v13622_v51 }
 0xeb0   :  { %v13511_v27 = vadd.f32 %v2825_v16, %v13273_v5  ;;  %9254 = vmatprep.subr.mxu1 %v13297_v28  ;;  %v13527_v5 = vld [vmem:[#allocation5 + $0x158] sm:$0xff]  ;;  %v13626_v16 = vld [vmem:[#allocation5 + $0x90] sm:$0xff] }
 0xeb1   :  { %9255 = vmatpush3.msra.mxu1 %v13514_v26  ;;  %16280 = vst [vmem:[#allocation29_spill] sm:$0xff] %v13626_v16 }
 0xeb2   :  { %10801 = vtanh.f32 %v13511_v27  ;;  %9256 = vmatprep.subr.mxu1 %v13297_v28 }
 0xeb3   :  { %9257 = vmatpush3.msra.mxu1 %v13519_v4 }
 0xeb4   :  { %9258 = vmatprep.subr.mxu1 %v13297_v28 }
 0xeb5   :  { %9259 = vmatpush3.msra.mxu1 %v13523_v19 }
 0xeb6   :  { %9260 = vmatprep.subr.mxu1 %v13297_v28 }
 0xeb7   :  { %9261 = vmatpush3.msra.mxu1 %v13527_v5 }
 0xeb8   :  { %9262 = vmatprep.subr.mxu1 %v13297_v28 }
 0xeb9   :  { %9263 = vmatpush3.msra.mxu1 %v13531_v25 }
 0xeba   :  { %9264 = vmatprep.subr.mxu1 %v13297_v28 }
 0xebb   :  { %9265 = vmatpush3.msra.mxu1 %v13535_v63 }
 0xebc   :  { %9266 = vmatprep.subr.mxu1 %v13297_v28 }
 0xebd   :  { %9267 = vmatpush3.msra.mxu1 %v13539_v53 }
 0xebe   :  { %9268 = vmatprep.subr.mxu1 %v13297_v28 }
 0xebf   :  { %v13543_v42 = vpop.eup %10801  ;;  %9269 = vmatpush3.msra.mxu1 %v13545_v49 }
 0xec0   :  { %9180 = vmatmul.mubr.f32.vlgmr.msra.gmra.mxu0 %v13543_v42  ;;  %9270 = vmatprep.subr.mxu1 %v13297_v28 }
 0xec1   :  { %9218 = vmatpush3.msra.mxu0 %v13550_v8  ;;  %9271 = vmatpush3.msra.mxu1 %v13553_v59 }
 0xec2   :  { %9219 = vmatprep.subr.mxu0 %v13297_v28  ;;  %9272 = vmatprep.subr.mxu1 %v13297_v28 }
 0xec3   :  { %9220 = vmatpush3.msra.mxu0 %v13558_v12  ;;  %9273 = vmatpush3.msra.mxu1 %v13561_v58 }
 0xec4   :  { %9221 = vmatprep.subr.mxu0 %v13297_v28  ;;  %9274 = vmatprep.subr.mxu1 %v13297_v28 }
 0xec5   :  { %9222 = vmatpush3.msra.mxu0 %v13566_v14  ;;  %9275 = vmatpush3.msra.mxu1 %v13569_v2 }
 0xec6   :  { %9223 = vmatprep.subr.mxu0 %v13297_v28  ;;  %9276 = vmatprep.subr.mxu1 %v13297_v28 }
 0xec7   :  { %9224 = vmatpush3.msra.mxu0 %v13574_v18  ;;  %9277 = vmatpush3.msra.mxu1 %v13577_v35 }
 0xec8   :  { %9225 = vmatprep.subr.mxu0 %v13297_v28  ;;  %9278 = vmatprep.subr.mxu1 %v13297_v28 }
 0xec9   :  { %9226 = vmatpush3.msra.mxu0 %v13582_v1  ;;  %9279 = vmatpush3.msra.mxu1 %v13136_v17  ;;  %v13601_v17 = vld [vmem:[#allocation5 + $0xc0] sm:$0xff] }
 0xeca   :  { %9227 = vmatprep.subr.mxu0 %v13297_v28  ;;  %9280 = vmatprep.subr.mxu1 %v13297_v28 }
 0xecb   :  { %9228 = vmatpush3.msra.mxu0 %v13588_v44  ;;  %9281 = vmatpush3.msra.mxu1 %v13142_v43  ;;  %v13606_v43 = vld [vmem:[#allocation5 + $0xb8] sm:$0xff] }
 0xecc   :  { %9229 = vmatprep.subr.mxu0 %v13297_v28  ;;  %9282 = vmatprep.subr.mxu1 %v13297_v28  ;;  %16275 = vst [vmem:[#allocation32_spill] sm:$0xff] %v13606_v43 }
 0xecd   :  { %9230 = vmatpush3.msra.mxu0 %v13594_v47  ;;  %9283 = vmatpush3.msra.mxu1 %v13148_v39  ;;  %v13610_v39 = vld [vmem:[#allocation5 + $0xb0] sm:$0xff] }
 0xece   :  { %9231 = vmatprep.subr.mxu0 %v13297_v28  ;;  %9249 = vmatprep.mubr.msk.f32.mxu0 %vm11369_vm0, %v13297_v28  ;;  %16276 = vst [vmem:[#allocation16_spill] sm:$0xff] %v13610_v39 }
 0xecf   :  { %9232 = vmatpush3.msra.mxu0 %v13601_v17  ;;  %9322 = vmatprep.subr.mxu1 %v13297_v28 }
 0xed0   :  { %9233 = vmatprep.subr.mxu0 %v13297_v28 }
 0xed1   :  { %9234 = vmatpush3.msra.mxu0 %v13606_v43 }
 0xed2   :  { %9235 = vmatprep.subr.mxu0 %v13297_v28 }
 0xed3   :  { %9236 = vmatpush3.msra.mxu0 %v13610_v39 }
 0xed4   :  { %9237 = vmatprep.subr.mxu0 %v13297_v28 }
 0xed5   :  { %9238 = vmatpush3.msra.mxu0 %v13614_v10  ;;  %v13630_v10 = vld [vmem:[#allocation5 + $0x88] sm:$0xff] }
 0xed6   :  { %9239 = vmatprep.subr.mxu0 %v13297_v28  ;;  %16281 = vst [vmem:[#allocation26_spill] sm:$0xff] %v13630_v10 }
 0xed7   :  { %9240 = vmatpush3.msra.mxu0 %v13618_v21  ;;  %v13634_v21 = vld [vmem:[#allocation5 + $0x80] sm:$0xff] }
 0xed8   :  { %9241 = vmatprep.subr.mxu0 %v13297_v28 }
 0xed9   :  { %9242 = vmatpush3.msra.mxu0 %v13622_v51 }
 0xeda   :  { %9243 = vmatprep.subr.mxu0 %v13297_v28 }
 0xedb   :  { %9244 = vmatpush3.msra.mxu0 %v13626_v16 }
 0xedc   :  { %9245 = vmatprep.subr.mxu0 %v13297_v28 }
 0xedd   :  { %9246 = vmatpush3.msra.mxu0 %v13630_v10 }
 0xede   :  { %9247 = vmatprep.subr.mxu0 %v13297_v28 }
 0xedf   :  { %9248 = vmatpush3.msra.mxu0 %v13634_v21 }
 0xee0   :  { %9287 = vmatprep.subr.mxu0 %v13297_v28 }
 0xf6e   :  { %v3046_v51 = vpop.f32.mrf.mxu1 }
 0xf6f   :  { %v3047_v39 = vadd.f32 %v13172_v55, %v3046_v51  ;;  %v13668_v51 = vld [vmem:[#allocation8] sm:$0xff] }
 0xf70   :  { %v9216_v43 = vpop.f32.mrf.mxu1 }
 0xf71   :  { %v13640_v16 = vsub.f32 %v13511_v27, %v3047_v39  ;;  %v13663_v43 = vld [vmem:[%s15924_s3 + $0x1] ss:$0 sm:$0xff] }
 0xf73   :  { %9285 = vmatmul.mubr.f32.vlgmr.msra.gmra.mxu1 %v13640_v16  ;;  %v3051_v10 = vmul.f32 %v13640_v16, %v13640_v16 }
 0xf74   :  { %9323 = vmatpush3.msra.mxu1 %v13357_v23  ;;  %9354 = vmatprep.mubr.msk.f32.mxu1 %vm11369_vm0, %v13297_v28 }
 0xf75   :  { %3052 = vadd.xlane.f32.xlu1 %v3051_v10  ;;  %9324 = vmatprep.subr.mxu1 %v13297_v28 }
 0xf76   :  { %9325 = vmatpush3.msra.mxu1 %v13363_v60 }
 0xf77   :  { %9326 = vmatprep.subr.mxu1 %v13297_v28 }
 0xf78   :  { %9327 = vmatpush3.msra.mxu1 %v13367_v0 }
 0xf79   :  { %9328 = vmatprep.subr.mxu1 %v13297_v28 }
 0xf7a   :  { %9329 = vmatpush3.msra.mxu1 %v13371_v3 }
 0xf7b   :  { %9330 = vmatprep.subr.mxu1 %v13297_v28 }
 0xf7c   :  { %9331 = vmatpush3.msra.mxu1 %v13375_v56 }
 0xf7d   :  { %9332 = vmatprep.subr.mxu1 %v13297_v28 }
 0xf7e   :  { %9333 = vmatpush3.msra.mxu1 %v13379_v15 }
 0xf7f   :  { %9334 = vmatprep.subr.mxu1 %v13297_v28 }
 0xf80   :  { %v2969_v55 = vpop.f32.mrf.mxu0  ;;  %9335 = vmatpush3.msra.mxu1 %v13384_v11 }
 0xf81   :  { %v2970_v39 = vadd.f32 %v13663_v43, %v2969_v55  ;;  %9336 = vmatprep.subr.mxu1 %v13297_v28  ;;  %v13697_v55 = vld [vmem:[#allocation7 + $0x108] sm:$0xff] }
 0xf82   :  { %v9181_v10 = vpop.f32.mrf.mxu0  ;;  %9337 = vmatpush3.msra.mxu1 %v13389_v20 }
 0xf83   :  { %v2973_v15 = vsub.f32 %v13668_v51, %v2970_v39  ;;  %9338 = vmatprep.subr.mxu1 %v13297_v28  ;;  %v13703_v39 = vld [vmem:[#allocation7 + $0x100] sm:$0xff] }
 0xf84   :  { %9339 = vmatpush3.msra.mxu1 %v13393_v38 }
 0xf85   :  { %9250 = vmatmul.mubr.f32.vlgmr.msra.gmra.mxu0 %v2973_v15  ;;  %v2974_v11 = vmul.f32 %v2973_v15, %v2973_v15  ;;  %9340 = vmatprep.subr.mxu1 %v13297_v28  ;;  %v13685_v15 = vld [vmem:[#allocation7 + $0x118] sm:$0xff] }
 0xf86   :  { %9341 = vmatpush3.msra.mxu1 %v13400_v33  ;;  %9288 = vmatpush3.msra.mxu0 %v13396_v32 }
 0xf87   :  { %2975 = vadd.xlane.f32.xlu0 %v2974_v11  ;;  %9342 = vmatprep.subr.mxu1 %v13297_v28  ;;  %v13691_v11 = vld [vmem:[#allocation7 + $0x110] sm:$0xff] }
 0xf88   :  { %9343 = vmatpush3.msra.mxu1 %v13408_v36  ;;  %9289 = vmatprep.subr.mxu0 %v13297_v28 }
 0xf89   :  { %9344 = vmatprep.subr.mxu1 %v13297_v28  ;;  %9290 = vmatpush3.msra.mxu0 %v13405_v50 }
 0xf8a   :  { %9345 = vmatpush3.msra.mxu1 %v13416_v22  ;;  %9291 = vmatprep.subr.mxu0 %v13297_v28 }
 0xf8b   :  { %9346 = vmatprep.subr.mxu1 %v13297_v28  ;;  %9292 = vmatpush3.msra.mxu0 %v13413_v7 }
 0xf8c   :  { %9347 = vmatpush3.msra.mxu1 %v13685_v15  ;;  %9293 = vmatprep.subr.mxu0 %v13297_v28 }
 0xf8d   :  { %9348 = vmatprep.subr.mxu1 %v13297_v28  ;;  %9294 = vmatpush3.msra.mxu0 %v13421_v31 }
 0xf8e   :  { %9349 = vmatpush3.msra.mxu1 %v13691_v11  ;;  %9295 = vmatprep.subr.mxu0 %v13297_v28 }
 0xf8f   :  { %9350 = vmatprep.subr.mxu1 %v13297_v28  ;;  %9296 = vmatpush3.msra.mxu0 %v13427_v29 }
 0xf90   :  { %9351 = vmatpush3.msra.mxu1 %v13697_v55  ;;  %9297 = vmatprep.subr.mxu0 %v13297_v28 }
 0xf91   :  { %9352 = vmatprep.subr.mxu1 %v13297_v28  ;;  %9298 = vmatpush3.msra.mxu0 %v13433_v24 }
 0xf92   :  { %9353 = vmatpush3.msra.mxu1 %v13703_v39  ;;  %9299 = vmatprep.subr.mxu0 %v13297_v28 }
 0xf93   :  { %9300 = vmatpush3.msra.mxu0 %v13439_v41  ;;  %9319 = vmatprep.mubr.msk.f32.mxu0 %vm11369_vm0, %v13297_v28 }
 0xf94   :  { %9301 = vmatprep.subr.mxu0 %v13297_v28  ;;  %9392 = vmatprep.subr.mxu1 %v13297_v28 }
 0xf95   :  { %9302 = vmatpush3.msra.mxu0 %v13444_v45 }
 0xf96   :  { %9303 = vmatprep.subr.mxu0 %v13297_v28 }
 0xf97   :  { %9304 = vmatpush3.msra.mxu0 %v13451_v52 }
 0xf98   :  { %9305 = vmatprep.subr.mxu0 %v13297_v28 }
 0xf99   :  { %9306 = vmatpush3.msra.mxu0 %v13455_v62 }
 0xf9a   :  { %9307 = vmatprep.subr.mxu0 %v13297_v28 }
 0xf9b   :  { %9308 = vmatpush3.msra.mxu0 %v13459_v48 }
 0xf9c   :  { %9309 = vmatprep.subr.mxu0 %v13297_v28 }
 0xf9d   :  { %9310 = vmatpush3.msra.mxu0 %v13463_v40 }
 0xf9e   :  { %9311 = vmatprep.subr.mxu0 %v13297_v28 }
 0xf9f   :  { %9312 = vmatpush3.msra.mxu0 %v13467_v6 }
 0xfa0   :  { %9313 = vmatprep.subr.mxu0 %v13297_v28 }
 0xfa1   :  { %9314 = vmatpush3.msra.mxu0 %v13471_v30  ;;  %v3206_v30 = vmul.f32 %v13501_v46, %v13501_v46 }
 0xfa2   :  { %9315 = vmatprep.subr.mxu0 %v13297_v28 }
 0xfa3   :  { %9316 = vmatpush3.msra.mxu0 %v13475_v54  ;;  %v3207_v6 = vsub.f32 1.0, %v3206_v30  ;;  %v3059_v30 = vsub.f32 0.0, %v13640_v16  ;;  %v16283_v16 = vld [vmem:[#allocation16_spill] sm:$0xff] }
 0xfa4   :  { %9317 = vmatprep.subr.mxu0 %v13297_v28 }
 0xfa5   :  { %9318 = vmatpush3.msra.mxu0 %v13479_v37 }
 0xfa6   :  { %9357 = vmatprep.subr.mxu0 %v13297_v28 }
 0xffe   :  { %v3053_v40 = vpop.xlane.xlu1 %3052 }
 0xfff   :  { %v3054_v62 = vmul.f32 0.5, %v3053_v40 }
0x1010   :  { %v2976_v10 = vpop.xlane.xlu0 %2975 }
0x1011   :  { %v2977_v48 = vmul.f32 0.5, %v2976_v10 }
0x1013   :  { %v13730_v52 = vadd.f32 %v3054_v62, %v2977_v48  ;;  %v3130_v48 = vmul.f32 %v13543_v42, %v13543_v42  ;;  %v16282_v42 = vld [vmem:[#allocation32_spill] sm:$0xff] }
0x1015   :  { %vm3056_vm8 = vcmp.lt.f32.partialorder %v13730_v52, %v13483_v9  ;;  %v3131_v40 = vsub.f32 1.0, %v3130_v48  ;;  %v16285_v48 = vld [vmem:[#allocation17_spill] sm:$0xff] }
0x1016   :  { %v3057_v54 = vsel %vm3056_vm8, 1.0, %v16259_v34 }
0x1017   :  { %v13738_v37 = vmul.f32 %v3057_v54, %v13491_v61  ;;  %v13794_v61 = vld [vmem:[#allocation5 + $0x110] sm:$0xff] }
0x1033   :  { %v3202_v45 = vpop.f32.mrf.mxu1 }
0x1034   :  { %v3208_v41 = vmul.f32 %v3207_v6, %v3202_v45 }
0x1035   :  { %v9286_v24 = vpop.f32.mrf.mxu1 }
0x1036   :  { %v3209_v10 = vmul.f32 %v3208_v41, %v13738_v37 }
0x1038   :  { %v13742_v62 = vadd.f32 %v3209_v10, %v13495_v57  ;;  %v13800_v57 = vld [vmem:[#allocation5 + $0x108] sm:$0xff]  ;;  %v16284_v10 = vld [vmem:[#allocation33_spill] sm:$0xff] }
0x103a   :  { %10803 = vtanh.f32 %v13742_v62 }
0x1045   :  { %v3126_v9 = vpop.f32.mrf.mxu0 }
0x1046   :  { %v3132_v46 = vmul.f32 %v3131_v40, %v3126_v9  ;;  %v16286_v40 = vld [vmem:[#allocation21_spill] sm:$0xff] }
0x1047   :  { %v13748_v34 = vpop.eup %10803  ;;  %v9251_v54 = vpop.f32.mrf.mxu0  ;;  %v16287_v9 = vld [vmem:[#allocation29_spill] sm:$0xff] }
0x1048   :  { %v3133_v45 = vadd.f32 %v3132_v46, %v3059_v30  ;;  %9355 = vmatmul.mubr.f32.vlgmr.msra.gmra.mxu1 %v13748_v34  ;;  %v16288_v30 = vld [vmem:[#allocation26_spill] sm:$0xff]  ;;  %v13836_v54 = vld [vmem:[%s15924_s3 + $0x2] ss:$0 sm:$0xff] }
0x1049   :  { %9393 = vmatpush3.msra.mxu1 %v13505_v13  ;;  %9424 = vmatprep.mubr.msk.f32.mxu1 %vm11369_vm0, %v13297_v28 }
0x104a   :  { %v3134_v24 = vmul.f32 %v3133_v45, %v13738_v37  ;;  %9394 = vmatprep.subr.mxu1 %v13297_v28 }
0x104b   :  { %9395 = vmatpush3.msra.mxu1 %v13514_v26 }
0x104c   :  { %v13758_v41 = vadd.f32 %v3134_v24, %v13511_v27  ;;  %9396 = vmatprep.subr.mxu1 %v13297_v28  ;;  %v13806_v27 = vld [vmem:[#allocation5 + $0x100] sm:$0xff] }
0x104d   :  { %9397 = vmatpush3.msra.mxu1 %v13519_v4 }
0x104e   :  { %10805 = vtanh.f32 %v13758_v41  ;;  %9398 = vmatprep.subr.mxu1 %v13297_v28 }
0x104f   :  { %9399 = vmatpush3.msra.mxu1 %v13523_v19 }
0x1050   :  { %9400 = vmatprep.subr.mxu1 %v13297_v28 }
0x1051   :  { %9401 = vmatpush3.msra.mxu1 %v13527_v5 }
0x1052   :  { %9402 = vmatprep.subr.mxu1 %v13297_v28 }
0x1053   :  { %9403 = vmatpush3.msra.mxu1 %v13531_v25 }
0x1054   :  { %9404 = vmatprep.subr.mxu1 %v13297_v28 }
0x1055   :  { %9405 = vmatpush3.msra.mxu1 %v13535_v63 }
0x1056   :  { %9406 = vmatprep.subr.mxu1 %v13297_v28 }
0x1057   :  { %9407 = vmatpush3.msra.mxu1 %v13539_v53 }
0x1058   :  { %9408 = vmatprep.subr.mxu1 %v13297_v28 }
0x1059   :  { %9409 = vmatpush3.msra.mxu1 %v13545_v49 }
0x105a   :  { %9410 = vmatprep.subr.mxu1 %v13297_v28 }
0x105b   :  { %v13776_v6 = vpop.eup %10805  ;;  %9411 = vmatpush3.msra.mxu1 %v13553_v59 }
0x105c   :  { %9320 = vmatmul.mubr.f32.vlgmr.msra.gmra.mxu0 %v13776_v6  ;;  %9412 = vmatprep.subr.mxu1 %v13297_v28 }
0x105d   :  { %9358 = vmatpush3.msra.mxu0 %v13550_v8  ;;  %9413 = vmatpush3.msra.mxu1 %v13561_v58 }
0x105e   :  { %9359 = vmatprep.subr.mxu0 %v13297_v28  ;;  %9414 = vmatprep.subr.mxu1 %v13297_v28 }
0x105f   :  { %9360 = vmatpush3.msra.mxu0 %v13558_v12  ;;  %9415 = vmatpush3.msra.mxu1 %v13569_v2 }
0x1060   :  { %9361 = vmatprep.subr.mxu0 %v13297_v28  ;;  %9416 = vmatprep.subr.mxu1 %v13297_v28 }
0x1061   :  { %9362 = vmatpush3.msra.mxu0 %v13566_v14  ;;  %9417 = vmatpush3.msra.mxu1 %v13577_v35 }
0x1062   :  { %9363 = vmatprep.subr.mxu0 %v13297_v28  ;;  %9418 = vmatprep.subr.mxu1 %v13297_v28 }
0x1063   :  { %9364 = vmatpush3.msra.mxu0 %v13574_v18  ;;  %9419 = vmatpush3.msra.mxu1 %v13794_v61 }
0x1064   :  { %9365 = vmatprep.subr.mxu0 %v13297_v28  ;;  %9420 = vmatprep.subr.mxu1 %v13297_v28 }
0x1065   :  { %9366 = vmatpush3.msra.mxu0 %v13582_v1  ;;  %9421 = vmatpush3.msra.mxu1 %v13800_v57 }
0x1066   :  { %9367 = vmatprep.subr.mxu0 %v13297_v28  ;;  %9422 = vmatprep.subr.mxu1 %v13297_v28 }
0x1067   :  { %9368 = vmatpush3.msra.mxu0 %v13588_v44  ;;  %9423 = vmatpush3.msra.mxu1 %v13806_v27 }
0x1068   :  { %9369 = vmatprep.subr.mxu0 %v13297_v28  ;;  %9389 = vmatprep.mubr.msk.f32.mxu0 %vm11369_vm0, %v13297_v28 }
0x1069   :  { %9370 = vmatpush3.msra.mxu0 %v13594_v47  ;;  %9462 = vmatprep.subr.mxu1 %v13297_v28 }
0x106a   :  { %9371 = vmatprep.subr.mxu0 %v13297_v28 }
0x106b   :  { %9372 = vmatpush3.msra.mxu0 %v13601_v17 }
0x106c   :  { %9373 = vmatprep.subr.mxu0 %v13297_v28 }
0x106d   :  { %9374 = vmatpush3.msra.mxu0 %v16282_v42 }
0x106e   :  { %9375 = vmatprep.subr.mxu0 %v13297_v28 }
0x106f   :  { %9376 = vmatpush3.msra.mxu0 %v16283_v16 }
0x1070   :  { %9377 = vmatprep.subr.mxu0 %v13297_v28 }
0x1071   :  { %9378 = vmatpush3.msra.mxu0 %v16284_v10 }
0x1072   :  { %9379 = vmatprep.subr.mxu0 %v13297_v28 }
0x1073   :  { %9380 = vmatpush3.msra.mxu0 %v16285_v48 }
0x1074   :  { %9381 = vmatprep.subr.mxu0 %v13297_v28 }
0x1075   :  { %9382 = vmatpush3.msra.mxu0 %v16286_v40 }
0x1076   :  { %9383 = vmatprep.subr.mxu0 %v13297_v28 }
0x1077   :  { %9384 = vmatpush3.msra.mxu0 %v16287_v9 }
0x1078   :  { %9385 = vmatprep.subr.mxu0 %v13297_v28 }
0x1079   :  { %9386 = vmatpush3.msra.mxu0 %v16288_v30 }
0x107a   :  { %9387 = vmatprep.subr.mxu0 %v13297_v28 }
0x107b   :  { %9388 = vmatpush3.msra.mxu0 %v13634_v21 }
0x107c   :  { %9427 = vmatprep.subr.mxu0 %v13297_v28 }
0x1108   :  { %v3355_v46 = vpop.f32.mrf.mxu1 }
0x1109   :  { %v3356_v45 = vadd.f32 %v13836_v54, %v3355_v46 }
0x110a   :  { %v9356_v24 = vpop.f32.mrf.mxu1 }
0x110b   :  { %v13840_v9 = vsub.f32 %v13758_v41, %v3356_v45  ;;  %v16301_v45 = vld [vmem:[#allocation18_spill] sm:$0xff] }
0x110d   :  { %9425 = vmatmul.mubr.f32.vlgmr.msra.gmra.mxu1 %v13840_v9  ;;  %v3360_v30 = vmul.f32 %v13840_v9, %v13840_v9 }
0x110e   :  { %9463 = vmatpush3.msra.mxu1 %v13357_v23  ;;  %9494 = vmatprep.mubr.msk.f32.mxu1 %vm11369_vm0, %v13297_v28  ;;  %v16289_v23 = vld [vmem:[#allocation19_spill] sm:$0xff] }
0x110f   :  { %3361 = vadd.xlane.f32.xlu1 %v3360_v30  ;;  %9464 = vmatprep.subr.mxu1 %v13297_v28  ;;  %v16290_v30 = vld [vmem:[#allocation23_spill] sm:$0xff] }
0x1110   :  { %9465 = vmatpush3.msra.mxu1 %v13363_v60 }
0x1111   :  { %9466 = vmatprep.subr.mxu1 %v13297_v28 }
0x1112   :  { %9467 = vmatpush3.msra.mxu1 %v13367_v0 }
0x1113   :  { %9468 = vmatprep.subr.mxu1 %v13297_v28 }
0x1114   :  { %9469 = vmatpush3.msra.mxu1 %v13371_v3 }
0x1115   :  { %9470 = vmatprep.subr.mxu1 %v13297_v28 }
0x1116   :  { %9471 = vmatpush3.msra.mxu1 %v13375_v56 }
0x1117   :  { %9472 = vmatprep.subr.mxu1 %v13297_v28 }
0x1118   :  { %9473 = vmatpush3.msra.mxu1 %v16289_v23 }
0x1119   :  { %9474 = vmatprep.subr.mxu1 %v13297_v28 }
0x111a   :  { %9475 = vmatpush3.msra.mxu1 %v16290_v30 }
0x111b   :  { %9476 = vmatprep.subr.mxu1 %v13297_v28 }
0x111c   :  { %v3278_v60 = vpop.f32.mrf.mxu0  ;;  %9477 = vmatpush3.msra.mxu1 %v13389_v20  ;;  %v16291_v20 = vld [vmem:[#allocation20_spill] sm:$0xff] }
0x111d   :  { %v3279_v0 = vadd.f32 %v13663_v43, %v3278_v60  ;;  %9478 = vmatprep.subr.mxu1 %v13297_v28 }
0x111e   :  { %v9321_v3 = vpop.f32.mrf.mxu0  ;;  %9479 = vmatpush3.msra.mxu1 %v13393_v38  ;;  %v16292_v38 = vld [vmem:[#allocation34_spill] sm:$0xff] }
0x111f   :  { %v3282_v56 = vsub.f32 %v13668_v51, %v3279_v0  ;;  %9480 = vmatprep.subr.mxu1 %v13297_v28  ;;  %v3515_v3 = vmul.f32 %v13748_v34, %v13748_v34 }
0x1120   :  { %9481 = vmatpush3.msra.mxu1 %v13400_v33  ;;  %v16294_v33 = vld [vmem:[#allocation22_spill] sm:$0xff] }
0x1121   :  { %9390 = vmatmul.mubr.f32.vlgmr.msra.gmra.mxu0 %v3282_v56  ;;  %v3283_v46 = vmul.f32 %v3282_v56, %v3282_v56  ;;  %9482 = vmatprep.subr.mxu1 %v13297_v28  ;;  %v16302_v56 = vmov 0.9  }
0x1122   :  { %9483 = vmatpush3.msra.mxu1 %v13408_v36  ;;  %9428 = vmatpush3.msra.mxu0 %v13396_v32  ;;  %v16293_v32 = vld [vmem:[#allocation24_spill] sm:$0xff]  ;;  %v16296_v36 = vld [vmem:[#allocation31_spill] sm:$0xff] }
0x1123   :  { %3284 = vadd.xlane.f32.xlu0 %v3283_v46  ;;  %9484 = vmatprep.subr.mxu1 %v13297_v28 }
0x1124   :  { %9485 = vmatpush3.msra.mxu1 %v13416_v22  ;;  %9429 = vmatprep.subr.mxu0 %v13297_v28  ;;  %v16298_v22 = vld [vmem:[#allocation28_spill] sm:$0xff] }
0x1125   :  { %9486 = vmatprep.subr.mxu1 %v13297_v28  ;;  %9430 = vmatpush3.msra.mxu0 %v13405_v50  ;;  %v16295_v50 = vld [vmem:[#allocation25_spill] sm:$0xff] }
0x1126   :  { %9487 = vmatpush3.msra.mxu1 %v13685_v15  ;;  %9431 = vmatprep.subr.mxu0 %v13297_v28 }
0x1127   :  { %9488 = vmatprep.subr.mxu1 %v13297_v28  ;;  %9432 = vmatpush3.msra.mxu0 %v13413_v7  ;;  %v16297_v7 = vld [vmem:[#allocation27_spill] sm:$0xff] }
0x1128   :  { %9489 = vmatpush3.msra.mxu1 %v13691_v11  ;;  %9433 = vmatprep.subr.mxu0 %v13297_v28 }
0x1129   :  { %9490 = vmatprep.subr.mxu1 %v13297_v28  ;;  %9434 = vmatpush3.msra.mxu0 %v13421_v31  ;;  %v16299_v31 = vld [vmem:[#allocation15_spill] sm:$0xff] }
0x112a   :  { %9491 = vmatpush3.msra.mxu1 %v13697_v55  ;;  %9435 = vmatprep.subr.mxu0 %v13297_v28 }
0x112b   :  { %9492 = vmatprep.subr.mxu1 %v13297_v28  ;;  %9436 = vmatpush3.msra.mxu0 %v13427_v29  ;;  %v16300_v29 = vld [vmem:[#allocation30_spill] sm:$0xff] }
0x112c   :  { %9493 = vmatpush3.msra.mxu1 %v13703_v39  ;;  %9437 = vmatprep.subr.mxu0 %v13297_v28 }
0x112d   :  { %9438 = vmatpush3.msra.mxu0 %v16291_v20  ;;  %9459 = vmatprep.mubr.msk.f32.mxu0 %vm11369_vm0, %v13297_v28  ;;  %v3516_v20 = vsub.f32 1.0, %v3515_v3  ;;  %v14135_v3 = vld [vmem:[#allocation7 + $0x90] sm:$0xff] }
0x112e   :  { %9439 = vmatprep.subr.mxu0 %v13297_v28  ;;  %9532 = vmatprep.subr.mxu1 %v13297_v28  ;;  %16315 = vst [vmem:[#allocation22_spill] sm:$0xff] %v14135_v3 }
0x112f   :  { %9440 = vmatpush3.msra.mxu0 %v16292_v38 }
0x1130   :  { %9441 = vmatprep.subr.mxu0 %v13297_v28 }
0x1131   :  { %9442 = vmatpush3.msra.mxu0 %v16293_v32 }
0x1132   :  { %9443 = vmatprep.subr.mxu0 %v13297_v28 }
0x1133   :  { %9444 = vmatpush3.msra.mxu0 %v16294_v33 }
0x1134   :  { %9445 = vmatprep.subr.mxu0 %v13297_v28 }
0x1135   :  { %9446 = vmatpush3.msra.mxu0 %v16295_v50 }
0x1136   :  { %9447 = vmatprep.subr.mxu0 %v13297_v28 }
0x1137   :  { %9448 = vmatpush3.msra.mxu0 %v16296_v36 }
0x1138   :  { %9449 = vmatprep.subr.mxu0 %v13297_v28 }
0x1139   :  { %9450 = vmatpush3.msra.mxu0 %v16297_v7 }
0x113a   :  { %9451 = vmatprep.subr.mxu0 %v13297_v28 }
0x113b   :  { %9452 = vmatpush3.msra.mxu0 %v16298_v22 }
0x113c   :  { %9453 = vmatprep.subr.mxu0 %v13297_v28 }
0x113d   :  { %9454 = vmatpush3.msra.mxu0 %v16299_v31 }
0x113e   :  { %9455 = vmatprep.subr.mxu0 %v13297_v28 }
0x113f   :  { %9456 = vmatpush3.msra.mxu0 %v16300_v29  ;;  %v3368_v29 = vsub.f32 0.0, %v13840_v9 }
0x1140   :  { %9457 = vmatprep.subr.mxu0 %v13297_v28 }
0x1141   :  { %9458 = vmatpush3.msra.mxu0 %v16301_v45 }
0x1142   :  { %9497 = vmatprep.subr.mxu0 %v13297_v28 }
0x1198   :  { %v3362_v23 = vpop.xlane.xlu1 %3361 }
0x1199   :  { %v3363_v60 = vmul.f32 0.5, %v3362_v23  ;;  %v14123_v23 = vld [vmem:[#allocation7 + $0xa8] sm:$0xff] }
0x119a   :  { %16312 = vst [vmem:[#allocation20_spill] sm:$0xff] %v14123_v23 }
0x11ac   :  { %v3285_v24 = vpop.xlane.xlu0 %3284 }
0x11ad   :  { %v3286_v30 = vmul.f32 0.5, %v3285_v24  ;;  %v13942_v24 = vld [vmem:[#allocation9 + $0x10] sm:$0xff] }
0x11af   :  { %v13915_v0 = vadd.f32 %v3363_v60, %v3286_v30  ;;  %v14127_v30 = vld [vmem:[#allocation7 + $0xa0] sm:$0xff]  ;;  %v14131_v60 = vld [vmem:[#allocation7 + $0x98] sm:$0xff] }
0x11b0   :  { %16313 = vst [vmem:[#allocation34_spill] sm:$0xff] %v14127_v30  ;;  %16314 = vst [vmem:[#allocation24_spill] sm:$0xff] %v14131_v60 }
0x11b1   :  { %vm3365_vm9 = vcmp.lt.f32.partialorder %v13915_v0, %v13730_v52  ;;  %v3439_v52 = vmul.f32 %v13776_v6, %v13776_v6 }
0x11b2   :  { %v3366_v46 = vsel %vm3365_vm9, 1.0, %v16302_v56 }
0x11b3   :  { %v13923_v32 = vmul.f32 %v3366_v46, %v13738_v37  ;;  %v3440_v34 = vsub.f32 1.0, %v3439_v52  ;;  %v14139_v46 = vld [vmem:[#allocation7 + $0x88] sm:$0xff] }
0x11b4   :  { %16316 = vst [vmem:[#allocation25_spill] sm:$0xff] %v14139_v46 }
0x11cd   :  { %v3511_v38 = vpop.f32.mrf.mxu1 }
0x11ce   :  { %v3517_v33 = vmul.f32 %v3516_v20, %v3511_v38  ;;  %v14143_v20 = vld [vmem:[#allocation7 + $0x80] sm:$0xff] }
0x11cf   :  { %v9426_v50 = vpop.f32.mrf.mxu1  ;;  %16317 = vst [vmem:[#allocation31_spill] sm:$0xff] %v14143_v20 }
0x11d0   :  { %v3518_v36 = vmul.f32 %v3517_v33, %v13923_v32 }
0x11d2   :  { %v13927_v7 = vadd.f32 %v3518_v36, %v13742_v62 }
0x11d4   :  { %10807 = vtanh.f32 %v13927_v7 }
0x11e1   :  { %v13932_v22 = vpop.eup %10807  ;;  %v3435_v31 = vpop.f32.mrf.mxu0 }
0x11e2   :  { %v3441_v37 = vmul.f32 %v3440_v34, %v3435_v31  ;;  %9495 = vmatmul.mubr.f32.vlgmr.msra.gmra.mxu1 %v13932_v22  ;;  %v3824_v34 = vmul.f32 %v13932_v22, %v13932_v22 }
0x11e3   :  { %v9391_v45 = vpop.f32.mrf.mxu0  ;;  %9533 = vmatpush3.msra.mxu1 %v13505_v13  ;;  %9564 = vmatprep.mubr.msk.f32.mxu1 %vm11369_vm0, %v13297_v28  ;;  %v16303_v13 = vld [vmem:[#allocation29_spill] sm:$0xff] }
0x11e4   :  { %v3442_v62 = vadd.f32 %v3441_v37, %v3368_v29  ;;  %9534 = vmatprep.subr.mxu1 %v13297_v28  ;;  %v3825_v29 = vsub.f32 1.0, %v3824_v34  ;;  %v14215_v34 = vld [vmem:[#allocation5 + $0x128] sm:$0xff] }
0x11e5   :  { %9535 = vmatpush3.msra.mxu1 %v13514_v26  ;;  %v16304_v26 = vld [vmem:[#allocation26_spill] sm:$0xff] }
0x11e6   :  { %v3443_v6 = vmul.f32 %v3442_v62, %v13923_v32  ;;  %9536 = vmatprep.subr.mxu1 %v13942_v24 }
0x11e7   :  { %9537 = vmatpush3.msra.mxu1 %v13519_v4 }
0x11e8   :  { %v13947_v9 = vadd.f32 %v3443_v6, %v13758_v41  ;;  %9538 = vmatprep.subr.mxu1 %v13942_v24 }
0x11e9   :  { %9539 = vmatpush3.msra.mxu1 %v13523_v19 }
0x11ea   :  { %10809 = vtanh.f32 %v13947_v9  ;;  %9540 = vmatprep.subr.mxu1 %v13942_v24 }
0x11eb   :  { %9541 = vmatpush3.msra.mxu1 %v13527_v5 }
0x11ec   :  { %9542 = vmatprep.subr.mxu1 %v13942_v24 }
0x11ed   :  { %9543 = vmatpush3.msra.mxu1 %v13531_v25 }
0x11ee   :  { %9544 = vmatprep.subr.mxu1 %v13942_v24 }
0x11ef   :  { %9545 = vmatpush3.msra.mxu1 %v13535_v63 }
0x11f0   :  { %9546 = vmatprep.subr.mxu1 %v13942_v24 }
0x11f1   :  { %9547 = vmatpush3.msra.mxu1 %v13539_v53  ;;  %v14021_v53 = vld [vmem:[#allocation7 + $0x178] sm:$0xff] }
0x11f2   :  { %9548 = vmatprep.subr.mxu1 %v13942_v24 }
0x11f3   :  { %9549 = vmatpush3.msra.mxu1 %v13545_v49  ;;  %v14027_v49 = vld [vmem:[#allocation7 + $0x170] sm:$0xff] }
0x11f4   :  { %9550 = vmatprep.subr.mxu1 %v13942_v24 }
0x11f5   :  { %9551 = vmatpush3.msra.mxu1 %v13553_v59  ;;  %v14035_v59 = vld [vmem:[#allocation7 + $0x160] sm:$0xff] }
0x11f6   :  { %9552 = vmatprep.subr.mxu1 %v13942_v24 }
0x11f7   :  { %v13965_v28 = vpop.eup %10809  ;;  %9553 = vmatpush3.msra.mxu1 %v13561_v58  ;;  %v14043_v58 = vld [vmem:[#allocation7 + $0x150] sm:$0xff] }
0x11f8   :  { %9460 = vmatmul.mubr.f32.vlgmr.msra.gmra.mxu0 %v13965_v28  ;;  %9554 = vmatprep.subr.mxu1 %v13942_v24 }
0x11f9   :  { %9498 = vmatpush3.msra.mxu0 %v13550_v8  ;;  %9555 = vmatpush3.msra.mxu1 %v13569_v2  ;;  %v14031_v8 = vld [vmem:[#allocation7 + $0x168] sm:$0xff]  ;;  %v14051_v2 = vld [vmem:[#allocation7 + $0x140] sm:$0xff] }
0x11fa   :  { %9499 = vmatprep.subr.mxu0 %v13942_v24  ;;  %9556 = vmatprep.subr.mxu1 %v13942_v24  ;;  %16305 = vst [vmem:[#allocation32_spill] sm:$0xff] %v14051_v2 }
0x11fb   :  { %9500 = vmatpush3.msra.mxu0 %v13558_v12  ;;  %9557 = vmatpush3.msra.mxu1 %v13577_v35  ;;  %v14039_v12 = vld [vmem:[#allocation7 + $0x158] sm:$0xff] }
0x11fc   :  { %9501 = vmatprep.subr.mxu0 %v13942_v24  ;;  %9558 = vmatprep.subr.mxu1 %v13942_v24  ;;  %v14055_v35 = vld [vmem:[#allocation7 + $0x138] sm:$0xff] }
0x11fd   :  { %9502 = vmatpush3.msra.mxu0 %v13566_v14  ;;  %9559 = vmatpush3.msra.mxu1 %v13794_v61  ;;  %v14047_v14 = vld [vmem:[#allocation7 + $0x148] sm:$0xff]  ;;  %16306 = vst [vmem:[#allocation16_spill] sm:$0xff] %v14055_v35 }
0x11fe   :  { %9503 = vmatprep.subr.mxu0 %v13942_v24  ;;  %9560 = vmatprep.subr.mxu1 %v13942_v24 }
0x11ff   :  { %9504 = vmatpush3.msra.mxu0 %v13574_v18  ;;  %9561 = vmatpush3.msra.mxu1 %v13800_v57 }
0x1200   :  { %9505 = vmatprep.subr.mxu0 %v13942_v24  ;;  %9562 = vmatprep.subr.mxu1 %v13942_v24 }
0x1201   :  { %9506 = vmatpush3.msra.mxu0 %v13582_v1  ;;  %9563 = vmatpush3.msra.mxu1 %v13806_v27 }
0x1202   :  { %9507 = vmatprep.subr.mxu0 %v13942_v24  ;;  %9529 = vmatprep.mubr.msk.f32.mxu0 %vm11369_vm0, %v13942_v24 }
0x1203   :  { %9508 = vmatpush3.msra.mxu0 %v13588_v44  ;;  %9602 = vmatprep.subr.mxu1 %v13942_v24 }
0x1204   :  { %9509 = vmatprep.subr.mxu0 %v13942_v24 }
0x1205   :  { %9510 = vmatpush3.msra.mxu0 %v13594_v47  ;;  %v14060_v47 = vld [vmem:[#allocation7 + $0x130] sm:$0xff] }
0x1206   :  { %9511 = vmatprep.subr.mxu0 %v13942_v24  ;;  %16307 = vst [vmem:[#allocation33_spill] sm:$0xff] %v14060_v47 }
0x1207   :  { %9512 = vmatpush3.msra.mxu0 %v13601_v17 }
0x1208   :  { %9513 = vmatprep.subr.mxu0 %v13942_v24 }
0x1209   :  { %9514 = vmatpush3.msra.mxu0 %v16282_v42  ;;  %v14072_v42 = vld [vmem:[#allocation7 + $0xf8] sm:$0xff] }
0x120a   :  { %9515 = vmatprep.subr.mxu0 %v13942_v24 }
0x120b   :  { %9516 = vmatpush3.msra.mxu0 %v16283_v16  ;;  %v14085_v16 = vld [vmem:[#allocation7 + $0xe8] sm:$0xff] }
0x120c   :  { %9517 = vmatprep.subr.mxu0 %v13942_v24 }
0x120d   :  { %9518 = vmatpush3.msra.mxu0 %v16284_v10  ;;  %v14111_v10 = vld [vmem:[#allocation7 + $0xc0] sm:$0xff] }
0x120e   :  { %9519 = vmatprep.subr.mxu0 %v13942_v24  ;;  %16309 = vst [vmem:[#allocation21_spill] sm:$0xff] %v14111_v10 }
0x120f   :  { %9520 = vmatpush3.msra.mxu0 %v16285_v48  ;;  %v14115_v48 = vld [vmem:[#allocation7 + $0xb8] sm:$0xff] }
0x1210   :  { %9521 = vmatprep.subr.mxu0 %v13942_v24  ;;  %16310 = vst [vmem:[#allocation19_spill] sm:$0xff] %v14115_v48 }
0x1211   :  { %9522 = vmatpush3.msra.mxu0 %v16286_v40  ;;  %v14119_v40 = vld [vmem:[#allocation7 + $0xb0] sm:$0xff] }
0x1212   :  { %9523 = vmatprep.subr.mxu0 %v13942_v24  ;;  %16311 = vst [vmem:[#allocation23_spill] sm:$0xff] %v14119_v40 }
0x1213   :  { %9524 = vmatpush3.msra.mxu0 %v16303_v13 }
0x1214   :  { %9525 = vmatprep.subr.mxu0 %v13942_v24 }
0x1215   :  { %9526 = vmatpush3.msra.mxu0 %v16304_v26 }
0x1216   :  { %9527 = vmatprep.subr.mxu0 %v13942_v24 }
0x1217   :  { %9528 = vmatpush3.msra.mxu0 %v13634_v21  ;;  %v14065_v21 = vld [vmem:[#allocation7 + $0x128] sm:$0xff] }
0x1218   :  { %9567 = vmatprep.subr.mxu0 %v13942_v24 }
0x12a2   :  { %v3664_v4 = vpop.f32.mrf.mxu1 }
0x12a3   :  { %v3665_v19 = vadd.f32 %v13836_v54, %v3664_v4 }
0x12a4   :  { %v9496_v5 = vpop.f32.mrf.mxu1 }
0x12a5   :  { %v14016_v25 = vsub.f32 %v13947_v9, %v3665_v19 }
0x12a7   :  { %9565 = vmatmul.mubr.f32.vlgmr.msra.gmra.mxu1 %v14016_v25  ;;  %v3669_v63 = vmul.f32 %v14016_v25, %v14016_v25 }
0x12a8   :  { %9603 = vmatpush3.msra.mxu1 %v14021_v53  ;;  %9634 = vmatprep.mubr.msk.f32.mxu1 %vm11369_vm0, %v13942_v24 }
0x12a9   :  { %3670 = vadd.xlane.f32.xlu1 %v3669_v63  ;;  %9604 = vmatprep.subr.mxu1 %v13942_v24 }
0x12aa   :  { %9605 = vmatpush3.msra.mxu1 %v14027_v49 }
0x12ab   :  { %9606 = vmatprep.subr.mxu1 %v13942_v24 }
0x12ac   :  { %9607 = vmatpush3.msra.mxu1 %v14031_v8 }
0x12ad   :  { %9608 = vmatprep.subr.mxu1 %v13942_v24 }
0x12ae   :  { %9609 = vmatpush3.msra.mxu1 %v14035_v59 }
0x12af   :  { %9610 = vmatprep.subr.mxu1 %v13942_v24 }
0x12b0   :  { %9611 = vmatpush3.msra.mxu1 %v14039_v12 }
0x12b1   :  { %9612 = vmatprep.subr.mxu1 %v13942_v24 }
0x12b2   :  { %9613 = vmatpush3.msra.mxu1 %v14043_v58 }
0x12b3   :  { %9614 = vmatprep.subr.mxu1 %v13942_v24 }
0x12b4   :  { %9615 = vmatpush3.msra.mxu1 %v14047_v14 }
0x12b5   :  { %9616 = vmatprep.subr.mxu1 %v13942_v24 }
0x12b6   :  { %9617 = vmatpush3.msra.mxu1 %v14051_v2 }
0x12b7   :  { %9618 = vmatprep.subr.mxu1 %v13942_v24 }
0x12b8   :  { %v3587_v18 = vpop.f32.mrf.mxu0  ;;  %9619 = vmatpush3.msra.mxu1 %v14055_v35 }
0x12b9   :  { %v3588_v1 = vadd.f32 %v13663_v43, %v3587_v18  ;;  %9620 = vmatprep.subr.mxu1 %v13942_v24  ;;  %v14069_v43 = vld [vmem:[#allocation7 + $0x120] sm:$0xff] }
0x12ba   :  { %v9461_v44 = vpop.f32.mrf.mxu0  ;;  %9621 = vmatpush3.msra.mxu1 %v14060_v47 }
0x12bb   :  { %v3591_v17 = vsub.f32 %v13668_v51, %v3588_v1  ;;  %9622 = vmatprep.subr.mxu1 %v13942_v24  ;;  %v14079_v51 = vld [vmem:[#allocation7 + $0xf0] sm:$0xff]  ;;  %v14178_v1 = vld [vmem:[#allocation5 + $0x168] sm:$0xff] }
0x12bc   :  { %9623 = vmatpush3.msra.mxu1 %v14065_v21 }
0x12bd   :  { %9530 = vmatmul.mubr.f32.vlgmr.msra.gmra.mxu0 %v3591_v17  ;;  %v3592_v41 = vmul.f32 %v3591_v17, %v3591_v17  ;;  %9624 = vmatprep.subr.mxu1 %v13942_v24 }
0x12be   :  { %9625 = vmatpush3.msra.mxu1 %v14069_v43  ;;  %9568 = vmatpush3.msra.mxu0 %v14072_v42 }
0x12bf   :  { %3593 = vadd.xlane.f32.xlu0 %v3592_v41  ;;  %9626 = vmatprep.subr.mxu1 %v13942_v24  ;;  %v14190_v41 = vld [vmem:[#allocation5 + $0x158] sm:$0xff] }
0x12c0   :  { %9627 = vmatpush3.msra.mxu1 %v13685_v15  ;;  %9569 = vmatprep.subr.mxu0 %v13942_v24  ;;  %v14091_v15 = vld [vmem:[#allocation7 + $0xe0] sm:$0xff] }
0x12c1   :  { %9628 = vmatprep.subr.mxu1 %v13942_v24  ;;  %9570 = vmatpush3.msra.mxu0 %v14079_v51 }
0x12c2   :  { %9629 = vmatpush3.msra.mxu1 %v13691_v11  ;;  %9571 = vmatprep.subr.mxu0 %v13942_v24  ;;  %v14096_v11 = vld [vmem:[#allocation7 + $0xd8] sm:$0xff] }
0x12c3   :  { %9630 = vmatprep.subr.mxu1 %v13942_v24  ;;  %9572 = vmatpush3.msra.mxu0 %v14085_v16 }
0x12c4   :  { %9631 = vmatpush3.msra.mxu1 %v13697_v55  ;;  %9573 = vmatprep.subr.mxu0 %v13942_v24  ;;  %v14103_v55 = vld [vmem:[#allocation7 + $0xd0] sm:$0xff] }
0x12c5   :  { %9632 = vmatprep.subr.mxu1 %v13942_v24  ;;  %9574 = vmatpush3.msra.mxu0 %v14091_v15 }
0x12c6   :  { %9633 = vmatpush3.msra.mxu1 %v13703_v39  ;;  %9575 = vmatprep.subr.mxu0 %v13942_v24  ;;  %v14107_v39 = vld [vmem:[#allocation7 + $0xc8] sm:$0xff] }
0x12c7   :  { %9576 = vmatpush3.msra.mxu0 %v14096_v11  ;;  %9599 = vmatprep.mubr.msk.f32.mxu0 %vm11369_vm0, %v13942_v24  ;;  %16308 = vst [vmem:[#allocation17_spill] sm:$0xff] %v14107_v39 }
0x12c8   :  { %9577 = vmatprep.subr.mxu0 %v13942_v24  ;;  %9672 = vmatprep.subr.mxu1 %v13942_v24 }
0x12c9   :  { %9578 = vmatpush3.msra.mxu0 %v14103_v55 }
0x12ca   :  { %9579 = vmatprep.subr.mxu0 %v13942_v24 }
0x12cb   :  { %9580 = vmatpush3.msra.mxu0 %v14107_v39 }
0x12cc   :  { %9581 = vmatprep.subr.mxu0 %v13942_v24 }
0x12cd   :  { %9582 = vmatpush3.msra.mxu0 %v14111_v10 }
0x12ce   :  { %9583 = vmatprep.subr.mxu0 %v13942_v24 }
0x12cf   :  { %9584 = vmatpush3.msra.mxu0 %v14115_v48 }
0x12d0   :  { %9585 = vmatprep.subr.mxu0 %v13942_v24 }
0x12d1   :  { %9586 = vmatpush3.msra.mxu0 %v14119_v40 }
0x12d2   :  { %9587 = vmatprep.subr.mxu0 %v13942_v24 }
0x12d3   :  { %9588 = vmatpush3.msra.mxu0 %v14123_v23 }
0x12d4   :  { %9589 = vmatprep.subr.mxu0 %v13942_v24 }
0x12d5   :  { %9590 = vmatpush3.msra.mxu0 %v14127_v30 }
0x12d6   :  { %9591 = vmatprep.subr.mxu0 %v13942_v24 }
0x12d7   :  { %9592 = vmatpush3.msra.mxu0 %v14131_v60 }
0x12d8   :  { %9593 = vmatprep.subr.mxu0 %v13942_v24 }
0x12d9   :  { %9594 = vmatpush3.msra.mxu0 %v14135_v3 }
0x12da   :  { %9595 = vmatprep.subr.mxu0 %v13942_v24 }
0x12db   :  { %9596 = vmatpush3.msra.mxu0 %v14139_v46 }
0x12dc   :  { %9597 = vmatprep.subr.mxu0 %v13942_v24 }
0x12dd   :  { %9598 = vmatpush3.msra.mxu0 %v14143_v20 }
0x12de   :  { %9637 = vmatprep.subr.mxu0 %v13942_v24 }
0x1332   :  { %v3671_v33 = vpop.xlane.xlu1 %3670 }
0x1333   :  { %v3672_v36 = vmul.f32 0.5, %v3671_v33  ;;  %v14199_v33 = vld [vmem:[#allocation5 + $0x148] sm:$0xff] }
0x1348   :  { %v3594_v38 = vpop.xlane.xlu0 %3593 }
0x1349   :  { %v3595_v50 = vmul.f32 0.5, %v3594_v38  ;;  %v14195_v38 = vld [vmem:[#allocation5 + $0x150] sm:$0xff] }
0x134b   :  { %v14147_v52 = vadd.f32 %v3672_v36, %v3595_v50  ;;  %v14207_v50 = vld [vmem:[#allocation5 + $0x138] sm:$0xff]  ;;  %v14211_v36 = vld [vmem:[#allocation5 + $0x130] sm:$0xff] }
0x134d   :  { %vm3674_vm10 = vcmp.lt.f32.partialorder %v14147_v52, %v13915_v0  ;;  %v3748_v0 = vmul.f32 %v13965_v28, %v13965_v28  ;;  %v14174_v28 = vld [vmem:[#allocation5 + $0x170] sm:$0xff] }
0x134e   :  { %v3675_v31 = vsel %vm3674_vm10, 1.0, %v16302_v56 }
0x134f   :  { %v14155_v45 = vmul.f32 %v3675_v31, %v13923_v32  ;;  %v3749_v4 = vsub.f32 1.0, %v3748_v0  ;;  %v14167_v32 = vld [vmem:[#allocation5 + $0x178] sm:$0xff]  ;;  %v14246_v0 = vld [vmem:[#allocation5 + $0xe0] sm:$0xff] }
0x1367   :  { %v3820_v37 = vpop.f32.mrf.mxu1 }
0x1368   :  { %v3826_v62 = vmul.f32 %v3825_v29, %v3820_v37  ;;  %v14221_v29 = vld [vmem:[#allocation5 + $0x120] sm:$0xff]  ;;  %v14226_v37 = vld [vmem:[#allocation5 + $0xf8] sm:$0xff] }
0x1369   :  { %v9566_v6 = vpop.f32.mrf.mxu1 }
0x136a   :  { %v3827_v13 = vmul.f32 %v3826_v62, %v14155_v45  ;;  %v14229_v62 = vld [vmem:[#allocation5 + $0x118] sm:$0xff]  ;;  %v14234_v6 = vld [vmem:[#allocation5 + $0xf0] sm:$0xff] }
0x136c   :  { %v14159_v26 = vadd.f32 %v3827_v13, %v13927_v7  ;;  %v3677_v7 = vsub.f32 0.0, %v14016_v25  ;;  %v14183_v25 = vld [vmem:[#allocation5 + $0x160] sm:$0xff]  ;;  %v14240_v13 = vld [vmem:[#allocation5 + $0xe8] sm:$0xff] }
0x136e   :  { %10811 = vtanh.f32 %v14159_v26 }
0x137b   :  { %v14164_v22 = vpop.eup %10811 }
0x137c   :  { %9635 = vmatmul.mubr.f32.vlgmr.msra.gmra.mxu1 %v14164_v22 }
0x137d   :  { %v3744_v19 = vpop.f32.mrf.mxu0  ;;  %9673 = vmatpush3.msra.mxu1 %v14167_v32  ;;  %9704 = vmatprep.mubr.msk.f32.mxu1 %vm11369_vm0, %v13942_v24 }
0x137e   :  { %v3750_v5 = vmul.f32 %v3749_v4, %v3744_v19  ;;  %9674 = vmatprep.subr.mxu1 %v13942_v24  ;;  %v14266_v4 = vld [vmem:[#allocation5 + $0xc0] sm:$0xff]  ;;  %v14270_v19 = vld [vmem:[#allocation5 + $0xb8] sm:$0xff] }
0x137f   :  { %v9531_v63 = vpop.f32.mrf.mxu0  ;;  %9675 = vmatpush3.msra.mxu1 %v14174_v28  ;;  %16318 = vst [vmem:[#allocation27_spill] sm:$0xff] %v14270_v19 }
0x1380   :  { %v3751_v18 = vadd.f32 %v3750_v5, %v3677_v7  ;;  %9676 = vmatprep.subr.mxu1 %v13942_v24  ;;  %v14274_v7 = vld [vmem:[#allocation5 + $0xb0] sm:$0xff]  ;;  %v14278_v5 = vld [vmem:[#allocation5 + $0xa8] sm:$0xff]  ;;  %v14282_v63 = vld [vmem:[#allocation5 + $0xa0] sm:$0xff] }
0x1381   :  { %9677 = vmatpush3.msra.mxu1 %v14178_v1  ;;  %16319 = vst [vmem:[#allocation28_spill] sm:$0xff] %v14274_v7  ;;  %16320 = vst [vmem:[#allocation15_spill] sm:$0xff] %v14278_v5 }
0x1382   :  { %v3752_v44 = vmul.f32 %v3751_v18, %v14155_v45  ;;  %9678 = vmatprep.subr.mxu1 %v13942_v24  ;;  %16321 = vst [vmem:[#allocation30_spill] sm:$0xff] %v14282_v63  ;;  %v14286_v18 = vld [vmem:[#allocation5 + $0x98] sm:$0xff] }
0x1383   :  { %9679 = vmatpush3.msra.mxu1 %v14183_v25  ;;  %16322 = vst [vmem:[#allocation18_spill] sm:$0xff] %v14286_v18 }
0x1384   :  { %v14187_v17 = vadd.f32 %v3752_v44, %v13947_v9  ;;  %9680 = vmatprep.subr.mxu1 %v13942_v24  ;;  %v14203_v9 = vld [vmem:[#allocation5 + $0x140] sm:$0xff]  ;;  %v14290_v44 = vld [vmem:[#allocation5 + $0x90] sm:$0xff] }
0x1385   :  { %9681 = vmatpush3.msra.mxu1 %v14190_v41  ;;  %16323 = vst [vmem:[#allocation29_spill] sm:$0xff] %v14290_v44 }
0x1386   :  { %10813 = vtanh.f32 %v14187_v17  ;;  %9682 = vmatprep.subr.mxu1 %v13942_v24 }
0x1387   :  { %9683 = vmatpush3.msra.mxu1 %v14195_v38 }
0x1388   :  { %9684 = vmatprep.subr.mxu1 %v13942_v24 }
0x1389   :  { %9685 = vmatpush3.msra.mxu1 %v14199_v33 }
0x138a   :  { %9686 = vmatprep.subr.mxu1 %v13942_v24 }
0x138b   :  { %9687 = vmatpush3.msra.mxu1 %v14203_v9 }
0x138c   :  { %9688 = vmatprep.subr.mxu1 %v13942_v24 }
0x138d   :  { %9689 = vmatpush3.msra.mxu1 %v14207_v50 }
0x138e   :  { %9690 = vmatprep.subr.mxu1 %v13942_v24 }
0x138f   :  { %9691 = vmatpush3.msra.mxu1 %v14211_v36 }
0x1390   :  { %9692 = vmatprep.subr.mxu1 %v13942_v24 }
0x1391   :  { %9693 = vmatpush3.msra.mxu1 %v14215_v34 }
0x1392   :  { %9694 = vmatprep.subr.mxu1 %v13942_v24 }
0x1393   :  { %v14219_v31 = vpop.eup %10813  ;;  %9695 = vmatpush3.msra.mxu1 %v14221_v29 }
0x1394   :  { %9600 = vmatmul.mubr.f32.vlgmr.msra.gmra.mxu0 %v14219_v31  ;;  %9696 = vmatprep.subr.mxu1 %v13942_v24 }
0x1395   :  { %9638 = vmatpush3.msra.mxu0 %v14226_v37  ;;  %9697 = vmatpush3.msra.mxu1 %v14229_v62 }
0x1396   :  { %9639 = vmatprep.subr.mxu0 %v13942_v24  ;;  %9698 = vmatprep.subr.mxu1 %v13942_v24 }
0x1397   :  { %9640 = vmatpush3.msra.mxu0 %v14234_v6  ;;  %9699 = vmatpush3.msra.mxu1 %v13794_v61  ;;  %v14253_v61 = vld [vmem:[#allocation5 + $0xd8] sm:$0xff] }
0x1398   :  { %9641 = vmatprep.subr.mxu0 %v13942_v24  ;;  %9700 = vmatprep.subr.mxu1 %v13942_v24 }
0x1399   :  { %9642 = vmatpush3.msra.mxu0 %v14240_v13  ;;  %9701 = vmatpush3.msra.mxu1 %v13800_v57  ;;  %v14258_v57 = vld [vmem:[#allocation5 + $0xd0] sm:$0xff] }
0x139a   :  { %9643 = vmatprep.subr.mxu0 %v13942_v24  ;;  %9702 = vmatprep.subr.mxu1 %v13942_v24 }
0x139b   :  { %9644 = vmatpush3.msra.mxu0 %v14246_v0  ;;  %9703 = vmatpush3.msra.mxu1 %v13806_v27  ;;  %v14262_v27 = vld [vmem:[#allocation5 + $0xc8] sm:$0xff] }
0x139c   :  { %9645 = vmatprep.subr.mxu0 %v13942_v24  ;;  %9669 = vmatprep.mubr.msk.f32.mxu0 %vm11369_vm0, %v13942_v24 }
0x139d   :  { %9646 = vmatpush3.msra.mxu0 %v14253_v61  ;;  %9742 = vmatprep.subr.mxu1 %v13942_v24 }
0x139e   :  { %9647 = vmatprep.subr.mxu0 %v13942_v24 }
0x139f   :  { %9648 = vmatpush3.msra.mxu0 %v14258_v57 }
0x13a0   :  { %9649 = vmatprep.subr.mxu0 %v13942_v24 }
0x13a1   :  { %9650 = vmatpush3.msra.mxu0 %v14262_v27 }
0x13a2   :  { %9651 = vmatprep.subr.mxu0 %v13942_v24 }
0x13a3   :  { %9652 = vmatpush3.msra.mxu0 %v14266_v4 }
0x13a4   :  { %9653 = vmatprep.subr.mxu0 %v13942_v24 }
0x13a5   :  { %9654 = vmatpush3.msra.mxu0 %v14270_v19 }
0x13a6   :  { %9655 = vmatprep.subr.mxu0 %v13942_v24 }
0x13a7   :  { %9656 = vmatpush3.msra.mxu0 %v14274_v7 }
0x13a8   :  { %9657 = vmatprep.subr.mxu0 %v13942_v24 }
0x13a9   :  { %9658 = vmatpush3.msra.mxu0 %v14278_v5  ;;  %v14294_v5 = vld [vmem:[#allocation5 + $0x88] sm:$0xff] }
0x13aa   :  { %9659 = vmatprep.subr.mxu0 %v13942_v24  ;;  %16324 = vst [vmem:[#allocation26_spill] sm:$0xff] %v14294_v5 }
0x13ab   :  { %9660 = vmatpush3.msra.mxu0 %v14282_v63  ;;  %v14298_v63 = vld [vmem:[#allocation5 + $0x80] sm:$0xff] }
0x13ac   :  { %9661 = vmatprep.subr.mxu0 %v13942_v24 }
0x13ad   :  { %9662 = vmatpush3.msra.mxu0 %v14286_v18 }
0x13ae   :  { %9663 = vmatprep.subr.mxu0 %v13942_v24 }
0x13af   :  { %9664 = vmatpush3.msra.mxu0 %v14290_v44 }
0x13b0   :  { %9665 = vmatprep.subr.mxu0 %v13942_v24 }
0x13b1   :  { %9666 = vmatpush3.msra.mxu0 %v14294_v5 }
0x13b2   :  { %9667 = vmatprep.subr.mxu0 %v13942_v24 }
0x13b3   :  { %9668 = vmatpush3.msra.mxu0 %v14298_v63 }
0x13b4   :  { %9707 = vmatprep.subr.mxu0 %v13942_v24 }
0x143c   :  { %v3973_v18 = vpop.f32.mrf.mxu1 }
0x143d   :  { %v3974_v7 = vadd.f32 %v13836_v54, %v3973_v18  ;;  %v14338_v18 = vld [vmem:[#allocation8] sm:$0xff] }
0x143e   :  { %v9636_v19 = vpop.f32.mrf.mxu1 }
0x143f   :  { %v14304_v44 = vsub.f32 %v14187_v17, %v3974_v7  ;;  %v14333_v19 = vld [vmem:[%s15924_s3 + $0x1] ss:$0 sm:$0xff] }
0x1441   :  { %9705 = vmatmul.mubr.f32.vlgmr.msra.gmra.mxu1 %v14304_v44  ;;  %v3978_v5 = vmul.f32 %v14304_v44, %v14304_v44 }
0x1442   :  { %9743 = vmatpush3.msra.mxu1 %v14021_v53  ;;  %9774 = vmatprep.mubr.msk.f32.mxu1 %vm11369_vm0, %v13942_v24 }
0x1443   :  { %3979 = vadd.xlane.f32.xlu1 %v3978_v5  ;;  %9744 = vmatprep.subr.mxu1 %v13942_v24 }
0x1444   :  { %9745 = vmatpush3.msra.mxu1 %v14027_v49 }
0x1445   :  { %9746 = vmatprep.subr.mxu1 %v13942_v24 }
0x1446   :  { %9747 = vmatpush3.msra.mxu1 %v14031_v8 }
0x1447   :  { %9748 = vmatprep.subr.mxu1 %v13942_v24 }
0x1448   :  { %9749 = vmatpush3.msra.mxu1 %v14035_v59 }
0x1449   :  { %9750 = vmatprep.subr.mxu1 %v13942_v24 }
0x144a   :  { %9751 = vmatpush3.msra.mxu1 %v14039_v12 }
0x144b   :  { %9752 = vmatprep.subr.mxu1 %v13942_v24 }
0x144c   :  { %9753 = vmatpush3.msra.mxu1 %v14043_v58 }
0x144d   :  { %9754 = vmatprep.subr.mxu1 %v13942_v24 }
0x144e   :  { %9755 = vmatpush3.msra.mxu1 %v14047_v14 }
0x144f   :  { %9756 = vmatprep.subr.mxu1 %v13942_v24 }
0x1450   :  { %9757 = vmatpush3.msra.mxu1 %v14051_v2  ;;  %v14344_v2 = vld [vmem:[#allocation7 + $0x118] sm:$0xff] }
0x1451   :  { %9758 = vmatprep.subr.mxu1 %v13942_v24 }
0x1452   :  { %9759 = vmatpush3.msra.mxu1 %v14055_v35 }
0x1453   :  { %9760 = vmatprep.subr.mxu1 %v13942_v24 }
0x1454   :  { %v3896_v54 = vpop.f32.mrf.mxu0  ;;  %9761 = vmatpush3.msra.mxu1 %v14060_v47 }
0x1455   :  { %v3897_v7 = vadd.f32 %v14333_v19, %v3896_v54  ;;  %9762 = vmatprep.subr.mxu1 %v13942_v24  ;;  %v14349_v54 = vld [vmem:[#allocation7 + $0x110] sm:$0xff] }
0x1456   :  { %v9601_v5 = vpop.f32.mrf.mxu0  ;;  %9763 = vmatpush3.msra.mxu1 %v14065_v21 }
0x1457   :  { %v3900_v35 = vsub.f32 %v14338_v18, %v3897_v7  ;;  %9764 = vmatprep.subr.mxu1 %v13942_v24 }
0x1458   :  { %9765 = vmatpush3.msra.mxu1 %v14069_v43 }
0x1459   :  { %9670 = vmatmul.mubr.f32.vlgmr.msra.gmra.mxu0 %v3900_v35  ;;  %v3901_v47 = vmul.f32 %v3900_v35, %v3900_v35  ;;  %9766 = vmatprep.subr.mxu1 %v13942_v24  ;;  %v14355_v35 = vld [vmem:[#allocation7 + $0x108] sm:$0xff] }
0x145a   :  { %9767 = vmatpush3.msra.mxu1 %v14344_v2  ;;  %9708 = vmatpush3.msra.mxu0 %v14072_v42 }
0x145b   :  { %3902 = vadd.xlane.f32.xlu0 %v3901_v47  ;;  %9768 = vmatprep.subr.mxu1 %v13942_v24  ;;  %v14361_v47 = vld [vmem:[#allocation7 + $0x100] sm:$0xff] }
0x145c   :  { %9769 = vmatpush3.msra.mxu1 %v14349_v54  ;;  %9709 = vmatprep.subr.mxu0 %v13942_v24 }
0x145d   :  { %9770 = vmatprep.subr.mxu1 %v13942_v24  ;;  %9710 = vmatpush3.msra.mxu0 %v14079_v51 }
0x145e   :  { %9771 = vmatpush3.msra.mxu1 %v14355_v35  ;;  %9711 = vmatprep.subr.mxu0 %v13942_v24 }
0x145f   :  { %9772 = vmatprep.subr.mxu1 %v13942_v24  ;;  %9712 = vmatpush3.msra.mxu0 %v14085_v16 }
0x1460   :  { %9773 = vmatpush3.msra.mxu1 %v14361_v47  ;;  %9713 = vmatprep.subr.mxu0 %v13942_v24 }
0x1461   :  { %9714 = vmatpush3.msra.mxu0 %v14091_v15  ;;  %9739 = vmatprep.mubr.msk.f32.mxu0 %vm11369_vm0, %v13942_v24 }
0x1462   :  { %9715 = vmatprep.subr.mxu0 %v13942_v24  ;;  %9812 = vmatprep.subr.mxu1 %v13942_v24 }
0x1463   :  { %9716 = vmatpush3.msra.mxu0 %v14096_v11 }
0x1464   :  { %9717 = vmatprep.subr.mxu0 %v13942_v24 }
0x1465   :  { %9718 = vmatpush3.msra.mxu0 %v14103_v55 }
0x1466   :  { %9719 = vmatprep.subr.mxu0 %v13942_v24 }
0x1467   :  { %9720 = vmatpush3.msra.mxu0 %v14107_v39 }
0x1468   :  { %9721 = vmatprep.subr.mxu0 %v13942_v24 }
0x1469   :  { %9722 = vmatpush3.msra.mxu0 %v14111_v10 }
0x146a   :  { %9723 = vmatprep.subr.mxu0 %v13942_v24 }
0x146b   :  { %9724 = vmatpush3.msra.mxu0 %v14115_v48 }
0x146c   :  { %9725 = vmatprep.subr.mxu0 %v13942_v24 }
0x146d   :  { %9726 = vmatpush3.msra.mxu0 %v14119_v40 }
0x146e   :  { %9727 = vmatprep.subr.mxu0 %v13942_v24 }
0x146f   :  { %9728 = vmatpush3.msra.mxu0 %v14123_v23 }
0x1470   :  { %9729 = vmatprep.subr.mxu0 %v13942_v24 }
0x1471   :  { %9730 = vmatpush3.msra.mxu0 %v14127_v30 }
0x1472   :  { %9731 = vmatprep.subr.mxu0 %v13942_v24 }
0x1473   :  { %9732 = vmatpush3.msra.mxu0 %v14131_v60 }
0x1474   :  { %9733 = vmatprep.subr.mxu0 %v13942_v24 }
0x1475   :  { %9734 = vmatpush3.msra.mxu0 %v14135_v3  ;;  %v4133_v3 = vmul.f32 %v14164_v22, %v14164_v22 }
0x1476   :  { %9735 = vmatprep.subr.mxu0 %v13942_v24 }
0x1477   :  { %9736 = vmatpush3.msra.mxu0 %v14139_v46  ;;  %v4134_v60 = vsub.f32 1.0, %v4133_v3 }
0x1478   :  { %9737 = vmatprep.subr.mxu0 %v13942_v24 }
0x1479   :  { %9738 = vmatpush3.msra.mxu0 %v14143_v20 }
0x147a   :  { %9777 = vmatprep.subr.mxu0 %v13942_v24 }
0x14cc   :  { %v3980_v5 = vpop.xlane.xlu1 %3979 }
0x14cd   :  { %v3981_v23 = vmul.f32 0.5, %v3980_v5  ;;  %v16325_v5 = vld [vmem:[#allocation27_spill] sm:$0xff] }
0x14e4   :  { %v3903_v7 = vpop.xlane.xlu0 %3902 }
0x14e5   :  { %v3904_v30 = vmul.f32 0.5, %v3903_v7 }
0x14e7   :  { %v14394_v40 = vadd.f32 %v3981_v23, %v3904_v30  ;;  %v4057_v30 = vmul.f32 %v14219_v31, %v14219_v31  ;;  %v14458_v31 = vld [vmem:[#allocation5 + $0x108] sm:$0xff] }
0x14e9   :  { %vm3983_vm11 = vcmp.lt.f32.partialorder %v14394_v40, %v14147_v52 }
0x14ea   :  { %v3984_v46 = vsel %vm3983_vm11, 1.0, %v16302_v56 }
0x14eb   :  { %v14402_v20 = vmul.f32 %v3984_v46, %v14155_v45 }
0x1501   :  { %v4129_v48 = vpop.f32.mrf.mxu1 }
0x1502   :  { %v4135_v10 = vmul.f32 %v4134_v60, %v4129_v48  ;;  %v3986_v48 = vsub.f32 0.0, %v14304_v44  ;;  %v14464_v44 = vld [vmem:[#allocation5 + $0x100] sm:$0xff] }
0x1503   :  { %v9706_v39 = vpop.f32.mrf.mxu1 }
0x1504   :  { %v4136_v7 = vmul.f32 %v4135_v10, %v14402_v20  ;;  %v4058_v39 = vsub.f32 1.0, %v4057_v30  ;;  %v16327_v30 = vld [vmem:[#allocation15_spill] sm:$0xff] }
0x1506   :  { %v14406_v23 = vadd.f32 %v4136_v7, %v14159_v26  ;;  %v16326_v7 = vld [vmem:[#allocation28_spill] sm:$0xff] }
0x1508   :  { %10815 = vtanh.f32 %v14406_v23 }
0x1515   :  { %v14411_v52 = vpop.eup %10815 }
0x1516   :  { %9775 = vmatmul.mubr.f32.vlgmr.msra.gmra.mxu1 %v14411_v52 }
0x1517   :  { %9813 = vmatpush3.msra.mxu1 %v14167_v32  ;;  %9844 = vmatprep.mubr.msk.f32.mxu1 %vm11369_vm0, %v13942_v24 }
0x1518   :  { %9814 = vmatprep.subr.mxu1 %v13942_v24 }
0x1519   :  { %v4053_v10 = vpop.f32.mrf.mxu0  ;;  %9815 = vmatpush3.msra.mxu1 %v14174_v28 }
0x151a   :  { %v4059_v60 = vmul.f32 %v4058_v39, %v4053_v10  ;;  %9816 = vmatprep.subr.mxu1 %v13942_v24  ;;  %v16328_v39 = vld [vmem:[#allocation30_spill] sm:$0xff] }
0x151b   :  { %v9671_v3 = vpop.f32.mrf.mxu0  ;;  %9817 = vmatpush3.msra.mxu1 %v14178_v1  ;;  %v16329_v10 = vld [vmem:[#allocation18_spill] sm:$0xff] }
0x151c   :  { %v4060_v46 = vadd.f32 %v4059_v60, %v3986_v48  ;;  %9818 = vmatprep.subr.mxu1 %v13942_v24  ;;  %v16330_v48 = vld [vmem:[#allocation29_spill] sm:$0xff]  ;;  %v16331_v60 = vld [vmem:[#allocation26_spill] sm:$0xff] }
0x151d   :  { %9819 = vmatpush3.msra.mxu1 %v14183_v25 }
0x151e   :  { %v4061_v45 = vmul.f32 %v4060_v46, %v14402_v20  ;;  %9820 = vmatprep.subr.mxu1 %v13942_v24  ;;  %v14500_v46 = vld [vmem:[%s15924_s3 + $0x2] ss:$0 sm:$0xff] }
0x151f   :  { %9821 = vmatpush3.msra.mxu1 %v14190_v41 }
0x1520   :  { %v14428_v26 = vadd.f32 %v4061_v45, %v14187_v17  ;;  %9822 = vmatprep.subr.mxu1 %v13942_v24  ;;  %v14452_v17 = vld [vmem:[#allocation5 + $0x110] sm:$0xff] }
0x1521   :  { %9823 = vmatpush3.msra.mxu1 %v14195_v38 }
0x1522   :  { %10817 = vtanh.f32 %v14428_v26  ;;  %9824 = vmatprep.subr.mxu1 %v13942_v24 }
0x1523   :  { %9825 = vmatpush3.msra.mxu1 %v14199_v33 }
0x1524   :  { %9826 = vmatprep.subr.mxu1 %v13942_v24 }
0x1525   :  { %9827 = vmatpush3.msra.mxu1 %v14203_v9 }
0x1526   :  { %9828 = vmatprep.subr.mxu1 %v13942_v24 }
0x1527   :  { %9829 = vmatpush3.msra.mxu1 %v14207_v50 }
0x1528   :  { %9830 = vmatprep.subr.mxu1 %v13942_v24 }
0x1529   :  { %9831 = vmatpush3.msra.mxu1 %v14211_v36 }
0x152a   :  { %9832 = vmatprep.subr.mxu1 %v13942_v24 }
0x152b   :  { %9833 = vmatpush3.msra.mxu1 %v14215_v34 }
0x152c   :  { %9834 = vmatprep.subr.mxu1 %v13942_v24 }
0x152d   :  { %9835 = vmatpush3.msra.mxu1 %v14221_v29 }
0x152e   :  { %9836 = vmatprep.subr.mxu1 %v13942_v24 }
0x152f   :  { %v14446_v22 = vpop.eup %10817  ;;  %9837 = vmatpush3.msra.mxu1 %v14229_v62 }
0x1530   :  { %9740 = vmatmul.mubr.f32.vlgmr.msra.gmra.mxu0 %v14446_v22  ;;  %9838 = vmatprep.subr.mxu1 %v13942_v24 }
0x1531   :  { %9778 = vmatpush3.msra.mxu0 %v14226_v37  ;;  %9839 = vmatpush3.msra.mxu1 %v14452_v17 }
0x1532   :  { %9779 = vmatprep.subr.mxu0 %v13942_v24  ;;  %9840 = vmatprep.subr.mxu1 %v13942_v24 }
0x1533   :  { %9780 = vmatpush3.msra.mxu0 %v14234_v6  ;;  %9841 = vmatpush3.msra.mxu1 %v14458_v31 }
0x1534   :  { %9781 = vmatprep.subr.mxu0 %v13942_v24  ;;  %9842 = vmatprep.subr.mxu1 %v13942_v24 }
0x1535   :  { %9782 = vmatpush3.msra.mxu0 %v14240_v13  ;;  %9843 = vmatpush3.msra.mxu1 %v14464_v44 }
0x1536   :  { %9783 = vmatprep.subr.mxu0 %v13942_v24  ;;  %9809 = vmatprep.mubr.msk.f32.mxu0 %vm11369_vm0, %v13942_v24 }
0x1537   :  { %9784 = vmatpush3.msra.mxu0 %v14246_v0  ;;  %9882 = vmatprep.subr.mxu1 %v13942_v24 }
0x1538   :  { %9785 = vmatprep.subr.mxu0 %v13942_v24 }
0x1539   :  { %9786 = vmatpush3.msra.mxu0 %v14253_v61 }
0x153a   :  { %9787 = vmatprep.subr.mxu0 %v13942_v24 }
0x153b   :  { %9788 = vmatpush3.msra.mxu0 %v14258_v57 }
0x153c   :  { %9789 = vmatprep.subr.mxu0 %v13942_v24 }
0x153d   :  { %9790 = vmatpush3.msra.mxu0 %v14262_v27 }
0x153e   :  { %9791 = vmatprep.subr.mxu0 %v13942_v24 }
0x153f   :  { %9792 = vmatpush3.msra.mxu0 %v14266_v4 }
0x1540   :  { %9793 = vmatprep.subr.mxu0 %v13942_v24 }
0x1541   :  { %9794 = vmatpush3.msra.mxu0 %v16325_v5 }
0x1542   :  { %9795 = vmatprep.subr.mxu0 %v13942_v24 }
0x1543   :  { %9796 = vmatpush3.msra.mxu0 %v16326_v7 }
0x1544   :  { %9797 = vmatprep.subr.mxu0 %v13942_v24 }
0x1545   :  { %9798 = vmatpush3.msra.mxu0 %v16327_v30 }
0x1546   :  { %9799 = vmatprep.subr.mxu0 %v13942_v24 }
0x1547   :  { %9800 = vmatpush3.msra.mxu0 %v16328_v39 }
0x1548   :  { %9801 = vmatprep.subr.mxu0 %v13942_v24 }
0x1549   :  { %9802 = vmatpush3.msra.mxu0 %v16329_v10 }
0x154a   :  { %9803 = vmatprep.subr.mxu0 %v13942_v24 }
0x154b   :  { %9804 = vmatpush3.msra.mxu0 %v16330_v48 }
0x154c   :  { %9805 = vmatprep.subr.mxu0 %v13942_v24 }
0x154d   :  { %9806 = vmatpush3.msra.mxu0 %v16331_v60 }
0x154e   :  { %9807 = vmatprep.subr.mxu0 %v13942_v24 }
0x154f   :  { %9808 = vmatpush3.msra.mxu0 %v14298_v63 }
0x1550   :  { %9847 = vmatprep.subr.mxu0 %v13942_v24 }
0x15d6   :  { %v4282_v3 = vpop.f32.mrf.mxu1 }
0x15d7   :  { %v4283_v45 = vadd.f32 %v14500_v46, %v4282_v3  ;;  %v16344_v3 = vld [vmem:[#allocation31_spill] sm:$0xff] }
0x15d8   :  { %v9776_v10 = vpop.f32.mrf.mxu1 }
0x15d9   :  { %v14504_v48 = vsub.f32 %v14428_v26, %v4283_v45 }
0x15db   :  { %9845 = vmatmul.mubr.f32.vlgmr.msra.gmra.mxu1 %v14504_v48  ;;  %v4287_v60 = vmul.f32 %v14504_v48, %v14504_v48 }
0x15dc   :  { %9883 = vmatpush3.msra.mxu1 %v14021_v53  ;;  %9914 = vmatprep.mubr.msk.f32.mxu1 %vm11369_vm0, %v13942_v24  ;;  %v16332_v53 = vld [vmem:[#allocation32_spill] sm:$0xff] }
0x15dd   :  { %4288 = vadd.xlane.f32.xlu1 %v4287_v60  ;;  %9884 = vmatprep.subr.mxu1 %v13942_v24  ;;  %v16343_v60 = vld [vmem:[#allocation25_spill] sm:$0xff] }
0x15de   :  { %9885 = vmatpush3.msra.mxu1 %v14027_v49  ;;  %v16333_v49 = vld [vmem:[#allocation16_spill] sm:$0xff] }
0x15df   :  { %9886 = vmatprep.subr.mxu1 %v13942_v24 }
0x15e0   :  { %9887 = vmatpush3.msra.mxu1 %v14031_v8  ;;  %v16334_v8 = vld [vmem:[#allocation33_spill] sm:$0xff] }
0x15e1   :  { %9888 = vmatprep.subr.mxu1 %v13942_v24 }
0x15e2   :  { %9889 = vmatpush3.msra.mxu1 %v14035_v59 }
0x15e3   :  { %9890 = vmatprep.subr.mxu1 %v13942_v24 }
0x15e4   :  { %9891 = vmatpush3.msra.mxu1 %v14039_v12 }
0x15e5   :  { %9892 = vmatprep.subr.mxu1 %v13942_v24 }
0x15e6   :  { %9893 = vmatpush3.msra.mxu1 %v14043_v58 }
0x15e7   :  { %9894 = vmatprep.subr.mxu1 %v13942_v24 }
0x15e8   :  { %9895 = vmatpush3.msra.mxu1 %v14047_v14 }
0x15e9   :  { %9896 = vmatprep.subr.mxu1 %v13942_v24 }
0x15ea   :  { %9897 = vmatpush3.msra.mxu1 %v16332_v53 }
0x15eb   :  { %9898 = vmatprep.subr.mxu1 %v13942_v24 }
0x15ec   :  { %9899 = vmatpush3.msra.mxu1 %v16333_v49 }
0x15ed   :  { %9900 = vmatprep.subr.mxu1 %v13942_v24 }
0x15ee   :  { %9901 = vmatpush3.msra.mxu1 %v16334_v8 }
0x15ef   :  { %9902 = vmatprep.subr.mxu1 %v13942_v24 }
0x15f0   :  { %v4205_v59 = vpop.f32.mrf.mxu0  ;;  %9903 = vmatpush3.msra.mxu1 %v14065_v21  ;;  %v16335_v21 = vld [vmem:[#allocation17_spill] sm:$0xff] }
0x15f1   :  { %v4206_v12 = vadd.f32 %v14333_v19, %v4205_v59  ;;  %9904 = vmatprep.subr.mxu1 %v13942_v24 }
0x15f2   :  { %v9741_v58 = vpop.f32.mrf.mxu0  ;;  %9905 = vmatpush3.msra.mxu1 %v14069_v43  ;;  %v16336_v43 = vld [vmem:[#allocation21_spill] sm:$0xff] }
0x15f3   :  { %v4209_v14 = vsub.f32 %v14338_v18, %v4206_v12  ;;  %9906 = vmatprep.subr.mxu1 %v13942_v24  ;;  %v4442_v12 = vmul.f32 %v14411_v52, %v14411_v52  ;;  %v4366_v52 = vmul.f32 %v14446_v22, %v14446_v22 }
0x15f4   :  { %9907 = vmatpush3.msra.mxu1 %v14344_v2 }
0x15f5   :  { %9810 = vmatmul.mubr.f32.vlgmr.msra.gmra.mxu0 %v4209_v14  ;;  %v4210_v10 = vmul.f32 %v4209_v14, %v4209_v14  ;;  %9908 = vmatprep.subr.mxu1 %v13942_v24  ;;  %v4443_v14 = vsub.f32 1.0, %v4442_v12  ;;  %v14795_v12 = vld [vmem:[#allocation7 + $0x98] sm:$0xff] }
0x15f6   :  { %9909 = vmatpush3.msra.mxu1 %v14349_v54  ;;  %9848 = vmatpush3.msra.mxu0 %v14072_v42  ;;  %v16337_v42 = vld [vmem:[#allocation19_spill] sm:$0xff]  ;;  %16356 = vst [vmem:[#allocation21_spill] sm:$0xff] %v14795_v12 }
0x15f7   :  { %4211 = vadd.xlane.f32.xlu0 %v4210_v10  ;;  %9910 = vmatprep.subr.mxu1 %v13942_v24 }
0x15f8   :  { %9911 = vmatpush3.msra.mxu1 %v14355_v35  ;;  %9849 = vmatprep.subr.mxu0 %v13942_v24 }
0x15f9   :  { %9912 = vmatprep.subr.mxu1 %v13942_v24  ;;  %9850 = vmatpush3.msra.mxu0 %v14079_v51  ;;  %v16338_v51 = vld [vmem:[#allocation23_spill] sm:$0xff] }
0x15fa   :  { %9913 = vmatpush3.msra.mxu1 %v14361_v47  ;;  %9851 = vmatprep.subr.mxu0 %v13942_v24 }
0x15fb   :  { %9852 = vmatpush3.msra.mxu0 %v14085_v16  ;;  %9879 = vmatprep.mubr.msk.f32.mxu0 %vm11369_vm0, %v13942_v24  ;;  %v16339_v16 = vld [vmem:[#allocation20_spill] sm:$0xff] }
0x15fc   :  { %9853 = vmatprep.subr.mxu0 %v13942_v24  ;;  %9952 = vmatprep.subr.mxu1 %v13942_v24 }
0x15fd   :  { %9854 = vmatpush3.msra.mxu0 %v14091_v15  ;;  %v16340_v15 = vld [vmem:[#allocation34_spill] sm:$0xff] }
0x15fe   :  { %9855 = vmatprep.subr.mxu0 %v13942_v24 }
0x15ff   :  { %9856 = vmatpush3.msra.mxu0 %v14096_v11  ;;  %v16341_v11 = vld [vmem:[#allocation24_spill] sm:$0xff] }
0x1600   :  { %9857 = vmatprep.subr.mxu0 %v13942_v24 }
0x1601   :  { %9858 = vmatpush3.msra.mxu0 %v14103_v55  ;;  %v16342_v55 = vld [vmem:[#allocation22_spill] sm:$0xff] }
0x1602   :  { %9859 = vmatprep.subr.mxu0 %v13942_v24 }
0x1603   :  { %9860 = vmatpush3.msra.mxu0 %v16335_v21 }
0x1604   :  { %9861 = vmatprep.subr.mxu0 %v13942_v24 }
0x1605   :  { %9862 = vmatpush3.msra.mxu0 %v16336_v43 }
0x1606   :  { %9863 = vmatprep.subr.mxu0 %v13942_v24 }
0x1607   :  { %9864 = vmatpush3.msra.mxu0 %v16337_v42 }
0x1608   :  { %9865 = vmatprep.subr.mxu0 %v13942_v24 }
0x1609   :  { %9866 = vmatpush3.msra.mxu0 %v16338_v51 }
0x160a   :  { %9867 = vmatprep.subr.mxu0 %v13942_v24 }
0x160b   :  { %9868 = vmatpush3.msra.mxu0 %v16339_v16 }
0x160c   :  { %9869 = vmatprep.subr.mxu0 %v13942_v24 }
0x160d   :  { %9870 = vmatpush3.msra.mxu0 %v16340_v15  ;;  %v4295_v15 = vsub.f32 0.0, %v14504_v48 }
0x160e   :  { %9871 = vmatprep.subr.mxu0 %v13942_v24 }
0x160f   :  { %9872 = vmatpush3.msra.mxu0 %v16341_v11 }
0x1610   :  { %9873 = vmatprep.subr.mxu0 %v13942_v24 }
0x1611   :  { %9874 = vmatpush3.msra.mxu0 %v16342_v55 }
0x1612   :  { %9875 = vmatprep.subr.mxu0 %v13942_v24 }
0x1613   :  { %9876 = vmatpush3.msra.mxu0 %v16343_v60  ;;  %v14742_v60 = vld [vmem:[#allocation7 + $0xf8] sm:$0xff] }
0x1614   :  { %9877 = vmatprep.subr.mxu0 %v13942_v24 }
0x1615   :  { %9878 = vmatpush3.msra.mxu0 %v16344_v3  ;;  %v14775_v3 = vld [vmem:[#allocation7 + $0xc0] sm:$0xff] }
0x1616   :  { %9917 = vmatprep.subr.mxu0 %v13942_v24 }
0x1666   :  { %v4289_v53 = vpop.xlane.xlu1 %4288 }
0x1667   :  { %v4290_v8 = vmul.f32 0.5, %v4289_v53  ;;  %v14783_v53 = vld [vmem:[#allocation7 + $0xb0] sm:$0xff] }
0x1668   :  { %16353 = vst [vmem:[#allocation16_spill] sm:$0xff] %v14783_v53 }
0x1680   :  { %v4212_v45 = vpop.xlane.xlu0 %4211 }
0x1681   :  { %v4213_v49 = vmul.f32 0.5, %v4212_v45  ;;  %v14779_v45 = vld [vmem:[#allocation7 + $0xb8] sm:$0xff] }
0x1682   :  { %16352 = vst [vmem:[#allocation32_spill] sm:$0xff] %v14779_v45 }
0x1683   :  { %v14579_v59 = vadd.f32 %v4290_v8, %v4213_v49  ;;  %v14787_v49 = vld [vmem:[#allocation7 + $0xa8] sm:$0xff]  ;;  %v14791_v8 = vld [vmem:[#allocation7 + $0xa0] sm:$0xff] }
0x1684   :  { %16354 = vst [vmem:[#allocation33_spill] sm:$0xff] %v14787_v49  ;;  %16355 = vst [vmem:[#allocation17_spill] sm:$0xff] %v14791_v8 }
0x1685   :  { %vm4292_vm12 = vcmp.lt.f32.partialorder %v14579_v59, %v14394_v40 }
0x1686   :  { %v4293_v58 = vsel %vm4292_vm12, 1.0, %v16302_v56 }
0x1687   :  { %v14587_v21 = vmul.f32 %v4293_v58, %v14402_v20  ;;  %v14600_v20 = vld [vmem:[#allocation9 + $0x10] sm:$0xff]  ;;  %v14799_v58 = vld [vmem:[#allocation7 + $0x90] sm:$0xff] }
0x1688   :  { %16357 = vst [vmem:[#allocation19_spill] sm:$0xff] %v14799_v58 }
0x169b   :  { %v4438_v10 = vpop.f32.mrf.mxu1 }
0x169c   :  { %v4444_v24 = vmul.f32 %v4443_v14, %v4438_v10  ;;  %v14803_v14 = vld [vmem:[#allocation7 + $0x88] sm:$0xff]  ;;  %v14807_v10 = vld [vmem:[#allocation7 + $0x80] sm:$0xff] }
0x169d   :  { %v9846_v43 = vpop.f32.mrf.mxu1  ;;  %16358 = vst [vmem:[#allocation23_spill] sm:$0xff] %v14803_v14  ;;  %16359 = vst [vmem:[#allocation20_spill] sm:$0xff] %v14807_v10 }
0x169e   :  { %v4445_v42 = vmul.f32 %v4444_v24, %v14587_v21 }
0x16a0   :  { %v14591_v51 = vadd.f32 %v4445_v42, %v14406_v23  ;;  %v4367_v23 = vsub.f32 1.0, %v4366_v52 }
0x16a2   :  { %10819 = vtanh.f32 %v14591_v51 }
0x16af   :  { %v14594_v40 = vpop.eup %10819 }
0x16b0   :  { %9915 = vmatmul.mubr.f32.vlgmr.msra.gmra.mxu1 %v14594_v40 }
0x16b1   :  { %9953 = vmatpush3.msra.mxu1 %v14167_v32  ;;  %9984 = vmatprep.mubr.msk.f32.mxu1 %vm11369_vm0, %v14600_v20 }
0x16b2   :  { %9954 = vmatprep.subr.mxu1 %v14600_v20 }
0x16b3   :  { %9955 = vmatpush3.msra.mxu1 %v14174_v28 }
0x16b4   :  { %9956 = vmatprep.subr.mxu1 %v14600_v20 }
0x16b5   :  { %v4362_v16 = vpop.f32.mrf.mxu0  ;;  %9957 = vmatpush3.msra.mxu1 %v14178_v1 }
0x16b6   :  { %v4368_v22 = vmul.f32 %v4367_v23, %v4362_v16  ;;  %9958 = vmatprep.subr.mxu1 %v14600_v20  ;;  %v4751_v16 = vmul.f32 %v14594_v40, %v14594_v40  ;;  %v14829_v40 = vld [vmem:[#allocation5 + $0x178] sm:$0xff] }
0x16b7   :  { %v9811_v32 = vpop.f32.mrf.mxu0  ;;  %9959 = vmatpush3.msra.mxu1 %v14183_v25 }
0x16b8   :  { %v4369_v11 = vadd.f32 %v4368_v22, %v4295_v15  ;;  %9960 = vmatprep.subr.mxu1 %v14600_v20  ;;  %v4752_v22 = vsub.f32 1.0, %v4751_v16  ;;  %v14875_v16 = vld [vmem:[#allocation5 + $0x130] sm:$0xff] }
0x16b9   :  { %9961 = vmatpush3.msra.mxu1 %v14190_v41  ;;  %v16345_v41 = vld [vmem:[#allocation18_spill] sm:$0xff] }
0x16ba   :  { %v4370_v28 = vmul.f32 %v4369_v11, %v14587_v21  ;;  %9962 = vmatprep.subr.mxu1 %v14600_v20 }
0x16bb   :  { %9963 = vmatpush3.msra.mxu1 %v14195_v38  ;;  %v16346_v38 = vld [vmem:[#allocation29_spill] sm:$0xff] }
0x16bc   :  { %v14617_v1 = vadd.f32 %v4370_v28, %v14428_v26  ;;  %9964 = vmatprep.subr.mxu1 %v14600_v20  ;;  %v14727_v26 = vld [vmem:[#allocation7 + $0x128] sm:$0xff] }
0x16bd   :  { %9965 = vmatpush3.msra.mxu1 %v14199_v33  ;;  %v16347_v33 = vld [vmem:[#allocation26_spill] sm:$0xff]  ;;  %16350 = vst [vmem:[#allocation15_spill] sm:$0xff] %v14727_v26 }
0x16be   :  { %10821 = vtanh.f32 %v14617_v1  ;;  %9966 = vmatprep.subr.mxu1 %v14600_v20 }
0x16bf   :  { %9967 = vmatpush3.msra.mxu1 %v14203_v9 }
0x16c0   :  { %9968 = vmatprep.subr.mxu1 %v14600_v20 }
0x16c1   :  { %9969 = vmatpush3.msra.mxu1 %v14207_v50 }
0x16c2   :  { %9970 = vmatprep.subr.mxu1 %v14600_v20 }
0x16c3   :  { %9971 = vmatpush3.msra.mxu1 %v14211_v36 }
0x16c4   :  { %9972 = vmatprep.subr.mxu1 %v14600_v20 }
0x16c5   :  { %9973 = vmatpush3.msra.mxu1 %v14215_v34 }
0x16c6   :  { %9974 = vmatprep.subr.mxu1 %v14600_v20 }
0x16c7   :  { %9975 = vmatpush3.msra.mxu1 %v14221_v29 }
0x16c8   :  { %9976 = vmatprep.subr.mxu1 %v14600_v20 }
0x16c9   :  { %9977 = vmatpush3.msra.mxu1 %v14229_v62  ;;  %v14691_v62 = vld [vmem:[#allocation7 + $0x170] sm:$0xff] }
0x16ca   :  { %9978 = vmatprep.subr.mxu1 %v14600_v20 }
0x16cb   :  { %v14635_v25 = vpop.eup %10821  ;;  %9979 = vmatpush3.msra.mxu1 %v14452_v17 }
0x16cc   :  { %9880 = vmatmul.mubr.f32.vlgmr.msra.gmra.mxu0 %v14635_v25  ;;  %9980 = vmatprep.subr.mxu1 %v14600_v20 }
0x16cd   :  { %9918 = vmatpush3.msra.mxu0 %v14226_v37  ;;  %9981 = vmatpush3.msra.mxu1 %v14458_v31  ;;  %v14685_v37 = vld [vmem:[#allocation7 + $0x178] sm:$0xff] }
0x16ce   :  { %9919 = vmatprep.subr.mxu0 %v14600_v20  ;;  %9982 = vmatprep.subr.mxu1 %v14600_v20 }
0x16cf   :  { %9920 = vmatpush3.msra.mxu0 %v14234_v6  ;;  %9983 = vmatpush3.msra.mxu1 %v14464_v44  ;;  %v14695_v6 = vld [vmem:[#allocation7 + $0x168] sm:$0xff] }
0x16d0   :  { %9921 = vmatprep.subr.mxu0 %v14600_v20  ;;  %9949 = vmatprep.mubr.msk.f32.mxu0 %vm11369_vm0, %v14600_v20 }
0x16d1   :  { %9922 = vmatpush3.msra.mxu0 %v14240_v13  ;;  %10022 = vmatprep.subr.mxu1 %v14600_v20  ;;  %v14699_v13 = vld [vmem:[#allocation7 + $0x160] sm:$0xff] }
0x16d2   :  { %9923 = vmatprep.subr.mxu0 %v14600_v20 }
0x16d3   :  { %9924 = vmatpush3.msra.mxu0 %v14246_v0  ;;  %v14703_v0 = vld [vmem:[#allocation7 + $0x158] sm:$0xff] }
0x16d4   :  { %9925 = vmatprep.subr.mxu0 %v14600_v20 }
0x16d5   :  { %9926 = vmatpush3.msra.mxu0 %v14253_v61  ;;  %v14707_v61 = vld [vmem:[#allocation7 + $0x150] sm:$0xff] }
0x16d6   :  { %9927 = vmatprep.subr.mxu0 %v14600_v20 }
0x16d7   :  { %9928 = vmatpush3.msra.mxu0 %v14258_v57  ;;  %v14711_v57 = vld [vmem:[#allocation7 + $0x148] sm:$0xff] }
0x16d8   :  { %9929 = vmatprep.subr.mxu0 %v14600_v20 }
0x16d9   :  { %9930 = vmatpush3.msra.mxu0 %v14262_v27  ;;  %v14715_v27 = vld [vmem:[#allocation7 + $0x140] sm:$0xff] }
0x16da   :  { %9931 = vmatprep.subr.mxu0 %v14600_v20 }
0x16db   :  { %9932 = vmatpush3.msra.mxu0 %v14266_v4  ;;  %v14719_v4 = vld [vmem:[#allocation7 + $0x138] sm:$0xff] }
0x16dc   :  { %9933 = vmatprep.subr.mxu0 %v14600_v20  ;;  %16348 = vst [vmem:[#allocation27_spill] sm:$0xff] %v14719_v4 }
0x16dd   :  { %9934 = vmatpush3.msra.mxu0 %v16325_v5 }
0x16de   :  { %9935 = vmatprep.subr.mxu0 %v14600_v20 }
0x16df   :  { %9936 = vmatpush3.msra.mxu0 %v16326_v7  ;;  %v14731_v7 = vld [vmem:[#allocation7 + $0x120] sm:$0xff] }
0x16e0   :  { %9937 = vmatprep.subr.mxu0 %v14600_v20  ;;  %16351 = vst [vmem:[#allocation30_spill] sm:$0xff] %v14731_v7 }
0x16e1   :  { %9938 = vmatpush3.msra.mxu0 %v16327_v30 }
0x16e2   :  { %9939 = vmatprep.subr.mxu0 %v14600_v20 }
0x16e3   :  { %9940 = vmatpush3.msra.mxu0 %v16328_v39 }
0x16e4   :  { %9941 = vmatprep.subr.mxu0 %v14600_v20 }
0x16e5   :  { %9942 = vmatpush3.msra.mxu0 %v16345_v41 }
0x16e6   :  { %9943 = vmatprep.subr.mxu0 %v14600_v20 }
0x16e7   :  { %9944 = vmatpush3.msra.mxu0 %v16346_v38 }
0x16e8   :  { %9945 = vmatprep.subr.mxu0 %v14600_v20 }
0x16e9   :  { %9946 = vmatpush3.msra.mxu0 %v16347_v33 }
0x16ea   :  { %9947 = vmatprep.subr.mxu0 %v14600_v20 }
0x16eb   :  { %9948 = vmatpush3.msra.mxu0 %v14298_v63  ;;  %v14723_v63 = vld [vmem:[#allocation7 + $0x130] sm:$0xff] }
0x16ec   :  { %9987 = vmatprep.subr.mxu0 %v14600_v20  ;;  %16349 = vst [vmem:[#allocation28_spill] sm:$0xff] %v14723_v63 }
0x1770   :  { %v4591_v9 = vpop.f32.mrf.mxu1 }
0x1771   :  { %v4592_v50 = vadd.f32 %v14500_v46, %v4591_v9  ;;  %v14841_v9 = vld [vmem:[#allocation5 + $0x168] sm:$0xff] }
0x1772   :  { %v9916_v36 = vpop.f32.mrf.mxu1 }
0x1773   :  { %v14680_v34 = vsub.f32 %v14617_v1, %v4592_v50 }
0x1775   :  { %9985 = vmatmul.mubr.f32.vlgmr.msra.gmra.mxu1 %v14680_v34  ;;  %v4596_v29 = vmul.f32 %v14680_v34, %v14680_v34 }
0x1776   :  { %10023 = vmatpush3.msra.mxu1 %v14685_v37  ;;  %10054 = vmatprep.mubr.msk.f32.mxu1 %vm11369_vm0, %v14600_v20 }
0x1777   :  { %4597 = vadd.xlane.f32.xlu1 %v4596_v29  ;;  %10024 = vmatprep.subr.mxu1 %v14600_v20  ;;  %v14845_v29 = vld [vmem:[#allocation5 + $0x160] sm:$0xff] }
0x1778   :  { %10025 = vmatpush3.msra.mxu1 %v14691_v62 }
0x1779   :  { %10026 = vmatprep.subr.mxu1 %v14600_v20 }
0x177a   :  { %10027 = vmatpush3.msra.mxu1 %v14695_v6 }
0x177b   :  { %10028 = vmatprep.subr.mxu1 %v14600_v20 }
0x177c   :  { %10029 = vmatpush3.msra.mxu1 %v14699_v13 }
0x177d   :  { %10030 = vmatprep.subr.mxu1 %v14600_v20 }
0x177e   :  { %10031 = vmatpush3.msra.mxu1 %v14703_v0 }
0x177f   :  { %10032 = vmatprep.subr.mxu1 %v14600_v20 }
0x1780   :  { %10033 = vmatpush3.msra.mxu1 %v14707_v61 }
0x1781   :  { %10034 = vmatprep.subr.mxu1 %v14600_v20 }
0x1782   :  { %10035 = vmatpush3.msra.mxu1 %v14711_v57 }
0x1783   :  { %10036 = vmatprep.subr.mxu1 %v14600_v20 }
0x1784   :  { %10037 = vmatpush3.msra.mxu1 %v14715_v27 }
0x1785   :  { %10038 = vmatprep.subr.mxu1 %v14600_v20 }
0x1786   :  { %10039 = vmatpush3.msra.mxu1 %v14719_v4 }
0x1787   :  { %10040 = vmatprep.subr.mxu1 %v14600_v20 }
0x1788   :  { %10041 = vmatpush3.msra.mxu1 %v14723_v63 }
0x1789   :  { %10042 = vmatprep.subr.mxu1 %v14600_v20 }
0x178a   :  { %10043 = vmatpush3.msra.mxu1 %v14727_v26 }
0x178b   :  { %10044 = vmatprep.subr.mxu1 %v14600_v20 }
0x178c   :  { %v4514_v5 = vpop.f32.mrf.mxu0  ;;  %10045 = vmatpush3.msra.mxu1 %v14731_v7 }
0x178d   :  { %v4515_v30 = vadd.f32 %v14333_v19, %v4514_v5  ;;  %10046 = vmatprep.subr.mxu1 %v14600_v20  ;;  %v14755_v19 = vld [vmem:[#allocation7 + $0xe8] sm:$0xff] }
0x178e   :  { %v9881_v39 = vpop.f32.mrf.mxu0  ;;  %10047 = vmatpush3.msra.mxu1 %v14344_v2  ;;  %v14748_v2 = vld [vmem:[#allocation7 + $0xf0] sm:$0xff] }
0x178f   :  { %v4518_v48 = vsub.f32 %v14338_v18, %v4515_v30  ;;  %10048 = vmatprep.subr.mxu1 %v14600_v20  ;;  %v14759_v18 = vld [vmem:[#allocation7 + $0xe0] sm:$0xff]  ;;  %v14850_v39 = vld [vmem:[#allocation5 + $0x158] sm:$0xff] }
0x1790   :  { %10049 = vmatpush3.msra.mxu1 %v14349_v54  ;;  %v14763_v54 = vld [vmem:[#allocation7 + $0xd8] sm:$0xff] }
0x1791   :  { %9950 = vmatmul.mubr.f32.vlgmr.msra.gmra.mxu0 %v4518_v48  ;;  %v4519_v55 = vmul.f32 %v4518_v48, %v4518_v48  ;;  %10050 = vmatprep.subr.mxu1 %v14600_v20 }
0x1792   :  { %10051 = vmatpush3.msra.mxu1 %v14355_v35  ;;  %9988 = vmatpush3.msra.mxu0 %v14742_v60  ;;  %v14767_v35 = vld [vmem:[#allocation7 + $0xd0] sm:$0xff] }
0x1793   :  { %4520 = vadd.xlane.f32.xlu0 %v4519_v55  ;;  %10052 = vmatprep.subr.mxu1 %v14600_v20  ;;  %v14854_v55 = vld [vmem:[#allocation5 + $0x150] sm:$0xff] }
0x1794   :  { %10053 = vmatpush3.msra.mxu1 %v14361_v47  ;;  %9989 = vmatprep.subr.mxu0 %v14600_v20  ;;  %v14771_v47 = vld [vmem:[#allocation7 + $0xc8] sm:$0xff] }
0x1795   :  { %9990 = vmatpush3.msra.mxu0 %v14748_v2  ;;  %10019 = vmatprep.mubr.msk.f32.mxu0 %vm11369_vm0, %v14600_v20 }
0x1796   :  { %9991 = vmatprep.subr.mxu0 %v14600_v20  ;;  %10092 = vmatprep.subr.mxu1 %v14600_v20 }
0x1797   :  { %9992 = vmatpush3.msra.mxu0 %v14755_v19 }
0x1798   :  { %9993 = vmatprep.subr.mxu0 %v14600_v20 }
0x1799   :  { %9994 = vmatpush3.msra.mxu0 %v14759_v18 }
0x179a   :  { %9995 = vmatprep.subr.mxu0 %v14600_v20 }
0x179b   :  { %9996 = vmatpush3.msra.mxu0 %v14763_v54 }
0x179c   :  { %9997 = vmatprep.subr.mxu0 %v14600_v20 }
0x179d   :  { %9998 = vmatpush3.msra.mxu0 %v14767_v35 }
0x179e   :  { %9999 = vmatprep.subr.mxu0 %v14600_v20 }
0x179f   :  { %10000 = vmatpush3.msra.mxu0 %v14771_v47 }
0x17a0   :  { %10001 = vmatprep.subr.mxu0 %v14600_v20 }
0x17a1   :  { %10002 = vmatpush3.msra.mxu0 %v14775_v3 }
0x17a2   :  { %10003 = vmatprep.subr.mxu0 %v14600_v20 }
0x17a3   :  { %10004 = vmatpush3.msra.mxu0 %v14779_v45 }
0x17a4   :  { %10005 = vmatprep.subr.mxu0 %v14600_v20 }
0x17a5   :  { %10006 = vmatpush3.msra.mxu0 %v14783_v53 }
0x17a6   :  { %10007 = vmatprep.subr.mxu0 %v14600_v20 }
0x17a7   :  { %10008 = vmatpush3.msra.mxu0 %v14787_v49 }
0x17a8   :  { %10009 = vmatprep.subr.mxu0 %v14600_v20 }
0x17a9   :  { %10010 = vmatpush3.msra.mxu0 %v14791_v8 }
0x17aa   :  { %10011 = vmatprep.subr.mxu0 %v14600_v20 }
0x17ab   :  { %10012 = vmatpush3.msra.mxu0 %v14795_v12 }
0x17ac   :  { %10013 = vmatprep.subr.mxu0 %v14600_v20 }
0x17ad   :  { %10014 = vmatpush3.msra.mxu0 %v14799_v58 }
0x17ae   :  { %10015 = vmatprep.subr.mxu0 %v14600_v20 }
0x17af   :  { %10016 = vmatpush3.msra.mxu0 %v14803_v14 }
0x17b0   :  { %10017 = vmatprep.subr.mxu0 %v14600_v20 }
0x17b1   :  { %10018 = vmatpush3.msra.mxu0 %v14807_v10 }
0x17b2   :  { %10057 = vmatprep.subr.mxu0 %v14600_v20 }
0x1800   :  { %v4598_v43 = vpop.xlane.xlu1 %4597 }
0x1801   :  { %v4599_v52 = vmul.f32 0.5, %v4598_v43 }
0x181c   :  { %v4521_v24 = vpop.xlane.xlu0 %4520 }
0x181d   :  { %v4522_v42 = vmul.f32 0.5, %v4521_v24 }
0x181f   :  { %v14811_v23 = vadd.f32 %v4599_v52, %v4522_v42  ;;  %v14866_v42 = vld [vmem:[#allocation5 + $0x140] sm:$0xff]  ;;  %v14871_v52 = vld [vmem:[#allocation5 + $0x138] sm:$0xff] }
0x1821   :  { %vm4601_vm13 = vcmp.lt.f32.partialorder %v14811_v23, %v14579_v59 }
0x1822   :  { %v4602_v15 = vsel %vm4601_vm13, 1.0, %v16302_v56 }
0x1823   :  { %v14819_v11 = vmul.f32 %v4602_v15, %v14587_v21  ;;  %v4675_v21 = vmul.f32 %v14635_v25, %v14635_v25  ;;  %v4604_v25 = vsub.f32 0.0, %v14680_v34  ;;  %v14859_v34 = vld [vmem:[#allocation5 + $0x148] sm:$0xff]  ;;  %v14883_v15 = vld [vmem:[#allocation5 + $0x120] sm:$0xff] }
0x1825   :  { %v4676_v50 = vsub.f32 1.0, %v4675_v21  ;;  %v14926_v21 = vld [vmem:[#allocation5 + $0xc8] sm:$0xff] }
0x1835   :  { %v4747_v32 = vpop.f32.mrf.mxu1 }
0x1836   :  { %v4753_v28 = vmul.f32 %v4752_v22, %v4747_v32  ;;  %v14887_v22 = vld [vmem:[#allocation5 + $0x118] sm:$0xff] }
0x1837   :  { %v9986_v41 = vpop.f32.mrf.mxu1 }
0x1838   :  { %v4754_v38 = vmul.f32 %v4753_v28, %v14819_v11  ;;  %v14898_v28 = vld [vmem:[#allocation5 + $0xf8] sm:$0xff] }
0x1839   :  { %v14918_v41 = vld [vmem:[#allocation5 + $0xd8] sm:$0xff] }
0x183a   :  { %v14823_v33 = vadd.f32 %v4754_v38, %v14591_v51  ;;  %v14837_v51 = vld [vmem:[#allocation5 + $0x170] sm:$0xff] }
0x183b   :  { %v14922_v38 = vld [vmem:[#allocation5 + $0xd0] sm:$0xff] }
0x183c   :  { %10823 = vtanh.f32 %v14823_v33 }
0x1849   :  { %v14826_v59 = vpop.eup %10823 }
0x184a   :  { %10055 = vmatmul.mubr.f32.vlgmr.msra.gmra.mxu1 %v14826_v59 }
0x184b   :  { %10093 = vmatpush3.msra.mxu1 %v14829_v40  ;;  %10124 = vmatprep.mubr.msk.f32.mxu1 %vm11369_vm0, %v14600_v20 }
0x184c   :  { %10094 = vmatprep.subr.mxu1 %v14600_v20 }
0x184d   :  { %10095 = vmatpush3.msra.mxu1 %v14837_v51 }
0x184e   :  { %10096 = vmatprep.subr.mxu1 %v14600_v20 }
0x184f   :  { %10097 = vmatpush3.msra.mxu1 %v14841_v9 }
0x1850   :  { %10098 = vmatprep.subr.mxu1 %v14600_v20 }
0x1851   :  { %v4671_v36 = vpop.f32.mrf.mxu0  ;;  %10099 = vmatpush3.msra.mxu1 %v14845_v29 }
0x1852   :  { %v4677_v5 = vmul.f32 %v4676_v50, %v4671_v36  ;;  %10100 = vmatprep.subr.mxu1 %v14600_v20  ;;  %v14930_v50 = vld [vmem:[#allocation5 + $0xc0] sm:$0xff]  ;;  %v14934_v36 = vld [vmem:[#allocation5 + $0xb8] sm:$0xff] }
0x1853   :  { %v9951_v30 = vpop.f32.mrf.mxu0  ;;  %10101 = vmatpush3.msra.mxu1 %v14850_v39  ;;  %16360 = vst [vmem:[#allocation34_spill] sm:$0xff] %v14934_v36 }
0x1854   :  { %v4678_v48 = vadd.f32 %v4677_v5, %v4604_v25  ;;  %10102 = vmatprep.subr.mxu1 %v14600_v20  ;;  %v14938_v25 = vld [vmem:[#allocation5 + $0xb0] sm:$0xff]  ;;  %v14942_v5 = vld [vmem:[#allocation5 + $0xa8] sm:$0xff]  ;;  %v14946_v30 = vld [vmem:[#allocation5 + $0xa0] sm:$0xff] }
0x1855   :  { %10103 = vmatpush3.msra.mxu1 %v14854_v55  ;;  %16361 = vst [vmem:[#allocation24_spill] sm:$0xff] %v14938_v25  ;;  %16362 = vst [vmem:[#allocation22_spill] sm:$0xff] %v14942_v5 }
0x1856   :  { %v4679_v24 = vmul.f32 %v4678_v48, %v14819_v11  ;;  %10104 = vmatprep.subr.mxu1 %v14600_v20  ;;  %16363 = vst [vmem:[#allocation25_spill] sm:$0xff] %v14946_v30  ;;  %v14950_v48 = vld [vmem:[#allocation5 + $0x98] sm:$0xff] }
0x1857   :  { %10105 = vmatpush3.msra.mxu1 %v14859_v34  ;;  %16364 = vst [vmem:[#allocation31_spill] sm:$0xff] %v14950_v48 }
0x1858   :  { %v14863_v43 = vadd.f32 %v4679_v24, %v14617_v1  ;;  %10106 = vmatprep.subr.mxu1 %v14600_v20  ;;  %v14879_v1 = vld [vmem:[#allocation5 + $0x128] sm:$0xff]  ;;  %v14954_v24 = vld [vmem:[#allocation5 + $0x90] sm:$0xff] }
0x1859   :  { %10107 = vmatpush3.msra.mxu1 %v14866_v42  ;;  %16365 = vst [vmem:[#allocation18_spill] sm:$0xff] %v14954_v24 }
0x185a   :  { %10825 = vtanh.f32 %v14863_v43  ;;  %10108 = vmatprep.subr.mxu1 %v14600_v20 }
0x185b   :  { %10109 = vmatpush3.msra.mxu1 %v14871_v52 }
0x185c   :  { %10110 = vmatprep.subr.mxu1 %v14600_v20 }
0x185d   :  { %10111 = vmatpush3.msra.mxu1 %v14875_v16 }
0x185e   :  { %10112 = vmatprep.subr.mxu1 %v14600_v20 }
0x185f   :  { %10113 = vmatpush3.msra.mxu1 %v14879_v1 }
0x1860   :  { %10114 = vmatprep.subr.mxu1 %v14600_v20 }
0x1861   :  { %10115 = vmatpush3.msra.mxu1 %v14883_v15 }
0x1862   :  { %10116 = vmatprep.subr.mxu1 %v14600_v20 }
0x1863   :  { %10117 = vmatpush3.msra.mxu1 %v14887_v22 }
0x1864   :  { %10118 = vmatprep.subr.mxu1 %v14600_v20 }
0x1865   :  { %10119 = vmatpush3.msra.mxu1 %v14452_v17  ;;  %v14905_v17 = vld [vmem:[#allocation5 + $0xf0] sm:$0xff] }
0x1866   :  { %10120 = vmatprep.subr.mxu1 %v14600_v20 }
0x1867   :  { %v14893_v32 = vpop.eup %10825  ;;  %10121 = vmatpush3.msra.mxu1 %v14458_v31  ;;  %v14910_v31 = vld [vmem:[#allocation5 + $0xe8] sm:$0xff] }
0x1868   :  { %10020 = vmatmul.mubr.f32.vlgmr.msra.gmra.mxu0 %v14893_v32  ;;  %10122 = vmatprep.subr.mxu1 %v14600_v20 }
0x1869   :  { %10058 = vmatpush3.msra.mxu0 %v14898_v28  ;;  %10123 = vmatpush3.msra.mxu1 %v14464_v44  ;;  %v14914_v44 = vld [vmem:[#allocation5 + $0xe0] sm:$0xff] }
0x186a   :  { %10059 = vmatprep.subr.mxu0 %v14600_v20  ;;  %10089 = vmatprep.mubr.msk.f32.mxu0 %vm11369_vm0, %v14600_v20 }
0x186b   :  { %10060 = vmatpush3.msra.mxu0 %v14905_v17  ;;  %10162 = vmatprep.subr.mxu1 %v14600_v20 }
0x186c   :  { %10061 = vmatprep.subr.mxu0 %v14600_v20 }
0x186d   :  { %10062 = vmatpush3.msra.mxu0 %v14910_v31 }
0x186e   :  { %10063 = vmatprep.subr.mxu0 %v14600_v20 }
0x186f   :  { %10064 = vmatpush3.msra.mxu0 %v14914_v44 }
0x1870   :  { %10065 = vmatprep.subr.mxu0 %v14600_v20 }
0x1871   :  { %10066 = vmatpush3.msra.mxu0 %v14918_v41 }
0x1872   :  { %10067 = vmatprep.subr.mxu0 %v14600_v20 }
0x1873   :  { %10068 = vmatpush3.msra.mxu0 %v14922_v38 }
0x1874   :  { %10069 = vmatprep.subr.mxu0 %v14600_v20 }
0x1875   :  { %10070 = vmatpush3.msra.mxu0 %v14926_v21 }
0x1876   :  { %10071 = vmatprep.subr.mxu0 %v14600_v20 }
0x1877   :  { %10072 = vmatpush3.msra.mxu0 %v14930_v50 }
0x1878   :  { %10073 = vmatprep.subr.mxu0 %v14600_v20 }
0x1879   :  { %10074 = vmatpush3.msra.mxu0 %v14934_v36 }
0x187a   :  { %10075 = vmatprep.subr.mxu0 %v14600_v20 }
0x187b   :  { %10076 = vmatpush3.msra.mxu0 %v14938_v25 }
0x187c   :  { %10077 = vmatprep.subr.mxu0 %v14600_v20 }
0x187d   :  { %10078 = vmatpush3.msra.mxu0 %v14942_v5  ;;  %v14958_v5 = vld [vmem:[#allocation5 + $0x88] sm:$0xff] }
0x187e   :  { %10079 = vmatprep.subr.mxu0 %v14600_v20  ;;  %16366 = vst [vmem:[#allocation29_spill] sm:$0xff] %v14958_v5 }
0x187f   :  { %10080 = vmatpush3.msra.mxu0 %v14946_v30  ;;  %v14962_v30 = vld [vmem:[#allocation5 + $0x80] sm:$0xff] }
0x1880   :  { %10081 = vmatprep.subr.mxu0 %v14600_v20 }
0x1881   :  { %10082 = vmatpush3.msra.mxu0 %v14950_v48 }
0x1882   :  { %10083 = vmatprep.subr.mxu0 %v14600_v20 }
0x1883   :  { %10084 = vmatpush3.msra.mxu0 %v14954_v24 }
0x1884   :  { %10085 = vmatprep.subr.mxu0 %v14600_v20 }
0x1885   :  { %10086 = vmatpush3.msra.mxu0 %v14958_v5 }
0x1886   :  { %10087 = vmatprep.subr.mxu0 %v14600_v20 }
0x1887   :  { %10088 = vmatpush3.msra.mxu0 %v14962_v30 }
0x1888   :  { %10127 = vmatprep.subr.mxu0 %v14600_v20 }
0x190a   :  { %v4900_v48 = vpop.f32.mrf.mxu1 }
0x190b   :  { %v4901_v25 = vadd.f32 %v14500_v46, %v4900_v48 }
0x190c   :  { %v10056_v36 = vpop.f32.mrf.mxu1 }
0x190d   :  { %v14968_v24 = vsub.f32 %v14863_v43, %v4901_v25  ;;  %v14999_v36 = vld [vmem:[#allocation7 + $0x118] sm:$0xff] }
0x190e   :  { %16367 = vst [vmem:[#allocation26_spill] sm:$0xff] %v14999_v36  ;;  %v15005_v25 = vld [vmem:[%s15924_s3 + $0x1] ss:$0 sm:$0xff] }
0x190f   :  { %10125 = vmatmul.mubr.f32.vlgmr.msra.gmra.mxu1 %v14968_v24  ;;  %v4905_v5 = vmul.f32 %v14968_v24, %v14968_v24 }
0x1910   :  { %10163 = vmatpush3.msra.mxu1 %v14685_v37  ;;  %10194 = vmatprep.mubr.msk.f32.mxu1 %vm11369_vm0, %v14600_v20 }
0x1911   :  { %4906 = vadd.xlane.f32.xlu1 %v4905_v5  ;;  %10164 = vmatprep.subr.mxu1 %v14600_v20 }
0x1912   :  { %10165 = vmatpush3.msra.mxu1 %v14691_v62 }
0x1913   :  { %10166 = vmatprep.subr.mxu1 %v14600_v20 }
0x1914   :  { %10167 = vmatpush3.msra.mxu1 %v14695_v6 }
0x1915   :  { %10168 = vmatprep.subr.mxu1 %v14600_v20 }
0x1916   :  { %10169 = vmatpush3.msra.mxu1 %v14699_v13 }
0x1917   :  { %10170 = vmatprep.subr.mxu1 %v14600_v20 }
0x1918   :  { %10171 = vmatpush3.msra.mxu1 %v14703_v0 }
0x1919   :  { %10172 = vmatprep.subr.mxu1 %v14600_v20 }
0x191a   :  { %10173 = vmatpush3.msra.mxu1 %v14707_v61 }
0x191b   :  { %10174 = vmatprep.subr.mxu1 %v14600_v20 }
0x191c   :  { %10175 = vmatpush3.msra.mxu1 %v14711_v57 }
0x191d   :  { %10176 = vmatprep.subr.mxu1 %v14600_v20 }
0x191e   :  { %10177 = vmatpush3.msra.mxu1 %v14715_v27 }
0x191f   :  { %10178 = vmatprep.subr.mxu1 %v14600_v20 }
0x1920   :  { %10179 = vmatpush3.msra.mxu1 %v14719_v4 }
0x1921   :  { %10180 = vmatprep.subr.mxu1 %v14600_v20 }
0x1922   :  { %10181 = vmatpush3.msra.mxu1 %v14723_v63 }
0x1923   :  { %10182 = vmatprep.subr.mxu1 %v14600_v20 }
0x1924   :  { %10183 = vmatpush3.msra.mxu1 %v14727_v26  ;;  %v15009_v26 = vld [vmem:[#allocation7 + $0x110] sm:$0xff] }
0x1925   :  { %10184 = vmatprep.subr.mxu1 %v14600_v20 }
0x1926   :  { %10185 = vmatpush3.msra.mxu1 %v14731_v7  ;;  %v15012_v7 = vld [vmem:[#allocation8] sm:$0xff] }
0x1927   :  { %10186 = vmatprep.subr.mxu1 %v14600_v20 }
0x1928   :  { %v4823_v46 = vpop.f32.mrf.mxu0  ;;  %10187 = vmatpush3.msra.mxu1 %v14999_v36  ;;  %v15016_v36 = vld [vmem:[#allocation7 + $0x108] sm:$0xff] }
0x1929   :  { %v4824_v5 = vadd.f32 %v15005_v25, %v4823_v46  ;;  %10188 = vmatprep.subr.mxu1 %v14600_v20  ;;  %v15020_v46 = vld [vmem:[#allocation7 + $0x100] sm:$0xff] }
0x192a   :  { %v10021_v48 = vpop.f32.mrf.mxu0  ;;  %10189 = vmatpush3.msra.mxu1 %v15009_v26 }
0x192b   :  { %v4827_v63 = vsub.f32 %v15012_v7, %v4824_v5  ;;  %10190 = vmatprep.subr.mxu1 %v14600_v20 }
0x192c   :  { %10191 = vmatpush3.msra.mxu1 %v15016_v36 }
0x192d   :  { %10090 = vmatmul.mubr.f32.vlgmr.msra.gmra.mxu0 %v4827_v63  ;;  %v4828_v4 = vmul.f32 %v4827_v63, %v4827_v63  ;;  %10192 = vmatprep.subr.mxu1 %v14600_v20 }
0x192e   :  { %10193 = vmatpush3.msra.mxu1 %v15020_v46  ;;  %10128 = vmatpush3.msra.mxu0 %v14742_v60 }
0x192f   :  { %4829 = vadd.xlane.f32.xlu0 %v4828_v4  ;;  %10129 = vmatprep.subr.mxu0 %v14600_v20 }
0x1930   :  { %10130 = vmatpush3.msra.mxu0 %v14748_v2  ;;  %10159 = vmatprep.mubr.msk.f32.mxu0 %vm11369_vm0, %v14600_v20 }
0x1931   :  { %10131 = vmatprep.subr.mxu0 %v14600_v20  ;;  %10232 = vmatprep.subr.mxu1 %v14600_v20 }
0x1932   :  { %10132 = vmatpush3.msra.mxu0 %v14755_v19 }
0x1933   :  { %10133 = vmatprep.subr.mxu0 %v14600_v20 }
0x1934   :  { %10134 = vmatpush3.msra.mxu0 %v14759_v18 }
0x1935   :  { %10135 = vmatprep.subr.mxu0 %v14600_v20 }
0x1936   :  { %10136 = vmatpush3.msra.mxu0 %v14763_v54 }
0x1937   :  { %10137 = vmatprep.subr.mxu0 %v14600_v20 }
0x1938   :  { %10138 = vmatpush3.msra.mxu0 %v14767_v35 }
0x1939   :  { %10139 = vmatprep.subr.mxu0 %v14600_v20 }
0x193a   :  { %10140 = vmatpush3.msra.mxu0 %v14771_v47 }
0x193b   :  { %10141 = vmatprep.subr.mxu0 %v14600_v20 }
0x193c   :  { %10142 = vmatpush3.msra.mxu0 %v14775_v3 }
0x193d   :  { %10143 = vmatprep.subr.mxu0 %v14600_v20 }
0x193e   :  { %10144 = vmatpush3.msra.mxu0 %v14779_v45 }
0x193f   :  { %10145 = vmatprep.subr.mxu0 %v14600_v20 }
0x1940   :  { %10146 = vmatpush3.msra.mxu0 %v14783_v53 }
0x1941   :  { %10147 = vmatprep.subr.mxu0 %v14600_v20 }
0x1942   :  { %10148 = vmatpush3.msra.mxu0 %v14787_v49 }
0x1943   :  { %10149 = vmatprep.subr.mxu0 %v14600_v20 }
0x1944   :  { %10150 = vmatpush3.msra.mxu0 %v14791_v8 }
0x1945   :  { %10151 = vmatprep.subr.mxu0 %v14600_v20 }
0x1946   :  { %10152 = vmatpush3.msra.mxu0 %v14795_v12 }
0x1947   :  { %10153 = vmatprep.subr.mxu0 %v14600_v20 }
0x1948   :  { %10154 = vmatpush3.msra.mxu0 %v14799_v58  ;;  %v5060_v58 = vmul.f32 %v14826_v59, %v14826_v59 }
0x1949   :  { %10155 = vmatprep.subr.mxu0 %v14600_v20 }
0x194a   :  { %10156 = vmatpush3.msra.mxu0 %v14803_v14  ;;  %v5061_v12 = vsub.f32 1.0, %v5060_v58 }
0x194b   :  { %10157 = vmatprep.subr.mxu0 %v14600_v20 }
0x194c   :  { %10158 = vmatpush3.msra.mxu0 %v14807_v10 }
0x194d   :  { %10197 = vmatprep.subr.mxu0 %v14600_v20 }
0x199a   :  { %v4907_v63 = vpop.xlane.xlu1 %4906 }
0x199b   :  { %v4908_v48 = vmul.f32 0.5, %v4907_v63 }
0x19b8   :  { %v4830_v4 = vpop.xlane.xlu0 %4829 }
0x19b9   :  { %v4831_v5 = vmul.f32 0.5, %v4830_v4 }
0x19bb   :  { %v15058_v8 = vadd.f32 %v4908_v48, %v4831_v5  ;;  %v15122_v5 = vld [vmem:[#allocation5 + $0x100] sm:$0xff]  ;;  %v16368_v48 = vld [vmem:[#allocation34_spill] sm:$0xff] }
0x19bd   :  { %vm4910_vm14 = vcmp.lt.f32.partialorder %v15058_v8, %v14811_v23 }
0x19be   :  { %v4911_v14 = vsel %vm4910_vm14, 1.0, %v16302_v56 }
0x19bf   :  { %v15066_v10 = vmul.f32 %v4911_v14, %v14819_v11 }
0x19cf   :  { %v5056_v49 = vpop.f32.mrf.mxu1 }
0x19d0   :  { %v5062_v53 = vmul.f32 %v5061_v12, %v5056_v49  ;;  %v4913_v12 = vsub.f32 0.0, %v14968_v24 }
0x19d1   :  { %v10126_v45 = vpop.f32.mrf.mxu1 }
0x19d2   :  { %v5063_v4 = vmul.f32 %v5062_v53, %v15066_v10  ;;  %v4984_v45 = vmul.f32 %v14893_v32, %v14893_v32  ;;  %v15116_v32 = vld [vmem:[#allocation5 + $0x108] sm:$0xff] }
0x19d4   :  { %v15070_v63 = vadd.f32 %v5063_v4, %v14823_v33  ;;  %v4985_v53 = vsub.f32 1.0, %v4984_v45  ;;  %v16369_v4 = vld [vmem:[#allocation24_spill] sm:$0xff]  ;;  %v16370_v45 = vld [vmem:[#allocation22_spill] sm:$0xff] }
0x19d6   :  { %10827 = vtanh.f32 %v15070_v63 }
0x19e3   :  { %v15073_v23 = vpop.eup %10827 }
0x19e4   :  { %10195 = vmatmul.mubr.f32.vlgmr.msra.gmra.mxu1 %v15073_v23 }
0x19e5   :  { %10233 = vmatpush3.msra.mxu1 %v14829_v40  ;;  %10264 = vmatprep.mubr.msk.f32.mxu1 %vm11369_vm0, %v14600_v20 }
0x19e6   :  { %10234 = vmatprep.subr.mxu1 %v14600_v20 }
0x19e7   :  { %10235 = vmatpush3.msra.mxu1 %v14837_v51 }
0x19e8   :  { %10236 = vmatprep.subr.mxu1 %v14600_v20 }
0x19e9   :  { %10237 = vmatpush3.msra.mxu1 %v14841_v9 }
0x19ea   :  { %10238 = vmatprep.subr.mxu1 %v14600_v20 }
0x19eb   :  { %10239 = vmatpush3.msra.mxu1 %v14845_v29 }
0x19ec   :  { %10240 = vmatprep.subr.mxu1 %v14600_v20 }
0x19ed   :  { %v4980_v49 = vpop.f32.mrf.mxu0  ;;  %10241 = vmatpush3.msra.mxu1 %v14850_v39 }
0x19ee   :  { %v4986_v58 = vmul.f32 %v4985_v53, %v4980_v49  ;;  %10242 = vmatprep.subr.mxu1 %v14600_v20  ;;  %v16371_v53 = vld [vmem:[#allocation25_spill] sm:$0xff]  ;;  %v16372_v49 = vld [vmem:[#allocation31_spill] sm:$0xff] }
0x19ef   :  { %v10091_v14 = vpop.f32.mrf.mxu0  ;;  %10243 = vmatpush3.msra.mxu1 %v14854_v55 }
0x19f0   :  { %v4987_v11 = vadd.f32 %v4986_v58, %v4913_v12  ;;  %10244 = vmatprep.subr.mxu1 %v14600_v20  ;;  %v16373_v12 = vld [vmem:[#allocation18_spill] sm:$0xff]  ;;  %v16374_v58 = vld [vmem:[#allocation29_spill] sm:$0xff] }
0x19f1   :  { %10245 = vmatpush3.msra.mxu1 %v14859_v34 }
0x19f2   :  { %v4988_v33 = vmul.f32 %v4987_v11, %v15066_v10  ;;  %10246 = vmatprep.subr.mxu1 %v14600_v20  ;;  %v15164_v11 = vld [vmem:[%s15924_s3 + $0x2] ss:$0 sm:$0xff] }
0x19f3   :  { %10247 = vmatpush3.msra.mxu1 %v14866_v42 }
0x19f4   :  { %v15098_v59 = vadd.f32 %v4988_v33, %v14863_v43  ;;  %10248 = vmatprep.subr.mxu1 %v14600_v20  ;;  %v15112_v43 = vld [vmem:[#allocation5 + $0x110] sm:$0xff] }
0x19f5   :  { %10249 = vmatpush3.msra.mxu1 %v14871_v52 }
0x19f6   :  { %10829 = vtanh.f32 %v15098_v59  ;;  %10250 = vmatprep.subr.mxu1 %v14600_v20 }
0x19f7   :  { %10251 = vmatpush3.msra.mxu1 %v14875_v16 }
0x19f8   :  { %10252 = vmatprep.subr.mxu1 %v14600_v20 }
0x19f9   :  { %10253 = vmatpush3.msra.mxu1 %v14879_v1 }
0x19fa   :  { %10254 = vmatprep.subr.mxu1 %v14600_v20 }
0x19fb   :  { %10255 = vmatpush3.msra.mxu1 %v14883_v15 }
0x19fc   :  { %10256 = vmatprep.subr.mxu1 %v14600_v20 }
0x19fd   :  { %10257 = vmatpush3.msra.mxu1 %v14887_v22 }
0x19fe   :  { %10258 = vmatprep.subr.mxu1 %v14600_v20 }
0x19ff   :  { %10259 = vmatpush3.msra.mxu1 %v15112_v43 }
0x1a00   :  { %10260 = vmatprep.subr.mxu1 %v14600_v20 }
0x1a01   :  { %10261 = vmatpush3.msra.mxu1 %v15116_v32 }
0x1a02   :  { %10262 = vmatprep.subr.mxu1 %v14600_v20 }
0x1a03   :  { %v15120_v24 = vpop.eup %10829  ;;  %10263 = vmatpush3.msra.mxu1 %v15122_v5 }
0x1a04   :  { %10160 = vmatmul.mubr.f32.vlgmr.msra.gmra.mxu0 %v15120_v24  ;;  %10302 = vmatprep.subr.mxu1 %v14600_v20 }
0x1a05   :  { %10198 = vmatpush3.msra.mxu0 %v14898_v28  ;;  %10229 = vmatprep.mubr.msk.f32.mxu0 %vm11369_vm0, %v14600_v20 }
0x1a06   :  { %10199 = vmatprep.subr.mxu0 %v14600_v20 }
0x1a07   :  { %10200 = vmatpush3.msra.mxu0 %v14905_v17 }
0x1a08   :  { %10201 = vmatprep.subr.mxu0 %v14600_v20 }
0x1a09   :  { %10202 = vmatpush3.msra.mxu0 %v14910_v31 }
0x1a0a   :  { %10203 = vmatprep.subr.mxu0 %v14600_v20 }
0x1a0b   :  { %10204 = vmatpush3.msra.mxu0 %v14914_v44 }
0x1a0c   :  { %10205 = vmatprep.subr.mxu0 %v14600_v20 }
0x1a0d   :  { %10206 = vmatpush3.msra.mxu0 %v14918_v41 }
0x1a0e   :  { %10207 = vmatprep.subr.mxu0 %v14600_v20 }
0x1a0f   :  { %10208 = vmatpush3.msra.mxu0 %v14922_v38 }
0x1a10   :  { %10209 = vmatprep.subr.mxu0 %v14600_v20 }
0x1a11   :  { %10210 = vmatpush3.msra.mxu0 %v14926_v21 }
0x1a12   :  { %10211 = vmatprep.subr.mxu0 %v14600_v20 }
0x1a13   :  { %10212 = vmatpush3.msra.mxu0 %v14930_v50 }
0x1a14   :  { %10213 = vmatprep.subr.mxu0 %v14600_v20 }
0x1a15   :  { %10214 = vmatpush3.msra.mxu0 %v16368_v48 }
0x1a16   :  { %10215 = vmatprep.subr.mxu0 %v14600_v20 }
0x1a17   :  { %10216 = vmatpush3.msra.mxu0 %v16369_v4 }
0x1a18   :  { %10217 = vmatprep.subr.mxu0 %v14600_v20 }
0x1a19   :  { %10218 = vmatpush3.msra.mxu0 %v16370_v45 }
0x1a1a   :  { %10219 = vmatprep.subr.mxu0 %v14600_v20 }
0x1a1b   :  { %10220 = vmatpush3.msra.mxu0 %v16371_v53 }
0x1a1c   :  { %10221 = vmatprep.subr.mxu0 %v14600_v20 }
0x1a1d   :  { %10222 = vmatpush3.msra.mxu0 %v16372_v49 }
0x1a1e   :  { %10223 = vmatprep.subr.mxu0 %v14600_v20 }
0x1a1f   :  { %10224 = vmatpush3.msra.mxu0 %v16373_v12 }
0x1a20   :  { %10225 = vmatprep.subr.mxu0 %v14600_v20 }
0x1a21   :  { %10226 = vmatpush3.msra.mxu0 %v16374_v58 }
0x1a22   :  { %10227 = vmatprep.subr.mxu0 %v14600_v20 }
0x1a23   :  { %10228 = vmatpush3.msra.mxu0 %v14962_v30 }
0x1a24   :  { %10267 = vmatprep.subr.mxu0 %v14600_v20 }
0x1aa4   :  { %v5209_v14 = vpop.f32.mrf.mxu1 }
0x1aa5   :  { %v5210_v33 = vadd.f32 %v15164_v11, %v5209_v14 }
0x1aa6   :  { %v10196_v49 = vpop.f32.mrf.mxu1 }
0x1aa7   :  { %v15168_v12 = vsub.f32 %v15098_v59, %v5210_v33 }
0x1aa9   :  { %10265 = vmatmul.mubr.f32.vlgmr.msra.gmra.mxu1 %v15168_v12  ;;  %v5214_v58 = vmul.f32 %v15168_v12, %v15168_v12 }
0x1aaa   :  { %10303 = vmatpush3.msra.mxu1 %v14685_v37  ;;  %10334 = vmatprep.mubr.msk.f32.mxu1 %vm11369_vm0, %v14600_v20  ;;  %v16375_v37 = vld [vmem:[#allocation27_spill] sm:$0xff] }
0x1aab   :  { %5215 = vadd.xlane.f32.xlu1 %v5214_v58  ;;  %10304 = vmatprep.subr.mxu1 %v14600_v20 }
0x1aac   :  { %10305 = vmatpush3.msra.mxu1 %v14691_v62  ;;  %v16376_v62 = vld [vmem:[#allocation28_spill] sm:$0xff] }
0x1aad   :  { %10306 = vmatprep.subr.mxu1 %v14600_v20 }
0x1aae   :  { %10307 = vmatpush3.msra.mxu1 %v14695_v6  ;;  %v16377_v6 = vld [vmem:[#allocation15_spill] sm:$0xff] }
0x1aaf   :  { %10308 = vmatprep.subr.mxu1 %v14600_v20 }
0x1ab0   :  { %10309 = vmatpush3.msra.mxu1 %v14699_v13  ;;  %v16378_v13 = vld [vmem:[#allocation30_spill] sm:$0xff] }
0x1ab1   :  { %10310 = vmatprep.subr.mxu1 %v14600_v20 }
0x1ab2   :  { %10311 = vmatpush3.msra.mxu1 %v14703_v0  ;;  %v16379_v0 = vld [vmem:[#allocation26_spill] sm:$0xff] }
0x1ab3   :  { %10312 = vmatprep.subr.mxu1 %v14600_v20 }
0x1ab4   :  { %10313 = vmatpush3.msra.mxu1 %v14707_v61 }
0x1ab5   :  { %10314 = vmatprep.subr.mxu1 %v14600_v20 }
0x1ab6   :  { %10315 = vmatpush3.msra.mxu1 %v14711_v57 }
0x1ab7   :  { %10316 = vmatprep.subr.mxu1 %v14600_v20 }
0x1ab8   :  { %10317 = vmatpush3.msra.mxu1 %v14715_v27 }
0x1ab9   :  { %10318 = vmatprep.subr.mxu1 %v14600_v20 }
0x1aba   :  { %10319 = vmatpush3.msra.mxu1 %v16375_v37 }
0x1abb   :  { %10320 = vmatprep.subr.mxu1 %v14600_v20 }
0x1abc   :  { %10321 = vmatpush3.msra.mxu1 %v16376_v62 }
0x1abd   :  { %10322 = vmatprep.subr.mxu1 %v14600_v20 }
0x1abe   :  { %10323 = vmatpush3.msra.mxu1 %v16377_v6 }
0x1abf   :  { %10324 = vmatprep.subr.mxu1 %v14600_v20 }
0x1ac0   :  { %10325 = vmatpush3.msra.mxu1 %v16378_v13  ;;  %v5369_v13 = vmul.f32 %v15073_v23, %v15073_v23  ;;  %v15262_v23 = vld [vmem:[#allocation9 + $0x10] sm:$0xff] }
0x1ac1   :  { %10326 = vmatprep.subr.mxu1 %v14600_v20 }
0x1ac2   :  { %10327 = vmatpush3.msra.mxu1 %v16379_v0 }
0x1ac3   :  { %10328 = vmatprep.subr.mxu1 %v14600_v20 }
0x1ac4   :  { %v5132_v61 = vpop.f32.mrf.mxu0  ;;  %10329 = vmatpush3.msra.mxu1 %v15009_v26 }
0x1ac5   :  { %v5133_v57 = vadd.f32 %v15005_v25, %v5132_v61  ;;  %10330 = vmatprep.subr.mxu1 %v14600_v20 }
0x1ac6   :  { %v10161_v27 = vpop.f32.mrf.mxu0  ;;  %10331 = vmatpush3.msra.mxu1 %v15016_v36 }
0x1ac7   :  { %v5136_v49 = vsub.f32 %v15012_v7, %v5133_v57  ;;  %10332 = vmatprep.subr.mxu1 %v14600_v20  ;;  %v5370_v57 = vsub.f32 1.0, %v5369_v13  ;;  %v15459_v13 = vld [vmem:[#allocation7 + $0x98] sm:$0xff] }
0x1ac8   :  { %10333 = vmatpush3.msra.mxu1 %v15020_v46  ;;  %16397 = vst [vmem:[#allocation15_spill] sm:$0xff] %v15459_v13 }
0x1ac9   :  { %10230 = vmatmul.mubr.f32.vlgmr.msra.gmra.mxu0 %v5136_v49  ;;  %v5137_v58 = vmul.f32 %v5136_v49, %v5136_v49  ;;  %10372 = vmatprep.subr.mxu1 %v14600_v20 }
0x1aca   :  { %10268 = vmatpush3.msra.mxu0 %v14742_v60  ;;  %10299 = vmatprep.mubr.msk.f32.mxu0 %vm11369_vm0, %v14600_v20  ;;  %v16380_v60 = vld [vmem:[#allocation32_spill] sm:$0xff] }
0x1acb   :  { %5138 = vadd.xlane.f32.xlu0 %v5137_v58  ;;  %10269 = vmatprep.subr.mxu0 %v14600_v20 }
0x1acc   :  { %10270 = vmatpush3.msra.mxu0 %v14748_v2  ;;  %v16381_v2 = vld [vmem:[#allocation16_spill] sm:$0xff] }
0x1acd   :  { %10271 = vmatprep.subr.mxu0 %v14600_v20 }
0x1ace   :  { %10272 = vmatpush3.msra.mxu0 %v14755_v19  ;;  %v16382_v19 = vld [vmem:[#allocation33_spill] sm:$0xff] }
0x1acf   :  { %10273 = vmatprep.subr.mxu0 %v14600_v20 }
0x1ad0   :  { %10274 = vmatpush3.msra.mxu0 %v14759_v18  ;;  %v16383_v18 = vld [vmem:[#allocation17_spill] sm:$0xff] }
0x1ad1   :  { %10275 = vmatprep.subr.mxu0 %v14600_v20 }
0x1ad2   :  { %10276 = vmatpush3.msra.mxu0 %v14763_v54  ;;  %v16384_v54 = vld [vmem:[#allocation21_spill] sm:$0xff] }
0x1ad3   :  { %10277 = vmatprep.subr.mxu0 %v14600_v20 }
0x1ad4   :  { %10278 = vmatpush3.msra.mxu0 %v14767_v35  ;;  %v16385_v35 = vld [vmem:[#allocation19_spill] sm:$0xff] }
0x1ad5   :  { %10279 = vmatprep.subr.mxu0 %v14600_v20 }
0x1ad6   :  { %10280 = vmatpush3.msra.mxu0 %v14771_v47  ;;  %v16386_v47 = vld [vmem:[#allocation23_spill] sm:$0xff] }
0x1ad7   :  { %10281 = vmatprep.subr.mxu0 %v14600_v20 }
0x1ad8   :  { %10282 = vmatpush3.msra.mxu0 %v14775_v3  ;;  %v16387_v3 = vld [vmem:[#allocation20_spill] sm:$0xff] }
0x1ad9   :  { %10283 = vmatprep.subr.mxu0 %v14600_v20 }
0x1ada   :  { %10284 = vmatpush3.msra.mxu0 %v16380_v60 }
0x1adb   :  { %10285 = vmatprep.subr.mxu0 %v14600_v20 }
0x1adc   :  { %10286 = vmatpush3.msra.mxu0 %v16381_v2 }
0x1add   :  { %10287 = vmatprep.subr.mxu0 %v14600_v20 }
0x1ade   :  { %10288 = vmatpush3.msra.mxu0 %v16382_v19 }
0x1adf   :  { %10289 = vmatprep.subr.mxu0 %v14600_v20 }
0x1ae0   :  { %10290 = vmatpush3.msra.mxu0 %v16383_v18 }
0x1ae1   :  { %10291 = vmatprep.subr.mxu0 %v14600_v20 }
0x1ae2   :  { %10292 = vmatpush3.msra.mxu0 %v16384_v54 }
0x1ae3   :  { %10293 = vmatprep.subr.mxu0 %v14600_v20 }
0x1ae4   :  { %10294 = vmatpush3.msra.mxu0 %v16385_v35  ;;  %v15409_v35 = vld [vmem:[#allocation7 + $0xf8] sm:$0xff] }
0x1ae5   :  { %10295 = vmatprep.subr.mxu0 %v14600_v20 }
0x1ae6   :  { %10296 = vmatpush3.msra.mxu0 %v16386_v47  ;;  %v15435_v47 = vld [vmem:[#allocation7 + $0xc8] sm:$0xff] }
0x1ae7   :  { %10297 = vmatprep.subr.mxu0 %v14600_v20 }
0x1ae8   :  { %10298 = vmatpush3.msra.mxu0 %v16387_v3  ;;  %v15439_v3 = vld [vmem:[#allocation7 + $0xc0] sm:$0xff] }
0x1ae9   :  { %10337 = vmatprep.subr.mxu0 %v14600_v20 }
0x1b34   :  { %v5216_v33 = vpop.xlane.xlu1 %5215 }
0x1b35   :  { %v5217_v62 = vmul.f32 0.5, %v5216_v33  ;;  %v15447_v33 = vld [vmem:[#allocation7 + $0xb0] sm:$0xff] }
0x1b36   :  { %16394 = vst [vmem:[#allocation25_spill] sm:$0xff] %v15447_v33 }
0x1b54   :  { %v5139_v14 = vpop.xlane.xlu0 %5138 }
0x1b55   :  { %v5140_v37 = vmul.f32 0.5, %v5139_v14  ;;  %v15443_v14 = vld [vmem:[#allocation7 + $0xb8] sm:$0xff] }
0x1b57   :  { %v15243_v6 = vadd.f32 %v5217_v62, %v5140_v37  ;;  %v15451_v37 = vld [vmem:[#allocation7 + $0xa8] sm:$0xff]  ;;  %v15455_v62 = vld [vmem:[#allocation7 + $0xa0] sm:$0xff] }
0x1b58   :  { %16395 = vst [vmem:[#allocation27_spill] sm:$0xff] %v15451_v37  ;;  %16396 = vst [vmem:[#allocation28_spill] sm:$0xff] %v15455_v62 }
0x1b59   :  { %vm5219_vm15 = vcmp.lt.f32.partialorder %v15243_v6, %v15058_v8 }
0x1b5a   :  { %v5220_v61 = vsel %vm5219_vm15, 1.0, %v16302_v56 }
0x1b5b   :  { %v15251_v49 = vmul.f32 %v5220_v61, %v15066_v10  ;;  %v5293_v10 = vmul.f32 %v15120_v24, %v15120_v24  ;;  %v15463_v61 = vld [vmem:[#allocation7 + $0x90] sm:$0xff] }
0x1b5c   :  { %16398 = vst [vmem:[#allocation30_spill] sm:$0xff] %v15463_v61 }
0x1b69   :  { %v5365_v27 = vpop.f32.mrf.mxu1 }
0x1b6a   :  { %v5371_v20 = vmul.f32 %v5370_v57, %v5365_v27  ;;  %v15467_v57 = vld [vmem:[#allocation7 + $0x88] sm:$0xff]  ;;  %v15471_v27 = vld [vmem:[#allocation7 + $0x80] sm:$0xff] }
0x1b6b   :  { %v10266_v58 = vpop.f32.mrf.mxu1  ;;  %16399 = vst [vmem:[#allocation26_spill] sm:$0xff] %v15467_v57  ;;  %16400 = vst [vmem:[#allocation32_spill] sm:$0xff] %v15471_v27 }
0x1b6c   :  { %v5372_v60 = vmul.f32 %v5371_v20, %v15251_v49 }
0x1b6e   :  { %v15255_v2 = vadd.f32 %v5372_v60, %v15070_v63 }
0x1b70   :  { %10831 = vtanh.f32 %v15255_v2 }
0x1b7d   :  { %v15258_v8 = vpop.eup %10831 }
0x1b7e   :  { %10335 = vmatmul.mubr.f32.vlgmr.msra.gmra.mxu1 %v15258_v8 }
0x1b7f   :  { %10373 = vmatpush3.msra.mxu1 %v14829_v40  ;;  %10404 = vmatprep.mubr.msk.f32.mxu1 %vm11369_vm0, %v15262_v23  ;;  %v5294_v40 = vsub.f32 1.0, %v5293_v10 }
0x1b80   :  { %10374 = vmatprep.subr.mxu1 %v15262_v23 }
0x1b81   :  { %10375 = vmatpush3.msra.mxu1 %v14837_v51  ;;  %v5222_v51 = vsub.f32 0.0, %v15168_v12 }
0x1b82   :  { %10376 = vmatprep.subr.mxu1 %v15262_v23 }
0x1b83   :  { %10377 = vmatpush3.msra.mxu1 %v14841_v9 }
0x1b84   :  { %10378 = vmatprep.subr.mxu1 %v15262_v23 }
0x1b85   :  { %10379 = vmatpush3.msra.mxu1 %v14845_v29 }
0x1b86   :  { %10380 = vmatprep.subr.mxu1 %v15262_v23 }
0x1b87   :  { %10381 = vmatpush3.msra.mxu1 %v14850_v39 }
0x1b88   :  { %10382 = vmatprep.subr.mxu1 %v15262_v23 }
0x1b89   :  { %v5289_v63 = vpop.f32.mrf.mxu0  ;;  %10383 = vmatpush3.msra.mxu1 %v14854_v55 }
0x1b8a   :  { %v5295_v9 = vmul.f32 %v5294_v40, %v5289_v63  ;;  %10384 = vmatprep.subr.mxu1 %v15262_v23  ;;  %v5678_v63 = vmul.f32 %v15258_v8, %v15258_v8  ;;  %v15493_v8 = vld [vmem:[#allocation5 + $0x178] sm:$0xff] }
0x1b8b   :  { %v10231_v24 = vpop.f32.mrf.mxu0  ;;  %10385 = vmatpush3.msra.mxu1 %v14859_v34  ;;  %v16388_v34 = vld [vmem:[#allocation31_spill] sm:$0xff] }
0x1b8c   :  { %v5296_v19 = vadd.f32 %v5295_v9, %v5222_v51  ;;  %10386 = vmatprep.subr.mxu1 %v15262_v23  ;;  %v5679_v9 = vsub.f32 1.0, %v5678_v63 }
0x1b8d   :  { %10387 = vmatpush3.msra.mxu1 %v14866_v42  ;;  %v16389_v42 = vld [vmem:[#allocation18_spill] sm:$0xff] }
0x1b8e   :  { %v5297_v29 = vmul.f32 %v5296_v19, %v15251_v49  ;;  %10388 = vmatprep.subr.mxu1 %v15262_v23 }
0x1b8f   :  { %10389 = vmatpush3.msra.mxu1 %v14871_v52  ;;  %v16390_v52 = vld [vmem:[#allocation29_spill] sm:$0xff] }
0x1b90   :  { %v15287_v39 = vadd.f32 %v5297_v29, %v15098_v59  ;;  %10390 = vmatprep.subr.mxu1 %v15262_v23  ;;  %v15383_v59 = vld [vmem:[#allocation7 + $0x138] sm:$0xff] }
0x1b91   :  { %10391 = vmatpush3.msra.mxu1 %v14875_v16 }
0x1b92   :  { %10833 = vtanh.f32 %v15287_v39  ;;  %10392 = vmatprep.subr.mxu1 %v15262_v23 }
0x1b93   :  { %10393 = vmatpush3.msra.mxu1 %v14879_v1 }
0x1b94   :  { %10394 = vmatprep.subr.mxu1 %v15262_v23 }
0x1b95   :  { %10395 = vmatpush3.msra.mxu1 %v14883_v15 }
0x1b96   :  { %10396 = vmatprep.subr.mxu1 %v15262_v23 }
0x1b97   :  { %10397 = vmatpush3.msra.mxu1 %v14887_v22 }
0x1b98   :  { %10398 = vmatprep.subr.mxu1 %v15262_v23 }
0x1b99   :  { %10399 = vmatpush3.msra.mxu1 %v15112_v43 }
0x1b9a   :  { %10400 = vmatprep.subr.mxu1 %v15262_v23 }
0x1b9b   :  { %10401 = vmatpush3.msra.mxu1 %v15116_v32 }
0x1b9c   :  { %10402 = vmatprep.subr.mxu1 %v15262_v23 }
0x1b9d   :  { %10403 = vmatpush3.msra.mxu1 %v15122_v5 }
0x1b9e   :  { %10442 = vmatprep.subr.mxu1 %v15262_v23 }
0x1b9f   :  { %v15305_v55 = vpop.eup %10833 }
0x1ba0   :  { %10300 = vmatmul.mubr.f32.vlgmr.msra.gmra.mxu0 %v15305_v55 }
0x1ba1   :  { %10338 = vmatpush3.msra.mxu0 %v14898_v28  ;;  %10369 = vmatprep.mubr.msk.f32.mxu0 %vm11369_vm0, %v15262_v23 }
0x1ba2   :  { %10339 = vmatprep.subr.mxu0 %v15262_v23 }
0x1ba3   :  { %10340 = vmatpush3.msra.mxu0 %v14905_v17  ;;  %v15349_v17 = vld [vmem:[#allocation7 + $0x178] sm:$0xff] }
0x1ba4   :  { %10341 = vmatprep.subr.mxu0 %v15262_v23 }
0x1ba5   :  { %10342 = vmatpush3.msra.mxu0 %v14910_v31  ;;  %v15355_v31 = vld [vmem:[#allocation7 + $0x170] sm:$0xff] }
0x1ba6   :  { %10343 = vmatprep.subr.mxu0 %v15262_v23 }
0x1ba7   :  { %10344 = vmatpush3.msra.mxu0 %v14914_v44  ;;  %v15359_v44 = vld [vmem:[#allocation7 + $0x168] sm:$0xff] }
0x1ba8   :  { %10345 = vmatprep.subr.mxu0 %v15262_v23 }
0x1ba9   :  { %10346 = vmatpush3.msra.mxu0 %v14918_v41  ;;  %v15363_v41 = vld [vmem:[#allocation7 + $0x160] sm:$0xff] }
0x1baa   :  { %10347 = vmatprep.subr.mxu0 %v15262_v23 }
0x1bab   :  { %10348 = vmatpush3.msra.mxu0 %v14922_v38  ;;  %v15367_v38 = vld [vmem:[#allocation7 + $0x158] sm:$0xff] }
0x1bac   :  { %10349 = vmatprep.subr.mxu0 %v15262_v23 }
0x1bad   :  { %10350 = vmatpush3.msra.mxu0 %v14926_v21  ;;  %v15371_v21 = vld [vmem:[#allocation7 + $0x150] sm:$0xff] }
0x1bae   :  { %10351 = vmatprep.subr.mxu0 %v15262_v23 }
0x1baf   :  { %10352 = vmatpush3.msra.mxu0 %v14930_v50  ;;  %v15375_v50 = vld [vmem:[#allocation7 + $0x148] sm:$0xff] }
0x1bb0   :  { %10353 = vmatprep.subr.mxu0 %v15262_v23 }
0x1bb1   :  { %10354 = vmatpush3.msra.mxu0 %v16368_v48  ;;  %v15387_v48 = vld [vmem:[#allocation7 + $0x130] sm:$0xff] }
0x1bb2   :  { %10355 = vmatprep.subr.mxu0 %v15262_v23  ;;  %16391 = vst [vmem:[#allocation34_spill] sm:$0xff] %v15387_v48 }
0x1bb3   :  { %10356 = vmatpush3.msra.mxu0 %v16369_v4  ;;  %v15391_v4 = vld [vmem:[#allocation7 + $0x128] sm:$0xff] }
0x1bb4   :  { %10357 = vmatprep.subr.mxu0 %v15262_v23  ;;  %16392 = vst [vmem:[#allocation24_spill] sm:$0xff] %v15391_v4 }
0x1bb5   :  { %10358 = vmatpush3.msra.mxu0 %v16370_v45  ;;  %v15395_v45 = vld [vmem:[#allocation7 + $0x120] sm:$0xff] }
0x1bb6   :  { %10359 = vmatprep.subr.mxu0 %v15262_v23  ;;  %16393 = vst [vmem:[#allocation22_spill] sm:$0xff] %v15395_v45 }
0x1bb7   :  { %10360 = vmatpush3.msra.mxu0 %v16371_v53 }
0x1bb8   :  { %10361 = vmatprep.subr.mxu0 %v15262_v23 }
0x1bb9   :  { %10362 = vmatpush3.msra.mxu0 %v16388_v34 }
0x1bba   :  { %10363 = vmatprep.subr.mxu0 %v15262_v23 }
0x1bbb   :  { %10364 = vmatpush3.msra.mxu0 %v16389_v42 }
0x1bbc   :  { %10365 = vmatprep.subr.mxu0 %v15262_v23 }
0x1bbd   :  { %10366 = vmatpush3.msra.mxu0 %v16390_v52 }
0x1bbe   :  { %10367 = vmatprep.subr.mxu0 %v15262_v23 }
0x1bbf   :  { %10368 = vmatpush3.msra.mxu0 %v14962_v30  ;;  %v15379_v30 = vld [vmem:[#allocation7 + $0x140] sm:$0xff] }
0x1bc0   :  { %10407 = vmatprep.subr.mxu0 %v15262_v23 }
0x1c3e   :  { %v5518_v16 = vpop.f32.mrf.mxu1 }
0x1c3f   :  { %v5519_v1 = vadd.f32 %v15164_v11, %v5518_v16  ;;  %v15507_v16 = vld [vmem:[#allocation5 + $0x160] sm:$0xff] }
0x1c40   :  { %v10336_v15 = vpop.f32.mrf.mxu1 }
0x1c41   :  { %v15344_v22 = vsub.f32 %v15287_v39, %v5519_v1  ;;  %v5602_v1 = vmul.f32 %v15305_v55, %v15305_v55  ;;  %v15513_v15 = vld [vmem:[#allocation5 + $0x158] sm:$0xff] }
0x1c43   :  { %10405 = vmatmul.mubr.f32.vlgmr.msra.gmra.mxu1 %v15344_v22  ;;  %v5523_v28 = vmul.f32 %v15344_v22, %v15344_v22  ;;  %v5531_v55 = vsub.f32 0.0, %v15344_v22  ;;  %v15535_v22 = vld [vmem:[#allocation5 + $0x130] sm:$0xff] }
0x1c44   :  { %10443 = vmatpush3.msra.mxu1 %v15349_v17  ;;  %10474 = vmatprep.mubr.msk.f32.mxu1 %vm11369_vm0, %v15262_v23 }
0x1c45   :  { %5524 = vadd.xlane.f32.xlu1 %v5523_v28  ;;  %10444 = vmatprep.subr.mxu1 %v15262_v23  ;;  %v15517_v28 = vld [vmem:[#allocation5 + $0x150] sm:$0xff] }
0x1c46   :  { %10445 = vmatpush3.msra.mxu1 %v15355_v31 }
0x1c47   :  { %10446 = vmatprep.subr.mxu1 %v15262_v23 }
0x1c48   :  { %10447 = vmatpush3.msra.mxu1 %v15359_v44 }
0x1c49   :  { %10448 = vmatprep.subr.mxu1 %v15262_v23 }
0x1c4a   :  { %10449 = vmatpush3.msra.mxu1 %v15363_v41 }
0x1c4b   :  { %10450 = vmatprep.subr.mxu1 %v15262_v23 }
0x1c4c   :  { %10451 = vmatpush3.msra.mxu1 %v15367_v38 }
0x1c4d   :  { %10452 = vmatprep.subr.mxu1 %v15262_v23 }
0x1c4e   :  { %10453 = vmatpush3.msra.mxu1 %v15371_v21 }
0x1c4f   :  { %10454 = vmatprep.subr.mxu1 %v15262_v23 }
0x1c50   :  { %10455 = vmatpush3.msra.mxu1 %v15375_v50 }
0x1c51   :  { %10456 = vmatprep.subr.mxu1 %v15262_v23 }
0x1c52   :  { %10457 = vmatpush3.msra.mxu1 %v15379_v30 }
0x1c53   :  { %10458 = vmatprep.subr.mxu1 %v15262_v23 }
0x1c54   :  { %10459 = vmatpush3.msra.mxu1 %v15383_v59 }
0x1c55   :  { %10460 = vmatprep.subr.mxu1 %v15262_v23 }
0x1c56   :  { %10461 = vmatpush3.msra.mxu1 %v15387_v48 }
0x1c57   :  { %10462 = vmatprep.subr.mxu1 %v15262_v23 }
0x1c58   :  { %10463 = vmatpush3.msra.mxu1 %v15391_v4 }
0x1c59   :  { %10464 = vmatprep.subr.mxu1 %v15262_v23 }
0x1c5a   :  { %10465 = vmatpush3.msra.mxu1 %v15395_v45 }
0x1c5b   :  { %10466 = vmatprep.subr.mxu1 %v15262_v23 }
0x1c5c   :  { %10467 = vmatpush3.msra.mxu1 %v16379_v0 }
0x1c5d   :  { %10468 = vmatprep.subr.mxu1 %v15262_v23 }
0x1c5e   :  { %10469 = vmatpush3.msra.mxu1 %v15009_v26  ;;  %v15415_v26 = vld [vmem:[#allocation7 + $0xf0] sm:$0xff] }
0x1c5f   :  { %10470 = vmatprep.subr.mxu1 %v15262_v23 }
0x1c60   :  { %v5441_v53 = vpop.f32.mrf.mxu0  ;;  %10471 = vmatpush3.msra.mxu1 %v15016_v36  ;;  %v15423_v36 = vld [vmem:[#allocation7 + $0xe0] sm:$0xff] }
0x1c61   :  { %v5442_v12 = vadd.f32 %v15005_v25, %v5441_v53  ;;  %10472 = vmatprep.subr.mxu1 %v15262_v23  ;;  %v15427_v25 = vld [vmem:[#allocation7 + $0xd8] sm:$0xff]  ;;  %v5603_v53 = vsub.f32 1.0, %v5602_v1  ;;  %v15590_v1 = vld [vmem:[#allocation5 + $0xc8] sm:$0xff] }
0x1c62   :  { %v10301_v18 = vpop.f32.mrf.mxu0  ;;  %10473 = vmatpush3.msra.mxu1 %v15020_v46  ;;  %v15431_v46 = vld [vmem:[#allocation7 + $0xd0] sm:$0xff] }
0x1c63   :  { %v5445_v54 = vsub.f32 %v15012_v7, %v5442_v12  ;;  %10512 = vmatprep.subr.mxu1 %v15262_v23  ;;  %v15419_v7 = vld [vmem:[#allocation7 + $0xe8] sm:$0xff] }
0x1c64   :  { %v15521_v18 = vld [vmem:[#allocation5 + $0x148] sm:$0xff] }
0x1c65   :  { %10370 = vmatmul.mubr.f32.vlgmr.msra.gmra.mxu0 %v5445_v54  ;;  %v5446_v0 = vmul.f32 %v5445_v54, %v5445_v54 }
0x1c66   :  { %10408 = vmatpush3.msra.mxu0 %v15409_v35  ;;  %10439 = vmatprep.mubr.msk.f32.mxu0 %vm11369_vm0, %v15262_v23 }
0x1c67   :  { %5447 = vadd.xlane.f32.xlu0 %v5446_v0  ;;  %10409 = vmatprep.subr.mxu0 %v15262_v23 }
0x1c68   :  { %10410 = vmatpush3.msra.mxu0 %v15415_v26 }
0x1c69   :  { %10411 = vmatprep.subr.mxu0 %v15262_v23 }
0x1c6a   :  { %10412 = vmatpush3.msra.mxu0 %v15419_v7 }
0x1c6b   :  { %10413 = vmatprep.subr.mxu0 %v15262_v23 }
0x1c6c   :  { %10414 = vmatpush3.msra.mxu0 %v15423_v36 }
0x1c6d   :  { %10415 = vmatprep.subr.mxu0 %v15262_v23 }
0x1c6e   :  { %10416 = vmatpush3.msra.mxu0 %v15427_v25 }
0x1c6f   :  { %10417 = vmatprep.subr.mxu0 %v15262_v23 }
0x1c70   :  { %10418 = vmatpush3.msra.mxu0 %v15431_v46 }
0x1c71   :  { %10419 = vmatprep.subr.mxu0 %v15262_v23 }
0x1c72   :  { %10420 = vmatpush3.msra.mxu0 %v15435_v47 }
0x1c73   :  { %10421 = vmatprep.subr.mxu0 %v15262_v23 }
0x1c74   :  { %10422 = vmatpush3.msra.mxu0 %v15439_v3 }
0x1c75   :  { %10423 = vmatprep.subr.mxu0 %v15262_v23 }
0x1c76   :  { %10424 = vmatpush3.msra.mxu0 %v15443_v14 }
0x1c77   :  { %10425 = vmatprep.subr.mxu0 %v15262_v23 }
0x1c78   :  { %10426 = vmatpush3.msra.mxu0 %v15447_v33 }
0x1c79   :  { %10427 = vmatprep.subr.mxu0 %v15262_v23 }
0x1c7a   :  { %10428 = vmatpush3.msra.mxu0 %v15451_v37 }
0x1c7b   :  { %10429 = vmatprep.subr.mxu0 %v15262_v23 }
0x1c7c   :  { %10430 = vmatpush3.msra.mxu0 %v15455_v62 }
0x1c7d   :  { %10431 = vmatprep.subr.mxu0 %v15262_v23 }
0x1c7e   :  { %10432 = vmatpush3.msra.mxu0 %v15459_v13 }
0x1c7f   :  { %10433 = vmatprep.subr.mxu0 %v15262_v23 }
0x1c80   :  { %10434 = vmatpush3.msra.mxu0 %v15463_v61 }
0x1c81   :  { %10435 = vmatprep.subr.mxu0 %v15262_v23 }
0x1c82   :  { %10436 = vmatpush3.msra.mxu0 %v15467_v57 }
0x1c83   :  { %10437 = vmatprep.subr.mxu0 %v15262_v23 }
0x1c84   :  { %10438 = vmatpush3.msra.mxu0 %v15471_v27 }
0x1c85   :  { %10477 = vmatprep.subr.mxu0 %v15262_v23 }
0x1cce   :  { %v5525_v58 = vpop.xlane.xlu1 %5524 }
0x1ccf   :  { %v5526_v10 = vmul.f32 0.5, %v5525_v58 }
0x1cf0   :  { %v5448_v20 = vpop.xlane.xlu0 %5447 }
0x1cf1   :  { %v5449_v60 = vmul.f32 0.5, %v5448_v20  ;;  %v15526_v20 = vld [vmem:[#allocation5 + $0x140] sm:$0xff] }
0x1cf3   :  { %v15475_v40 = vadd.f32 %v5526_v10, %v5449_v60  ;;  %v15530_v60 = vld [vmem:[#allocation5 + $0x138] sm:$0xff] }
0x1cf5   :  { %vm5528_vm1 = vcmp.lt.f32.partialorder %v15475_v40, %v15243_v6 }
0x1cf6   :  { %v5529_v51 = vsel %vm5528_vm1, 1.0, %v16302_v56 }
0x1cf7   :  { %v15483_v19 = vmul.f32 %v5529_v51, %v15251_v49  ;;  %v15499_v49 = vld [vmem:[#allocation5 + $0x170] sm:$0xff]  ;;  %v15542_v51 = vld [vmem:[#allocation5 + $0x128] sm:$0xff] }
0x1d03   :  { %v5674_v24 = vpop.f32.mrf.mxu1 }
0x1d04   :  { %v5680_v29 = vmul.f32 %v5679_v9, %v5674_v24  ;;  %v15547_v9 = vld [vmem:[#allocation5 + $0x120] sm:$0xff]  ;;  %v15551_v24 = vld [vmem:[#allocation5 + $0x118] sm:$0xff] }
0x1d05   :  { %v10406_v34 = vpop.f32.mrf.mxu1 }
0x1d06   :  { %v5681_v42 = vmul.f32 %v5680_v29, %v15483_v19  ;;  %v15564_v29 = vld [vmem:[#allocation5 + $0xf8] sm:$0xff] }
0x1d07   :  { %v15582_v34 = vld [vmem:[#allocation5 + $0xd8] sm:$0xff] }
0x1d08   :  { %v15487_v52 = vadd.f32 %v5681_v42, %v15255_v2  ;;  %v15503_v2 = vld [vmem:[#allocation5 + $0x168] sm:$0xff]  ;;  %v15586_v42 = vld [vmem:[#allocation5 + $0xd0] sm:$0xff] }
0x1d0a   :  { %10835 = vtanh.f32 %v15487_v52 }
0x1d17   :  { %v15490_v6 = vpop.eup %10835 }
0x1d18   :  { %10475 = vmatmul.mubr.f32.vlgmr.msra.gmra.mxu1 %v15490_v6 }
0x1d19   :  { %10513 = vmatpush3.msra.mxu1 %v15493_v8  ;;  %10544 = vmatprep.mubr.msk.f32.mxu1 %vm11369_vm0, %v15262_v23 }
0x1d1a   :  { %10514 = vmatprep.subr.mxu1 %v15262_v23 }
0x1d1b   :  { %10515 = vmatpush3.msra.mxu1 %v15499_v49 }
0x1d1c   :  { %10516 = vmatprep.subr.mxu1 %v15262_v23 }
0x1d1d   :  { %10517 = vmatpush3.msra.mxu1 %v15503_v2 }
0x1d1e   :  { %10518 = vmatprep.subr.mxu1 %v15262_v23 }
0x1d1f   :  { %10519 = vmatpush3.msra.mxu1 %v15507_v16 }
0x1d20   :  { %10520 = vmatprep.subr.mxu1 %v15262_v23 }
0x1d21   :  { %10521 = vmatpush3.msra.mxu1 %v15513_v15 }
0x1d22   :  { %10522 = vmatprep.subr.mxu1 %v15262_v23 }
0x1d23   :  { %10523 = vmatpush3.msra.mxu1 %v15517_v28 }
0x1d24   :  { %10524 = vmatprep.subr.mxu1 %v15262_v23 }
0x1d25   :  { %v5598_v12 = vpop.f32.mrf.mxu0  ;;  %10525 = vmatpush3.msra.mxu1 %v15521_v18 }
0x1d26   :  { %v5604_v54 = vmul.f32 %v5603_v53, %v5598_v12  ;;  %10526 = vmatprep.subr.mxu1 %v15262_v23  ;;  %v15594_v53 = vld [vmem:[#allocation5 + $0xc0] sm:$0xff]  ;;  %v15598_v12 = vld [vmem:[#allocation5 + $0xb8] sm:$0xff] }
0x1d27   :  { %v10371_v0 = vpop.f32.mrf.mxu0  ;;  %10527 = vmatpush3.msra.mxu1 %v15526_v20  ;;  %16401 = vst [vmem:[#allocation16_spill] sm:$0xff] %v15598_v12 }
0x1d28   :  { %v5605_v58 = vadd.f32 %v5604_v54, %v5531_v55  ;;  %10528 = vmatprep.subr.mxu1 %v15262_v23  ;;  %v15602_v55 = vld [vmem:[#allocation5 + $0xb0] sm:$0xff]  ;;  %v15606_v54 = vld [vmem:[#allocation5 + $0xa8] sm:$0xff]  ;;  %v15610_v0 = vld [vmem:[#allocation5 + $0xa0] sm:$0xff] }
0x1d29   :  { %10529 = vmatpush3.msra.mxu1 %v15530_v60  ;;  %16402 = vst [vmem:[#allocation33_spill] sm:$0xff] %v15602_v55  ;;  %16403 = vst [vmem:[#allocation17_spill] sm:$0xff] %v15606_v54 }
0x1d2a   :  { %v5606_v10 = vmul.f32 %v5605_v58, %v15483_v19  ;;  %10530 = vmatprep.subr.mxu1 %v15262_v23  ;;  %16404 = vst [vmem:[#allocation21_spill] sm:$0xff] %v15610_v0  ;;  %v15614_v58 = vld [vmem:[#allocation5 + $0x98] sm:$0xff] }
0x1d2b   :  { %10531 = vmatpush3.msra.mxu1 %v15535_v22  ;;  %16405 = vst [vmem:[#allocation19_spill] sm:$0xff] %v15614_v58 }
0x1d2c   :  { %v15539_v63 = vadd.f32 %v5606_v10, %v15287_v39  ;;  %10532 = vmatprep.subr.mxu1 %v15262_v23  ;;  %v15618_v10 = vld [vmem:[#allocation5 + $0x90] sm:$0xff] }
0x1d2d   :  { %10533 = vmatpush3.msra.mxu1 %v15542_v51  ;;  %16406 = vst [vmem:[#allocation23_spill] sm:$0xff] %v15618_v10 }
0x1d2e   :  { %10837 = vtanh.f32 %v15539_v63  ;;  %10534 = vmatprep.subr.mxu1 %v15262_v23 }
0x1d2f   :  { %10535 = vmatpush3.msra.mxu1 %v15547_v9 }
0x1d30   :  { %10536 = vmatprep.subr.mxu1 %v15262_v23 }
0x1d31   :  { %10537 = vmatpush3.msra.mxu1 %v15551_v24 }
0x1d32   :  { %10538 = vmatprep.subr.mxu1 %v15262_v23 }
0x1d33   :  { %10539 = vmatpush3.msra.mxu1 %v15112_v43  ;;  %v15570_v43 = vld [vmem:[#allocation5 + $0xf0] sm:$0xff] }
0x1d34   :  { %10540 = vmatprep.subr.mxu1 %v15262_v23 }
0x1d35   :  { %10541 = vmatpush3.msra.mxu1 %v15116_v32  ;;  %v15574_v32 = vld [vmem:[#allocation5 + $0xe8] sm:$0xff] }
0x1d36   :  { %10542 = vmatprep.subr.mxu1 %v15262_v23 }
0x1d37   :  { %10543 = vmatpush3.msra.mxu1 %v15122_v5  ;;  %v15578_v5 = vld [vmem:[#allocation5 + $0xe0] sm:$0xff] }
0x1d38   :  { %10582 = vmatprep.subr.mxu1 %v15262_v23 }
0x1d3b   :  { %v15561_v39 = vpop.eup %10837 }
0x1d3c   :  { %10440 = vmatmul.mubr.f32.vlgmr.msra.gmra.mxu0 %v15561_v39 }
0x1d3d   :  { %10478 = vmatpush3.msra.mxu0 %v15564_v29  ;;  %10509 = vmatprep.mubr.msk.f32.mxu0 %vm11369_vm0, %v15262_v23 }
0x1d3e   :  { %10479 = vmatprep.subr.mxu0 %v15262_v23 }
0x1d3f   :  { %10480 = vmatpush3.msra.mxu0 %v15570_v43 }
0x1d40   :  { %10481 = vmatprep.subr.mxu0 %v15262_v23 }
0x1d41   :  { %10482 = vmatpush3.msra.mxu0 %v15574_v32 }
0x1d42   :  { %10483 = vmatprep.subr.mxu0 %v15262_v23 }
0x1d43   :  { %10484 = vmatpush3.msra.mxu0 %v15578_v5 }
0x1d44   :  { %10485 = vmatprep.subr.mxu0 %v15262_v23 }
0x1d45   :  { %10486 = vmatpush3.msra.mxu0 %v15582_v34 }
0x1d46   :  { %10487 = vmatprep.subr.mxu0 %v15262_v23 }
0x1d47   :  { %10488 = vmatpush3.msra.mxu0 %v15586_v42 }
0x1d48   :  { %10489 = vmatprep.subr.mxu0 %v15262_v23 }
0x1d49   :  { %10490 = vmatpush3.msra.mxu0 %v15590_v1 }
0x1d4a   :  { %10491 = vmatprep.subr.mxu0 %v15262_v23 }
0x1d4b   :  { %10492 = vmatpush3.msra.mxu0 %v15594_v53 }
0x1d4c   :  { %10493 = vmatprep.subr.mxu0 %v15262_v23 }
0x1d4d   :  { %10494 = vmatpush3.msra.mxu0 %v15598_v12 }
0x1d4e   :  { %10495 = vmatprep.subr.mxu0 %v15262_v23 }
0x1d4f   :  { %10496 = vmatpush3.msra.mxu0 %v15602_v55 }
0x1d50   :  { %10497 = vmatprep.subr.mxu0 %v15262_v23 }
0x1d51   :  { %10498 = vmatpush3.msra.mxu0 %v15606_v54  ;;  %v15622_v54 = vld [vmem:[#allocation5 + $0x88] sm:$0xff] }
0x1d52   :  { %10499 = vmatprep.subr.mxu0 %v15262_v23  ;;  %16407 = vst [vmem:[#allocation20_spill] sm:$0xff] %v15622_v54 }
0x1d53   :  { %10500 = vmatpush3.msra.mxu0 %v15610_v0  ;;  %v15626_v0 = vld [vmem:[#allocation5 + $0x80] sm:$0xff] }
0x1d54   :  { %10501 = vmatprep.subr.mxu0 %v15262_v23 }
0x1d55   :  { %10502 = vmatpush3.msra.mxu0 %v15614_v58 }
0x1d56   :  { %10503 = vmatprep.subr.mxu0 %v15262_v23 }
0x1d57   :  { %10504 = vmatpush3.msra.mxu0 %v15618_v10 }
0x1d58   :  { %10505 = vmatprep.subr.mxu0 %v15262_v23 }
0x1d59   :  { %10506 = vmatpush3.msra.mxu0 %v15622_v54 }
0x1d5a   :  { %10507 = vmatprep.subr.mxu0 %v15262_v23 }
0x1d5b   :  { %10508 = vmatpush3.msra.mxu0 %v15626_v0 }
0x1d5c   :  { %10547 = vmatprep.subr.mxu0 %v15262_v23 }
0x1dd8   :  { %v5827_v58 = vpop.f32.mrf.mxu1 }
0x1dd9   :  { %v5828_v55 = vadd.f32 %v15164_v11, %v5827_v58  ;;  %v15663_v11 = vld [vmem:[#allocation7 + $0x118] sm:$0xff]  ;;  %v15675_v58 = vld [vmem:[#allocation7 + $0x100] sm:$0xff] }
0x1dda   :  { %v10476_v12 = vpop.f32.mrf.mxu1  ;;  %16408 = vst [vmem:[#allocation31_spill] sm:$0xff] %v15663_v11 }
0x1ddb   :  { %v15632_v10 = vsub.f32 %v15539_v63, %v5828_v55  ;;  %v15667_v12 = vld [vmem:[#allocation7 + $0x110] sm:$0xff]  ;;  %v15671_v55 = vld [vmem:[#allocation7 + $0x108] sm:$0xff] }
0x1ddc   :  { %16409 = vst [vmem:[#allocation18_spill] sm:$0xff] %v15667_v12  ;;  %16410 = vst [vmem:[#allocation29_spill] sm:$0xff] %v15671_v55 }
0x1ddd   :  { %10545 = vmatmul.mubr.f32.vlgmr.msra.gmra.mxu1 %v15632_v10  ;;  %v5832_v54 = vmul.f32 %v15632_v10, %v15632_v10 }
0x1dde   :  { %10583 = vmatpush3.msra.mxu1 %v15349_v17  ;;  %10614 = vmatprep.mubr.msk.f32.mxu1 %vm11369_vm0, %v15262_v23 }
0x1ddf   :  { %5833 = vadd.xlane.f32.xlu1 %v5832_v54  ;;  %10584 = vmatprep.subr.mxu1 %v15262_v23 }
0x1de0   :  { %10585 = vmatpush3.msra.mxu1 %v15355_v31 }
0x1de1   :  { %10586 = vmatprep.subr.mxu1 %v15262_v23 }
0x1de2   :  { %10587 = vmatpush3.msra.mxu1 %v15359_v44 }
0x1de3   :  { %10588 = vmatprep.subr.mxu1 %v15262_v23 }
0x1de4   :  { %10589 = vmatpush3.msra.mxu1 %v15363_v41 }
0x1de5   :  { %10590 = vmatprep.subr.mxu1 %v15262_v23 }
0x1de6   :  { %10591 = vmatpush3.msra.mxu1 %v15367_v38 }
0x1de7   :  { %10592 = vmatprep.subr.mxu1 %v15262_v23 }
0x1de8   :  { %10593 = vmatpush3.msra.mxu1 %v15371_v21 }
0x1de9   :  { %10594 = vmatprep.subr.mxu1 %v15262_v23 }
0x1dea   :  { %10595 = vmatpush3.msra.mxu1 %v15375_v50 }
0x1deb   :  { %10596 = vmatprep.subr.mxu1 %v15262_v23 }
0x1dec   :  { %10597 = vmatpush3.msra.mxu1 %v15379_v30 }
0x1ded   :  { %10598 = vmatprep.subr.mxu1 %v15262_v23 }
0x1dee   :  { %10599 = vmatpush3.msra.mxu1 %v15383_v59 }
0x1def   :  { %10600 = vmatprep.subr.mxu1 %v15262_v23 }
0x1df0   :  { %10601 = vmatpush3.msra.mxu1 %v15387_v48 }
0x1df1   :  { %10602 = vmatprep.subr.mxu1 %v15262_v23 }
0x1df2   :  { %10603 = vmatpush3.msra.mxu1 %v15391_v4  ;;  %v15685_v4 = vld [vmem:[#allocation8] sm:$0xff] }
0x1df3   :  { %10604 = vmatprep.subr.mxu1 %v15262_v23 }
0x1df4   :  { %10605 = vmatpush3.msra.mxu1 %v15395_v45 }
0x1df5   :  { %10606 = vmatprep.subr.mxu1 %v15262_v23 }
0x1df6   :  { %10607 = vmatpush3.msra.mxu1 %v15663_v11  ;;  %v15681_v11 = vld [vmem:[%s15924_s3 + $0x1] ss:$0 sm:$0xff] }
0x1df7   :  { %10608 = vmatprep.subr.mxu1 %v15262_v23 }
0x1df8   :  { %10609 = vmatpush3.msra.mxu1 %v15667_v12 }
0x1df9   :  { %10610 = vmatprep.subr.mxu1 %v15262_v23 }
0x1dfa   :  { %10611 = vmatpush3.msra.mxu1 %v15671_v55 }
0x1dfb   :  { %10612 = vmatprep.subr.mxu1 %v15262_v23 }
0x1dfc   :  { %v5750_v54 = vpop.f32.mrf.mxu0  ;;  %10613 = vmatpush3.msra.mxu1 %v15675_v58 }
0x1dfd   :  { %v5751_v12 = vadd.f32 %v15681_v11, %v5750_v54  ;;  %10652 = vmatprep.subr.mxu1 %v15262_v23 }
0x1dfe   :  { %v10441_v45 = vpop.f32.mrf.mxu0 }
0x1dff   :  { %v5754_v55 = vsub.f32 %v15685_v4, %v5751_v12 }
0x1e01   :  { %10510 = vmatmul.mubr.f32.vlgmr.msra.gmra.mxu0 %v5754_v55  ;;  %v5755_v48 = vmul.f32 %v5754_v55, %v5754_v55 }
0x1e02   :  { %10548 = vmatpush3.msra.mxu0 %v15409_v35  ;;  %10579 = vmatprep.mubr.msk.f32.mxu0 %vm11369_vm0, %v15262_v23 }
0x1e03   :  { %5756 = vadd.xlane.f32.xlu0 %v5755_v48  ;;  %10549 = vmatprep.subr.mxu0 %v15262_v23 }
0x1e04   :  { %10550 = vmatpush3.msra.mxu0 %v15415_v26 }
0x1e05   :  { %10551 = vmatprep.subr.mxu0 %v15262_v23 }
0x1e06   :  { %10552 = vmatpush3.msra.mxu0 %v15419_v7 }
0x1e07   :  { %10553 = vmatprep.subr.mxu0 %v15262_v23 }
0x1e08   :  { %10554 = vmatpush3.msra.mxu0 %v15423_v36 }
0x1e09   :  { %10555 = vmatprep.subr.mxu0 %v15262_v23 }
0x1e0a   :  { %10556 = vmatpush3.msra.mxu0 %v15427_v25 }
0x1e0b   :  { %10557 = vmatprep.subr.mxu0 %v15262_v23 }
0x1e0c   :  { %10558 = vmatpush3.msra.mxu0 %v15431_v46 }
0x1e0d   :  { %10559 = vmatprep.subr.mxu0 %v15262_v23 }
0x1e0e   :  { %10560 = vmatpush3.msra.mxu0 %v15435_v47 }
0x1e0f   :  { %10561 = vmatprep.subr.mxu0 %v15262_v23 }
0x1e10   :  { %10562 = vmatpush3.msra.mxu0 %v15439_v3 }
0x1e11   :  { %10563 = vmatprep.subr.mxu0 %v15262_v23 }
0x1e12   :  { %10564 = vmatpush3.msra.mxu0 %v15443_v14 }
0x1e13   :  { %10565 = vmatprep.subr.mxu0 %v15262_v23 }
0x1e14   :  { %10566 = vmatpush3.msra.mxu0 %v15447_v33 }
0x1e15   :  { %10567 = vmatprep.subr.mxu0 %v15262_v23 }
0x1e16   :  { %10568 = vmatpush3.msra.mxu0 %v15451_v37 }
0x1e17   :  { %10569 = vmatprep.subr.mxu0 %v15262_v23 }
0x1e18   :  { %10570 = vmatpush3.msra.mxu0 %v15455_v62 }
0x1e19   :  { %10571 = vmatprep.subr.mxu0 %v15262_v23 }
0x1e1a   :  { %10572 = vmatpush3.msra.mxu0 %v15459_v13 }
0x1e1b   :  { %10573 = vmatprep.subr.mxu0 %v15262_v23 }
0x1e1c   :  { %10574 = vmatpush3.msra.mxu0 %v15463_v61  ;;  %v5987_v61 = vmul.f32 %v15490_v6, %v15490_v6 }
0x1e1d   :  { %10575 = vmatprep.subr.mxu0 %v15262_v23 }
0x1e1e   :  { %10576 = vmatpush3.msra.mxu0 %v15467_v57  ;;  %v5988_v13 = vsub.f32 1.0, %v5987_v61 }
0x1e1f   :  { %10577 = vmatprep.subr.mxu0 %v15262_v23 }
0x1e20   :  { %10578 = vmatpush3.msra.mxu0 %v15471_v27 }
0x1e21   :  { %10617 = vmatprep.subr.mxu0 %v15262_v23 }
0x1e68   :  { %v5834_v45 = vpop.xlane.xlu1 %5833 }
0x1e69   :  { %v5835_v55 = vmul.f32 0.5, %v5834_v45 }
0x1e8c   :  { %v5757_v48 = vpop.xlane.xlu0 %5756 }
0x1e8d   :  { %v5758_v12 = vmul.f32 0.5, %v5757_v48 }
0x1e8f   :  { %v15722_v54 = vadd.f32 %v5835_v55, %v5758_v12 }
0x1e91   :  { %vm5837_vm2 = vcmp.lt.f32.partialorder %v15722_v54, %v15475_v40 }
0x1e92   :  { %v5838_v57 = vsel %vm5837_vm2, 1.0, %v16302_v56 }
0x1e93   :  { %v15730_v27 = vmul.f32 %v5838_v57, %v15483_v19 }
0x1e9d   :  { %v5983_v62 = vpop.f32.mrf.mxu1 }
0x1e9e   :  { %v5989_v37 = vmul.f32 %v5988_v13, %v5983_v62  ;;  %v5840_v13 = vsub.f32 0.0, %v15632_v10 }
0x1e9f   :  { %v10546_v33 = vpop.f32.mrf.mxu1 }
0x1ea0   :  { %v5990_v48 = vmul.f32 %v5989_v37, %v15730_v27  ;;  %v5911_v33 = vmul.f32 %v15561_v39, %v15561_v39 }
0x1ea2   :  { %v15734_v45 = vadd.f32 %v5990_v48, %v15487_v52  ;;  %v5912_v37 = vsub.f32 1.0, %v5911_v33 }
0x1ea4   :  { %10839 = vtanh.f32 %v15734_v45 }
0x1eb1   :  { %v15737_v40 = vpop.eup %10839 }
0x1eb2   :  { %10615 = vmatmul.mubr.f32.vlgmr.msra.gmra.mxu1 %v15737_v40 }
0x1eb3   :  { %10653 = vmatpush3.msra.mxu1 %v15493_v8  ;;  %10684 = vmatprep.mubr.msk.f32.mxu1 %vm11369_vm0, %v15262_v23  ;;  %v11251_v8 = vld [vmem:[#allocation5 + $0x110] sm:$0xff] }
0x1eb4   :  { %10654 = vmatprep.subr.mxu1 %v15262_v23 }
0x1eb5   :  { %10655 = vmatpush3.msra.mxu1 %v15499_v49  ;;  %v11252_v49 = vld [vmem:[#allocation5 + $0x108] sm:$0xff] }
0x1eb6   :  { %10656 = vmatprep.subr.mxu1 %v15262_v23 }
0x1eb7   :  { %10657 = vmatpush3.msra.mxu1 %v15503_v2  ;;  %v11253_v2 = vld [vmem:[#allocation5 + $0x100] sm:$0xff] }
0x1eb8   :  { %10658 = vmatprep.subr.mxu1 %v15262_v23 }
0x1eb9   :  { %10659 = vmatpush3.msra.mxu1 %v15507_v16 }
0x1eba   :  { %10660 = vmatprep.subr.mxu1 %v15262_v23 }
0x1ebb   :  { %10661 = vmatpush3.msra.mxu1 %v15513_v15  ;;  %v16411_v15 = vld [vmem:[#allocation16_spill] sm:$0xff] }
0x1ebc   :  { %10662 = vmatprep.subr.mxu1 %v15262_v23 }
0x1ebd   :  { %10663 = vmatpush3.msra.mxu1 %v15517_v28  ;;  %v16412_v28 = vld [vmem:[#allocation33_spill] sm:$0xff] }
0x1ebe   :  { %10664 = vmatprep.subr.mxu1 %v15262_v23 }
0x1ebf   :  { %10665 = vmatpush3.msra.mxu1 %v15521_v18  ;;  %v16413_v18 = vld [vmem:[#allocation17_spill] sm:$0xff] }
0x1ec0   :  { %10666 = vmatprep.subr.mxu1 %v15262_v23 }
0x1ec1   :  { %v5907_v62 = vpop.f32.mrf.mxu0  ;;  %10667 = vmatpush3.msra.mxu1 %v15526_v20  ;;  %v16414_v20 = vld [vmem:[#allocation21_spill] sm:$0xff] }
0x1ec2   :  { %v5913_v61 = vmul.f32 %v5912_v37, %v5907_v62  ;;  %10668 = vmatprep.subr.mxu1 %v15262_v23 }
0x1ec3   :  { %v10511_v57 = vpop.f32.mrf.mxu0  ;;  %10669 = vmatpush3.msra.mxu1 %v15530_v60  ;;  %v16415_v60 = vld [vmem:[#allocation19_spill] sm:$0xff] }
0x1ec4   :  { %v5914_v19 = vadd.f32 %v5913_v61, %v5840_v13  ;;  %10670 = vmatprep.subr.mxu1 %v15262_v23 }
0x1ec5   :  { %10671 = vmatpush3.msra.mxu1 %v15535_v22  ;;  %v16416_v22 = vld [vmem:[#allocation23_spill] sm:$0xff] }
0x1ec6   :  { %v5915_v52 = vmul.f32 %v5914_v19, %v15730_v27  ;;  %10672 = vmatprep.subr.mxu1 %v15262_v23 }
0x1ec7   :  { %10673 = vmatpush3.msra.mxu1 %v15542_v51 }
0x1ec8   :  { %v15768_v6 = vadd.f32 %v5915_v52, %v15539_v63  ;;  %10674 = vmatprep.subr.mxu1 %v15262_v23  ;;  %v16417_v63 = vld [vmem:[#allocation20_spill] sm:$0xff] }
0x1ec9   :  { %10675 = vmatpush3.msra.mxu1 %v15547_v9  ;;  %v15819_v9 = vld [vmem:[%s15924_s3 + $0x2] ss:$0 sm:$0xff]  ;;  %s11371_s3 = smov [#allocation8]  }
0x1eca   :  { %10841 = vtanh.f32 %v15768_v6  ;;  %10676 = vmatprep.subr.mxu1 %v15262_v23  ;;  %s6460_s9 = sshll.u32 %s11371_s3, 4  ;;  %s6461_s9 = int_to_ptr.vmem [resolvable:$true] %s6460_s9 }
0x1ecb   :  { %10677 = vmatpush3.msra.mxu1 %v15551_v24  ;;  %s11315_s10 = scalar_lea.vmem %s6461_s9, 384  ;;  %p11320_p2 = scmp.lt.s32.totalorder %s6461_s9, %s6461_s9 }
0x1ecc   :  { %10678 = vmatprep.subr.mxu1 %v15262_v23  ;;  %p11316_p1 = scmp.ne.s32.totalorder %s6461_s9, %s11315_s10  ;;  %p11321_p3 = scmp.lt.s32.totalorder %s11315_s10, %s11315_s10 }
0x1ecd   :  { %10679 = vmatpush3.msra.mxu1 %v11251_v8 }
0x1ece   :  { %10680 = vmatprep.subr.mxu1 %v15262_v23  ;;  %p11322_p4 = por %p11321_p3, %p11320_p2 }
0x1ecf   :  { %10681 = vmatpush3.msra.mxu1 %v11252_v49 }
0x1ed0   :  { %10682 = vmatprep.subr.mxu1 %v15262_v23  ;;  %p11323_p5 = pnand %p11322_p4, %p11316_p1 }
0x1ed1   :  { %10683 = vmatpush3.msra.mxu1 %v11253_v2 }
0x1ed2   :  { %10722 = vmatprep.subr.mxu1 %v15262_v23 }
0x1ed7   :  { %v15779_v16 = vpop.eup %10841 }
0x1ed8   :  { %10580 = vmatmul.mubr.f32.vlgmr.msra.gmra.mxu0 %v15779_v16 }
0x1ed9   :  { %10618 = vmatpush3.msra.mxu0 %v15564_v29  ;;  %10649 = vmatprep.mubr.msk.f32.mxu0 %vm11369_vm0, %v15262_v23 }
0x1eda   :  { %10619 = vmatprep.subr.mxu0 %v15262_v23 }
0x1edb   :  { %10620 = vmatpush3.msra.mxu0 %v15570_v43 }
0x1edc   :  { %10621 = vmatprep.subr.mxu0 %v15262_v23 }
0x1edd   :  { %10622 = vmatpush3.msra.mxu0 %v15574_v32 }
0x1ede   :  { %10623 = vmatprep.subr.mxu0 %v15262_v23 }
0x1edf   :  { %10624 = vmatpush3.msra.mxu0 %v15578_v5 }
0x1ee0   :  { %10625 = vmatprep.subr.mxu0 %v15262_v23 }
0x1ee1   :  { %10626 = vmatpush3.msra.mxu0 %v15582_v34 }
0x1ee2   :  { %10627 = vmatprep.subr.mxu0 %v15262_v23 }
0x1ee3   :  { %10628 = vmatpush3.msra.mxu0 %v15586_v42 }
0x1ee4   :  { %10629 = vmatprep.subr.mxu0 %v15262_v23 }
0x1ee5   :  { %10630 = vmatpush3.msra.mxu0 %v15590_v1 }
0x1ee6   :  { %10631 = vmatprep.subr.mxu0 %v15262_v23 }
0x1ee7   :  { %10632 = vmatpush3.msra.mxu0 %v15594_v53  ;;  %v6296_v53 = vmul.f32 %v15737_v40, %v15737_v40 }
0x1ee8   :  { %10633 = vmatprep.subr.mxu0 %v15262_v23 }
0x1ee9   :  { %10634 = vmatpush3.msra.mxu0 %v16411_v15  ;;  %v6297_v10 = vsub.f32 1.0, %v6296_v53 }
0x1eea   :  { %10635 = vmatprep.subr.mxu0 %v15262_v23 }
0x1eeb   :  { %10636 = vmatpush3.msra.mxu0 %v16412_v28 }
0x1eec   :  { %10637 = vmatprep.subr.mxu0 %v15262_v23 }
0x1eed   :  { %10638 = vmatpush3.msra.mxu0 %v16413_v18 }
0x1eee   :  { %10639 = vmatprep.subr.mxu0 %v15262_v23 }
0x1eef   :  { %10640 = vmatpush3.msra.mxu0 %v16414_v20 }
0x1ef0   :  { %10641 = vmatprep.subr.mxu0 %v15262_v23 }
0x1ef1   :  { %10642 = vmatpush3.msra.mxu0 %v16415_v60 }
0x1ef2   :  { %10643 = vmatprep.subr.mxu0 %v15262_v23 }
0x1ef3   :  { %10644 = vmatpush3.msra.mxu0 %v16416_v22 }
0x1ef4   :  { %10645 = vmatprep.subr.mxu0 %v15262_v23 }
0x1ef5   :  { %10646 = vmatpush3.msra.mxu0 %v16417_v63 }
0x1ef6   :  { %10647 = vmatprep.subr.mxu0 %v15262_v23 }
0x1ef7   :  { %10648 = vmatpush3.msra.mxu0 %v15626_v0 }
0x1ef8   :  { %10687 = vmatprep.subr.mxu0 %v15262_v23 }
0x1f72   :  { %v6136_v51 = vpop.f32.mrf.mxu1 }
0x1f73   :  { %v6137_v24 = vadd.f32 %v15819_v9, %v6136_v51 }
0x1f74   :  { %v10616_v39 = vpop.f32.mrf.mxu1 }
0x1f75   :  { %v15823_v29 = vsub.f32 %v15768_v6, %v6137_v24 }
0x1f77   :  { %10685 = vmatmul.mubr.f32.vlgmr.msra.gmra.mxu1 %v15823_v29  ;;  %v6141_v43 = vmul.f32 %v15823_v29, %v15823_v29 }
0x1f78   :  { %10723 = vmatpush3.msra.mxu1 %v15349_v17  ;;  %10754 = vmatprep.mubr.msk.f32.mxu1 %vm11369_vm0, %v15262_v23  ;;  %v16418_v17 = vld [vmem:[#allocation34_spill] sm:$0xff] }
0x1f79   :  { %6142 = vadd.xlane.f32.xlu1 %v6141_v43  ;;  %10724 = vmatprep.subr.mxu1 %v15262_v23 }
0x1f7a   :  { %10725 = vmatpush3.msra.mxu1 %v15355_v31  ;;  %v16419_v31 = vld [vmem:[#allocation24_spill] sm:$0xff] }
0x1f7b   :  { %10726 = vmatprep.subr.mxu1 %v15262_v23 }
0x1f7c   :  { %10727 = vmatpush3.msra.mxu1 %v15359_v44  ;;  %v16420_v44 = vld [vmem:[#allocation22_spill] sm:$0xff] }
0x1f7d   :  { %10728 = vmatprep.subr.mxu1 %v15262_v23 }
0x1f7e   :  { %10729 = vmatpush3.msra.mxu1 %v15363_v41  ;;  %v16421_v41 = vld [vmem:[#allocation31_spill] sm:$0xff] }
0x1f7f   :  { %10730 = vmatprep.subr.mxu1 %v15262_v23 }
0x1f80   :  { %10731 = vmatpush3.msra.mxu1 %v15367_v38  ;;  %v16422_v38 = vld [vmem:[#allocation18_spill] sm:$0xff] }
0x1f81   :  { %10732 = vmatprep.subr.mxu1 %v15262_v23 }
0x1f82   :  { %10733 = vmatpush3.msra.mxu1 %v15371_v21  ;;  %v16423_v21 = vld [vmem:[#allocation29_spill] sm:$0xff] }
0x1f83   :  { %10734 = vmatprep.subr.mxu1 %v15262_v23 }
0x1f84   :  { %10735 = vmatpush3.msra.mxu1 %v15375_v50 }
0x1f85   :  { %10736 = vmatprep.subr.mxu1 %v15262_v23 }
0x1f86   :  { %10737 = vmatpush3.msra.mxu1 %v15379_v30 }
0x1f87   :  { %10738 = vmatprep.subr.mxu1 %v15262_v23 }
0x1f88   :  { %10739 = vmatpush3.msra.mxu1 %v15383_v59 }
0x1f89   :  { %10740 = vmatprep.subr.mxu1 %v15262_v23 }
0x1f8a   :  { %10741 = vmatpush3.msra.mxu1 %v16418_v17 }
0x1f8b   :  { %10742 = vmatprep.subr.mxu1 %v15262_v23 }
0x1f8c   :  { %10743 = vmatpush3.msra.mxu1 %v16419_v31 }
0x1f8d   :  { %10744 = vmatprep.subr.mxu1 %v15262_v23 }
0x1f8e   :  { %10745 = vmatpush3.msra.mxu1 %v16420_v44 }
0x1f8f   :  { %10746 = vmatprep.subr.mxu1 %v15262_v23 }
0x1f90   :  { %10747 = vmatpush3.msra.mxu1 %v16421_v41 }
0x1f91   :  { %10748 = vmatprep.subr.mxu1 %v15262_v23 }
0x1f92   :  { %10749 = vmatpush3.msra.mxu1 %v16422_v38 }
0x1f93   :  { %10750 = vmatprep.subr.mxu1 %v15262_v23 }
0x1f94   :  { %10751 = vmatpush3.msra.mxu1 %v16423_v21 }
0x1f95   :  { %10752 = vmatprep.subr.mxu1 %v15262_v23 }
0x1f96   :  { %10753 = vmatpush3.msra.mxu1 %v15675_v58 }
0x1f98   :  { %v6059_v50 = vpop.f32.mrf.mxu0 }
0x1f99   :  { %v6060_v30 = vadd.f32 %v15681_v11, %v6059_v50 }
0x1f9a   :  { %v10581_v59 = vpop.f32.mrf.mxu0 }
0x1f9b   :  { %v6063_v32 = vsub.f32 %v15685_v4, %v6060_v30 }
0x1f9d   :  { %10650 = vmatmul.mubr.f32.vlgmr.msra.gmra.mxu0 %v6063_v32  ;;  %v6064_v5 = vmul.f32 %v6063_v32, %v6063_v32 }
0x1f9e   :  { %10688 = vmatpush3.msra.mxu0 %v15409_v35  ;;  %10719 = vmatprep.mubr.msk.f32.mxu0 %vm11369_vm0, %v15262_v23  ;;  %v16424_v35 = vld [vmem:[#allocation25_spill] sm:$0xff] }
0x1f9f   :  { %6065 = vadd.xlane.f32.xlu0 %v6064_v5  ;;  %10689 = vmatprep.subr.mxu0 %v15262_v23 }
0x1fa0   :  { %10690 = vmatpush3.msra.mxu0 %v15415_v26  ;;  %v16425_v26 = vld [vmem:[#allocation27_spill] sm:$0xff] }
0x1fa1   :  { %10691 = vmatprep.subr.mxu0 %v15262_v23 }
0x1fa2   :  { %10692 = vmatpush3.msra.mxu0 %v15419_v7  ;;  %v16426_v7 = vld [vmem:[#allocation28_spill] sm:$0xff] }
0x1fa3   :  { %10693 = vmatprep.subr.mxu0 %v15262_v23 }
0x1fa4   :  { %10694 = vmatpush3.msra.mxu0 %v15423_v36  ;;  %v16427_v36 = vld [vmem:[#allocation15_spill] sm:$0xff] }
0x1fa5   :  { %10695 = vmatprep.subr.mxu0 %v15262_v23 }
0x1fa6   :  { %10696 = vmatpush3.msra.mxu0 %v15427_v25  ;;  %v16428_v25 = vld [vmem:[#allocation30_spill] sm:$0xff] }
0x1fa7   :  { %10697 = vmatprep.subr.mxu0 %v15262_v23 }
0x1fa8   :  { %10698 = vmatpush3.msra.mxu0 %v15431_v46  ;;  %v16429_v46 = vld [vmem:[#allocation26_spill] sm:$0xff] }
0x1fa9   :  { %10699 = vmatprep.subr.mxu0 %v15262_v23 }
0x1faa   :  { %10700 = vmatpush3.msra.mxu0 %v15435_v47  ;;  %v16430_v47 = vld [vmem:[#allocation32_spill] sm:$0xff] }
0x1fab   :  { %10701 = vmatprep.subr.mxu0 %v15262_v23 }
0x1fac   :  { %10702 = vmatpush3.msra.mxu0 %v15439_v3 }
0x1fad   :  { %10703 = vmatprep.subr.mxu0 %v15262_v23 }
0x1fae   :  { %10704 = vmatpush3.msra.mxu0 %v15443_v14 }
0x1faf   :  { %10705 = vmatprep.subr.mxu0 %v15262_v23 }
0x1fb0   :  { %10706 = vmatpush3.msra.mxu0 %v16424_v35 }
0x1fb1   :  { %10707 = vmatprep.subr.mxu0 %v15262_v23 }
0x1fb2   :  { %10708 = vmatpush3.msra.mxu0 %v16425_v26 }
0x1fb3   :  { %10709 = vmatprep.subr.mxu0 %v15262_v23 }
0x1fb4   :  { %10710 = vmatpush3.msra.mxu0 %v16426_v7 }
0x1fb5   :  { %10711 = vmatprep.subr.mxu0 %v15262_v23 }
0x1fb6   :  { %10712 = vmatpush3.msra.mxu0 %v16427_v36 }
0x1fb7   :  { %10713 = vmatprep.subr.mxu0 %v15262_v23 }
0x1fb8   :  { %10714 = vmatpush3.msra.mxu0 %v16428_v25 }
0x1fb9   :  { %10715 = vmatprep.subr.mxu0 %v15262_v23 }
0x1fba   :  { %10716 = vmatpush3.msra.mxu0 %v16429_v46 }
0x1fbb   :  { %10717 = vmatprep.subr.mxu0 %v15262_v23 }
0x1fbc   :  { %10718 = vmatpush3.msra.mxu0 %v16430_v47 }
0x2002   :  { %v6143_v14 = vpop.xlane.xlu1 %6142 }
0x2003   :  { %v6144_v42 = vmul.f32 0.5, %v6143_v14 }
0x2028   :  { %v6066_v3 = vpop.xlane.xlu0 %6065 }
0x2029   :  { %v6067_v34 = vmul.f32 0.5, %v6066_v3 }
0x202b   :  { %v6145_v1 = vadd.f32 %v6144_v42, %v6067_v34 }
0x202d   :  { %vm6146_vm0 = vcmp.lt.f32.partialorder %v6145_v1, %v15722_v54  ;;  %v6220_v54 = vmul.f32 %v15779_v16, %v15779_v16 }
0x202e   :  { %v6147_v0 = vsel %vm6146_vm0, 1.0, %v16302_v56  ;;  %v6149_v56 = vsub.f32 0.0, %v15823_v29 }
0x202f   :  { %v6148_v12 = vmul.f32 %v6147_v0, %v15730_v27  ;;  %v6221_v62 = vsub.f32 1.0, %v6220_v54 }
0x2037   :  { %v6292_v58 = vpop.f32.mrf.mxu1 }
0x2038   :  { %v6298_v55 = vmul.f32 %v6297_v10, %v6292_v58 }
0x2039   :  { %v10686_v23 = vpop.f32.mrf.mxu1 }
0x203a   :  { %v6299_v48 = vmul.f32 %v6298_v55, %v6148_v12 }
0x203c   :  { %v6300_v33 = vadd.f32 %v6299_v48, %v15734_v45 }
0x203e   :  { %10843 = vtanh.f32 %v6300_v33  ;;  %6449 = vst [vmem:[#allocation8 + $0x10] sm:$0xff] %v6300_v33 }
0x204b   :  { %v10844_v37 = vpop.eup %10843 }
0x204c   :  { %10755 = vmatmul.mubr.f32.vlgmr.msra.gmra.mxu1 %v10844_v37 }
0x205d   :  { %v6216_v40 = vpop.f32.mrf.mxu0 }
0x205e   :  { %v6222_v13 = vmul.f32 %v6221_v62, %v6216_v40 }
0x205f   :  { %v10651_v61 = vpop.f32.mrf.mxu0 }
0x2060   :  { %v6223_v57 = vadd.f32 %v6222_v13, %v6149_v56 }
0x2062   :  { %v6224_v27 = vmul.f32 %v6223_v57, %v6148_v12 }
0x2064   :  { %v6225_v19 = vadd.f32 %v6224_v27, %v15768_v6 }
0x2066   :  { %10845 = vtanh.f32 %v6225_v19  ;;  %6447 = vst [vmem:[#allocation8 + $0x8] sm:$0xff] %v6225_v19 }
0x2073   :  { %v10846_v45 = vpop.eup %10845 }
0x2074   :  { %10720 = vmatmul.mubr.f32.vlgmr.msra.gmra.mxu0 %v10846_v45 }
0x2075   :  { %11326 = shalt.err (!%p11323_p5)
}
0x2076   :  { %6466 = dma.vmem_to_hbm [thread:$0]  %s6461_s9, 384, %s15925_s4, [#allocation4], %s11364_s21, %s11364_s21, %s11365_s22  }
0x2077   :  { %s11372_s13 = smov [#allocation9]  }
0x2078   :  { %s6472_s14 = sshll.u32 %s11372_s13, 4  ;;  %s6473_s14 = int_to_ptr.vmem [resolvable:$true] %s6472_s14 }
0x2079   :  { %s11335_s15 = scalar_lea.vmem %s6473_s14, 384  ;;  %p11340_p7 = scmp.lt.s32.totalorder %s6473_s14, %s6473_s14 }
0x207a   :  { %p11336_p6 = scmp.ne.s32.totalorder %s6473_s14, %s11335_s15  ;;  %p11341_p8 = scmp.lt.s32.totalorder %s11335_s15, %s11335_s15 }
0x207c   :  { %p11342_p9 = por %p11341_p8, %p11340_p7 }
0x207e   :  { %p11343_p10 = pnand %p11342_p9, %p11336_p6 }
0x210c   :  { %v6440_v52 = vpop.f32.mrf.mxu1 }
0x210d   :  { %v6441_v6 = vadd.f32 %v15819_v9, %v6440_v52 }
0x210e   :  { %v10756_v8 = vpop.f32.mrf.mxu1 }
0x210f   :  { %v6444_v49 = vsub.f32 %v6225_v19, %v6441_v6 }
0x2111   :  { %6452 = vst [vmem:[#allocation9 + $0x8] sm:$0xff] %v6444_v49 }
0x2134   :  { %v6368_v2 = vpop.f32.mrf.mxu0 }
0x2135   :  { %v6369_v16 = vadd.f32 %v15681_v11, %v6368_v2 }
0x2136   :  { %v10721_v15 = vpop.f32.mrf.mxu0 }
0x2137   :  { %v6372_v28 = vsub.f32 %v15685_v4, %v6369_v16 }
0x2139   :  { %6450 = vst [vmem:[#allocation9] sm:$0xff] %v6372_v28 }
0x213a   :  { %11346 = shalt.err (!%p11343_p10)
}
0x213b   :  { %6478 = dma.vmem_to_hbm [thread:$0]  %s6473_s14, 384, %s15926_s5, [#allocation10], %s11364_s21, %s11364_s21, %s11365_s22  }
0x213c   :  { %11359 = dma.done.wait [#allocation4], 384  }
0x213d   :  { %11360 = vsyncadd [#allocation4], 4294966912 }
0x213e   :  { %11361 = dma.done.wait [#allocation10], 384  }
0x213f   :  { %11362 = vsyncadd [#allocation10], 4294966912 }
0x2140   :  { %6485 = vsyncpa [#allocation3], 1 }
0x2141   :  { %6486 = vsyncpa [#allocation6], 1 }
0x2142   :  { %6487 = vsyncpa [#allocation4], 1 }
0x2143   :  { %6488 = vsyncpa [#allocation10], 1 }

</bundles_post_ra>
